<compile_context>
chip_gen: v6e
topology: v6e:2x2x1
jax: 0.10.0
libtpu: 0.0.40
codegen_flags: <defaults>
</compile_context>

<pallas_src>
import functools
import math

import numpy as np

import jax
import jax.numpy as jnp
from jax.experimental import pallas as pl
from jax.experimental.pallas import tpu as pltpu

EPS = 1e-5
NEG_INF = -1e30


def find_multiple(n: int, k: int) -> int:
    if n % k == 0:
        return n
    return n + k - (n % k)


# ----------------------------- fused Block kernel ----------------------------
def _block_kernel(x_ref, rms1_ref, w_attn_ref, b_attn_ref, cos_ref, sin_ref,
                  wp_ref, bp_ref, rms2_ref, wfc_ref, wcp_ref, bcp_ref,
                  o_ref, y_scr, *, n_head):
    bblk, T, C = x_ref.shape
    M = bblk * T
    hd = C // n_head
    hh = hd // 2

    # residual math in f32 even if the inter-block activations are bf16
    x = x_ref[...].astype(jnp.float32).reshape(M, C)          # (Bblk*T, C)

    # ---- RMSNorm 1 (f32 VPU math; bf16 only at the MXU boundary) ----
    ms = jnp.mean(x * x, axis=-1, keepdims=True)
    xn = (x * jax.lax.rsqrt(ms + EPS) * rms1_ref[0]).astype(jnp.bfloat16)

    # ---- fused qkv projection over all Bblk*T rows (bf16 MXU, f32 acc) ----
    qkv = jnp.dot(xn, w_attn_ref[...],
                  preferred_element_type=jnp.float32) + b_attn_ref[0]

    cos = cos_ref[...]                                        # (T, hd//2)
    sin = sin_ref[...]                                        # (T, hd//2)
    inv_sqrt_hd = 1.0 / math.sqrt(hd)

    # causal mask built in-kernel (no (T, T) DMA)
    row = jax.lax.broadcasted_iota(jnp.int32, (T, T), 0)
    col = jax.lax.broadcasted_iota(jnp.int32, (T, T), 1)
    causal = col <= row

    # ---- attention: per (batch-row, head); each head's (T, hd) output goes
    # straight into its lane slice of the VMEM scratch ----
    for b in range(bblk):
        r0 = b * T
        for h in range(n_head):
            cq, ck, cv = h * hd, C + h * hd, 2 * C + h * hd
            q_h = qkv[r0:r0 + T, cq:cq + hd]          # within-head [even|odd]
            k_h = qkv[r0:r0 + T, ck:ck + hd]          # within-head [even|odd]
            v_h = qkv[r0:r0 + T, cv:cv + hd]          # original layout

            # RoPE in the de-interleaved layout (explicit halves; no matmul,
            # no roll, sign handled directly)
            qe, qo = q_h[:, :hh], q_h[:, hh:]
            ke, ko = k_h[:, :hh], k_h[:, hh:]
            q_r = jnp.concatenate([qe * cos - qo * sin, qo * cos + qe * sin], 1)
            k_r = jnp.concatenate([ke * cos - ko * sin, ko * cos + ke * sin], 1)

            q16 = (q_r * inv_sqrt_hd).astype(jnp.bfloat16)    # fold 1/sqrt(hd)
            k16 = k_r.astype(jnp.bfloat16)

            # single K=hd contraction per head (was 2x K=hd/2)
            s = jax.lax.dot_general(q16, k16, (((1,), (1,)), ((), ())),
                                    preferred_element_type=jnp.float32)
            s = jnp.where(causal, s, NEG_INF)
            s = s - jnp.max(s, axis=-1, keepdims=True)
            e = jnp.exp(s)
            # approx reciprocal (EUP) ~1e-3 rel err: fine for inference; use
            # approx=False for training / logit-sensitive eval.
            p = e * pl.reciprocal(jnp.sum(e, axis=-1, keepdims=True),
                                  approx=True)
            yh = jnp.dot(p.astype(jnp.bfloat16), v_h.astype(jnp.bfloat16),
                         preferred_element_type=jnp.float32)
            y_scr[r0:r0 + T, cq:cq + hd] = yh                 # commit per head

    # ---- attention output projection + residual 1 ----
    y16 = y_scr[...].astype(jnp.bfloat16)
    attn = jnp.dot(y16, wp_ref[...],
                   preferred_element_type=jnp.float32) + bp_ref[0]
    x1 = x + attn

    # ---- RMSNorm 2 + SwiGLU MLP (fused fc1|fc2) + residual 2 ----
    ms2 = jnp.mean(x1 * x1, axis=-1, keepdims=True)
    x2 = (x1 * jax.lax.rsqrt(ms2 + EPS) * rms2_ref[0]).astype(jnp.bfloat16)
    fc = jnp.dot(x2, wfc_ref[...], preferred_element_type=jnp.float32)
    Hn = fc.shape[-1] // 2
    a, bgate = fc[:, :Hn], fc[:, Hn:]
    g = (a * jax.nn.sigmoid(a)) * (bgate * jax.nn.sigmoid(bgate))   # silu*silu
    mlp = jnp.dot(g.astype(jnp.bfloat16), wcp_ref[...],
                  preferred_element_type=jnp.float32) + bcp_ref[0]
    o_ref[...] = (x1 + mlp).astype(o_ref.dtype).reshape(bblk, T, C)


# ------------------------------- call wrapper ---------------------------------
def _pick_bblk(B: int, T: int, target_rows: int = 512) -> int:
    """Largest divisor of B whose Bblk*T matmul row count stays <= target."""
    best = 1
    for d in range(1, B + 1):
        if B % d == 0 and d * T <= max(target_rows, T):
            best = d
    return best


def _vmem_limit_bytes() -> int:
    limit = 64 * 1024 * 1024                # safe default on every generation
    try:
        cap = int(pltpu.get_tpu_info().vmem_capacity_bytes)
        limit = min(96 * 1024 * 1024, (cap * 3) // 4)   # 96MiB v5e/v6e, 48MiB v7x
    except Exception:
        pass
    return limit


def llama_block(x, prep, n_head, out_dtype=None, bblk=None):
    """Prefill path of the Llama Block. Returns (out, new_kv_cache=None)."""
    B, T, C = x.shape
    hidden = prep["w_cproj_mlp"].shape[0]
    hh = (C // n_head) // 2
    if out_dtype is None:
        out_dtype = x.dtype          # pass jnp.bfloat16 to halve HBM traffic
    if bblk is None:
        bblk = _pick_bblk(B, T)
    assert B % bblk == 0

    act_in = pl.BlockSpec((bblk, T, C), lambda i: (i, 0, 0))
    act_out = pl.BlockSpec((bblk, T, C), lambda i: (i, 0, 0))

    def build_call(single_buffer_invariants: bool):
        def const(shape):
            n = len(shape)

            def idx(i):
                return (0,) * n

            if single_buffer_invariants:
                # grid-invariant: one resident buffer instead of two
                return pl.BlockSpec(shape, idx, pipeline_mode=pl.Buffered(1))
            return pl.BlockSpec(shape, idx)

        kernel = functools.partial(_block_kernel, n_head=n_head)
        return pl.pallas_call(
            kernel,
            grid=(B // bblk,),
            in_specs=[
                act_in,
                const((1, C)),              # rms1
                const((C, 3 * C)),          # w_attn (q/k cols de-interleaved per head)
                const((1, 3 * C)),          # b_attn (same permutation)
                const((T, hh)),             # cos table
                const((T, hh)),             # sin table
                const((C, C)),              # w_cproj_attn
                const((1, C)),              # b_cproj_attn
                const((1, C)),              # rms2
                const((C, 2 * hidden)),     # [w_fc1 | w_fc2]
                const((hidden, C)),         # w_cproj_mlp
                const((1, C)),              # b_cproj_mlp
            ],
            out_specs=act_out,
            out_shape=jax.ShapeDtypeStruct((B, T, C), out_dtype),
            scratch_shapes=[pltpu.VMEM((bblk * T, C), jnp.float32)],
            compiler_params=pltpu.CompilerParams(
                dimension_semantics=("parallel",),
                vmem_limit_bytes=_vmem_limit_bytes()),
        )

    args = (x, prep["rms1"], prep["w_attn"], prep["b_attn"], prep["cos"],
            prep["sin"], prep["w_cproj_attn"], prep["b_cproj_attn"],
            prep["rms2"], prep["w_fc"], prep["w_cproj_mlp"],
            prep["b_cproj_mlp"])

    want_single_buffer = hasattr(pl, "Buffered")
    try:
        out = build_call(want_single_buffer)(*args)
    except Exception:
        if not want_single_buffer:
            raise
        out = build_call(False)(*args)      # fallback: default double-buffering
    return out, None


# ------------------- one-time host-side weight preprocessing ------------------
def prepare_block_params(params, cos_h, sin_h, n_head):
    """Static weight prep: permute c_attn's q/k output columns into a
    within-head de-interleaved layout (per head: [even pair elems | odd pair
    elems]), fuse fc_1|fc_2, cast MXU weights to bf16 (biases / norm scales /
    RoPE tables stay f32).  Scores are invariant to the within-head
    permutation so v / c_proj keep the original layout."""
    C = params["w_attn"].shape[0]
    hd = C // n_head
    hh = hd // 2

    j = np.arange(C)
    j_in = j % hd
    perm = ((j // hd) * hd + 2 * (j_in % hh) + (j_in >= hh)).astype(np.int32)

    w_attn = params["w_attn"]
    b_attn = params["b_attn"]
    w_attn_p = jnp.concatenate(
        [w_attn[:, :C][:, perm], w_attn[:, C:2 * C][:, perm], w_attn[:, 2 * C:]],
        axis=1)
    b_attn_p = jnp.concatenate(
        [b_attn[:, :C][:, perm], b_attn[:, C:2 * C][:, perm], b_attn[:, 2 * C:]],
        axis=1)
    w_fc = jnp.concatenate([params["w_fc1"], params["w_fc2"]], axis=1)

    return dict(
        rms1=params["rms1"],
        rms2=params["rms2"],
        w_attn=w_attn_p.astype(jnp.bfloat16),
        b_attn=b_attn_p,
        cos=cos_h.astype(jnp.float32),            # (T, hd//2)
        sin=sin_h.astype(jnp.float32),            # (T, hd//2)
        w_cproj_attn=params["w_cproj_attn"].astype(jnp.bfloat16),
        b_cproj_attn=params["b_cproj_attn"],
        w_fc=w_fc.astype(jnp.bfloat16),
        w_cproj_mlp=params["w_cproj_mlp"].astype(jnp.bfloat16),
        b_cproj_mlp=params["b_cproj_mlp"],
    )


# ------------------------------ pure-JAX reference ----------------------------
def block_reference(x, params, cos_h, sin_h, mask_add, n_head):
    B, T, C = x.shape
    hd = C // n_head

    def rmsnorm(v, scale):
        ms = jnp.mean(v * v, axis=-1, keepdims=True)
        return scale * (v * jax.lax.rsqrt(ms + EPS))

    x1 = rmsnorm(x, params["rms1"])
    qkv = x1 @ params["w_attn"] + params["b_attn"]
    q, k, v = jnp.split(qkv, 3, axis=-1)
    q = q.reshape(B, T, n_head, hd)
    k = k.reshape(B, T, n_head, hd)
    v = v.reshape(B, T, n_head, hd)

    def rope(t):
        t2 = t.reshape(B, T, n_head, hd // 2, 2)
        c = cos_h[None, :, None, :]
        s = sin_h[None, :, None, :]
        o0 = t2[..., 0] * c - t2[..., 1] * s
        o1 = t2[..., 1] * c + t2[..., 0] * s
        return jnp.stack([o0, o1], axis=-1).reshape(B, T, n_head, hd)

    q, k = rope(q), rope(k)
    q = q.transpose(0, 2, 1, 3)
    k = k.transpose(0, 2, 1, 3)
    v = v.transpose(0, 2, 1, 3)
    s = (q @ jnp.swapaxes(k, -1, -2)) / math.sqrt(hd) + mask_add[None, None]
    p = jax.nn.softmax(s, axis=-1)
    y = (p @ v).transpose(0, 2, 1, 3).reshape(B, T, C)
    y = y @ params["w_cproj_attn"] + params["b_cproj_attn"]
    x = x + y
    x2 = rmsnorm(x, params["rms2"])
    g = jax.nn.silu(x2 @ params["w_fc1"]) * jax.nn.silu(x2 @ params["w_fc2"])
    return x + (g @ params["w_cproj_mlp"] + params["b_cproj_mlp"])


if __name__ == "__main__":
    B, T = 2, 8
    n_head = 8
    C = 128                       # n_embd ("baby_llama")
    hd = C // n_head              # head size = 16
    hidden = find_multiple(int(2 * (4 * C) / 3), 256)   # SwiGLU hidden = 512

    key = jax.random.PRNGKey(0)
    keys = jax.random.split(key, 12)

    def w(k, shape, scale=0.02):
        return scale * jax.random.normal(k, shape, dtype=jnp.float32)

    params = dict(
        rms1=1.0 + 0.1 * jax.random.normal(keys[0], (1, C), jnp.float32),
        w_attn=w(keys[1], (C, 3 * C)),
        b_attn=w(keys[2], (1, 3 * C)),
        w_cproj_attn=w(keys[3], (C, C)),
        b_cproj_attn=w(keys[4], (1, C)),
        rms2=1.0 + 0.1 * jax.random.normal(keys[5], (1, C), jnp.float32),
        w_fc1=w(keys[6], (C, hidden)),
        w_fc2=w(keys[7], (C, hidden)),
        w_cproj_mlp=w(keys[8], (hidden, C)),
        b_cproj_mlp=w(keys[9], (1, C)),
    )
    x = jax.random.normal(keys[10], (B, T, C), jnp.float32)

    # RoPE cache (theta = 1 / 10000^(2i/hd), like lit-llama's build_rope_cache)
    theta = 1.0 / (10000.0 ** (jnp.arange(0, hd, 2, dtype=jnp.float32) / hd))
    ang = jnp.arange(T, dtype=jnp.float32)[:, None] * theta[None, :]   # (T, hd/2)
    cos_h, sin_h = jnp.cos(ang), jnp.sin(ang)

    prep = prepare_block_params(params, cos_h, sin_h, n_head)

    out, new_kv_cache = llama_block(x, prep, n_head)
    out = jax.block_until_ready(out)

    # additive causal mask for the reference (kernel builds it via iota)
    causal = jnp.tril(jnp.ones((T, T), dtype=bool))
    mask_add = jnp.where(causal, 0.0, NEG_INF).astype(jnp.float32)
    ref = block_reference(x, params, cos_h, sin_h, mask_add, n_head)

    assert out.shape == (B, T, C)
    max_err = float(jnp.max(jnp.abs(out - ref)))
    # bf16 MXU operands vs. the f32 reference -> slightly looser tolerance
    assert jnp.allclose(out, ref, atol=2e-2, rtol=2e-2), max_err
    print("KERNEL_OK")
</pallas_src>

<mosaic_0001>
module attributes {stable_mosaic.version = 11 : i64} {
  func.func @_block_kernel(%arg0: i32, %arg1: memref<2x8x128xf32, #tpu.memory_space<vmem>>, %arg2: memref<1x128xf32, #tpu.memory_space<vmem>>, %arg3: memref<128x384xbf16, #tpu.memory_space<vmem>>, %arg4: memref<1x384xf32, #tpu.memory_space<vmem>>, %arg5: memref<8x8xf32, #tpu.memory_space<vmem>>, %arg6: memref<8x8xf32, #tpu.memory_space<vmem>>, %arg7: memref<128x128xbf16, #tpu.memory_space<vmem>>, %arg8: memref<1x128xf32, #tpu.memory_space<vmem>>, %arg9: memref<1x128xf32, #tpu.memory_space<vmem>>, %arg10: memref<128x1024xbf16, #tpu.memory_space<vmem>>, %arg11: memref<512x128xbf16, #tpu.memory_space<vmem>>, %arg12: memref<1x128xf32, #tpu.memory_space<vmem>>, %arg13: memref<2x8x128xf32, #tpu.memory_space<vmem>>, %arg14: memref<16x128xf32, #tpu.memory_space<vmem>>) attributes {dimension_semantics = [#tpu.dimension_semantics<parallel>], iteration_bounds = array<i64: 1>, scalar_prefetch = 0 : i64, scratch_operands = 1 : i64, tpu.core_type = #tpu.core_type<tc>, window_params = [{transform_indices = @transform_0, window_bounds = array<i64: 2, 8, 128>}, {pipeline_mode = #tpu.pipeline_mode<synchronous>, transform_indices = @transform_1, window_bounds = array<i64: 1, 128>}, {pipeline_mode = #tpu.pipeline_mode<synchronous>, transform_indices = @transform_2, window_bounds = array<i64: 128, 384>}, {pipeline_mode = #tpu.pipeline_mode<synchronous>, transform_indices = @transform_3, window_bounds = array<i64: 1, 384>}, {pipeline_mode = #tpu.pipeline_mode<synchronous>, transform_indices = @transform_4, window_bounds = array<i64: 8, 8>}, {pipeline_mode = #tpu.pipeline_mode<synchronous>, transform_indices = @transform_5, window_bounds = array<i64: 8, 8>}, {pipeline_mode = #tpu.pipeline_mode<synchronous>, transform_indices = @transform_6, window_bounds = array<i64: 128, 128>}, {pipeline_mode = #tpu.pipeline_mode<synchronous>, transform_indices = @transform_7, window_bounds = array<i64: 1, 128>}, {pipeline_mode = #tpu.pipeline_mode<synchronous>, transform_indices = @transform_8, window_bounds = array<i64: 1, 128>}, {pipeline_mode = #tpu.pipeline_mode<synchronous>, transform_indices = @transform_9, window_bounds = array<i64: 128, 1024>}, {pipeline_mode = #tpu.pipeline_mode<synchronous>, transform_indices = @transform_10, window_bounds = array<i64: 512, 128>}, {pipeline_mode = #tpu.pipeline_mode<synchronous>, transform_indices = @transform_11, window_bounds = array<i64: 1, 128>}, {transform_indices = @transform_12, window_bounds = array<i64: 2, 8, 128>}]} {
    %c0 = arith.constant 0 : index
    %c0_0 = arith.constant 0 : index
    %c0_1 = arith.constant 0 : index
    %0 = vector.load %arg1[%c0, %c0_0, %c0_1] : memref<2x8x128xf32, #tpu.memory_space<vmem>>, vector<2x8x128xf32>
    %1 = vector.shape_cast %0 : vector<2x8x128xf32> to vector<16x128xf32>
    %2 = arith.mulf %1, %1 : vector<16x128xf32>
    %cst = arith.constant dense<0.000000e+00> : vector<16xf32>
    %3 = vector.multi_reduction <add>, %2, %cst [1] : vector<16x128xf32> to vector<16xf32>
    %4 = vector.shape_cast %3 : vector<16xf32> to vector<16x1xf32>
    %cst_2 = arith.constant 1.280000e+02 : f32
    %5 = vector.broadcast %cst_2 : f32 to vector<16x1xf32>
    %6 = arith.divf %4, %5 : vector<16x1xf32>
    %cst_3 = arith.constant 9.99999974E-6 : f32
    %7 = vector.broadcast %cst_3 : f32 to vector<16x1xf32>
    %8 = arith.addf %6, %7 : vector<16x1xf32>
    %9 = math.rsqrt %8 : vector<16x1xf32>
    %10 = vector.broadcast %9 : vector<16x1xf32> to vector<16x128xf32>
    %11 = arith.mulf %1, %10 : vector<16x128xf32>
    %c0_4 = arith.constant 0 : index
    %c0_5 = arith.constant 0 : index
    %12 = vector.load %arg2[%c0_4, %c0_5] : memref<1x128xf32, #tpu.memory_space<vmem>>, vector<1x128xf32>
    %13 = vector.shape_cast %12 : vector<1x128xf32> to vector<128xf32>
    %14 = vector.shape_cast %13 : vector<128xf32> to vector<1x128xf32>
    %15 = vector.broadcast %14 : vector<1x128xf32> to vector<16x128xf32>
    %16 = arith.mulf %11, %15 : vector<16x128xf32>
    %17 = arith.truncf %16 : vector<16x128xf32> to vector<16x128xbf16>
    %c0_6 = arith.constant 0 : index
    %c0_7 = arith.constant 0 : index
    %18 = vector.load %arg3[%c0_6, %c0_7] : memref<128x384xbf16, #tpu.memory_space<vmem>>, vector<128x384xbf16>
    %cst_8 = arith.constant dense<0.000000e+00> : vector<16x384xf32>
    %19 = tpu.matmul %17, %18, %cst_8 {dimension_numbers = #tpu.dot_dimension_numbers<[1], [0], [0], [1], [0, 0, 1, 1], [], []>} : vector<16x128xbf16>, vector<128x384xbf16>, vector<16x384xf32> -> vector<16x384xf32>
    %c0_9 = arith.constant 0 : index
    %c0_10 = arith.constant 0 : index
    %20 = vector.load %arg4[%c0_9, %c0_10] : memref<1x384xf32, #tpu.memory_space<vmem>>, vector<1x384xf32>
    %21 = vector.shape_cast %20 : vector<1x384xf32> to vector<384xf32>
    %22 = vector.shape_cast %21 : vector<384xf32> to vector<1x384xf32>
    %23 = vector.broadcast %22 : vector<1x384xf32> to vector<16x384xf32>
    %24 = arith.addf %19, %23 : vector<16x384xf32>
    %c0_11 = arith.constant 0 : index
    %c0_12 = arith.constant 0 : index
    %25 = vector.load %arg5[%c0_11, %c0_12] : memref<8x8xf32, #tpu.memory_space<vmem>>, vector<8x8xf32>
    %c0_13 = arith.constant 0 : index
    %c0_14 = arith.constant 0 : index
    %26 = vector.load %arg6[%c0_13, %c0_14] : memref<8x8xf32, #tpu.memory_space<vmem>>, vector<8x8xf32>
    %27 = tpu.iota {dimensions = array<i32: 0>} : vector<8x8xi32>
    %28 = tpu.iota {dimensions = array<i32: 1>} : vector<8x8xi32>
    %29 = arith.cmpi sle, %28, %27 : vector<8x8xi32>
    %30 = vector.extract_strided_slice %24 {offsets = [0, 0], sizes = [8, 16], strides = [1, 1]} : vector<16x384xf32> to vector<8x16xf32>
    %31 = vector.extract_strided_slice %24 {offsets = [0, 128], sizes = [8, 16], strides = [1, 1]} : vector<16x384xf32> to vector<8x16xf32>
    %32 = vector.extract_strided_slice %24 {offsets = [0, 256], sizes = [8, 16], strides = [1, 1]} : vector<16x384xf32> to vector<8x16xf32>
    %33 = vector.extract_strided_slice %30 {offsets = [0, 0], sizes = [8, 8], strides = [1, 1]} : vector<8x16xf32> to vector<8x8xf32>
    %34 = vector.extract_strided_slice %30 {offsets = [0, 8], sizes = [8, 8], strides = [1, 1]} : vector<8x16xf32> to vector<8x8xf32>
    %35 = vector.extract_strided_slice %31 {offsets = [0, 0], sizes = [8, 8], strides = [1, 1]} : vector<8x16xf32> to vector<8x8xf32>
    %36 = vector.extract_strided_slice %31 {offsets = [0, 8], sizes = [8, 8], strides = [1, 1]} : vector<8x16xf32> to vector<8x8xf32>
    %37 = arith.mulf %33, %25 : vector<8x8xf32>
    %38 = arith.mulf %34, %26 : vector<8x8xf32>
    %39 = arith.subf %37, %38 : vector<8x8xf32>
    %40 = arith.mulf %34, %25 : vector<8x8xf32>
    %41 = arith.mulf %33, %26 : vector<8x8xf32>
    %42 = arith.addf %40, %41 : vector<8x8xf32>
    %43 = tpu.concatenate %39, %42 in 1 : vector<8x8xf32>, vector<8x8xf32> -> vector<8x16xf32>
    %44 = arith.mulf %35, %25 : vector<8x8xf32>
    %45 = arith.mulf %36, %26 : vector<8x8xf32>
    %46 = arith.subf %44, %45 : vector<8x8xf32>
    %47 = arith.mulf %36, %25 : vector<8x8xf32>
    %48 = arith.mulf %35, %26 : vector<8x8xf32>
    %49 = arith.addf %47, %48 : vector<8x8xf32>
    %50 = tpu.concatenate %46, %49 in 1 : vector<8x8xf32>, vector<8x8xf32> -> vector<8x16xf32>
    %cst_15 = arith.constant 2.500000e-01 : f32
    %51 = vector.broadcast %cst_15 : f32 to vector<8x16xf32>
    %52 = arith.mulf %43, %51 : vector<8x16xf32>
    %53 = arith.truncf %52 : vector<8x16xf32> to vector<8x16xbf16>
    %54 = arith.truncf %50 : vector<8x16xf32> to vector<8x16xbf16>
    %cst_16 = arith.constant dense<0.000000e+00> : vector<8x8xf32>
    %55 = tpu.matmul %53, %54, %cst_16 {dimension_numbers = #tpu.dot_dimension_numbers<[1], [1], [0], [0], [0, 0, 1, 0], [], []>} : vector<8x16xbf16>, vector<8x16xbf16>, vector<8x8xf32> -> vector<8x8xf32>
    %cst_17 = arith.constant -1.000000e+30 : f32
    %56 = vector.broadcast %cst_17 : f32 to vector<8x8xf32>
    %57 = arith.select %29, %55, %56 : vector<8x8xi1>, vector<8x8xf32>
    %cst_18 = arith.constant dense<0xFF800000> : vector<8xf32>
    %58 = vector.multi_reduction <maximumf>, %57, %cst_18 [1] : vector<8x8xf32> to vector<8xf32>
    %59 = vector.shape_cast %58 : vector<8xf32> to vector<8x1xf32>
    %60 = vector.broadcast %59 : vector<8x1xf32> to vector<8x8xf32>
    %61 = arith.subf %57, %60 : vector<8x8xf32>
    %62 = math.exp %61 : vector<8x8xf32>
    %cst_19 = arith.constant dense<0.000000e+00> : vector<8xf32>
    %63 = vector.multi_reduction <add>, %62, %cst_19 [1] : vector<8x8xf32> to vector<8xf32>
    %64 = vector.shape_cast %63 : vector<8xf32> to vector<8x1xf32>
    %65 = tpu.reciprocal %64 {approx = true} : vector<8x1xf32> -> vector<8x1xf32>
    %66 = vector.broadcast %65 : vector<8x1xf32> to vector<8x8xf32>
    %67 = arith.mulf %62, %66 : vector<8x8xf32>
    %68 = arith.truncf %67 : vector<8x8xf32> to vector<8x8xbf16>
    %69 = arith.truncf %32 : vector<8x16xf32> to vector<8x16xbf16>
    %cst_20 = arith.constant dense<0.000000e+00> : vector<8x16xf32>
    %70 = tpu.matmul %68, %69, %cst_20 {dimension_numbers = #tpu.dot_dimension_numbers<[1], [0], [0], [1], [0, 0, 1, 1], [], []>} : vector<8x8xbf16>, vector<8x16xbf16>, vector<8x16xf32> -> vector<8x16xf32>
    %c0_21 = arith.constant 0 : index
    %c0_22 = arith.constant 0 : index
    %71 = vector.load %arg14[%c0_21, %c0_22] : memref<16x128xf32, #tpu.memory_space<vmem>>, vector<8x16xf32>
    tpu.vector_store %arg14[%c0_21, %c0_22], %70 {strides = array<i32>} : memref<16x128xf32, #tpu.memory_space<vmem>>, vector<8x16xf32>,
    %72 = vector.extract_strided_slice %24 {offsets = [0, 16], sizes = [8, 16], strides = [1, 1]} : vector<16x384xf32> to vector<8x16xf32>
    %73 = vector.extract_strided_slice %24 {offsets = [0, 144], sizes = [8, 16], strides = [1, 1]} : vector<16x384xf32> to vector<8x16xf32>
    %74 = vector.extract_strided_slice %24 {offsets = [0, 272], sizes = [8, 16], strides = [1, 1]} : vector<16x384xf32> to vector<8x16xf32>
    %75 = vector.extract_strided_slice %72 {offsets = [0, 0], sizes = [8, 8], strides = [1, 1]} : vector<8x16xf32> to vector<8x8xf32>
    %76 = vector.extract_strided_slice %72 {offsets = [0, 8], sizes = [8, 8], strides = [1, 1]} : vector<8x16xf32> to vector<8x8xf32>
    %77 = vector.extract_strided_slice %73 {offsets = [0, 0], sizes = [8, 8], strides = [1, 1]} : vector<8x16xf32> to vector<8x8xf32>
    %78 = vector.extract_strided_slice %73 {offsets = [0, 8], sizes = [8, 8], strides = [1, 1]} : vector<8x16xf32> to vector<8x8xf32>
    %79 = arith.mulf %75, %25 : vector<8x8xf32>
    %80 = arith.mulf %76, %26 : vector<8x8xf32>
    %81 = arith.subf %79, %80 : vector<8x8xf32>
    %82 = arith.mulf %76, %25 : vector<8x8xf32>
    %83 = arith.mulf %75, %26 : vector<8x8xf32>
    %84 = arith.addf %82, %83 : vector<8x8xf32>
    %85 = tpu.concatenate %81, %84 in 1 : vector<8x8xf32>, vector<8x8xf32> -> vector<8x16xf32>
    %86 = arith.mulf %77, %25 : vector<8x8xf32>
    %87 = arith.mulf %78, %26 : vector<8x8xf32>
    %88 = arith.subf %86, %87 : vector<8x8xf32>
    %89 = arith.mulf %78, %25 : vector<8x8xf32>
    %90 = arith.mulf %77, %26 : vector<8x8xf32>
    %91 = arith.addf %89, %90 : vector<8x8xf32>
    %92 = tpu.concatenate %88, %91 in 1 : vector<8x8xf32>, vector<8x8xf32> -> vector<8x16xf32>
    %cst_23 = arith.constant 2.500000e-01 : f32
    %93 = vector.broadcast %cst_23 : f32 to vector<8x16xf32>
    %94 = arith.mulf %85, %93 : vector<8x16xf32>
    %95 = arith.truncf %94 : vector<8x16xf32> to vector<8x16xbf16>
    %96 = arith.truncf %92 : vector<8x16xf32> to vector<8x16xbf16>
    %cst_24 = arith.constant dense<0.000000e+00> : vector<8x8xf32>
    %97 = tpu.matmul %95, %96, %cst_24 {dimension_numbers = #tpu.dot_dimension_numbers<[1], [1], [0], [0], [0, 0, 1, 0], [], []>} : vector<8x16xbf16>, vector<8x16xbf16>, vector<8x8xf32> -> vector<8x8xf32>
    %cst_25 = arith.constant -1.000000e+30 : f32
    %98 = vector.broadcast %cst_25 : f32 to vector<8x8xf32>
    %99 = arith.select %29, %97, %98 : vector<8x8xi1>, vector<8x8xf32>
    %cst_26 = arith.constant dense<0xFF800000> : vector<8xf32>
    %100 = vector.multi_reduction <maximumf>, %99, %cst_26 [1] : vector<8x8xf32> to vector<8xf32>
    %101 = vector.shape_cast %100 : vector<8xf32> to vector<8x1xf32>
    %102 = vector.broadcast %101 : vector<8x1xf32> to vector<8x8xf32>
    %103 = arith.subf %99, %102 : vector<8x8xf32>
    %104 = math.exp %103 : vector<8x8xf32>
    %cst_27 = arith.constant dense<0.000000e+00> : vector<8xf32>
    %105 = vector.multi_reduction <add>, %104, %cst_27 [1] : vector<8x8xf32> to vector<8xf32>
    %106 = vector.shape_cast %105 : vector<8xf32> to vector<8x1xf32>
    %107 = tpu.reciprocal %106 {approx = true} : vector<8x1xf32> -> vector<8x1xf32>
    %108 = vector.broadcast %107 : vector<8x1xf32> to vector<8x8xf32>
    %109 = arith.mulf %104, %108 : vector<8x8xf32>
    %110 = arith.truncf %109 : vector<8x8xf32> to vector<8x8xbf16>
    %111 = arith.truncf %74 : vector<8x16xf32> to vector<8x16xbf16>
    %cst_28 = arith.constant dense<0.000000e+00> : vector<8x16xf32>
    %112 = tpu.matmul %110, %111, %cst_28 {dimension_numbers = #tpu.dot_dimension_numbers<[1], [0], [0], [1], [0, 0, 1, 1], [], []>} : vector<8x8xbf16>, vector<8x16xbf16>, vector<8x16xf32> -> vector<8x16xf32>
    %c0_29 = arith.constant 0 : index
    %c16 = arith.constant 16 : index
    %113 = vector.load %arg14[%c0_29, %c16] : memref<16x128xf32, #tpu.memory_space<vmem>>, vector<8x16xf32>
    tpu.vector_store %arg14[%c0_29, %c16], %112 {strides = array<i32>} : memref<16x128xf32, #tpu.memory_space<vmem>>, vector<8x16xf32>,
    %114 = vector.extract_strided_slice %24 {offsets = [0, 32], sizes = [8, 16], strides = [1, 1]} : vector<16x384xf32> to vector<8x16xf32>
    %115 = vector.extract_strided_slice %24 {offsets = [0, 160], sizes = [8, 16], strides = [1, 1]} : vector<16x384xf32> to vector<8x16xf32>
    %116 = vector.extract_strided_slice %24 {offsets = [0, 288], sizes = [8, 16], strides = [1, 1]} : vector<16x384xf32> to vector<8x16xf32>
    %117 = vector.extract_strided_slice %114 {offsets = [0, 0], sizes = [8, 8], strides = [1, 1]} : vector<8x16xf32> to vector<8x8xf32>
    %118 = vector.extract_strided_slice %114 {offsets = [0, 8], sizes = [8, 8], strides = [1, 1]} : vector<8x16xf32> to vector<8x8xf32>
    %119 = vector.extract_strided_slice %115 {offsets = [0, 0], sizes = [8, 8], strides = [1, 1]} : vector<8x16xf32> to vector<8x8xf32>
    %120 = vector.extract_strided_slice %115 {offsets = [0, 8], sizes = [8, 8], strides = [1, 1]} : vector<8x16xf32> to vector<8x8xf32>
    %121 = arith.mulf %117, %25 : vector<8x8xf32>
    %122 = arith.mulf %118, %26 : vector<8x8xf32>
    %123 = arith.subf %121, %122 : vector<8x8xf32>
    %124 = arith.mulf %118, %25 : vector<8x8xf32>
    %125 = arith.mulf %117, %26 : vector<8x8xf32>
    %126 = arith.addf %124, %125 : vector<8x8xf32>
    %127 = tpu.concatenate %123, %126 in 1 : vector<8x8xf32>, vector<8x8xf32> -> vector<8x16xf32>
    %128 = arith.mulf %119, %25 : vector<8x8xf32>
    %129 = arith.mulf %120, %26 : vector<8x8xf32>
    %130 = arith.subf %128, %129 : vector<8x8xf32>
    %131 = arith.mulf %120, %25 : vector<8x8xf32>
    %132 = arith.mulf %119, %26 : vector<8x8xf32>
    %133 = arith.addf %131, %132 : vector<8x8xf32>
    %134 = tpu.concatenate %130, %133 in 1 : vector<8x8xf32>, vector<8x8xf32> -> vector<8x16xf32>
    %cst_30 = arith.constant 2.500000e-01 : f32
    %135 = vector.broadcast %cst_30 : f32 to vector<8x16xf32>
    %136 = arith.mulf %127, %135 : vector<8x16xf32>
    %137 = arith.truncf %136 : vector<8x16xf32> to vector<8x16xbf16>
    %138 = arith.truncf %134 : vector<8x16xf32> to vector<8x16xbf16>
    %cst_31 = arith.constant dense<0.000000e+00> : vector<8x8xf32>
    %139 = tpu.matmul %137, %138, %cst_31 {dimension_numbers = #tpu.dot_dimension_numbers<[1], [1], [0], [0], [0, 0, 1, 0], [], []>} : vector<8x16xbf16>, vector<8x16xbf16>, vector<8x8xf32> -> vector<8x8xf32>
    %cst_32 = arith.constant -1.000000e+30 : f32
    %140 = vector.broadcast %cst_32 : f32 to vector<8x8xf32>
    %141 = arith.select %29, %139, %140 : vector<8x8xi1>, vector<8x8xf32>
    %cst_33 = arith.constant dense<0xFF800000> : vector<8xf32>
    %142 = vector.multi_reduction <maximumf>, %141, %cst_33 [1] : vector<8x8xf32> to vector<8xf32>
    %143 = vector.shape_cast %142 : vector<8xf32> to vector<8x1xf32>
    %144 = vector.broadcast %143 : vector<8x1xf32> to vector<8x8xf32>
    %145 = arith.subf %141, %144 : vector<8x8xf32>
    %146 = math.exp %145 : vector<8x8xf32>
    %cst_34 = arith.constant dense<0.000000e+00> : vector<8xf32>
    %147 = vector.multi_reduction <add>, %146, %cst_34 [1] : vector<8x8xf32> to vector<8xf32>
    %148 = vector.shape_cast %147 : vector<8xf32> to vector<8x1xf32>
    %149 = tpu.reciprocal %148 {approx = true} : vector<8x1xf32> -> vector<8x1xf32>
    %150 = vector.broadcast %149 : vector<8x1xf32> to vector<8x8xf32>
    %151 = arith.mulf %146, %150 : vector<8x8xf32>
    %152 = arith.truncf %151 : vector<8x8xf32> to vector<8x8xbf16>
    %153 = arith.truncf %116 : vector<8x16xf32> to vector<8x16xbf16>
    %cst_35 = arith.constant dense<0.000000e+00> : vector<8x16xf32>
    %154 = tpu.matmul %152, %153, %cst_35 {dimension_numbers = #tpu.dot_dimension_numbers<[1], [0], [0], [1], [0, 0, 1, 1], [], []>} : vector<8x8xbf16>, vector<8x16xbf16>, vector<8x16xf32> -> vector<8x16xf32>
    %c0_36 = arith.constant 0 : index
    %c32 = arith.constant 32 : index
    %155 = vector.load %arg14[%c0_36, %c32] : memref<16x128xf32, #tpu.memory_space<vmem>>, vector<8x16xf32>
    tpu.vector_store %arg14[%c0_36, %c32], %154 {strides = array<i32>} : memref<16x128xf32, #tpu.memory_space<vmem>>, vector<8x16xf32>,
    %156 = vector.extract_strided_slice %24 {offsets = [0, 48], sizes = [8, 16], strides = [1, 1]} : vector<16x384xf32> to vector<8x16xf32>
    %157 = vector.extract_strided_slice %24 {offsets = [0, 176], sizes = [8, 16], strides = [1, 1]} : vector<16x384xf32> to vector<8x16xf32>
    %158 = vector.extract_strided_slice %24 {offsets = [0, 304], sizes = [8, 16], strides = [1, 1]} : vector<16x384xf32> to vector<8x16xf32>
    %159 = vector.extract_strided_slice %156 {offsets = [0, 0], sizes = [8, 8], strides = [1, 1]} : vector<8x16xf32> to vector<8x8xf32>
    %160 = vector.extract_strided_slice %156 {offsets = [0, 8], sizes = [8, 8], strides = [1, 1]} : vector<8x16xf32> to vector<8x8xf32>
    %161 = vector.extract_strided_slice %157 {offsets = [0, 0], sizes = [8, 8], strides = [1, 1]} : vector<8x16xf32> to vector<8x8xf32>
    %162 = vector.extract_strided_slice %157 {offsets = [0, 8], sizes = [8, 8], strides = [1, 1]} : vector<8x16xf32> to vector<8x8xf32>
    %163 = arith.mulf %159, %25 : vector<8x8xf32>
    %164 = arith.mulf %160, %26 : vector<8x8xf32>
    %165 = arith.subf %163, %164 : vector<8x8xf32>
    %166 = arith.mulf %160, %25 : vector<8x8xf32>
    %167 = arith.mulf %159, %26 : vector<8x8xf32>
    %168 = arith.addf %166, %167 : vector<8x8xf32>
    %169 = tpu.concatenate %165, %168 in 1 : vector<8x8xf32>, vector<8x8xf32> -> vector<8x16xf32>
    %170 = arith.mulf %161, %25 : vector<8x8xf32>
    %171 = arith.mulf %162, %26 : vector<8x8xf32>
    %172 = arith.subf %170, %171 : vector<8x8xf32>
    %173 = arith.mulf %162, %25 : vector<8x8xf32>
    %174 = arith.mulf %161, %26 : vector<8x8xf32>
    %175 = arith.addf %173, %174 : vector<8x8xf32>
    %176 = tpu.concatenate %172, %175 in 1 : vector<8x8xf32>, vector<8x8xf32> -> vector<8x16xf32>
    %cst_37 = arith.constant 2.500000e-01 : f32
    %177 = vector.broadcast %cst_37 : f32 to vector<8x16xf32>
    %178 = arith.mulf %169, %177 : vector<8x16xf32>
    %179 = arith.truncf %178 : vector<8x16xf32> to vector<8x16xbf16>
    %180 = arith.truncf %176 : vector<8x16xf32> to vector<8x16xbf16>
    %cst_38 = arith.constant dense<0.000000e+00> : vector<8x8xf32>
    %181 = tpu.matmul %179, %180, %cst_38 {dimension_numbers = #tpu.dot_dimension_numbers<[1], [1], [0], [0], [0, 0, 1, 0], [], []>} : vector<8x16xbf16>, vector<8x16xbf16>, vector<8x8xf32> -> vector<8x8xf32>
    %cst_39 = arith.constant -1.000000e+30 : f32
    %182 = vector.broadcast %cst_39 : f32 to vector<8x8xf32>
    %183 = arith.select %29, %181, %182 : vector<8x8xi1>, vector<8x8xf32>
    %cst_40 = arith.constant dense<0xFF800000> : vector<8xf32>
    %184 = vector.multi_reduction <maximumf>, %183, %cst_40 [1] : vector<8x8xf32> to vector<8xf32>
    %185 = vector.shape_cast %184 : vector<8xf32> to vector<8x1xf32>
    %186 = vector.broadcast %185 : vector<8x1xf32> to vector<8x8xf32>
    %187 = arith.subf %183, %186 : vector<8x8xf32>
    %188 = math.exp %187 : vector<8x8xf32>
    %cst_41 = arith.constant dense<0.000000e+00> : vector<8xf32>
    %189 = vector.multi_reduction <add>, %188, %cst_41 [1] : vector<8x8xf32> to vector<8xf32>
    %190 = vector.shape_cast %189 : vector<8xf32> to vector<8x1xf32>
    %191 = tpu.reciprocal %190 {approx = true} : vector<8x1xf32> -> vector<8x1xf32>
    %192 = vector.broadcast %191 : vector<8x1xf32> to vector<8x8xf32>
    %193 = arith.mulf %188, %192 : vector<8x8xf32>
    %194 = arith.truncf %193 : vector<8x8xf32> to vector<8x8xbf16>
    %195 = arith.truncf %158 : vector<8x16xf32> to vector<8x16xbf16>
    %cst_42 = arith.constant dense<0.000000e+00> : vector<8x16xf32>
    %196 = tpu.matmul %194, %195, %cst_42 {dimension_numbers = #tpu.dot_dimension_numbers<[1], [0], [0], [1], [0, 0, 1, 1], [], []>} : vector<8x8xbf16>, vector<8x16xbf16>, vector<8x16xf32> -> vector<8x16xf32>
    %c0_43 = arith.constant 0 : index
    %c48 = arith.constant 48 : index
    %197 = vector.load %arg14[%c0_43, %c48] : memref<16x128xf32, #tpu.memory_space<vmem>>, vector<8x16xf32>
    tpu.vector_store %arg14[%c0_43, %c48], %196 {strides = array<i32>} : memref<16x128xf32, #tpu.memory_space<vmem>>, vector<8x16xf32>,
    %198 = vector.extract_strided_slice %24 {offsets = [0, 64], sizes = [8, 16], strides = [1, 1]} : vector<16x384xf32> to vector<8x16xf32>
    %199 = vector.extract_strided_slice %24 {offsets = [0, 192], sizes = [8, 16], strides = [1, 1]} : vector<16x384xf32> to vector<8x16xf32>
    %200 = vector.extract_strided_slice %24 {offsets = [0, 320], sizes = [8, 16], strides = [1, 1]} : vector<16x384xf32> to vector<8x16xf32>
    %201 = vector.extract_strided_slice %198 {offsets = [0, 0], sizes = [8, 8], strides = [1, 1]} : vector<8x16xf32> to vector<8x8xf32>
    %202 = vector.extract_strided_slice %198 {offsets = [0, 8], sizes = [8, 8], strides = [1, 1]} : vector<8x16xf32> to vector<8x8xf32>
    %203 = vector.extract_strided_slice %199 {offsets = [0, 0], sizes = [8, 8], strides = [1, 1]} : vector<8x16xf32> to vector<8x8xf32>
    %204 = vector.extract_strided_slice %199 {offsets = [0, 8], sizes = [8, 8], strides = [1, 1]} : vector<8x16xf32> to vector<8x8xf32>
    %205 = arith.mulf %201, %25 : vector<8x8xf32>
    %206 = arith.mulf %202, %26 : vector<8x8xf32>
    %207 = arith.subf %205, %206 : vector<8x8xf32>
    %208 = arith.mulf %202, %25 : vector<8x8xf32>
    %209 = arith.mulf %201, %26 : vector<8x8xf32>
    %210 = arith.addf %208, %209 : vector<8x8xf32>
    %211 = tpu.concatenate %207, %210 in 1 : vector<8x8xf32>, vector<8x8xf32> -> vector<8x16xf32>
    %212 = arith.mulf %203, %25 : vector<8x8xf32>
    %213 = arith.mulf %204, %26 : vector<8x8xf32>
    %214 = arith.subf %212, %213 : vector<8x8xf32>
    %215 = arith.mulf %204, %25 : vector<8x8xf32>
    %216 = arith.mulf %203, %26 : vector<8x8xf32>
    %217 = arith.addf %215, %216 : vector<8x8xf32>
    %218 = tpu.concatenate %214, %217 in 1 : vector<8x8xf32>, vector<8x8xf32> -> vector<8x16xf32>
    %cst_44 = arith.constant 2.500000e-01 : f32
    %219 = vector.broadcast %cst_44 : f32 to vector<8x16xf32>
    %220 = arith.mulf %211, %219 : vector<8x16xf32>
    %221 = arith.truncf %220 : vector<8x16xf32> to vector<8x16xbf16>
    %222 = arith.truncf %218 : vector<8x16xf32> to vector<8x16xbf16>
    %cst_45 = arith.constant dense<0.000000e+00> : vector<8x8xf32>
    %223 = tpu.matmul %221, %222, %cst_45 {dimension_numbers = #tpu.dot_dimension_numbers<[1], [1], [0], [0], [0, 0, 1, 0], [], []>} : vector<8x16xbf16>, vector<8x16xbf16>, vector<8x8xf32> -> vector<8x8xf32>
    %cst_46 = arith.constant -1.000000e+30 : f32
    %224 = vector.broadcast %cst_46 : f32 to vector<8x8xf32>
    %225 = arith.select %29, %223, %224 : vector<8x8xi1>, vector<8x8xf32>
    %cst_47 = arith.constant dense<0xFF800000> : vector<8xf32>
    %226 = vector.multi_reduction <maximumf>, %225, %cst_47 [1] : vector<8x8xf32> to vector<8xf32>
    %227 = vector.shape_cast %226 : vector<8xf32> to vector<8x1xf32>
    %228 = vector.broadcast %227 : vector<8x1xf32> to vector<8x8xf32>
    %229 = arith.subf %225, %228 : vector<8x8xf32>
    %230 = math.exp %229 : vector<8x8xf32>
    %cst_48 = arith.constant dense<0.000000e+00> : vector<8xf32>
    %231 = vector.multi_reduction <add>, %230, %cst_48 [1] : vector<8x8xf32> to vector<8xf32>
    %232 = vector.shape_cast %231 : vector<8xf32> to vector<8x1xf32>
    %233 = tpu.reciprocal %232 {approx = true} : vector<8x1xf32> -> vector<8x1xf32>
    %234 = vector.broadcast %233 : vector<8x1xf32> to vector<8x8xf32>
    %235 = arith.mulf %230, %234 : vector<8x8xf32>
    %236 = arith.truncf %235 : vector<8x8xf32> to vector<8x8xbf16>
    %237 = arith.truncf %200 : vector<8x16xf32> to vector<8x16xbf16>
    %cst_49 = arith.constant dense<0.000000e+00> : vector<8x16xf32>
    %238 = tpu.matmul %236, %237, %cst_49 {dimension_numbers = #tpu.dot_dimension_numbers<[1], [0], [0], [1], [0, 0, 1, 1], [], []>} : vector<8x8xbf16>, vector<8x16xbf16>, vector<8x16xf32> -> vector<8x16xf32>
    %c0_50 = arith.constant 0 : index
    %c64 = arith.constant 64 : index
    %239 = vector.load %arg14[%c0_50, %c64] : memref<16x128xf32, #tpu.memory_space<vmem>>, vector<8x16xf32>
    tpu.vector_store %arg14[%c0_50, %c64], %238 {strides = array<i32>} : memref<16x128xf32, #tpu.memory_space<vmem>>, vector<8x16xf32>,
    %240 = vector.extract_strided_slice %24 {offsets = [0, 80], sizes = [8, 16], strides = [1, 1]} : vector<16x384xf32> to vector<8x16xf32>
    %241 = vector.extract_strided_slice %24 {offsets = [0, 208], sizes = [8, 16], strides = [1, 1]} : vector<16x384xf32> to vector<8x16xf32>
    %242 = vector.extract_strided_slice %24 {offsets = [0, 336], sizes = [8, 16], strides = [1, 1]} : vector<16x384xf32> to vector<8x16xf32>
    %243 = vector.extract_strided_slice %240 {offsets = [0, 0], sizes = [8, 8], strides = [1, 1]} : vector<8x16xf32> to vector<8x8xf32>
    %244 = vector.extract_strided_slice %240 {offsets = [0, 8], sizes = [8, 8], strides = [1, 1]} : vector<8x16xf32> to vector<8x8xf32>
    %245 = vector.extract_strided_slice %241 {offsets = [0, 0], sizes = [8, 8], strides = [1, 1]} : vector<8x16xf32> to vector<8x8xf32>
    %246 = vector.extract_strided_slice %241 {offsets = [0, 8], sizes = [8, 8], strides = [1, 1]} : vector<8x16xf32> to vector<8x8xf32>
    %247 = arith.mulf %243, %25 : vector<8x8xf32>
    %248 = arith.mulf %244, %26 : vector<8x8xf32>
    %249 = arith.subf %247, %248 : vector<8x8xf32>
    %250 = arith.mulf %244, %25 : vector<8x8xf32>
    %251 = arith.mulf %243, %26 : vector<8x8xf32>
    %252 = arith.addf %250, %251 : vector<8x8xf32>
    %253 = tpu.concatenate %249, %252 in 1 : vector<8x8xf32>, vector<8x8xf32> -> vector<8x16xf32>
    %254 = arith.mulf %245, %25 : vector<8x8xf32>
    %255 = arith.mulf %246, %26 : vector<8x8xf32>
    %256 = arith.subf %254, %255 : vector<8x8xf32>
    %257 = arith.mulf %246, %25 : vector<8x8xf32>
    %258 = arith.mulf %245, %26 : vector<8x8xf32>
    %259 = arith.addf %257, %258 : vector<8x8xf32>
    %260 = tpu.concatenate %256, %259 in 1 : vector<8x8xf32>, vector<8x8xf32> -> vector<8x16xf32>
    %cst_51 = arith.constant 2.500000e-01 : f32
    %261 = vector.broadcast %cst_51 : f32 to vector<8x16xf32>
    %262 = arith.mulf %253, %261 : vector<8x16xf32>
    %263 = arith.truncf %262 : vector<8x16xf32> to vector<8x16xbf16>
    %264 = arith.truncf %260 : vector<8x16xf32> to vector<8x16xbf16>
    %cst_52 = arith.constant dense<0.000000e+00> : vector<8x8xf32>
    %265 = tpu.matmul %263, %264, %cst_52 {dimension_numbers = #tpu.dot_dimension_numbers<[1], [1], [0], [0], [0, 0, 1, 0], [], []>} : vector<8x16xbf16>, vector<8x16xbf16>, vector<8x8xf32> -> vector<8x8xf32>
    %cst_53 = arith.constant -1.000000e+30 : f32
    %266 = vector.broadcast %cst_53 : f32 to vector<8x8xf32>
    %267 = arith.select %29, %265, %266 : vector<8x8xi1>, vector<8x8xf32>
    %cst_54 = arith.constant dense<0xFF800000> : vector<8xf32>
    %268 = vector.multi_reduction <maximumf>, %267, %cst_54 [1] : vector<8x8xf32> to vector<8xf32>
    %269 = vector.shape_cast %268 : vector<8xf32> to vector<8x1xf32>
    %270 = vector.broadcast %269 : vector<8x1xf32> to vector<8x8xf32>
    %271 = arith.subf %267, %270 : vector<8x8xf32>
    %272 = math.exp %271 : vector<8x8xf32>
    %cst_55 = arith.constant dense<0.000000e+00> : vector<8xf32>
    %273 = vector.multi_reduction <add>, %272, %cst_55 [1] : vector<8x8xf32> to vector<8xf32>
    %274 = vector.shape_cast %273 : vector<8xf32> to vector<8x1xf32>
    %275 = tpu.reciprocal %274 {approx = true} : vector<8x1xf32> -> vector<8x1xf32>
    %276 = vector.broadcast %275 : vector<8x1xf32> to vector<8x8xf32>
    %277 = arith.mulf %272, %276 : vector<8x8xf32>
    %278 = arith.truncf %277 : vector<8x8xf32> to vector<8x8xbf16>
    %279 = arith.truncf %242 : vector<8x16xf32> to vector<8x16xbf16>
    %cst_56 = arith.constant dense<0.000000e+00> : vector<8x16xf32>
    %280 = tpu.matmul %278, %279, %cst_56 {dimension_numbers = #tpu.dot_dimension_numbers<[1], [0], [0], [1], [0, 0, 1, 1], [], []>} : vector<8x8xbf16>, vector<8x16xbf16>, vector<8x16xf32> -> vector<8x16xf32>
    %c0_57 = arith.constant 0 : index
    %c80 = arith.constant 80 : index
    %281 = vector.load %arg14[%c0_57, %c80] : memref<16x128xf32, #tpu.memory_space<vmem>>, vector<8x16xf32>
    tpu.vector_store %arg14[%c0_57, %c80], %280 {strides = array<i32>} : memref<16x128xf32, #tpu.memory_space<vmem>>, vector<8x16xf32>,
    %282 = vector.extract_strided_slice %24 {offsets = [0, 96], sizes = [8, 16], strides = [1, 1]} : vector<16x384xf32> to vector<8x16xf32>
    %283 = vector.extract_strided_slice %24 {offsets = [0, 224], sizes = [8, 16], strides = [1, 1]} : vector<16x384xf32> to vector<8x16xf32>
    %284 = vector.extract_strided_slice %24 {offsets = [0, 352], sizes = [8, 16], strides = [1, 1]} : vector<16x384xf32> to vector<8x16xf32>
    %285 = vector.extract_strided_slice %282 {offsets = [0, 0], sizes = [8, 8], strides = [1, 1]} : vector<8x16xf32> to vector<8x8xf32>
    %286 = vector.extract_strided_slice %282 {offsets = [0, 8], sizes = [8, 8], strides = [1, 1]} : vector<8x16xf32> to vector<8x8xf32>
    %287 = vector.extract_strided_slice %283 {offsets = [0, 0], sizes = [8, 8], strides = [1, 1]} : vector<8x16xf32> to vector<8x8xf32>
    %288 = vector.extract_strided_slice %283 {offsets = [0, 8], sizes = [8, 8], strides = [1, 1]} : vector<8x16xf32> to vector<8x8xf32>
    %289 = arith.mulf %285, %25 : vector<8x8xf32>
    %290 = arith.mulf %286, %26 : vector<8x8xf32>
    %291 = arith.subf %289, %290 : vector<8x8xf32>
    %292 = arith.mulf %286, %25 : vector<8x8xf32>
    %293 = arith.mulf %285, %26 : vector<8x8xf32>
    %294 = arith.addf %292, %293 : vector<8x8xf32>
    %295 = tpu.concatenate %291, %294 in 1 : vector<8x8xf32>, vector<8x8xf32> -> vector<8x16xf32>
    %296 = arith.mulf %287, %25 : vector<8x8xf32>
    %297 = arith.mulf %288, %26 : vector<8x8xf32>
    %298 = arith.subf %296, %297 : vector<8x8xf32>
    %299 = arith.mulf %288, %25 : vector<8x8xf32>
    %300 = arith.mulf %287, %26 : vector<8x8xf32>
    %301 = arith.addf %299, %300 : vector<8x8xf32>
    %302 = tpu.concatenate %298, %301 in 1 : vector<8x8xf32>, vector<8x8xf32> -> vector<8x16xf32>
    %cst_58 = arith.constant 2.500000e-01 : f32
    %303 = vector.broadcast %cst_58 : f32 to vector<8x16xf32>
    %304 = arith.mulf %295, %303 : vector<8x16xf32>
    %305 = arith.truncf %304 : vector<8x16xf32> to vector<8x16xbf16>
    %306 = arith.truncf %302 : vector<8x16xf32> to vector<8x16xbf16>
    %cst_59 = arith.constant dense<0.000000e+00> : vector<8x8xf32>
    %307 = tpu.matmul %305, %306, %cst_59 {dimension_numbers = #tpu.dot_dimension_numbers<[1], [1], [0], [0], [0, 0, 1, 0], [], []>} : vector<8x16xbf16>, vector<8x16xbf16>, vector<8x8xf32> -> vector<8x8xf32>
    %cst_60 = arith.constant -1.000000e+30 : f32
    %308 = vector.broadcast %cst_60 : f32 to vector<8x8xf32>
    %309 = arith.select %29, %307, %308 : vector<8x8xi1>, vector<8x8xf32>
    %cst_61 = arith.constant dense<0xFF800000> : vector<8xf32>
    %310 = vector.multi_reduction <maximumf>, %309, %cst_61 [1] : vector<8x8xf32> to vector<8xf32>
    %311 = vector.shape_cast %310 : vector<8xf32> to vector<8x1xf32>
    %312 = vector.broadcast %311 : vector<8x1xf32> to vector<8x8xf32>
    %313 = arith.subf %309, %312 : vector<8x8xf32>
    %314 = math.exp %313 : vector<8x8xf32>
    %cst_62 = arith.constant dense<0.000000e+00> : vector<8xf32>
    %315 = vector.multi_reduction <add>, %314, %cst_62 [1] : vector<8x8xf32> to vector<8xf32>
    %316 = vector.shape_cast %315 : vector<8xf32> to vector<8x1xf32>
    %317 = tpu.reciprocal %316 {approx = true} : vector<8x1xf32> -> vector<8x1xf32>
    %318 = vector.broadcast %317 : vector<8x1xf32> to vector<8x8xf32>
    %319 = arith.mulf %314, %318 : vector<8x8xf32>
    %320 = arith.truncf %319 : vector<8x8xf32> to vector<8x8xbf16>
    %321 = arith.truncf %284 : vector<8x16xf32> to vector<8x16xbf16>
    %cst_63 = arith.constant dense<0.000000e+00> : vector<8x16xf32>
    %322 = tpu.matmul %320, %321, %cst_63 {dimension_numbers = #tpu.dot_dimension_numbers<[1], [0], [0], [1], [0, 0, 1, 1], [], []>} : vector<8x8xbf16>, vector<8x16xbf16>, vector<8x16xf32> -> vector<8x16xf32>
    %c0_64 = arith.constant 0 : index
    %c96 = arith.constant 96 : index
    %323 = vector.load %arg14[%c0_64, %c96] : memref<16x128xf32, #tpu.memory_space<vmem>>, vector<8x16xf32>
    tpu.vector_store %arg14[%c0_64, %c96], %322 {strides = array<i32>} : memref<16x128xf32, #tpu.memory_space<vmem>>, vector<8x16xf32>,
    %324 = vector.extract_strided_slice %24 {offsets = [0, 112], sizes = [8, 16], strides = [1, 1]} : vector<16x384xf32> to vector<8x16xf32>
    %325 = vector.extract_strided_slice %24 {offsets = [0, 240], sizes = [8, 16], strides = [1, 1]} : vector<16x384xf32> to vector<8x16xf32>
    %326 = vector.extract_strided_slice %24 {offsets = [0, 368], sizes = [8, 16], strides = [1, 1]} : vector<16x384xf32> to vector<8x16xf32>
    %327 = vector.extract_strided_slice %324 {offsets = [0, 0], sizes = [8, 8], strides = [1, 1]} : vector<8x16xf32> to vector<8x8xf32>
    %328 = vector.extract_strided_slice %324 {offsets = [0, 8], sizes = [8, 8], strides = [1, 1]} : vector<8x16xf32> to vector<8x8xf32>
    %329 = vector.extract_strided_slice %325 {offsets = [0, 0], sizes = [8, 8], strides = [1, 1]} : vector<8x16xf32> to vector<8x8xf32>
    %330 = vector.extract_strided_slice %325 {offsets = [0, 8], sizes = [8, 8], strides = [1, 1]} : vector<8x16xf32> to vector<8x8xf32>
    %331 = arith.mulf %327, %25 : vector<8x8xf32>
    %332 = arith.mulf %328, %26 : vector<8x8xf32>
    %333 = arith.subf %331, %332 : vector<8x8xf32>
    %334 = arith.mulf %328, %25 : vector<8x8xf32>
    %335 = arith.mulf %327, %26 : vector<8x8xf32>
    %336 = arith.addf %334, %335 : vector<8x8xf32>
    %337 = tpu.concatenate %333, %336 in 1 : vector<8x8xf32>, vector<8x8xf32> -> vector<8x16xf32>
    %338 = arith.mulf %329, %25 : vector<8x8xf32>
    %339 = arith.mulf %330, %26 : vector<8x8xf32>
    %340 = arith.subf %338, %339 : vector<8x8xf32>
    %341 = arith.mulf %330, %25 : vector<8x8xf32>
    %342 = arith.mulf %329, %26 : vector<8x8xf32>
    %343 = arith.addf %341, %342 : vector<8x8xf32>
    %344 = tpu.concatenate %340, %343 in 1 : vector<8x8xf32>, vector<8x8xf32> -> vector<8x16xf32>
    %cst_65 = arith.constant 2.500000e-01 : f32
    %345 = vector.broadcast %cst_65 : f32 to vector<8x16xf32>
    %346 = arith.mulf %337, %345 : vector<8x16xf32>
    %347 = arith.truncf %346 : vector<8x16xf32> to vector<8x16xbf16>
    %348 = arith.truncf %344 : vector<8x16xf32> to vector<8x16xbf16>
    %cst_66 = arith.constant dense<0.000000e+00> : vector<8x8xf32>
    %349 = tpu.matmul %347, %348, %cst_66 {dimension_numbers = #tpu.dot_dimension_numbers<[1], [1], [0], [0], [0, 0, 1, 0], [], []>} : vector<8x16xbf16>, vector<8x16xbf16>, vector<8x8xf32> -> vector<8x8xf32>
    %cst_67 = arith.constant -1.000000e+30 : f32
    %350 = vector.broadcast %cst_67 : f32 to vector<8x8xf32>
    %351 = arith.select %29, %349, %350 : vector<8x8xi1>, vector<8x8xf32>
    %cst_68 = arith.constant dense<0xFF800000> : vector<8xf32>
    %352 = vector.multi_reduction <maximumf>, %351, %cst_68 [1] : vector<8x8xf32> to vector<8xf32>
    %353 = vector.shape_cast %352 : vector<8xf32> to vector<8x1xf32>
    %354 = vector.broadcast %353 : vector<8x1xf32> to vector<8x8xf32>
    %355 = arith.subf %351, %354 : vector<8x8xf32>
    %356 = math.exp %355 : vector<8x8xf32>
    %cst_69 = arith.constant dense<0.000000e+00> : vector<8xf32>
    %357 = vector.multi_reduction <add>, %356, %cst_69 [1] : vector<8x8xf32> to vector<8xf32>
    %358 = vector.shape_cast %357 : vector<8xf32> to vector<8x1xf32>
    %359 = tpu.reciprocal %358 {approx = true} : vector<8x1xf32> -> vector<8x1xf32>
    %360 = vector.broadcast %359 : vector<8x1xf32> to vector<8x8xf32>
    %361 = arith.mulf %356, %360 : vector<8x8xf32>
    %362 = arith.truncf %361 : vector<8x8xf32> to vector<8x8xbf16>
    %363 = arith.truncf %326 : vector<8x16xf32> to vector<8x16xbf16>
    %cst_70 = arith.constant dense<0.000000e+00> : vector<8x16xf32>
    %364 = tpu.matmul %362, %363, %cst_70 {dimension_numbers = #tpu.dot_dimension_numbers<[1], [0], [0], [1], [0, 0, 1, 1], [], []>} : vector<8x8xbf16>, vector<8x16xbf16>, vector<8x16xf32> -> vector<8x16xf32>
    %c0_71 = arith.constant 0 : index
    %c112 = arith.constant 112 : index
    %365 = vector.load %arg14[%c0_71, %c112] : memref<16x128xf32, #tpu.memory_space<vmem>>, vector<8x16xf32>
    tpu.vector_store %arg14[%c0_71, %c112], %364 {strides = array<i32>} : memref<16x128xf32, #tpu.memory_space<vmem>>, vector<8x16xf32>,
    %366 = vector.extract_strided_slice %24 {offsets = [8, 0], sizes = [8, 16], strides = [1, 1]} : vector<16x384xf32> to vector<8x16xf32>
    %367 = vector.extract_strided_slice %24 {offsets = [8, 128], sizes = [8, 16], strides = [1, 1]} : vector<16x384xf32> to vector<8x16xf32>
    %368 = vector.extract_strided_slice %24 {offsets = [8, 256], sizes = [8, 16], strides = [1, 1]} : vector<16x384xf32> to vector<8x16xf32>
    %369 = vector.extract_strided_slice %366 {offsets = [0, 0], sizes = [8, 8], strides = [1, 1]} : vector<8x16xf32> to vector<8x8xf32>
    %370 = vector.extract_strided_slice %366 {offsets = [0, 8], sizes = [8, 8], strides = [1, 1]} : vector<8x16xf32> to vector<8x8xf32>
    %371 = vector.extract_strided_slice %367 {offsets = [0, 0], sizes = [8, 8], strides = [1, 1]} : vector<8x16xf32> to vector<8x8xf32>
    %372 = vector.extract_strided_slice %367 {offsets = [0, 8], sizes = [8, 8], strides = [1, 1]} : vector<8x16xf32> to vector<8x8xf32>
    %373 = arith.mulf %369, %25 : vector<8x8xf32>
    %374 = arith.mulf %370, %26 : vector<8x8xf32>
    %375 = arith.subf %373, %374 : vector<8x8xf32>
    %376 = arith.mulf %370, %25 : vector<8x8xf32>
    %377 = arith.mulf %369, %26 : vector<8x8xf32>
    %378 = arith.addf %376, %377 : vector<8x8xf32>
    %379 = tpu.concatenate %375, %378 in 1 : vector<8x8xf32>, vector<8x8xf32> -> vector<8x16xf32>
    %380 = arith.mulf %371, %25 : vector<8x8xf32>
    %381 = arith.mulf %372, %26 : vector<8x8xf32>
    %382 = arith.subf %380, %381 : vector<8x8xf32>
    %383 = arith.mulf %372, %25 : vector<8x8xf32>
    %384 = arith.mulf %371, %26 : vector<8x8xf32>
    %385 = arith.addf %383, %384 : vector<8x8xf32>
    %386 = tpu.concatenate %382, %385 in 1 : vector<8x8xf32>, vector<8x8xf32> -> vector<8x16xf32>
    %cst_72 = arith.constant 2.500000e-01 : f32
    %387 = vector.broadcast %cst_72 : f32 to vector<8x16xf32>
    %388 = arith.mulf %379, %387 : vector<8x16xf32>
    %389 = arith.truncf %388 : vector<8x16xf32> to vector<8x16xbf16>
    %390 = arith.truncf %386 : vector<8x16xf32> to vector<8x16xbf16>
    %cst_73 = arith.constant dense<0.000000e+00> : vector<8x8xf32>
    %391 = tpu.matmul %389, %390, %cst_73 {dimension_numbers = #tpu.dot_dimension_numbers<[1], [1], [0], [0], [0, 0, 1, 0], [], []>} : vector<8x16xbf16>, vector<8x16xbf16>, vector<8x8xf32> -> vector<8x8xf32>
    %cst_74 = arith.constant -1.000000e+30 : f32
    %392 = vector.broadcast %cst_74 : f32 to vector<8x8xf32>
    %393 = arith.select %29, %391, %392 : vector<8x8xi1>, vector<8x8xf32>
    %cst_75 = arith.constant dense<0xFF800000> : vector<8xf32>
    %394 = vector.multi_reduction <maximumf>, %393, %cst_75 [1] : vector<8x8xf32> to vector<8xf32>
    %395 = vector.shape_cast %394 : vector<8xf32> to vector<8x1xf32>
    %396 = vector.broadcast %395 : vector<8x1xf32> to vector<8x8xf32>
    %397 = arith.subf %393, %396 : vector<8x8xf32>
    %398 = math.exp %397 : vector<8x8xf32>
    %cst_76 = arith.constant dense<0.000000e+00> : vector<8xf32>
    %399 = vector.multi_reduction <add>, %398, %cst_76 [1] : vector<8x8xf32> to vector<8xf32>
    %400 = vector.shape_cast %399 : vector<8xf32> to vector<8x1xf32>
    %401 = tpu.reciprocal %400 {approx = true} : vector<8x1xf32> -> vector<8x1xf32>
    %402 = vector.broadcast %401 : vector<8x1xf32> to vector<8x8xf32>
    %403 = arith.mulf %398, %402 : vector<8x8xf32>
    %404 = arith.truncf %403 : vector<8x8xf32> to vector<8x8xbf16>
    %405 = arith.truncf %368 : vector<8x16xf32> to vector<8x16xbf16>
    %cst_77 = arith.constant dense<0.000000e+00> : vector<8x16xf32>
    %406 = tpu.matmul %404, %405, %cst_77 {dimension_numbers = #tpu.dot_dimension_numbers<[1], [0], [0], [1], [0, 0, 1, 1], [], []>} : vector<8x8xbf16>, vector<8x16xbf16>, vector<8x16xf32> -> vector<8x16xf32>
    %c8 = arith.constant 8 : index
    %c0_78 = arith.constant 0 : index
    %407 = vector.load %arg14[%c8, %c0_78] : memref<16x128xf32, #tpu.memory_space<vmem>>, vector<8x16xf32>
    tpu.vector_store %arg14[%c8, %c0_78], %406 {strides = array<i32>} : memref<16x128xf32, #tpu.memory_space<vmem>>, vector<8x16xf32>,
    %408 = vector.extract_strided_slice %24 {offsets = [8, 16], sizes = [8, 16], strides = [1, 1]} : vector<16x384xf32> to vector<8x16xf32>
    %409 = vector.extract_strided_slice %24 {offsets = [8, 144], sizes = [8, 16], strides = [1, 1]} : vector<16x384xf32> to vector<8x16xf32>
    %410 = vector.extract_strided_slice %24 {offsets = [8, 272], sizes = [8, 16], strides = [1, 1]} : vector<16x384xf32> to vector<8x16xf32>
    %411 = vector.extract_strided_slice %408 {offsets = [0, 0], sizes = [8, 8], strides = [1, 1]} : vector<8x16xf32> to vector<8x8xf32>
    %412 = vector.extract_strided_slice %408 {offsets = [0, 8], sizes = [8, 8], strides = [1, 1]} : vector<8x16xf32> to vector<8x8xf32>
    %413 = vector.extract_strided_slice %409 {offsets = [0, 0], sizes = [8, 8], strides = [1, 1]} : vector<8x16xf32> to vector<8x8xf32>
    %414 = vector.extract_strided_slice %409 {offsets = [0, 8], sizes = [8, 8], strides = [1, 1]} : vector<8x16xf32> to vector<8x8xf32>
    %415 = arith.mulf %411, %25 : vector<8x8xf32>
    %416 = arith.mulf %412, %26 : vector<8x8xf32>
    %417 = arith.subf %415, %416 : vector<8x8xf32>
    %418 = arith.mulf %412, %25 : vector<8x8xf32>
    %419 = arith.mulf %411, %26 : vector<8x8xf32>
    %420 = arith.addf %418, %419 : vector<8x8xf32>
    %421 = tpu.concatenate %417, %420 in 1 : vector<8x8xf32>, vector<8x8xf32> -> vector<8x16xf32>
    %422 = arith.mulf %413, %25 : vector<8x8xf32>
    %423 = arith.mulf %414, %26 : vector<8x8xf32>
    %424 = arith.subf %422, %423 : vector<8x8xf32>
    %425 = arith.mulf %414, %25 : vector<8x8xf32>
    %426 = arith.mulf %413, %26 : vector<8x8xf32>
    %427 = arith.addf %425, %426 : vector<8x8xf32>
    %428 = tpu.concatenate %424, %427 in 1 : vector<8x8xf32>, vector<8x8xf32> -> vector<8x16xf32>
    %cst_79 = arith.constant 2.500000e-01 : f32
    %429 = vector.broadcast %cst_79 : f32 to vector<8x16xf32>
    %430 = arith.mulf %421, %429 : vector<8x16xf32>
    %431 = arith.truncf %430 : vector<8x16xf32> to vector<8x16xbf16>
    %432 = arith.truncf %428 : vector<8x16xf32> to vector<8x16xbf16>
    %cst_80 = arith.constant dense<0.000000e+00> : vector<8x8xf32>
    %433 = tpu.matmul %431, %432, %cst_80 {dimension_numbers = #tpu.dot_dimension_numbers<[1], [1], [0], [0], [0, 0, 1, 0], [], []>} : vector<8x16xbf16>, vector<8x16xbf16>, vector<8x8xf32> -> vector<8x8xf32>
    %cst_81 = arith.constant -1.000000e+30 : f32
    %434 = vector.broadcast %cst_81 : f32 to vector<8x8xf32>
    %435 = arith.select %29, %433, %434 : vector<8x8xi1>, vector<8x8xf32>
    %cst_82 = arith.constant dense<0xFF800000> : vector<8xf32>
    %436 = vector.multi_reduction <maximumf>, %435, %cst_82 [1] : vector<8x8xf32> to vector<8xf32>
    %437 = vector.shape_cast %436 : vector<8xf32> to vector<8x1xf32>
    %438 = vector.broadcast %437 : vector<8x1xf32> to vector<8x8xf32>
    %439 = arith.subf %435, %438 : vector<8x8xf32>
    %440 = math.exp %439 : vector<8x8xf32>
    %cst_83 = arith.constant dense<0.000000e+00> : vector<8xf32>
    %441 = vector.multi_reduction <add>, %440, %cst_83 [1] : vector<8x8xf32> to vector<8xf32>
    %442 = vector.shape_cast %441 : vector<8xf32> to vector<8x1xf32>
    %443 = tpu.reciprocal %442 {approx = true} : vector<8x1xf32> -> vector<8x1xf32>
    %444 = vector.broadcast %443 : vector<8x1xf32> to vector<8x8xf32>
    %445 = arith.mulf %440, %444 : vector<8x8xf32>
    %446 = arith.truncf %445 : vector<8x8xf32> to vector<8x8xbf16>
    %447 = arith.truncf %410 : vector<8x16xf32> to vector<8x16xbf16>
    %cst_84 = arith.constant dense<0.000000e+00> : vector<8x16xf32>
    %448 = tpu.matmul %446, %447, %cst_84 {dimension_numbers = #tpu.dot_dimension_numbers<[1], [0], [0], [1], [0, 0, 1, 1], [], []>} : vector<8x8xbf16>, vector<8x16xbf16>, vector<8x16xf32> -> vector<8x16xf32>
    %c8_85 = arith.constant 8 : index
    %c16_86 = arith.constant 16 : index
    %449 = vector.load %arg14[%c8_85, %c16_86] : memref<16x128xf32, #tpu.memory_space<vmem>>, vector<8x16xf32>
    tpu.vector_store %arg14[%c8_85, %c16_86], %448 {strides = array<i32>} : memref<16x128xf32, #tpu.memory_space<vmem>>, vector<8x16xf32>,
    %450 = vector.extract_strided_slice %24 {offsets = [8, 32], sizes = [8, 16], strides = [1, 1]} : vector<16x384xf32> to vector<8x16xf32>
    %451 = vector.extract_strided_slice %24 {offsets = [8, 160], sizes = [8, 16], strides = [1, 1]} : vector<16x384xf32> to vector<8x16xf32>
    %452 = vector.extract_strided_slice %24 {offsets = [8, 288], sizes = [8, 16], strides = [1, 1]} : vector<16x384xf32> to vector<8x16xf32>
    %453 = vector.extract_strided_slice %450 {offsets = [0, 0], sizes = [8, 8], strides = [1, 1]} : vector<8x16xf32> to vector<8x8xf32>
    %454 = vector.extract_strided_slice %450 {offsets = [0, 8], sizes = [8, 8], strides = [1, 1]} : vector<8x16xf32> to vector<8x8xf32>
    %455 = vector.extract_strided_slice %451 {offsets = [0, 0], sizes = [8, 8], strides = [1, 1]} : vector<8x16xf32> to vector<8x8xf32>
    %456 = vector.extract_strided_slice %451 {offsets = [0, 8], sizes = [8, 8], strides = [1, 1]} : vector<8x16xf32> to vector<8x8xf32>
    %457 = arith.mulf %453, %25 : vector<8x8xf32>
    %458 = arith.mulf %454, %26 : vector<8x8xf32>
    %459 = arith.subf %457, %458 : vector<8x8xf32>
    %460 = arith.mulf %454, %25 : vector<8x8xf32>
    %461 = arith.mulf %453, %26 : vector<8x8xf32>
    %462 = arith.addf %460, %461 : vector<8x8xf32>
    %463 = tpu.concatenate %459, %462 in 1 : vector<8x8xf32>, vector<8x8xf32> -> vector<8x16xf32>
    %464 = arith.mulf %455, %25 : vector<8x8xf32>
    %465 = arith.mulf %456, %26 : vector<8x8xf32>
    %466 = arith.subf %464, %465 : vector<8x8xf32>
    %467 = arith.mulf %456, %25 : vector<8x8xf32>
    %468 = arith.mulf %455, %26 : vector<8x8xf32>
    %469 = arith.addf %467, %468 : vector<8x8xf32>
    %470 = tpu.concatenate %466, %469 in 1 : vector<8x8xf32>, vector<8x8xf32> -> vector<8x16xf32>
    %cst_87 = arith.constant 2.500000e-01 : f32
    %471 = vector.broadcast %cst_87 : f32 to vector<8x16xf32>
    %472 = arith.mulf %463, %471 : vector<8x16xf32>
    %473 = arith.truncf %472 : vector<8x16xf32> to vector<8x16xbf16>
    %474 = arith.truncf %470 : vector<8x16xf32> to vector<8x16xbf16>
    %cst_88 = arith.constant dense<0.000000e+00> : vector<8x8xf32>
    %475 = tpu.matmul %473, %474, %cst_88 {dimension_numbers = #tpu.dot_dimension_numbers<[1], [1], [0], [0], [0, 0, 1, 0], [], []>} : vector<8x16xbf16>, vector<8x16xbf16>, vector<8x8xf32> -> vector<8x8xf32>
    %cst_89 = arith.constant -1.000000e+30 : f32
    %476 = vector.broadcast %cst_89 : f32 to vector<8x8xf32>
    %477 = arith.select %29, %475, %476 : vector<8x8xi1>, vector<8x8xf32>
    %cst_90 = arith.constant dense<0xFF800000> : vector<8xf32>
    %478 = vector.multi_reduction <maximumf>, %477, %cst_90 [1] : vector<8x8xf32> to vector<8xf32>
    %479 = vector.shape_cast %478 : vector<8xf32> to vector<8x1xf32>
    %480 = vector.broadcast %479 : vector<8x1xf32> to vector<8x8xf32>
    %481 = arith.subf %477, %480 : vector<8x8xf32>
    %482 = math.exp %481 : vector<8x8xf32>
    %cst_91 = arith.constant dense<0.000000e+00> : vector<8xf32>
    %483 = vector.multi_reduction <add>, %482, %cst_91 [1] : vector<8x8xf32> to vector<8xf32>
    %484 = vector.shape_cast %483 : vector<8xf32> to vector<8x1xf32>
    %485 = tpu.reciprocal %484 {approx = true} : vector<8x1xf32> -> vector<8x1xf32>
    %486 = vector.broadcast %485 : vector<8x1xf32> to vector<8x8xf32>
    %487 = arith.mulf %482, %486 : vector<8x8xf32>
    %488 = arith.truncf %487 : vector<8x8xf32> to vector<8x8xbf16>
    %489 = arith.truncf %452 : vector<8x16xf32> to vector<8x16xbf16>
    %cst_92 = arith.constant dense<0.000000e+00> : vector<8x16xf32>
    %490 = tpu.matmul %488, %489, %cst_92 {dimension_numbers = #tpu.dot_dimension_numbers<[1], [0], [0], [1], [0, 0, 1, 1], [], []>} : vector<8x8xbf16>, vector<8x16xbf16>, vector<8x16xf32> -> vector<8x16xf32>
    %c8_93 = arith.constant 8 : index
    %c32_94 = arith.constant 32 : index
    %491 = vector.load %arg14[%c8_93, %c32_94] : memref<16x128xf32, #tpu.memory_space<vmem>>, vector<8x16xf32>
    tpu.vector_store %arg14[%c8_93, %c32_94], %490 {strides = array<i32>} : memref<16x128xf32, #tpu.memory_space<vmem>>, vector<8x16xf32>,
    %492 = vector.extract_strided_slice %24 {offsets = [8, 48], sizes = [8, 16], strides = [1, 1]} : vector<16x384xf32> to vector<8x16xf32>
    %493 = vector.extract_strided_slice %24 {offsets = [8, 176], sizes = [8, 16], strides = [1, 1]} : vector<16x384xf32> to vector<8x16xf32>
    %494 = vector.extract_strided_slice %24 {offsets = [8, 304], sizes = [8, 16], strides = [1, 1]} : vector<16x384xf32> to vector<8x16xf32>
    %495 = vector.extract_strided_slice %492 {offsets = [0, 0], sizes = [8, 8], strides = [1, 1]} : vector<8x16xf32> to vector<8x8xf32>
    %496 = vector.extract_strided_slice %492 {offsets = [0, 8], sizes = [8, 8], strides = [1, 1]} : vector<8x16xf32> to vector<8x8xf32>
    %497 = vector.extract_strided_slice %493 {offsets = [0, 0], sizes = [8, 8], strides = [1, 1]} : vector<8x16xf32> to vector<8x8xf32>
    %498 = vector.extract_strided_slice %493 {offsets = [0, 8], sizes = [8, 8], strides = [1, 1]} : vector<8x16xf32> to vector<8x8xf32>
    %499 = arith.mulf %495, %25 : vector<8x8xf32>
    %500 = arith.mulf %496, %26 : vector<8x8xf32>
    %501 = arith.subf %499, %500 : vector<8x8xf32>
    %502 = arith.mulf %496, %25 : vector<8x8xf32>
    %503 = arith.mulf %495, %26 : vector<8x8xf32>
    %504 = arith.addf %502, %503 : vector<8x8xf32>
    %505 = tpu.concatenate %501, %504 in 1 : vector<8x8xf32>, vector<8x8xf32> -> vector<8x16xf32>
    %506 = arith.mulf %497, %25 : vector<8x8xf32>
    %507 = arith.mulf %498, %26 : vector<8x8xf32>
    %508 = arith.subf %506, %507 : vector<8x8xf32>
    %509 = arith.mulf %498, %25 : vector<8x8xf32>
    %510 = arith.mulf %497, %26 : vector<8x8xf32>
    %511 = arith.addf %509, %510 : vector<8x8xf32>
    %512 = tpu.concatenate %508, %511 in 1 : vector<8x8xf32>, vector<8x8xf32> -> vector<8x16xf32>
    %cst_95 = arith.constant 2.500000e-01 : f32
    %513 = vector.broadcast %cst_95 : f32 to vector<8x16xf32>
    %514 = arith.mulf %505, %513 : vector<8x16xf32>
    %515 = arith.truncf %514 : vector<8x16xf32> to vector<8x16xbf16>
    %516 = arith.truncf %512 : vector<8x16xf32> to vector<8x16xbf16>
    %cst_96 = arith.constant dense<0.000000e+00> : vector<8x8xf32>
    %517 = tpu.matmul %515, %516, %cst_96 {dimension_numbers = #tpu.dot_dimension_numbers<[1], [1], [0], [0], [0, 0, 1, 0], [], []>} : vector<8x16xbf16>, vector<8x16xbf16>, vector<8x8xf32> -> vector<8x8xf32>
    %cst_97 = arith.constant -1.000000e+30 : f32
    %518 = vector.broadcast %cst_97 : f32 to vector<8x8xf32>
    %519 = arith.select %29, %517, %518 : vector<8x8xi1>, vector<8x8xf32>
    %cst_98 = arith.constant dense<0xFF800000> : vector<8xf32>
    %520 = vector.multi_reduction <maximumf>, %519, %cst_98 [1] : vector<8x8xf32> to vector<8xf32>
    %521 = vector.shape_cast %520 : vector<8xf32> to vector<8x1xf32>
    %522 = vector.broadcast %521 : vector<8x1xf32> to vector<8x8xf32>
    %523 = arith.subf %519, %522 : vector<8x8xf32>
    %524 = math.exp %523 : vector<8x8xf32>
    %cst_99 = arith.constant dense<0.000000e+00> : vector<8xf32>
    %525 = vector.multi_reduction <add>, %524, %cst_99 [1] : vector<8x8xf32> to vector<8xf32>
    %526 = vector.shape_cast %525 : vector<8xf32> to vector<8x1xf32>
    %527 = tpu.reciprocal %526 {approx = true} : vector<8x1xf32> -> vector<8x1xf32>
    %528 = vector.broadcast %527 : vector<8x1xf32> to vector<8x8xf32>
    %529 = arith.mulf %524, %528 : vector<8x8xf32>
    %530 = arith.truncf %529 : vector<8x8xf32> to vector<8x8xbf16>
    %531 = arith.truncf %494 : vector<8x16xf32> to vector<8x16xbf16>
    %cst_100 = arith.constant dense<0.000000e+00> : vector<8x16xf32>
    %532 = tpu.matmul %530, %531, %cst_100 {dimension_numbers = #tpu.dot_dimension_numbers<[1], [0], [0], [1], [0, 0, 1, 1], [], []>} : vector<8x8xbf16>, vector<8x16xbf16>, vector<8x16xf32> -> vector<8x16xf32>
    %c8_101 = arith.constant 8 : index
    %c48_102 = arith.constant 48 : index
    %533 = vector.load %arg14[%c8_101, %c48_102] : memref<16x128xf32, #tpu.memory_space<vmem>>, vector<8x16xf32>
    tpu.vector_store %arg14[%c8_101, %c48_102], %532 {strides = array<i32>} : memref<16x128xf32, #tpu.memory_space<vmem>>, vector<8x16xf32>,
    %534 = vector.extract_strided_slice %24 {offsets = [8, 64], sizes = [8, 16], strides = [1, 1]} : vector<16x384xf32> to vector<8x16xf32>
    %535 = vector.extract_strided_slice %24 {offsets = [8, 192], sizes = [8, 16], strides = [1, 1]} : vector<16x384xf32> to vector<8x16xf32>
    %536 = vector.extract_strided_slice %24 {offsets = [8, 320], sizes = [8, 16], strides = [1, 1]} : vector<16x384xf32> to vector<8x16xf32>
    %537 = vector.extract_strided_slice %534 {offsets = [0, 0], sizes = [8, 8], strides = [1, 1]} : vector<8x16xf32> to vector<8x8xf32>
    %538 = vector.extract_strided_slice %534 {offsets = [0, 8], sizes = [8, 8], strides = [1, 1]} : vector<8x16xf32> to vector<8x8xf32>
    %539 = vector.extract_strided_slice %535 {offsets = [0, 0], sizes = [8, 8], strides = [1, 1]} : vector<8x16xf32> to vector<8x8xf32>
    %540 = vector.extract_strided_slice %535 {offsets = [0, 8], sizes = [8, 8], strides = [1, 1]} : vector<8x16xf32> to vector<8x8xf32>
    %541 = arith.mulf %537, %25 : vector<8x8xf32>
    %542 = arith.mulf %538, %26 : vector<8x8xf32>
    %543 = arith.subf %541, %542 : vector<8x8xf32>
    %544 = arith.mulf %538, %25 : vector<8x8xf32>
    %545 = arith.mulf %537, %26 : vector<8x8xf32>
    %546 = arith.addf %544, %545 : vector<8x8xf32>
    %547 = tpu.concatenate %543, %546 in 1 : vector<8x8xf32>, vector<8x8xf32> -> vector<8x16xf32>
    %548 = arith.mulf %539, %25 : vector<8x8xf32>
    %549 = arith.mulf %540, %26 : vector<8x8xf32>
    %550 = arith.subf %548, %549 : vector<8x8xf32>
    %551 = arith.mulf %540, %25 : vector<8x8xf32>
    %552 = arith.mulf %539, %26 : vector<8x8xf32>
    %553 = arith.addf %551, %552 : vector<8x8xf32>
    %554 = tpu.concatenate %550, %553 in 1 : vector<8x8xf32>, vector<8x8xf32> -> vector<8x16xf32>
    %cst_103 = arith.constant 2.500000e-01 : f32
    %555 = vector.broadcast %cst_103 : f32 to vector<8x16xf32>
    %556 = arith.mulf %547, %555 : vector<8x16xf32>
    %557 = arith.truncf %556 : vector<8x16xf32> to vector<8x16xbf16>
    %558 = arith.truncf %554 : vector<8x16xf32> to vector<8x16xbf16>
    %cst_104 = arith.constant dense<0.000000e+00> : vector<8x8xf32>
    %559 = tpu.matmul %557, %558, %cst_104 {dimension_numbers = #tpu.dot_dimension_numbers<[1], [1], [0], [0], [0, 0, 1, 0], [], []>} : vector<8x16xbf16>, vector<8x16xbf16>, vector<8x8xf32> -> vector<8x8xf32>
    %cst_105 = arith.constant -1.000000e+30 : f32
    %560 = vector.broadcast %cst_105 : f32 to vector<8x8xf32>
    %561 = arith.select %29, %559, %560 : vector<8x8xi1>, vector<8x8xf32>
    %cst_106 = arith.constant dense<0xFF800000> : vector<8xf32>
    %562 = vector.multi_reduction <maximumf>, %561, %cst_106 [1] : vector<8x8xf32> to vector<8xf32>
    %563 = vector.shape_cast %562 : vector<8xf32> to vector<8x1xf32>
    %564 = vector.broadcast %563 : vector<8x1xf32> to vector<8x8xf32>
    %565 = arith.subf %561, %564 : vector<8x8xf32>
    %566 = math.exp %565 : vector<8x8xf32>
    %cst_107 = arith.constant dense<0.000000e+00> : vector<8xf32>
    %567 = vector.multi_reduction <add>, %566, %cst_107 [1] : vector<8x8xf32> to vector<8xf32>
    %568 = vector.shape_cast %567 : vector<8xf32> to vector<8x1xf32>
    %569 = tpu.reciprocal %568 {approx = true} : vector<8x1xf32> -> vector<8x1xf32>
    %570 = vector.broadcast %569 : vector<8x1xf32> to vector<8x8xf32>
    %571 = arith.mulf %566, %570 : vector<8x8xf32>
    %572 = arith.truncf %571 : vector<8x8xf32> to vector<8x8xbf16>
    %573 = arith.truncf %536 : vector<8x16xf32> to vector<8x16xbf16>
    %cst_108 = arith.constant dense<0.000000e+00> : vector<8x16xf32>
    %574 = tpu.matmul %572, %573, %cst_108 {dimension_numbers = #tpu.dot_dimension_numbers<[1], [0], [0], [1], [0, 0, 1, 1], [], []>} : vector<8x8xbf16>, vector<8x16xbf16>, vector<8x16xf32> -> vector<8x16xf32>
    %c8_109 = arith.constant 8 : index
    %c64_110 = arith.constant 64 : index
    %575 = vector.load %arg14[%c8_109, %c64_110] : memref<16x128xf32, #tpu.memory_space<vmem>>, vector<8x16xf32>
    tpu.vector_store %arg14[%c8_109, %c64_110], %574 {strides = array<i32>} : memref<16x128xf32, #tpu.memory_space<vmem>>, vector<8x16xf32>,
    %576 = vector.extract_strided_slice %24 {offsets = [8, 80], sizes = [8, 16], strides = [1, 1]} : vector<16x384xf32> to vector<8x16xf32>
    %577 = vector.extract_strided_slice %24 {offsets = [8, 208], sizes = [8, 16], strides = [1, 1]} : vector<16x384xf32> to vector<8x16xf32>
    %578 = vector.extract_strided_slice %24 {offsets = [8, 336], sizes = [8, 16], strides = [1, 1]} : vector<16x384xf32> to vector<8x16xf32>
    %579 = vector.extract_strided_slice %576 {offsets = [0, 0], sizes = [8, 8], strides = [1, 1]} : vector<8x16xf32> to vector<8x8xf32>
    %580 = vector.extract_strided_slice %576 {offsets = [0, 8], sizes = [8, 8], strides = [1, 1]} : vector<8x16xf32> to vector<8x8xf32>
    %581 = vector.extract_strided_slice %577 {offsets = [0, 0], sizes = [8, 8], strides = [1, 1]} : vector<8x16xf32> to vector<8x8xf32>
    %582 = vector.extract_strided_slice %577 {offsets = [0, 8], sizes = [8, 8], strides = [1, 1]} : vector<8x16xf32> to vector<8x8xf32>
    %583 = arith.mulf %579, %25 : vector<8x8xf32>
    %584 = arith.mulf %580, %26 : vector<8x8xf32>
    %585 = arith.subf %583, %584 : vector<8x8xf32>
    %586 = arith.mulf %580, %25 : vector<8x8xf32>
    %587 = arith.mulf %579, %26 : vector<8x8xf32>
    %588 = arith.addf %586, %587 : vector<8x8xf32>
    %589 = tpu.concatenate %585, %588 in 1 : vector<8x8xf32>, vector<8x8xf32> -> vector<8x16xf32>
    %590 = arith.mulf %581, %25 : vector<8x8xf32>
    %591 = arith.mulf %582, %26 : vector<8x8xf32>
    %592 = arith.subf %590, %591 : vector<8x8xf32>
    %593 = arith.mulf %582, %25 : vector<8x8xf32>
    %594 = arith.mulf %581, %26 : vector<8x8xf32>
    %595 = arith.addf %593, %594 : vector<8x8xf32>
    %596 = tpu.concatenate %592, %595 in 1 : vector<8x8xf32>, vector<8x8xf32> -> vector<8x16xf32>
    %cst_111 = arith.constant 2.500000e-01 : f32
    %597 = vector.broadcast %cst_111 : f32 to vector<8x16xf32>
    %598 = arith.mulf %589, %597 : vector<8x16xf32>
    %599 = arith.truncf %598 : vector<8x16xf32> to vector<8x16xbf16>
    %600 = arith.truncf %596 : vector<8x16xf32> to vector<8x16xbf16>
    %cst_112 = arith.constant dense<0.000000e+00> : vector<8x8xf32>
    %601 = tpu.matmul %599, %600, %cst_112 {dimension_numbers = #tpu.dot_dimension_numbers<[1], [1], [0], [0], [0, 0, 1, 0], [], []>} : vector<8x16xbf16>, vector<8x16xbf16>, vector<8x8xf32> -> vector<8x8xf32>
    %cst_113 = arith.constant -1.000000e+30 : f32
    %602 = vector.broadcast %cst_113 : f32 to vector<8x8xf32>
    %603 = arith.select %29, %601, %602 : vector<8x8xi1>, vector<8x8xf32>
    %cst_114 = arith.constant dense<0xFF800000> : vector<8xf32>
    %604 = vector.multi_reduction <maximumf>, %603, %cst_114 [1] : vector<8x8xf32> to vector<8xf32>
    %605 = vector.shape_cast %604 : vector<8xf32> to vector<8x1xf32>
    %606 = vector.broadcast %605 : vector<8x1xf32> to vector<8x8xf32>
    %607 = arith.subf %603, %606 : vector<8x8xf32>
    %608 = math.exp %607 : vector<8x8xf32>
    %cst_115 = arith.constant dense<0.000000e+00> : vector<8xf32>
    %609 = vector.multi_reduction <add>, %608, %cst_115 [1] : vector<8x8xf32> to vector<8xf32>
    %610 = vector.shape_cast %609 : vector<8xf32> to vector<8x1xf32>
    %611 = tpu.reciprocal %610 {approx = true} : vector<8x1xf32> -> vector<8x1xf32>
    %612 = vector.broadcast %611 : vector<8x1xf32> to vector<8x8xf32>
    %613 = arith.mulf %608, %612 : vector<8x8xf32>
    %614 = arith.truncf %613 : vector<8x8xf32> to vector<8x8xbf16>
    %615 = arith.truncf %578 : vector<8x16xf32> to vector<8x16xbf16>
    %cst_116 = arith.constant dense<0.000000e+00> : vector<8x16xf32>
    %616 = tpu.matmul %614, %615, %cst_116 {dimension_numbers = #tpu.dot_dimension_numbers<[1], [0], [0], [1], [0, 0, 1, 1], [], []>} : vector<8x8xbf16>, vector<8x16xbf16>, vector<8x16xf32> -> vector<8x16xf32>
    %c8_117 = arith.constant 8 : index
    %c80_118 = arith.constant 80 : index
    %617 = vector.load %arg14[%c8_117, %c80_118] : memref<16x128xf32, #tpu.memory_space<vmem>>, vector<8x16xf32>
    tpu.vector_store %arg14[%c8_117, %c80_118], %616 {strides = array<i32>} : memref<16x128xf32, #tpu.memory_space<vmem>>, vector<8x16xf32>,
    %618 = vector.extract_strided_slice %24 {offsets = [8, 96], sizes = [8, 16], strides = [1, 1]} : vector<16x384xf32> to vector<8x16xf32>
    %619 = vector.extract_strided_slice %24 {offsets = [8, 224], sizes = [8, 16], strides = [1, 1]} : vector<16x384xf32> to vector<8x16xf32>
    %620 = vector.extract_strided_slice %24 {offsets = [8, 352], sizes = [8, 16], strides = [1, 1]} : vector<16x384xf32> to vector<8x16xf32>
    %621 = vector.extract_strided_slice %618 {offsets = [0, 0], sizes = [8, 8], strides = [1, 1]} : vector<8x16xf32> to vector<8x8xf32>
    %622 = vector.extract_strided_slice %618 {offsets = [0, 8], sizes = [8, 8], strides = [1, 1]} : vector<8x16xf32> to vector<8x8xf32>
    %623 = vector.extract_strided_slice %619 {offsets = [0, 0], sizes = [8, 8], strides = [1, 1]} : vector<8x16xf32> to vector<8x8xf32>
    %624 = vector.extract_strided_slice %619 {offsets = [0, 8], sizes = [8, 8], strides = [1, 1]} : vector<8x16xf32> to vector<8x8xf32>
    %625 = arith.mulf %621, %25 : vector<8x8xf32>
    %626 = arith.mulf %622, %26 : vector<8x8xf32>
    %627 = arith.subf %625, %626 : vector<8x8xf32>
    %628 = arith.mulf %622, %25 : vector<8x8xf32>
    %629 = arith.mulf %621, %26 : vector<8x8xf32>
    %630 = arith.addf %628, %629 : vector<8x8xf32>
    %631 = tpu.concatenate %627, %630 in 1 : vector<8x8xf32>, vector<8x8xf32> -> vector<8x16xf32>
    %632 = arith.mulf %623, %25 : vector<8x8xf32>
    %633 = arith.mulf %624, %26 : vector<8x8xf32>
    %634 = arith.subf %632, %633 : vector<8x8xf32>
    %635 = arith.mulf %624, %25 : vector<8x8xf32>
    %636 = arith.mulf %623, %26 : vector<8x8xf32>
    %637 = arith.addf %635, %636 : vector<8x8xf32>
    %638 = tpu.concatenate %634, %637 in 1 : vector<8x8xf32>, vector<8x8xf32> -> vector<8x16xf32>
    %cst_119 = arith.constant 2.500000e-01 : f32
    %639 = vector.broadcast %cst_119 : f32 to vector<8x16xf32>
    %640 = arith.mulf %631, %639 : vector<8x16xf32>
    %641 = arith.truncf %640 : vector<8x16xf32> to vector<8x16xbf16>
    %642 = arith.truncf %638 : vector<8x16xf32> to vector<8x16xbf16>
    %cst_120 = arith.constant dense<0.000000e+00> : vector<8x8xf32>
    %643 = tpu.matmul %641, %642, %cst_120 {dimension_numbers = #tpu.dot_dimension_numbers<[1], [1], [0], [0], [0, 0, 1, 0], [], []>} : vector<8x16xbf16>, vector<8x16xbf16>, vector<8x8xf32> -> vector<8x8xf32>
    %cst_121 = arith.constant -1.000000e+30 : f32
    %644 = vector.broadcast %cst_121 : f32 to vector<8x8xf32>
    %645 = arith.select %29, %643, %644 : vector<8x8xi1>, vector<8x8xf32>
    %cst_122 = arith.constant dense<0xFF800000> : vector<8xf32>
    %646 = vector.multi_reduction <maximumf>, %645, %cst_122 [1] : vector<8x8xf32> to vector<8xf32>
    %647 = vector.shape_cast %646 : vector<8xf32> to vector<8x1xf32>
    %648 = vector.broadcast %647 : vector<8x1xf32> to vector<8x8xf32>
    %649 = arith.subf %645, %648 : vector<8x8xf32>
    %650 = math.exp %649 : vector<8x8xf32>
    %cst_123 = arith.constant dense<0.000000e+00> : vector<8xf32>
    %651 = vector.multi_reduction <add>, %650, %cst_123 [1] : vector<8x8xf32> to vector<8xf32>
    %652 = vector.shape_cast %651 : vector<8xf32> to vector<8x1xf32>
    %653 = tpu.reciprocal %652 {approx = true} : vector<8x1xf32> -> vector<8x1xf32>
    %654 = vector.broadcast %653 : vector<8x1xf32> to vector<8x8xf32>
    %655 = arith.mulf %650, %654 : vector<8x8xf32>
    %656 = arith.truncf %655 : vector<8x8xf32> to vector<8x8xbf16>
    %657 = arith.truncf %620 : vector<8x16xf32> to vector<8x16xbf16>
    %cst_124 = arith.constant dense<0.000000e+00> : vector<8x16xf32>
    %658 = tpu.matmul %656, %657, %cst_124 {dimension_numbers = #tpu.dot_dimension_numbers<[1], [0], [0], [1], [0, 0, 1, 1], [], []>} : vector<8x8xbf16>, vector<8x16xbf16>, vector<8x16xf32> -> vector<8x16xf32>
    %c8_125 = arith.constant 8 : index
    %c96_126 = arith.constant 96 : index
    %659 = vector.load %arg14[%c8_125, %c96_126] : memref<16x128xf32, #tpu.memory_space<vmem>>, vector<8x16xf32>
    tpu.vector_store %arg14[%c8_125, %c96_126], %658 {strides = array<i32>} : memref<16x128xf32, #tpu.memory_space<vmem>>, vector<8x16xf32>,
    %660 = vector.extract_strided_slice %24 {offsets = [8, 112], sizes = [8, 16], strides = [1, 1]} : vector<16x384xf32> to vector<8x16xf32>
    %661 = vector.extract_strided_slice %24 {offsets = [8, 240], sizes = [8, 16], strides = [1, 1]} : vector<16x384xf32> to vector<8x16xf32>
    %662 = vector.extract_strided_slice %24 {offsets = [8, 368], sizes = [8, 16], strides = [1, 1]} : vector<16x384xf32> to vector<8x16xf32>
    %663 = vector.extract_strided_slice %660 {offsets = [0, 0], sizes = [8, 8], strides = [1, 1]} : vector<8x16xf32> to vector<8x8xf32>
    %664 = vector.extract_strided_slice %660 {offsets = [0, 8], sizes = [8, 8], strides = [1, 1]} : vector<8x16xf32> to vector<8x8xf32>
    %665 = vector.extract_strided_slice %661 {offsets = [0, 0], sizes = [8, 8], strides = [1, 1]} : vector<8x16xf32> to vector<8x8xf32>
    %666 = vector.extract_strided_slice %661 {offsets = [0, 8], sizes = [8, 8], strides = [1, 1]} : vector<8x16xf32> to vector<8x8xf32>
    %667 = arith.mulf %663, %25 : vector<8x8xf32>
    %668 = arith.mulf %664, %26 : vector<8x8xf32>
    %669 = arith.subf %667, %668 : vector<8x8xf32>
    %670 = arith.mulf %664, %25 : vector<8x8xf32>
    %671 = arith.mulf %663, %26 : vector<8x8xf32>
    %672 = arith.addf %670, %671 : vector<8x8xf32>
    %673 = tpu.concatenate %669, %672 in 1 : vector<8x8xf32>, vector<8x8xf32> -> vector<8x16xf32>
    %674 = arith.mulf %665, %25 : vector<8x8xf32>
    %675 = arith.mulf %666, %26 : vector<8x8xf32>
    %676 = arith.subf %674, %675 : vector<8x8xf32>
    %677 = arith.mulf %666, %25 : vector<8x8xf32>
    %678 = arith.mulf %665, %26 : vector<8x8xf32>
    %679 = arith.addf %677, %678 : vector<8x8xf32>
    %680 = tpu.concatenate %676, %679 in 1 : vector<8x8xf32>, vector<8x8xf32> -> vector<8x16xf32>
    %cst_127 = arith.constant 2.500000e-01 : f32
    %681 = vector.broadcast %cst_127 : f32 to vector<8x16xf32>
    %682 = arith.mulf %673, %681 : vector<8x16xf32>
    %683 = arith.truncf %682 : vector<8x16xf32> to vector<8x16xbf16>
    %684 = arith.truncf %680 : vector<8x16xf32> to vector<8x16xbf16>
    %cst_128 = arith.constant dense<0.000000e+00> : vector<8x8xf32>
    %685 = tpu.matmul %683, %684, %cst_128 {dimension_numbers = #tpu.dot_dimension_numbers<[1], [1], [0], [0], [0, 0, 1, 0], [], []>} : vector<8x16xbf16>, vector<8x16xbf16>, vector<8x8xf32> -> vector<8x8xf32>
    %cst_129 = arith.constant -1.000000e+30 : f32
    %686 = vector.broadcast %cst_129 : f32 to vector<8x8xf32>
    %687 = arith.select %29, %685, %686 : vector<8x8xi1>, vector<8x8xf32>
    %cst_130 = arith.constant dense<0xFF800000> : vector<8xf32>
    %688 = vector.multi_reduction <maximumf>, %687, %cst_130 [1] : vector<8x8xf32> to vector<8xf32>
    %689 = vector.shape_cast %688 : vector<8xf32> to vector<8x1xf32>
    %690 = vector.broadcast %689 : vector<8x1xf32> to vector<8x8xf32>
    %691 = arith.subf %687, %690 : vector<8x8xf32>
    %692 = math.exp %691 : vector<8x8xf32>
    %cst_131 = arith.constant dense<0.000000e+00> : vector<8xf32>
    %693 = vector.multi_reduction <add>, %692, %cst_131 [1] : vector<8x8xf32> to vector<8xf32>
    %694 = vector.shape_cast %693 : vector<8xf32> to vector<8x1xf32>
    %695 = tpu.reciprocal %694 {approx = true} : vector<8x1xf32> -> vector<8x1xf32>
    %696 = vector.broadcast %695 : vector<8x1xf32> to vector<8x8xf32>
    %697 = arith.mulf %692, %696 : vector<8x8xf32>
    %698 = arith.truncf %697 : vector<8x8xf32> to vector<8x8xbf16>
    %699 = arith.truncf %662 : vector<8x16xf32> to vector<8x16xbf16>
    %cst_132 = arith.constant dense<0.000000e+00> : vector<8x16xf32>
    %700 = tpu.matmul %698, %699, %cst_132 {dimension_numbers = #tpu.dot_dimension_numbers<[1], [0], [0], [1], [0, 0, 1, 1], [], []>} : vector<8x8xbf16>, vector<8x16xbf16>, vector<8x16xf32> -> vector<8x16xf32>
    %c8_133 = arith.constant 8 : index
    %c112_134 = arith.constant 112 : index
    %701 = vector.load %arg14[%c8_133, %c112_134] : memref<16x128xf32, #tpu.memory_space<vmem>>, vector<8x16xf32>
    tpu.vector_store %arg14[%c8_133, %c112_134], %700 {strides = array<i32>} : memref<16x128xf32, #tpu.memory_space<vmem>>, vector<8x16xf32>,
    %c0_135 = arith.constant 0 : index
    %c0_136 = arith.constant 0 : index
    %702 = vector.load %arg14[%c0_135, %c0_136] : memref<16x128xf32, #tpu.memory_space<vmem>>, vector<16x128xf32>
    %703 = arith.truncf %702 : vector<16x128xf32> to vector<16x128xbf16>
    %c0_137 = arith.constant 0 : index
    %c0_138 = arith.constant 0 : index
    %704 = vector.load %arg7[%c0_137, %c0_138] : memref<128x128xbf16, #tpu.memory_space<vmem>>, vector<128x128xbf16>
    %cst_139 = arith.constant dense<0.000000e+00> : vector<16x128xf32>
    %705 = tpu.matmul %703, %704, %cst_139 {dimension_numbers = #tpu.dot_dimension_numbers<[1], [0], [0], [1], [0, 0, 1, 1], [], []>} : vector<16x128xbf16>, vector<128x128xbf16>, vector<16x128xf32> -> vector<16x128xf32>
    %c0_140 = arith.constant 0 : index
    %c0_141 = arith.constant 0 : index
    %706 = vector.load %arg8[%c0_140, %c0_141] : memref<1x128xf32, #tpu.memory_space<vmem>>, vector<1x128xf32>
    %707 = vector.shape_cast %706 : vector<1x128xf32> to vector<128xf32>
    %708 = vector.shape_cast %707 : vector<128xf32> to vector<1x128xf32>
    %709 = vector.broadcast %708 : vector<1x128xf32> to vector<16x128xf32>
    %710 = arith.addf %705, %709 : vector<16x128xf32>
    %711 = arith.addf %1, %710 : vector<16x128xf32>
    %712 = arith.mulf %711, %711 : vector<16x128xf32>
    %cst_142 = arith.constant dense<0.000000e+00> : vector<16xf32>
    %713 = vector.multi_reduction <add>, %712, %cst_142 [1] : vector<16x128xf32> to vector<16xf32>
    %714 = vector.shape_cast %713 : vector<16xf32> to vector<16x1xf32>
    %cst_143 = arith.constant 1.280000e+02 : f32
    %715 = vector.broadcast %cst_143 : f32 to vector<16x1xf32>
    %716 = arith.divf %714, %715 : vector<16x1xf32>
    %cst_144 = arith.constant 9.99999974E-6 : f32
    %717 = vector.broadcast %cst_144 : f32 to vector<16x1xf32>
    %718 = arith.addf %716, %717 : vector<16x1xf32>
    %719 = math.rsqrt %718 : vector<16x1xf32>
    %720 = vector.broadcast %719 : vector<16x1xf32> to vector<16x128xf32>
    %721 = arith.mulf %711, %720 : vector<16x128xf32>
    %c0_145 = arith.constant 0 : index
    %c0_146 = arith.constant 0 : index
    %722 = vector.load %arg9[%c0_145, %c0_146] : memref<1x128xf32, #tpu.memory_space<vmem>>, vector<1x128xf32>
    %723 = vector.shape_cast %722 : vector<1x128xf32> to vector<128xf32>
    %724 = vector.shape_cast %723 : vector<128xf32> to vector<1x128xf32>
    %725 = vector.broadcast %724 : vector<1x128xf32> to vector<16x128xf32>
    %726 = arith.mulf %721, %725 : vector<16x128xf32>
    %727 = arith.truncf %726 : vector<16x128xf32> to vector<16x128xbf16>
    %c0_147 = arith.constant 0 : index
    %c0_148 = arith.constant 0 : index
    %728 = vector.load %arg10[%c0_147, %c0_148] : memref<128x1024xbf16, #tpu.memory_space<vmem>>, vector<128x1024xbf16>
    %cst_149 = arith.constant dense<0.000000e+00> : vector<16x1024xf32>
    %729 = tpu.matmul %727, %728, %cst_149 {dimension_numbers = #tpu.dot_dimension_numbers<[1], [0], [0], [1], [0, 0, 1, 1], [], []>} : vector<16x128xbf16>, vector<128x1024xbf16>, vector<16x1024xf32> -> vector<16x1024xf32>
    %730 = vector.extract_strided_slice %729 {offsets = [0, 0], sizes = [16, 512], strides = [1, 1]} : vector<16x1024xf32> to vector<16x512xf32>
    %731 = vector.extract_strided_slice %729 {offsets = [0, 512], sizes = [16, 512], strides = [1, 1]} : vector<16x1024xf32> to vector<16x512xf32>
    %732 = arith.negf %730 : vector<16x512xf32>
    %733 = math.exp %732 : vector<16x512xf32>
    %cst_150 = arith.constant 1.000000e+00 : f32
    %734 = vector.broadcast %cst_150 : f32 to vector<16x512xf32>
    %735 = arith.addf %734, %733 : vector<16x512xf32>
    %736 = arith.divf %734, %735 : vector<16x512xf32>
    %737 = arith.mulf %730, %736 : vector<16x512xf32>
    %738 = arith.negf %731 : vector<16x512xf32>
    %739 = math.exp %738 : vector<16x512xf32>
    %cst_151 = arith.constant 1.000000e+00 : f32
    %740 = vector.broadcast %cst_151 : f32 to vector<16x512xf32>
    %741 = arith.addf %740, %739 : vector<16x512xf32>
    %742 = arith.divf %740, %741 : vector<16x512xf32>
    %743 = arith.mulf %731, %742 : vector<16x512xf32>
    %744 = arith.mulf %737, %743 : vector<16x512xf32>
    %745 = arith.truncf %744 : vector<16x512xf32> to vector<16x512xbf16>
    %c0_152 = arith.constant 0 : index
    %c0_153 = arith.constant 0 : index
    %746 = vector.load %arg11[%c0_152, %c0_153] : memref<512x128xbf16, #tpu.memory_space<vmem>>, vector<512x128xbf16>
    %cst_154 = arith.constant dense<0.000000e+00> : vector<16x128xf32>
    %747 = tpu.matmul %745, %746, %cst_154 {dimension_numbers = #tpu.dot_dimension_numbers<[1], [0], [0], [1], [0, 0, 1, 1], [], []>} : vector<16x512xbf16>, vector<512x128xbf16>, vector<16x128xf32> -> vector<16x128xf32>
    %c0_155 = arith.constant 0 : index
    %c0_156 = arith.constant 0 : index
    %748 = vector.load %arg12[%c0_155, %c0_156] : memref<1x128xf32, #tpu.memory_space<vmem>>, vector<1x128xf32>
    %749 = vector.shape_cast %748 : vector<1x128xf32> to vector<128xf32>
    %750 = vector.shape_cast %749 : vector<128xf32> to vector<1x128xf32>
    %751 = vector.broadcast %750 : vector<1x128xf32> to vector<16x128xf32>
    %752 = arith.addf %747, %751 : vector<16x128xf32>
    %753 = arith.addf %711, %752 : vector<16x128xf32>
    %754 = vector.shape_cast %753 : vector<16x128xf32> to vector<2x8x128xf32>
    %c0_157 = arith.constant 0 : index
    %c0_158 = arith.constant 0 : index
    %c0_159 = arith.constant 0 : index
    %755 = vector.load %arg13[%c0_157, %c0_158, %c0_159] : memref<2x8x128xf32, #tpu.memory_space<vmem>>, vector<2x8x128xf32>
    tpu.vector_store %arg13[%c0_157, %c0_158, %c0_159], %754 {strides = array<i32>} : memref<2x8x128xf32, #tpu.memory_space<vmem>>, vector<2x8x128xf32>,
    return
  }
  func.func @transform_0(%arg0: i32) -> (i32, i32, i32) {
    %c0_i32 = arith.constant 0 : i32
    %c0_i32_0 = arith.constant 0 : i32
    %c0_i32_1 = arith.constant 0 : i32
    return %arg0, %c0_i32, %c0_i32_0 : i32, i32, i32
  }
  func.func @transform_1(%arg0: i32) -> (i32, i32) {
    %c0_i32 = arith.constant 0 : i32
    %c0_i32_0 = arith.constant 0 : i32
    %c0_i32_1 = arith.constant 0 : i32
    return %c0_i32, %c0_i32_0 : i32, i32
  }
  func.func @transform_2(%arg0: i32) -> (i32, i32) {
    %c0_i32 = arith.constant 0 : i32
    %c0_i32_0 = arith.constant 0 : i32
    %c0_i32_1 = arith.constant 0 : i32
    return %c0_i32, %c0_i32_0 : i32, i32
  }
  func.func @transform_3(%arg0: i32) -> (i32, i32) {
    %c0_i32 = arith.constant 0 : i32
    %c0_i32_0 = arith.constant 0 : i32
    %c0_i32_1 = arith.constant 0 : i32
    return %c0_i32, %c0_i32_0 : i32, i32
  }
  func.func @transform_4(%arg0: i32) -> (i32, i32) {
    %c0_i32 = arith.constant 0 : i32
    %c0_i32_0 = arith.constant 0 : i32
    %c0_i32_1 = arith.constant 0 : i32
    return %c0_i32, %c0_i32_0 : i32, i32
  }
  func.func @transform_5(%arg0: i32) -> (i32, i32) {
    %c0_i32 = arith.constant 0 : i32
    %c0_i32_0 = arith.constant 0 : i32
    %c0_i32_1 = arith.constant 0 : i32
    return %c0_i32, %c0_i32_0 : i32, i32
  }
  func.func @transform_6(%arg0: i32) -> (i32, i32) {
    %c0_i32 = arith.constant 0 : i32
    %c0_i32_0 = arith.constant 0 : i32
    %c0_i32_1 = arith.constant 0 : i32
    return %c0_i32, %c0_i32_0 : i32, i32
  }
  func.func @transform_7(%arg0: i32) -> (i32, i32) {
    %c0_i32 = arith.constant 0 : i32
    %c0_i32_0 = arith.constant 0 : i32
    %c0_i32_1 = arith.constant 0 : i32
    return %c0_i32, %c0_i32_0 : i32, i32
  }
  func.func @transform_8(%arg0: i32) -> (i32, i32) {
    %c0_i32 = arith.constant 0 : i32
    %c0_i32_0 = arith.constant 0 : i32
    %c0_i32_1 = arith.constant 0 : i32
    return %c0_i32, %c0_i32_0 : i32, i32
  }
  func.func @transform_9(%arg0: i32) -> (i32, i32) {
    %c0_i32 = arith.constant 0 : i32
    %c0_i32_0 = arith.constant 0 : i32
    %c0_i32_1 = arith.constant 0 : i32
    return %c0_i32, %c0_i32_0 : i32, i32
  }
  func.func @transform_10(%arg0: i32) -> (i32, i32) {
    %c0_i32 = arith.constant 0 : i32
    %c0_i32_0 = arith.constant 0 : i32
    %c0_i32_1 = arith.constant 0 : i32
    return %c0_i32, %c0_i32_0 : i32, i32
  }
  func.func @transform_11(%arg0: i32) -> (i32, i32) {
    %c0_i32 = arith.constant 0 : i32
    %c0_i32_0 = arith.constant 0 : i32
    %c0_i32_1 = arith.constant 0 : i32
    return %c0_i32, %c0_i32_0 : i32, i32
  }
  func.func @transform_12(%arg0: i32) -> (i32, i32, i32) {
    %c0_i32 = arith.constant 0 : i32
    %c0_i32_0 = arith.constant 0 : i32
    %c0_i32_1 = arith.constant 0 : i32
    return %arg0, %c0_i32, %c0_i32_0 : i32, i32, i32
  }
}

module attributes {stable_mosaic.version = 11 : i64} {
  func.func @_block_kernel(%arg0: i32, %arg1: memref<2x8x128xf32, #tpu.memory_space<vmem>>, %arg2: memref<1x128xf32, #tpu.memory_space<vmem>>, %arg3: memref<128x384xbf16, #tpu.memory_space<vmem>>, %arg4: memref<1x384xf32, #tpu.memory_space<vmem>>, %arg5: memref<8x8xf32, #tpu.memory_space<vmem>>, %arg6: memref<8x8xf32, #tpu.memory_space<vmem>>, %arg7: memref<128x128xbf16, #tpu.memory_space<vmem>>, %arg8: memref<1x128xf32, #tpu.memory_space<vmem>>, %arg9: memref<1x128xf32, #tpu.memory_space<vmem>>, %arg10: memref<128x1024xbf16, #tpu.memory_space<vmem>>, %arg11: memref<512x128xbf16, #tpu.memory_space<vmem>>, %arg12: memref<1x128xf32, #tpu.memory_space<vmem>>, %arg13: memref<2x8x128xf32, #tpu.memory_space<vmem>>, %arg14: memref<16x128xf32, #tpu.memory_space<vmem>>) attributes {dimension_semantics = [#tpu.dimension_semantics<parallel>], iteration_bounds = array<i64: 1>, scalar_prefetch = 0 : i64, scratch_operands = 1 : i64, tpu.core_type = #tpu.core_type<tc>, window_params = [{transform_indices = @transform_0, window_bounds = array<i64: 2, 8, 128>}, {pipeline_mode = #tpu.pipeline_mode<synchronous>, transform_indices = @transform_1, window_bounds = array<i64: 1, 128>}, {pipeline_mode = #tpu.pipeline_mode<synchronous>, transform_indices = @transform_2, window_bounds = array<i64: 128, 384>}, {pipeline_mode = #tpu.pipeline_mode<synchronous>, transform_indices = @transform_3, window_bounds = array<i64: 1, 384>}, {pipeline_mode = #tpu.pipeline_mode<synchronous>, transform_indices = @transform_4, window_bounds = array<i64: 8, 8>}, {pipeline_mode = #tpu.pipeline_mode<synchronous>, transform_indices = @transform_5, window_bounds = array<i64: 8, 8>}, {pipeline_mode = #tpu.pipeline_mode<synchronous>, transform_indices = @transform_6, window_bounds = array<i64: 128, 128>}, {pipeline_mode = #tpu.pipeline_mode<synchronous>, transform_indices = @transform_7, window_bounds = array<i64: 1, 128>}, {pipeline_mode = #tpu.pipeline_mode<synchronous>, transform_indices = @transform_8, window_bounds = array<i64: 1, 128>}, {pipeline_mode = #tpu.pipeline_mode<synchronous>, transform_indices = @transform_9, window_bounds = array<i64: 128, 1024>}, {pipeline_mode = #tpu.pipeline_mode<synchronous>, transform_indices = @transform_10, window_bounds = array<i64: 512, 128>}, {pipeline_mode = #tpu.pipeline_mode<synchronous>, transform_indices = @transform_11, window_bounds = array<i64: 1, 128>}, {transform_indices = @transform_12, window_bounds = array<i64: 2, 8, 128>}]} {
    %c0 = arith.constant 0 : index
    %c0_0 = arith.constant 0 : index
    %c0_1 = arith.constant 0 : index
    %0 = vector.load %arg1[%c0, %c0_0, %c0_1] : memref<2x8x128xf32, #tpu.memory_space<vmem>>, vector<2x8x128xf32>
    %1 = vector.shape_cast %0 : vector<2x8x128xf32> to vector<16x128xf32>
    %2 = arith.mulf %1, %1 : vector<16x128xf32>
    %cst = arith.constant dense<0.000000e+00> : vector<16xf32>
    %3 = vector.multi_reduction <add>, %2, %cst [1] : vector<16x128xf32> to vector<16xf32>
    %4 = vector.shape_cast %3 : vector<16xf32> to vector<16x1xf32>
    %cst_2 = arith.constant 1.280000e+02 : f32
    %5 = vector.broadcast %cst_2 : f32 to vector<16x1xf32>
    %6 = arith.divf %4, %5 : vector<16x1xf32>
    %cst_3 = arith.constant 9.99999974E-6 : f32
    %7 = vector.broadcast %cst_3 : f32 to vector<16x1xf32>
    %8 = arith.addf %6, %7 : vector<16x1xf32>
    %9 = math.rsqrt %8 : vector<16x1xf32>
    %10 = vector.broadcast %9 : vector<16x1xf32> to vector<16x128xf32>
    %11 = arith.mulf %1, %10 : vector<16x128xf32>
    %c0_4 = arith.constant 0 : index
    %c0_5 = arith.constant 0 : index
    %12 = vector.load %arg2[%c0_4, %c0_5] : memref<1x128xf32, #tpu.memory_space<vmem>>, vector<1x128xf32>
    %13 = vector.shape_cast %12 : vector<1x128xf32> to vector<128xf32>
    %14 = vector.shape_cast %13 : vector<128xf32> to vector<1x128xf32>
    %15 = vector.broadcast %14 : vector<1x128xf32> to vector<16x128xf32>
    %16 = arith.mulf %11, %15 : vector<16x128xf32>
    %17 = arith.truncf %16 : vector<16x128xf32> to vector<16x128xbf16>
    %c0_6 = arith.constant 0 : index
    %c0_7 = arith.constant 0 : index
    %18 = vector.load %arg3[%c0_6, %c0_7] : memref<128x384xbf16, #tpu.memory_space<vmem>>, vector<128x384xbf16>
    %cst_8 = arith.constant dense<0.000000e+00> : vector<16x384xf32>
    %19 = tpu.matmul %17, %18, %cst_8 {dimension_numbers = #tpu.dot_dimension_numbers<[1], [0], [0], [1], [0, 0, 1, 1], [], []>} : vector<16x128xbf16>, vector<128x384xbf16>, vector<16x384xf32> -> vector<16x384xf32>
    %c0_9 = arith.constant 0 : index
    %c0_10 = arith.constant 0 : index
    %20 = vector.load %arg4[%c0_9, %c0_10] : memref<1x384xf32, #tpu.memory_space<vmem>>, vector<1x384xf32>
    %21 = vector.shape_cast %20 : vector<1x384xf32> to vector<384xf32>
    %22 = vector.shape_cast %21 : vector<384xf32> to vector<1x384xf32>
    %23 = vector.broadcast %22 : vector<1x384xf32> to vector<16x384xf32>
    %24 = arith.addf %19, %23 : vector<16x384xf32>
    %c0_11 = arith.constant 0 : index
    %c0_12 = arith.constant 0 : index
    %25 = vector.load %arg5[%c0_11, %c0_12] : memref<8x8xf32, #tpu.memory_space<vmem>>, vector<8x8xf32>
    %c0_13 = arith.constant 0 : index
    %c0_14 = arith.constant 0 : index
    %26 = vector.load %arg6[%c0_13, %c0_14] : memref<8x8xf32, #tpu.memory_space<vmem>>, vector<8x8xf32>
    %27 = tpu.iota {dimensions = array<i32: 0>} : vector<8x8xi32>
    %28 = tpu.iota {dimensions = array<i32: 1>} : vector<8x8xi32>
    %29 = arith.cmpi sle, %28, %27 : vector<8x8xi32>
    %30 = vector.extract_strided_slice %24 {offsets = [0, 0], sizes = [8, 16], strides = [1, 1]} : vector<16x384xf32> to vector<8x16xf32>
    %31 = vector.extract_strided_slice %24 {offsets = [0, 128], sizes = [8, 16], strides = [1, 1]} : vector<16x384xf32> to vector<8x16xf32>
    %32 = vector.extract_strided_slice %24 {offsets = [0, 256], sizes = [8, 16], strides = [1, 1]} : vector<16x384xf32> to vector<8x16xf32>
    %33 = vector.extract_strided_slice %30 {offsets = [0, 0], sizes = [8, 8], strides = [1, 1]} : vector<8x16xf32> to vector<8x8xf32>
    %34 = vector.extract_strided_slice %30 {offsets = [0, 8], sizes = [8, 8], strides = [1, 1]} : vector<8x16xf32> to vector<8x8xf32>
    %35 = vector.extract_strided_slice %31 {offsets = [0, 0], sizes = [8, 8], strides = [1, 1]} : vector<8x16xf32> to vector<8x8xf32>
    %36 = vector.extract_strided_slice %31 {offsets = [0, 8], sizes = [8, 8], strides = [1, 1]} : vector<8x16xf32> to vector<8x8xf32>
    %37 = arith.mulf %33, %25 : vector<8x8xf32>
    %38 = arith.mulf %34, %26 : vector<8x8xf32>
    %39 = arith.subf %37, %38 : vector<8x8xf32>
    %40 = arith.mulf %34, %25 : vector<8x8xf32>
    %41 = arith.mulf %33, %26 : vector<8x8xf32>
    %42 = arith.addf %40, %41 : vector<8x8xf32>
    %43 = tpu.concatenate %39, %42 in 1 : vector<8x8xf32>, vector<8x8xf32> -> vector<8x16xf32>
    %44 = arith.mulf %35, %25 : vector<8x8xf32>
    %45 = arith.mulf %36, %26 : vector<8x8xf32>
    %46 = arith.subf %44, %45 : vector<8x8xf32>
    %47 = arith.mulf %36, %25 : vector<8x8xf32>
    %48 = arith.mulf %35, %26 : vector<8x8xf32>
    %49 = arith.addf %47, %48 : vector<8x8xf32>
    %50 = tpu.concatenate %46, %49 in 1 : vector<8x8xf32>, vector<8x8xf32> -> vector<8x16xf32>
    %cst_15 = arith.constant 2.500000e-01 : f32
    %51 = vector.broadcast %cst_15 : f32 to vector<8x16xf32>
    %52 = arith.mulf %43, %51 : vector<8x16xf32>
    %53 = arith.truncf %52 : vector<8x16xf32> to vector<8x16xbf16>
    %54 = arith.truncf %50 : vector<8x16xf32> to vector<8x16xbf16>
    %cst_16 = arith.constant dense<0.000000e+00> : vector<8x8xf32>
    %55 = tpu.matmul %53, %54, %cst_16 {dimension_numbers = #tpu.dot_dimension_numbers<[1], [1], [0], [0], [0, 0, 1, 0], [], []>} : vector<8x16xbf16>, vector<8x16xbf16>, vector<8x8xf32> -> vector<8x8xf32>
    %cst_17 = arith.constant -1.000000e+30 : f32
    %56 = vector.broadcast %cst_17 : f32 to vector<8x8xf32>
    %57 = arith.select %29, %55, %56 : vector<8x8xi1>, vector<8x8xf32>
    %cst_18 = arith.constant dense<0xFF800000> : vector<8xf32>
    %58 = vector.multi_reduction <maximumf>, %57, %cst_18 [1] : vector<8x8xf32> to vector<8xf32>
    %59 = vector.shape_cast %58 : vector<8xf32> to vector<8x1xf32>
    %60 = vector.broadcast %59 : vector<8x1xf32> to vector<8x8xf32>
    %61 = arith.subf %57, %60 : vector<8x8xf32>
    %62 = math.exp %61 : vector<8x8xf32>
    %cst_19 = arith.constant dense<0.000000e+00> : vector<8xf32>
    %63 = vector.multi_reduction <add>, %62, %cst_19 [1] : vector<8x8xf32> to vector<8xf32>
    %64 = vector.shape_cast %63 : vector<8xf32> to vector<8x1xf32>
    %65 = tpu.reciprocal %64 {approx = true} : vector<8x1xf32> -> vector<8x1xf32>
    %66 = vector.broadcast %65 : vector<8x1xf32> to vector<8x8xf32>
    %67 = arith.mulf %62, %66 : vector<8x8xf32>
    %68 = arith.truncf %67 : vector<8x8xf32> to vector<8x8xbf16>
    %69 = arith.truncf %32 : vector<8x16xf32> to vector<8x16xbf16>
    %cst_20 = arith.constant dense<0.000000e+00> : vector<8x16xf32>
    %70 = tpu.matmul %68, %69, %cst_20 {dimension_numbers = #tpu.dot_dimension_numbers<[1], [0], [0], [1], [0, 0, 1, 1], [], []>} : vector<8x8xbf16>, vector<8x16xbf16>, vector<8x16xf32> -> vector<8x16xf32>
    %c0_21 = arith.constant 0 : index
    %c0_22 = arith.constant 0 : index
    %71 = vector.load %arg14[%c0_21, %c0_22] : memref<16x128xf32, #tpu.memory_space<vmem>>, vector<8x16xf32>
    tpu.vector_store %arg14[%c0_21, %c0_22], %70 {strides = array<i32>} : memref<16x128xf32, #tpu.memory_space<vmem>>, vector<8x16xf32>,
    %72 = vector.extract_strided_slice %24 {offsets = [0, 16], sizes = [8, 16], strides = [1, 1]} : vector<16x384xf32> to vector<8x16xf32>
    %73 = vector.extract_strided_slice %24 {offsets = [0, 144], sizes = [8, 16], strides = [1, 1]} : vector<16x384xf32> to vector<8x16xf32>
    %74 = vector.extract_strided_slice %24 {offsets = [0, 272], sizes = [8, 16], strides = [1, 1]} : vector<16x384xf32> to vector<8x16xf32>
    %75 = vector.extract_strided_slice %72 {offsets = [0, 0], sizes = [8, 8], strides = [1, 1]} : vector<8x16xf32> to vector<8x8xf32>
    %76 = vector.extract_strided_slice %72 {offsets = [0, 8], sizes = [8, 8], strides = [1, 1]} : vector<8x16xf32> to vector<8x8xf32>
    %77 = vector.extract_strided_slice %73 {offsets = [0, 0], sizes = [8, 8], strides = [1, 1]} : vector<8x16xf32> to vector<8x8xf32>
    %78 = vector.extract_strided_slice %73 {offsets = [0, 8], sizes = [8, 8], strides = [1, 1]} : vector<8x16xf32> to vector<8x8xf32>
    %79 = arith.mulf %75, %25 : vector<8x8xf32>
    %80 = arith.mulf %76, %26 : vector<8x8xf32>
    %81 = arith.subf %79, %80 : vector<8x8xf32>
    %82 = arith.mulf %76, %25 : vector<8x8xf32>
    %83 = arith.mulf %75, %26 : vector<8x8xf32>
    %84 = arith.addf %82, %83 : vector<8x8xf32>
    %85 = tpu.concatenate %81, %84 in 1 : vector<8x8xf32>, vector<8x8xf32> -> vector<8x16xf32>
    %86 = arith.mulf %77, %25 : vector<8x8xf32>
    %87 = arith.mulf %78, %26 : vector<8x8xf32>
    %88 = arith.subf %86, %87 : vector<8x8xf32>
    %89 = arith.mulf %78, %25 : vector<8x8xf32>
    %90 = arith.mulf %77, %26 : vector<8x8xf32>
    %91 = arith.addf %89, %90 : vector<8x8xf32>
    %92 = tpu.concatenate %88, %91 in 1 : vector<8x8xf32>, vector<8x8xf32> -> vector<8x16xf32>
    %cst_23 = arith.constant 2.500000e-01 : f32
    %93 = vector.broadcast %cst_23 : f32 to vector<8x16xf32>
    %94 = arith.mulf %85, %93 : vector<8x16xf32>
    %95 = arith.truncf %94 : vector<8x16xf32> to vector<8x16xbf16>
    %96 = arith.truncf %92 : vector<8x16xf32> to vector<8x16xbf16>
    %cst_24 = arith.constant dense<0.000000e+00> : vector<8x8xf32>
    %97 = tpu.matmul %95, %96, %cst_24 {dimension_numbers = #tpu.dot_dimension_numbers<[1], [1], [0], [0], [0, 0, 1, 0], [], []>} : vector<8x16xbf16>, vector<8x16xbf16>, vector<8x8xf32> -> vector<8x8xf32>
    %cst_25 = arith.constant -1.000000e+30 : f32
    %98 = vector.broadcast %cst_25 : f32 to vector<8x8xf32>
    %99 = arith.select %29, %97, %98 : vector<8x8xi1>, vector<8x8xf32>
    %cst_26 = arith.constant dense<0xFF800000> : vector<8xf32>
    %100 = vector.multi_reduction <maximumf>, %99, %cst_26 [1] : vector<8x8xf32> to vector<8xf32>
    %101 = vector.shape_cast %100 : vector<8xf32> to vector<8x1xf32>
    %102 = vector.broadcast %101 : vector<8x1xf32> to vector<8x8xf32>
    %103 = arith.subf %99, %102 : vector<8x8xf32>
    %104 = math.exp %103 : vector<8x8xf32>
    %cst_27 = arith.constant dense<0.000000e+00> : vector<8xf32>
    %105 = vector.multi_reduction <add>, %104, %cst_27 [1] : vector<8x8xf32> to vector<8xf32>
    %106 = vector.shape_cast %105 : vector<8xf32> to vector<8x1xf32>
    %107 = tpu.reciprocal %106 {approx = true} : vector<8x1xf32> -> vector<8x1xf32>
    %108 = vector.broadcast %107 : vector<8x1xf32> to vector<8x8xf32>
    %109 = arith.mulf %104, %108 : vector<8x8xf32>
    %110 = arith.truncf %109 : vector<8x8xf32> to vector<8x8xbf16>
    %111 = arith.truncf %74 : vector<8x16xf32> to vector<8x16xbf16>
    %cst_28 = arith.constant dense<0.000000e+00> : vector<8x16xf32>
    %112 = tpu.matmul %110, %111, %cst_28 {dimension_numbers = #tpu.dot_dimension_numbers<[1], [0], [0], [1], [0, 0, 1, 1], [], []>} : vector<8x8xbf16>, vector<8x16xbf16>, vector<8x16xf32> -> vector<8x16xf32>
    %c0_29 = arith.constant 0 : index
    %c16 = arith.constant 16 : index
    %113 = vector.load %arg14[%c0_29, %c16] : memref<16x128xf32, #tpu.memory_space<vmem>>, vector<8x16xf32>
    tpu.vector_store %arg14[%c0_29, %c16], %112 {strides = array<i32>} : memref<16x128xf32, #tpu.memory_space<vmem>>, vector<8x16xf32>,
    %114 = vector.extract_strided_slice %24 {offsets = [0, 32], sizes = [8, 16], strides = [1, 1]} : vector<16x384xf32> to vector<8x16xf32>
    %115 = vector.extract_strided_slice %24 {offsets = [0, 160], sizes = [8, 16], strides = [1, 1]} : vector<16x384xf32> to vector<8x16xf32>
    %116 = vector.extract_strided_slice %24 {offsets = [0, 288], sizes = [8, 16], strides = [1, 1]} : vector<16x384xf32> to vector<8x16xf32>
    %117 = vector.extract_strided_slice %114 {offsets = [0, 0], sizes = [8, 8], strides = [1, 1]} : vector<8x16xf32> to vector<8x8xf32>
    %118 = vector.extract_strided_slice %114 {offsets = [0, 8], sizes = [8, 8], strides = [1, 1]} : vector<8x16xf32> to vector<8x8xf32>
    %119 = vector.extract_strided_slice %115 {offsets = [0, 0], sizes = [8, 8], strides = [1, 1]} : vector<8x16xf32> to vector<8x8xf32>
    %120 = vector.extract_strided_slice %115 {offsets = [0, 8], sizes = [8, 8], strides = [1, 1]} : vector<8x16xf32> to vector<8x8xf32>
    %121 = arith.mulf %117, %25 : vector<8x8xf32>
    %122 = arith.mulf %118, %26 : vector<8x8xf32>
    %123 = arith.subf %121, %122 : vector<8x8xf32>
    %124 = arith.mulf %118, %25 : vector<8x8xf32>
    %125 = arith.mulf %117, %26 : vector<8x8xf32>
    %126 = arith.addf %124, %125 : vector<8x8xf32>
    %127 = tpu.concatenate %123, %126 in 1 : vector<8x8xf32>, vector<8x8xf32> -> vector<8x16xf32>
    %128 = arith.mulf %119, %25 : vector<8x8xf32>
    %129 = arith.mulf %120, %26 : vector<8x8xf32>
    %130 = arith.subf %128, %129 : vector<8x8xf32>
    %131 = arith.mulf %120, %25 : vector<8x8xf32>
    %132 = arith.mulf %119, %26 : vector<8x8xf32>
    %133 = arith.addf %131, %132 : vector<8x8xf32>
    %134 = tpu.concatenate %130, %133 in 1 : vector<8x8xf32>, vector<8x8xf32> -> vector<8x16xf32>
    %cst_30 = arith.constant 2.500000e-01 : f32
    %135 = vector.broadcast %cst_30 : f32 to vector<8x16xf32>
    %136 = arith.mulf %127, %135 : vector<8x16xf32>
    %137 = arith.truncf %136 : vector<8x16xf32> to vector<8x16xbf16>
    %138 = arith.truncf %134 : vector<8x16xf32> to vector<8x16xbf16>
    %cst_31 = arith.constant dense<0.000000e+00> : vector<8x8xf32>
    %139 = tpu.matmul %137, %138, %cst_31 {dimension_numbers = #tpu.dot_dimension_numbers<[1], [1], [0], [0], [0, 0, 1, 0], [], []>} : vector<8x16xbf16>, vector<8x16xbf16>, vector<8x8xf32> -> vector<8x8xf32>
    %cst_32 = arith.constant -1.000000e+30 : f32
    %140 = vector.broadcast %cst_32 : f32 to vector<8x8xf32>
    %141 = arith.select %29, %139, %140 : vector<8x8xi1>, vector<8x8xf32>
    %cst_33 = arith.constant dense<0xFF800000> : vector<8xf32>
    %142 = vector.multi_reduction <maximumf>, %141, %cst_33 [1] : vector<8x8xf32> to vector<8xf32>
    %143 = vector.shape_cast %142 : vector<8xf32> to vector<8x1xf32>
    %144 = vector.broadcast %143 : vector<8x1xf32> to vector<8x8xf32>
    %145 = arith.subf %141, %144 : vector<8x8xf32>
    %146 = math.exp %145 : vector<8x8xf32>
    %cst_34 = arith.constant dense<0.000000e+00> : vector<8xf32>
    %147 = vector.multi_reduction <add>, %146, %cst_34 [1] : vector<8x8xf32> to vector<8xf32>
    %148 = vector.shape_cast %147 : vector<8xf32> to vector<8x1xf32>
    %149 = tpu.reciprocal %148 {approx = true} : vector<8x1xf32> -> vector<8x1xf32>
    %150 = vector.broadcast %149 : vector<8x1xf32> to vector<8x8xf32>
    %151 = arith.mulf %146, %150 : vector<8x8xf32>
    %152 = arith.truncf %151 : vector<8x8xf32> to vector<8x8xbf16>
    %153 = arith.truncf %116 : vector<8x16xf32> to vector<8x16xbf16>
    %cst_35 = arith.constant dense<0.000000e+00> : vector<8x16xf32>
    %154 = tpu.matmul %152, %153, %cst_35 {dimension_numbers = #tpu.dot_dimension_numbers<[1], [0], [0], [1], [0, 0, 1, 1], [], []>} : vector<8x8xbf16>, vector<8x16xbf16>, vector<8x16xf32> -> vector<8x16xf32>
    %c0_36 = arith.constant 0 : index
    %c32 = arith.constant 32 : index
    %155 = vector.load %arg14[%c0_36, %c32] : memref<16x128xf32, #tpu.memory_space<vmem>>, vector<8x16xf32>
    tpu.vector_store %arg14[%c0_36, %c32], %154 {strides = array<i32>} : memref<16x128xf32, #tpu.memory_space<vmem>>, vector<8x16xf32>,
    %156 = vector.extract_strided_slice %24 {offsets = [0, 48], sizes = [8, 16], strides = [1, 1]} : vector<16x384xf32> to vector<8x16xf32>
    %157 = vector.extract_strided_slice %24 {offsets = [0, 176], sizes = [8, 16], strides = [1, 1]} : vector<16x384xf32> to vector<8x16xf32>
    %158 = vector.extract_strided_slice %24 {offsets = [0, 304], sizes = [8, 16], strides = [1, 1]} : vector<16x384xf32> to vector<8x16xf32>
    %159 = vector.extract_strided_slice %156 {offsets = [0, 0], sizes = [8, 8], strides = [1, 1]} : vector<8x16xf32> to vector<8x8xf32>
    %160 = vector.extract_strided_slice %156 {offsets = [0, 8], sizes = [8, 8], strides = [1, 1]} : vector<8x16xf32> to vector<8x8xf32>
    %161 = vector.extract_strided_slice %157 {offsets = [0, 0], sizes = [8, 8], strides = [1, 1]} : vector<8x16xf32> to vector<8x8xf32>
    %162 = vector.extract_strided_slice %157 {offsets = [0, 8], sizes = [8, 8], strides = [1, 1]} : vector<8x16xf32> to vector<8x8xf32>
    %163 = arith.mulf %159, %25 : vector<8x8xf32>
    %164 = arith.mulf %160, %26 : vector<8x8xf32>
    %165 = arith.subf %163, %164 : vector<8x8xf32>
    %166 = arith.mulf %160, %25 : vector<8x8xf32>
    %167 = arith.mulf %159, %26 : vector<8x8xf32>
    %168 = arith.addf %166, %167 : vector<8x8xf32>
    %169 = tpu.concatenate %165, %168 in 1 : vector<8x8xf32>, vector<8x8xf32> -> vector<8x16xf32>
    %170 = arith.mulf %161, %25 : vector<8x8xf32>
    %171 = arith.mulf %162, %26 : vector<8x8xf32>
    %172 = arith.subf %170, %171 : vector<8x8xf32>
    %173 = arith.mulf %162, %25 : vector<8x8xf32>
    %174 = arith.mulf %161, %26 : vector<8x8xf32>
    %175 = arith.addf %173, %174 : vector<8x8xf32>
    %176 = tpu.concatenate %172, %175 in 1 : vector<8x8xf32>, vector<8x8xf32> -> vector<8x16xf32>
    %cst_37 = arith.constant 2.500000e-01 : f32
    %177 = vector.broadcast %cst_37 : f32 to vector<8x16xf32>
    %178 = arith.mulf %169, %177 : vector<8x16xf32>
    %179 = arith.truncf %178 : vector<8x16xf32> to vector<8x16xbf16>
    %180 = arith.truncf %176 : vector<8x16xf32> to vector<8x16xbf16>
    %cst_38 = arith.constant dense<0.000000e+00> : vector<8x8xf32>
    %181 = tpu.matmul %179, %180, %cst_38 {dimension_numbers = #tpu.dot_dimension_numbers<[1], [1], [0], [0], [0, 0, 1, 0], [], []>} : vector<8x16xbf16>, vector<8x16xbf16>, vector<8x8xf32> -> vector<8x8xf32>
    %cst_39 = arith.constant -1.000000e+30 : f32
    %182 = vector.broadcast %cst_39 : f32 to vector<8x8xf32>
    %183 = arith.select %29, %181, %182 : vector<8x8xi1>, vector<8x8xf32>
    %cst_40 = arith.constant dense<0xFF800000> : vector<8xf32>
    %184 = vector.multi_reduction <maximumf>, %183, %cst_40 [1] : vector<8x8xf32> to vector<8xf32>
    %185 = vector.shape_cast %184 : vector<8xf32> to vector<8x1xf32>
    %186 = vector.broadcast %185 : vector<8x1xf32> to vector<8x8xf32>
    %187 = arith.subf %183, %186 : vector<8x8xf32>
    %188 = math.exp %187 : vector<8x8xf32>
    %cst_41 = arith.constant dense<0.000000e+00> : vector<8xf32>
    %189 = vector.multi_reduction <add>, %188, %cst_41 [1] : vector<8x8xf32> to vector<8xf32>
    %190 = vector.shape_cast %189 : vector<8xf32> to vector<8x1xf32>
    %191 = tpu.reciprocal %190 {approx = true} : vector<8x1xf32> -> vector<8x1xf32>
    %192 = vector.broadcast %191 : vector<8x1xf32> to vector<8x8xf32>
    %193 = arith.mulf %188, %192 : vector<8x8xf32>
    %194 = arith.truncf %193 : vector<8x8xf32> to vector<8x8xbf16>
    %195 = arith.truncf %158 : vector<8x16xf32> to vector<8x16xbf16>
    %cst_42 = arith.constant dense<0.000000e+00> : vector<8x16xf32>
    %196 = tpu.matmul %194, %195, %cst_42 {dimension_numbers = #tpu.dot_dimension_numbers<[1], [0], [0], [1], [0, 0, 1, 1], [], []>} : vector<8x8xbf16>, vector<8x16xbf16>, vector<8x16xf32> -> vector<8x16xf32>
    %c0_43 = arith.constant 0 : index
    %c48 = arith.constant 48 : index
    %197 = vector.load %arg14[%c0_43, %c48] : memref<16x128xf32, #tpu.memory_space<vmem>>, vector<8x16xf32>
    tpu.vector_store %arg14[%c0_43, %c48], %196 {strides = array<i32>} : memref<16x128xf32, #tpu.memory_space<vmem>>, vector<8x16xf32>,
    %198 = vector.extract_strided_slice %24 {offsets = [0, 64], sizes = [8, 16], strides = [1, 1]} : vector<16x384xf32> to vector<8x16xf32>
    %199 = vector.extract_strided_slice %24 {offsets = [0, 192], sizes = [8, 16], strides = [1, 1]} : vector<16x384xf32> to vector<8x16xf32>
    %200 = vector.extract_strided_slice %24 {offsets = [0, 320], sizes = [8, 16], strides = [1, 1]} : vector<16x384xf32> to vector<8x16xf32>
    %201 = vector.extract_strided_slice %198 {offsets = [0, 0], sizes = [8, 8], strides = [1, 1]} : vector<8x16xf32> to vector<8x8xf32>
    %202 = vector.extract_strided_slice %198 {offsets = [0, 8], sizes = [8, 8], strides = [1, 1]} : vector<8x16xf32> to vector<8x8xf32>
    %203 = vector.extract_strided_slice %199 {offsets = [0, 0], sizes = [8, 8], strides = [1, 1]} : vector<8x16xf32> to vector<8x8xf32>
    %204 = vector.extract_strided_slice %199 {offsets = [0, 8], sizes = [8, 8], strides = [1, 1]} : vector<8x16xf32> to vector<8x8xf32>
    %205 = arith.mulf %201, %25 : vector<8x8xf32>
    %206 = arith.mulf %202, %26 : vector<8x8xf32>
    %207 = arith.subf %205, %206 : vector<8x8xf32>
    %208 = arith.mulf %202, %25 : vector<8x8xf32>
    %209 = arith.mulf %201, %26 : vector<8x8xf32>
    %210 = arith.addf %208, %209 : vector<8x8xf32>
    %211 = tpu.concatenate %207, %210 in 1 : vector<8x8xf32>, vector<8x8xf32> -> vector<8x16xf32>
    %212 = arith.mulf %203, %25 : vector<8x8xf32>
    %213 = arith.mulf %204, %26 : vector<8x8xf32>
    %214 = arith.subf %212, %213 : vector<8x8xf32>
    %215 = arith.mulf %204, %25 : vector<8x8xf32>
    %216 = arith.mulf %203, %26 : vector<8x8xf32>
    %217 = arith.addf %215, %216 : vector<8x8xf32>
    %218 = tpu.concatenate %214, %217 in 1 : vector<8x8xf32>, vector<8x8xf32> -> vector<8x16xf32>
    %cst_44 = arith.constant 2.500000e-01 : f32
    %219 = vector.broadcast %cst_44 : f32 to vector<8x16xf32>
    %220 = arith.mulf %211, %219 : vector<8x16xf32>
    %221 = arith.truncf %220 : vector<8x16xf32> to vector<8x16xbf16>
    %222 = arith.truncf %218 : vector<8x16xf32> to vector<8x16xbf16>
    %cst_45 = arith.constant dense<0.000000e+00> : vector<8x8xf32>
    %223 = tpu.matmul %221, %222, %cst_45 {dimension_numbers = #tpu.dot_dimension_numbers<[1], [1], [0], [0], [0, 0, 1, 0], [], []>} : vector<8x16xbf16>, vector<8x16xbf16>, vector<8x8xf32> -> vector<8x8xf32>
    %cst_46 = arith.constant -1.000000e+30 : f32
    %224 = vector.broadcast %cst_46 : f32 to vector<8x8xf32>
    %225 = arith.select %29, %223, %224 : vector<8x8xi1>, vector<8x8xf32>
    %cst_47 = arith.constant dense<0xFF800000> : vector<8xf32>
    %226 = vector.multi_reduction <maximumf>, %225, %cst_47 [1] : vector<8x8xf32> to vector<8xf32>
    %227 = vector.shape_cast %226 : vector<8xf32> to vector<8x1xf32>
    %228 = vector.broadcast %227 : vector<8x1xf32> to vector<8x8xf32>
    %229 = arith.subf %225, %228 : vector<8x8xf32>
    %230 = math.exp %229 : vector<8x8xf32>
    %cst_48 = arith.constant dense<0.000000e+00> : vector<8xf32>
    %231 = vector.multi_reduction <add>, %230, %cst_48 [1] : vector<8x8xf32> to vector<8xf32>
    %232 = vector.shape_cast %231 : vector<8xf32> to vector<8x1xf32>
    %233 = tpu.reciprocal %232 {approx = true} : vector<8x1xf32> -> vector<8x1xf32>
    %234 = vector.broadcast %233 : vector<8x1xf32> to vector<8x8xf32>
    %235 = arith.mulf %230, %234 : vector<8x8xf32>
    %236 = arith.truncf %235 : vector<8x8xf32> to vector<8x8xbf16>
    %237 = arith.truncf %200 : vector<8x16xf32> to vector<8x16xbf16>
    %cst_49 = arith.constant dense<0.000000e+00> : vector<8x16xf32>
    %238 = tpu.matmul %236, %237, %cst_49 {dimension_numbers = #tpu.dot_dimension_numbers<[1], [0], [0], [1], [0, 0, 1, 1], [], []>} : vector<8x8xbf16>, vector<8x16xbf16>, vector<8x16xf32> -> vector<8x16xf32>
    %c0_50 = arith.constant 0 : index
    %c64 = arith.constant 64 : index
    %239 = vector.load %arg14[%c0_50, %c64] : memref<16x128xf32, #tpu.memory_space<vmem>>, vector<8x16xf32>
    tpu.vector_store %arg14[%c0_50, %c64], %238 {strides = array<i32>} : memref<16x128xf32, #tpu.memory_space<vmem>>, vector<8x16xf32>,
    %240 = vector.extract_strided_slice %24 {offsets = [0, 80], sizes = [8, 16], strides = [1, 1]} : vector<16x384xf32> to vector<8x16xf32>
    %241 = vector.extract_strided_slice %24 {offsets = [0, 208], sizes = [8, 16], strides = [1, 1]} : vector<16x384xf32> to vector<8x16xf32>
    %242 = vector.extract_strided_slice %24 {offsets = [0, 336], sizes = [8, 16], strides = [1, 1]} : vector<16x384xf32> to vector<8x16xf32>
    %243 = vector.extract_strided_slice %240 {offsets = [0, 0], sizes = [8, 8], strides = [1, 1]} : vector<8x16xf32> to vector<8x8xf32>
    %244 = vector.extract_strided_slice %240 {offsets = [0, 8], sizes = [8, 8], strides = [1, 1]} : vector<8x16xf32> to vector<8x8xf32>
    %245 = vector.extract_strided_slice %241 {offsets = [0, 0], sizes = [8, 8], strides = [1, 1]} : vector<8x16xf32> to vector<8x8xf32>
    %246 = vector.extract_strided_slice %241 {offsets = [0, 8], sizes = [8, 8], strides = [1, 1]} : vector<8x16xf32> to vector<8x8xf32>
    %247 = arith.mulf %243, %25 : vector<8x8xf32>
    %248 = arith.mulf %244, %26 : vector<8x8xf32>
    %249 = arith.subf %247, %248 : vector<8x8xf32>
    %250 = arith.mulf %244, %25 : vector<8x8xf32>
    %251 = arith.mulf %243, %26 : vector<8x8xf32>
    %252 = arith.addf %250, %251 : vector<8x8xf32>
    %253 = tpu.concatenate %249, %252 in 1 : vector<8x8xf32>, vector<8x8xf32> -> vector<8x16xf32>
    %254 = arith.mulf %245, %25 : vector<8x8xf32>
    %255 = arith.mulf %246, %26 : vector<8x8xf32>
    %256 = arith.subf %254, %255 : vector<8x8xf32>
    %257 = arith.mulf %246, %25 : vector<8x8xf32>
    %258 = arith.mulf %245, %26 : vector<8x8xf32>
    %259 = arith.addf %257, %258 : vector<8x8xf32>
    %260 = tpu.concatenate %256, %259 in 1 : vector<8x8xf32>, vector<8x8xf32> -> vector<8x16xf32>
    %cst_51 = arith.constant 2.500000e-01 : f32
    %261 = vector.broadcast %cst_51 : f32 to vector<8x16xf32>
    %262 = arith.mulf %253, %261 : vector<8x16xf32>
    %263 = arith.truncf %262 : vector<8x16xf32> to vector<8x16xbf16>
    %264 = arith.truncf %260 : vector<8x16xf32> to vector<8x16xbf16>
    %cst_52 = arith.constant dense<0.000000e+00> : vector<8x8xf32>
    %265 = tpu.matmul %263, %264, %cst_52 {dimension_numbers = #tpu.dot_dimension_numbers<[1], [1], [0], [0], [0, 0, 1, 0], [], []>} : vector<8x16xbf16>, vector<8x16xbf16>, vector<8x8xf32> -> vector<8x8xf32>
    %cst_53 = arith.constant -1.000000e+30 : f32
    %266 = vector.broadcast %cst_53 : f32 to vector<8x8xf32>
    %267 = arith.select %29, %265, %266 : vector<8x8xi1>, vector<8x8xf32>
    %cst_54 = arith.constant dense<0xFF800000> : vector<8xf32>
    %268 = vector.multi_reduction <maximumf>, %267, %cst_54 [1] : vector<8x8xf32> to vector<8xf32>
    %269 = vector.shape_cast %268 : vector<8xf32> to vector<8x1xf32>
    %270 = vector.broadcast %269 : vector<8x1xf32> to vector<8x8xf32>
    %271 = arith.subf %267, %270 : vector<8x8xf32>
    %272 = math.exp %271 : vector<8x8xf32>
    %cst_55 = arith.constant dense<0.000000e+00> : vector<8xf32>
    %273 = vector.multi_reduction <add>, %272, %cst_55 [1] : vector<8x8xf32> to vector<8xf32>
    %274 = vector.shape_cast %273 : vector<8xf32> to vector<8x1xf32>
    %275 = tpu.reciprocal %274 {approx = true} : vector<8x1xf32> -> vector<8x1xf32>
    %276 = vector.broadcast %275 : vector<8x1xf32> to vector<8x8xf32>
    %277 = arith.mulf %272, %276 : vector<8x8xf32>
    %278 = arith.truncf %277 : vector<8x8xf32> to vector<8x8xbf16>
    %279 = arith.truncf %242 : vector<8x16xf32> to vector<8x16xbf16>
    %cst_56 = arith.constant dense<0.000000e+00> : vector<8x16xf32>
    %280 = tpu.matmul %278, %279, %cst_56 {dimension_numbers = #tpu.dot_dimension_numbers<[1], [0], [0], [1], [0, 0, 1, 1], [], []>} : vector<8x8xbf16>, vector<8x16xbf16>, vector<8x16xf32> -> vector<8x16xf32>
    %c0_57 = arith.constant 0 : index
    %c80 = arith.constant 80 : index
    %281 = vector.load %arg14[%c0_57, %c80] : memref<16x128xf32, #tpu.memory_space<vmem>>, vector<8x16xf32>
    tpu.vector_store %arg14[%c0_57, %c80], %280 {strides = array<i32>} : memref<16x128xf32, #tpu.memory_space<vmem>>, vector<8x16xf32>,
    %282 = vector.extract_strided_slice %24 {offsets = [0, 96], sizes = [8, 16], strides = [1, 1]} : vector<16x384xf32> to vector<8x16xf32>
    %283 = vector.extract_strided_slice %24 {offsets = [0, 224], sizes = [8, 16], strides = [1, 1]} : vector<16x384xf32> to vector<8x16xf32>
    %284 = vector.extract_strided_slice %24 {offsets = [0, 352], sizes = [8, 16], strides = [1, 1]} : vector<16x384xf32> to vector<8x16xf32>
    %285 = vector.extract_strided_slice %282 {offsets = [0, 0], sizes = [8, 8], strides = [1, 1]} : vector<8x16xf32> to vector<8x8xf32>
    %286 = vector.extract_strided_slice %282 {offsets = [0, 8], sizes = [8, 8], strides = [1, 1]} : vector<8x16xf32> to vector<8x8xf32>
    %287 = vector.extract_strided_slice %283 {offsets = [0, 0], sizes = [8, 8], strides = [1, 1]} : vector<8x16xf32> to vector<8x8xf32>
    %288 = vector.extract_strided_slice %283 {offsets = [0, 8], sizes = [8, 8], strides = [1, 1]} : vector<8x16xf32> to vector<8x8xf32>
    %289 = arith.mulf %285, %25 : vector<8x8xf32>
    %290 = arith.mulf %286, %26 : vector<8x8xf32>
    %291 = arith.subf %289, %290 : vector<8x8xf32>
    %292 = arith.mulf %286, %25 : vector<8x8xf32>
    %293 = arith.mulf %285, %26 : vector<8x8xf32>
    %294 = arith.addf %292, %293 : vector<8x8xf32>
    %295 = tpu.concatenate %291, %294 in 1 : vector<8x8xf32>, vector<8x8xf32> -> vector<8x16xf32>
    %296 = arith.mulf %287, %25 : vector<8x8xf32>
    %297 = arith.mulf %288, %26 : vector<8x8xf32>
    %298 = arith.subf %296, %297 : vector<8x8xf32>
    %299 = arith.mulf %288, %25 : vector<8x8xf32>
    %300 = arith.mulf %287, %26 : vector<8x8xf32>
    %301 = arith.addf %299, %300 : vector<8x8xf32>
    %302 = tpu.concatenate %298, %301 in 1 : vector<8x8xf32>, vector<8x8xf32> -> vector<8x16xf32>
    %cst_58 = arith.constant 2.500000e-01 : f32
    %303 = vector.broadcast %cst_58 : f32 to vector<8x16xf32>
    %304 = arith.mulf %295, %303 : vector<8x16xf32>
    %305 = arith.truncf %304 : vector<8x16xf32> to vector<8x16xbf16>
    %306 = arith.truncf %302 : vector<8x16xf32> to vector<8x16xbf16>
    %cst_59 = arith.constant dense<0.000000e+00> : vector<8x8xf32>
    %307 = tpu.matmul %305, %306, %cst_59 {dimension_numbers = #tpu.dot_dimension_numbers<[1], [1], [0], [0], [0, 0, 1, 0], [], []>} : vector<8x16xbf16>, vector<8x16xbf16>, vector<8x8xf32> -> vector<8x8xf32>
    %cst_60 = arith.constant -1.000000e+30 : f32
    %308 = vector.broadcast %cst_60 : f32 to vector<8x8xf32>
    %309 = arith.select %29, %307, %308 : vector<8x8xi1>, vector<8x8xf32>
    %cst_61 = arith.constant dense<0xFF800000> : vector<8xf32>
    %310 = vector.multi_reduction <maximumf>, %309, %cst_61 [1] : vector<8x8xf32> to vector<8xf32>
    %311 = vector.shape_cast %310 : vector<8xf32> to vector<8x1xf32>
    %312 = vector.broadcast %311 : vector<8x1xf32> to vector<8x8xf32>
    %313 = arith.subf %309, %312 : vector<8x8xf32>
    %314 = math.exp %313 : vector<8x8xf32>
    %cst_62 = arith.constant dense<0.000000e+00> : vector<8xf32>
    %315 = vector.multi_reduction <add>, %314, %cst_62 [1] : vector<8x8xf32> to vector<8xf32>
    %316 = vector.shape_cast %315 : vector<8xf32> to vector<8x1xf32>
    %317 = tpu.reciprocal %316 {approx = true} : vector<8x1xf32> -> vector<8x1xf32>
    %318 = vector.broadcast %317 : vector<8x1xf32> to vector<8x8xf32>
    %319 = arith.mulf %314, %318 : vector<8x8xf32>
    %320 = arith.truncf %319 : vector<8x8xf32> to vector<8x8xbf16>
    %321 = arith.truncf %284 : vector<8x16xf32> to vector<8x16xbf16>
    %cst_63 = arith.constant dense<0.000000e+00> : vector<8x16xf32>
    %322 = tpu.matmul %320, %321, %cst_63 {dimension_numbers = #tpu.dot_dimension_numbers<[1], [0], [0], [1], [0, 0, 1, 1], [], []>} : vector<8x8xbf16>, vector<8x16xbf16>, vector<8x16xf32> -> vector<8x16xf32>
    %c0_64 = arith.constant 0 : index
    %c96 = arith.constant 96 : index
    %323 = vector.load %arg14[%c0_64, %c96] : memref<16x128xf32, #tpu.memory_space<vmem>>, vector<8x16xf32>
    tpu.vector_store %arg14[%c0_64, %c96], %322 {strides = array<i32>} : memref<16x128xf32, #tpu.memory_space<vmem>>, vector<8x16xf32>,
    %324 = vector.extract_strided_slice %24 {offsets = [0, 112], sizes = [8, 16], strides = [1, 1]} : vector<16x384xf32> to vector<8x16xf32>
    %325 = vector.extract_strided_slice %24 {offsets = [0, 240], sizes = [8, 16], strides = [1, 1]} : vector<16x384xf32> to vector<8x16xf32>
    %326 = vector.extract_strided_slice %24 {offsets = [0, 368], sizes = [8, 16], strides = [1, 1]} : vector<16x384xf32> to vector<8x16xf32>
    %327 = vector.extract_strided_slice %324 {offsets = [0, 0], sizes = [8, 8], strides = [1, 1]} : vector<8x16xf32> to vector<8x8xf32>
    %328 = vector.extract_strided_slice %324 {offsets = [0, 8], sizes = [8, 8], strides = [1, 1]} : vector<8x16xf32> to vector<8x8xf32>
    %329 = vector.extract_strided_slice %325 {offsets = [0, 0], sizes = [8, 8], strides = [1, 1]} : vector<8x16xf32> to vector<8x8xf32>
    %330 = vector.extract_strided_slice %325 {offsets = [0, 8], sizes = [8, 8], strides = [1, 1]} : vector<8x16xf32> to vector<8x8xf32>
    %331 = arith.mulf %327, %25 : vector<8x8xf32>
    %332 = arith.mulf %328, %26 : vector<8x8xf32>
    %333 = arith.subf %331, %332 : vector<8x8xf32>
    %334 = arith.mulf %328, %25 : vector<8x8xf32>
    %335 = arith.mulf %327, %26 : vector<8x8xf32>
    %336 = arith.addf %334, %335 : vector<8x8xf32>
    %337 = tpu.concatenate %333, %336 in 1 : vector<8x8xf32>, vector<8x8xf32> -> vector<8x16xf32>
    %338 = arith.mulf %329, %25 : vector<8x8xf32>
    %339 = arith.mulf %330, %26 : vector<8x8xf32>
    %340 = arith.subf %338, %339 : vector<8x8xf32>
    %341 = arith.mulf %330, %25 : vector<8x8xf32>
    %342 = arith.mulf %329, %26 : vector<8x8xf32>
    %343 = arith.addf %341, %342 : vector<8x8xf32>
    %344 = tpu.concatenate %340, %343 in 1 : vector<8x8xf32>, vector<8x8xf32> -> vector<8x16xf32>
    %cst_65 = arith.constant 2.500000e-01 : f32
    %345 = vector.broadcast %cst_65 : f32 to vector<8x16xf32>
    %346 = arith.mulf %337, %345 : vector<8x16xf32>
    %347 = arith.truncf %346 : vector<8x16xf32> to vector<8x16xbf16>
    %348 = arith.truncf %344 : vector<8x16xf32> to vector<8x16xbf16>
    %cst_66 = arith.constant dense<0.000000e+00> : vector<8x8xf32>
    %349 = tpu.matmul %347, %348, %cst_66 {dimension_numbers = #tpu.dot_dimension_numbers<[1], [1], [0], [0], [0, 0, 1, 0], [], []>} : vector<8x16xbf16>, vector<8x16xbf16>, vector<8x8xf32> -> vector<8x8xf32>
    %cst_67 = arith.constant -1.000000e+30 : f32
    %350 = vector.broadcast %cst_67 : f32 to vector<8x8xf32>
    %351 = arith.select %29, %349, %350 : vector<8x8xi1>, vector<8x8xf32>
    %cst_68 = arith.constant dense<0xFF800000> : vector<8xf32>
    %352 = vector.multi_reduction <maximumf>, %351, %cst_68 [1] : vector<8x8xf32> to vector<8xf32>
    %353 = vector.shape_cast %352 : vector<8xf32> to vector<8x1xf32>
    %354 = vector.broadcast %353 : vector<8x1xf32> to vector<8x8xf32>
    %355 = arith.subf %351, %354 : vector<8x8xf32>
    %356 = math.exp %355 : vector<8x8xf32>
    %cst_69 = arith.constant dense<0.000000e+00> : vector<8xf32>
    %357 = vector.multi_reduction <add>, %356, %cst_69 [1] : vector<8x8xf32> to vector<8xf32>
    %358 = vector.shape_cast %357 : vector<8xf32> to vector<8x1xf32>
    %359 = tpu.reciprocal %358 {approx = true} : vector<8x1xf32> -> vector<8x1xf32>
    %360 = vector.broadcast %359 : vector<8x1xf32> to vector<8x8xf32>
    %361 = arith.mulf %356, %360 : vector<8x8xf32>
    %362 = arith.truncf %361 : vector<8x8xf32> to vector<8x8xbf16>
    %363 = arith.truncf %326 : vector<8x16xf32> to vector<8x16xbf16>
    %cst_70 = arith.constant dense<0.000000e+00> : vector<8x16xf32>
    %364 = tpu.matmul %362, %363, %cst_70 {dimension_numbers = #tpu.dot_dimension_numbers<[1], [0], [0], [1], [0, 0, 1, 1], [], []>} : vector<8x8xbf16>, vector<8x16xbf16>, vector<8x16xf32> -> vector<8x16xf32>
    %c0_71 = arith.constant 0 : index
    %c112 = arith.constant 112 : index
    %365 = vector.load %arg14[%c0_71, %c112] : memref<16x128xf32, #tpu.memory_space<vmem>>, vector<8x16xf32>
    tpu.vector_store %arg14[%c0_71, %c112], %364 {strides = array<i32>} : memref<16x128xf32, #tpu.memory_space<vmem>>, vector<8x16xf32>,
    %366 = vector.extract_strided_slice %24 {offsets = [8, 0], sizes = [8, 16], strides = [1, 1]} : vector<16x384xf32> to vector<8x16xf32>
    %367 = vector.extract_strided_slice %24 {offsets = [8, 128], sizes = [8, 16], strides = [1, 1]} : vector<16x384xf32> to vector<8x16xf32>
    %368 = vector.extract_strided_slice %24 {offsets = [8, 256], sizes = [8, 16], strides = [1, 1]} : vector<16x384xf32> to vector<8x16xf32>
    %369 = vector.extract_strided_slice %366 {offsets = [0, 0], sizes = [8, 8], strides = [1, 1]} : vector<8x16xf32> to vector<8x8xf32>
    %370 = vector.extract_strided_slice %366 {offsets = [0, 8], sizes = [8, 8], strides = [1, 1]} : vector<8x16xf32> to vector<8x8xf32>
    %371 = vector.extract_strided_slice %367 {offsets = [0, 0], sizes = [8, 8], strides = [1, 1]} : vector<8x16xf32> to vector<8x8xf32>
    %372 = vector.extract_strided_slice %367 {offsets = [0, 8], sizes = [8, 8], strides = [1, 1]} : vector<8x16xf32> to vector<8x8xf32>
    %373 = arith.mulf %369, %25 : vector<8x8xf32>
    %374 = arith.mulf %370, %26 : vector<8x8xf32>
    %375 = arith.subf %373, %374 : vector<8x8xf32>
    %376 = arith.mulf %370, %25 : vector<8x8xf32>
    %377 = arith.mulf %369, %26 : vector<8x8xf32>
    %378 = arith.addf %376, %377 : vector<8x8xf32>
    %379 = tpu.concatenate %375, %378 in 1 : vector<8x8xf32>, vector<8x8xf32> -> vector<8x16xf32>
    %380 = arith.mulf %371, %25 : vector<8x8xf32>
    %381 = arith.mulf %372, %26 : vector<8x8xf32>
    %382 = arith.subf %380, %381 : vector<8x8xf32>
    %383 = arith.mulf %372, %25 : vector<8x8xf32>
    %384 = arith.mulf %371, %26 : vector<8x8xf32>
    %385 = arith.addf %383, %384 : vector<8x8xf32>
    %386 = tpu.concatenate %382, %385 in 1 : vector<8x8xf32>, vector<8x8xf32> -> vector<8x16xf32>
    %cst_72 = arith.constant 2.500000e-01 : f32
    %387 = vector.broadcast %cst_72 : f32 to vector<8x16xf32>
    %388 = arith.mulf %379, %387 : vector<8x16xf32>
    %389 = arith.truncf %388 : vector<8x16xf32> to vector<8x16xbf16>
    %390 = arith.truncf %386 : vector<8x16xf32> to vector<8x16xbf16>
    %cst_73 = arith.constant dense<0.000000e+00> : vector<8x8xf32>
    %391 = tpu.matmul %389, %390, %cst_73 {dimension_numbers = #tpu.dot_dimension_numbers<[1], [1], [0], [0], [0, 0, 1, 0], [], []>} : vector<8x16xbf16>, vector<8x16xbf16>, vector<8x8xf32> -> vector<8x8xf32>
    %cst_74 = arith.constant -1.000000e+30 : f32
    %392 = vector.broadcast %cst_74 : f32 to vector<8x8xf32>
    %393 = arith.select %29, %391, %392 : vector<8x8xi1>, vector<8x8xf32>
    %cst_75 = arith.constant dense<0xFF800000> : vector<8xf32>
    %394 = vector.multi_reduction <maximumf>, %393, %cst_75 [1] : vector<8x8xf32> to vector<8xf32>
    %395 = vector.shape_cast %394 : vector<8xf32> to vector<8x1xf32>
    %396 = vector.broadcast %395 : vector<8x1xf32> to vector<8x8xf32>
    %397 = arith.subf %393, %396 : vector<8x8xf32>
    %398 = math.exp %397 : vector<8x8xf32>
    %cst_76 = arith.constant dense<0.000000e+00> : vector<8xf32>
    %399 = vector.multi_reduction <add>, %398, %cst_76 [1] : vector<8x8xf32> to vector<8xf32>
    %400 = vector.shape_cast %399 : vector<8xf32> to vector<8x1xf32>
    %401 = tpu.reciprocal %400 {approx = true} : vector<8x1xf32> -> vector<8x1xf32>
    %402 = vector.broadcast %401 : vector<8x1xf32> to vector<8x8xf32>
    %403 = arith.mulf %398, %402 : vector<8x8xf32>
    %404 = arith.truncf %403 : vector<8x8xf32> to vector<8x8xbf16>
    %405 = arith.truncf %368 : vector<8x16xf32> to vector<8x16xbf16>
    %cst_77 = arith.constant dense<0.000000e+00> : vector<8x16xf32>
    %406 = tpu.matmul %404, %405, %cst_77 {dimension_numbers = #tpu.dot_dimension_numbers<[1], [0], [0], [1], [0, 0, 1, 1], [], []>} : vector<8x8xbf16>, vector<8x16xbf16>, vector<8x16xf32> -> vector<8x16xf32>
    %c8 = arith.constant 8 : index
    %c0_78 = arith.constant 0 : index
    %407 = vector.load %arg14[%c8, %c0_78] : memref<16x128xf32, #tpu.memory_space<vmem>>, vector<8x16xf32>
    tpu.vector_store %arg14[%c8, %c0_78], %406 {strides = array<i32>} : memref<16x128xf32, #tpu.memory_space<vmem>>, vector<8x16xf32>,
    %408 = vector.extract_strided_slice %24 {offsets = [8, 16], sizes = [8, 16], strides = [1, 1]} : vector<16x384xf32> to vector<8x16xf32>
    %409 = vector.extract_strided_slice %24 {offsets = [8, 144], sizes = [8, 16], strides = [1, 1]} : vector<16x384xf32> to vector<8x16xf32>
    %410 = vector.extract_strided_slice %24 {offsets = [8, 272], sizes = [8, 16], strides = [1, 1]} : vector<16x384xf32> to vector<8x16xf32>
    %411 = vector.extract_strided_slice %408 {offsets = [0, 0], sizes = [8, 8], strides = [1, 1]} : vector<8x16xf32> to vector<8x8xf32>
    %412 = vector.extract_strided_slice %408 {offsets = [0, 8], sizes = [8, 8], strides = [1, 1]} : vector<8x16xf32> to vector<8x8xf32>
    %413 = vector.extract_strided_slice %409 {offsets = [0, 0], sizes = [8, 8], strides = [1, 1]} : vector<8x16xf32> to vector<8x8xf32>
    %414 = vector.extract_strided_slice %409 {offsets = [0, 8], sizes = [8, 8], strides = [1, 1]} : vector<8x16xf32> to vector<8x8xf32>
    %415 = arith.mulf %411, %25 : vector<8x8xf32>
    %416 = arith.mulf %412, %26 : vector<8x8xf32>
    %417 = arith.subf %415, %416 : vector<8x8xf32>
    %418 = arith.mulf %412, %25 : vector<8x8xf32>
    %419 = arith.mulf %411, %26 : vector<8x8xf32>
    %420 = arith.addf %418, %419 : vector<8x8xf32>
    %421 = tpu.concatenate %417, %420 in 1 : vector<8x8xf32>, vector<8x8xf32> -> vector<8x16xf32>
    %422 = arith.mulf %413, %25 : vector<8x8xf32>
    %423 = arith.mulf %414, %26 : vector<8x8xf32>
    %424 = arith.subf %422, %423 : vector<8x8xf32>
    %425 = arith.mulf %414, %25 : vector<8x8xf32>
    %426 = arith.mulf %413, %26 : vector<8x8xf32>
    %427 = arith.addf %425, %426 : vector<8x8xf32>
    %428 = tpu.concatenate %424, %427 in 1 : vector<8x8xf32>, vector<8x8xf32> -> vector<8x16xf32>
    %cst_79 = arith.constant 2.500000e-01 : f32
    %429 = vector.broadcast %cst_79 : f32 to vector<8x16xf32>
    %430 = arith.mulf %421, %429 : vector<8x16xf32>
    %431 = arith.truncf %430 : vector<8x16xf32> to vector<8x16xbf16>
    %432 = arith.truncf %428 : vector<8x16xf32> to vector<8x16xbf16>
    %cst_80 = arith.constant dense<0.000000e+00> : vector<8x8xf32>
    %433 = tpu.matmul %431, %432, %cst_80 {dimension_numbers = #tpu.dot_dimension_numbers<[1], [1], [0], [0], [0, 0, 1, 0], [], []>} : vector<8x16xbf16>, vector<8x16xbf16>, vector<8x8xf32> -> vector<8x8xf32>
    %cst_81 = arith.constant -1.000000e+30 : f32
    %434 = vector.broadcast %cst_81 : f32 to vector<8x8xf32>
    %435 = arith.select %29, %433, %434 : vector<8x8xi1>, vector<8x8xf32>
    %cst_82 = arith.constant dense<0xFF800000> : vector<8xf32>
    %436 = vector.multi_reduction <maximumf>, %435, %cst_82 [1] : vector<8x8xf32> to vector<8xf32>
    %437 = vector.shape_cast %436 : vector<8xf32> to vector<8x1xf32>
    %438 = vector.broadcast %437 : vector<8x1xf32> to vector<8x8xf32>
    %439 = arith.subf %435, %438 : vector<8x8xf32>
    %440 = math.exp %439 : vector<8x8xf32>
    %cst_83 = arith.constant dense<0.000000e+00> : vector<8xf32>
    %441 = vector.multi_reduction <add>, %440, %cst_83 [1] : vector<8x8xf32> to vector<8xf32>
    %442 = vector.shape_cast %441 : vector<8xf32> to vector<8x1xf32>
    %443 = tpu.reciprocal %442 {approx = true} : vector<8x1xf32> -> vector<8x1xf32>
    %444 = vector.broadcast %443 : vector<8x1xf32> to vector<8x8xf32>
    %445 = arith.mulf %440, %444 : vector<8x8xf32>
    %446 = arith.truncf %445 : vector<8x8xf32> to vector<8x8xbf16>
    %447 = arith.truncf %410 : vector<8x16xf32> to vector<8x16xbf16>
    %cst_84 = arith.constant dense<0.000000e+00> : vector<8x16xf32>
    %448 = tpu.matmul %446, %447, %cst_84 {dimension_numbers = #tpu.dot_dimension_numbers<[1], [0], [0], [1], [0, 0, 1, 1], [], []>} : vector<8x8xbf16>, vector<8x16xbf16>, vector<8x16xf32> -> vector<8x16xf32>
    %c8_85 = arith.constant 8 : index
    %c16_86 = arith.constant 16 : index
    %449 = vector.load %arg14[%c8_85, %c16_86] : memref<16x128xf32, #tpu.memory_space<vmem>>, vector<8x16xf32>
    tpu.vector_store %arg14[%c8_85, %c16_86], %448 {strides = array<i32>} : memref<16x128xf32, #tpu.memory_space<vmem>>, vector<8x16xf32>,
    %450 = vector.extract_strided_slice %24 {offsets = [8, 32], sizes = [8, 16], strides = [1, 1]} : vector<16x384xf32> to vector<8x16xf32>
    %451 = vector.extract_strided_slice %24 {offsets = [8, 160], sizes = [8, 16], strides = [1, 1]} : vector<16x384xf32> to vector<8x16xf32>
    %452 = vector.extract_strided_slice %24 {offsets = [8, 288], sizes = [8, 16], strides = [1, 1]} : vector<16x384xf32> to vector<8x16xf32>
    %453 = vector.extract_strided_slice %450 {offsets = [0, 0], sizes = [8, 8], strides = [1, 1]} : vector<8x16xf32> to vector<8x8xf32>
    %454 = vector.extract_strided_slice %450 {offsets = [0, 8], sizes = [8, 8], strides = [1, 1]} : vector<8x16xf32> to vector<8x8xf32>
    %455 = vector.extract_strided_slice %451 {offsets = [0, 0], sizes = [8, 8], strides = [1, 1]} : vector<8x16xf32> to vector<8x8xf32>
    %456 = vector.extract_strided_slice %451 {offsets = [0, 8], sizes = [8, 8], strides = [1, 1]} : vector<8x16xf32> to vector<8x8xf32>
    %457 = arith.mulf %453, %25 : vector<8x8xf32>
    %458 = arith.mulf %454, %26 : vector<8x8xf32>
    %459 = arith.subf %457, %458 : vector<8x8xf32>
    %460 = arith.mulf %454, %25 : vector<8x8xf32>
    %461 = arith.mulf %453, %26 : vector<8x8xf32>
    %462 = arith.addf %460, %461 : vector<8x8xf32>
    %463 = tpu.concatenate %459, %462 in 1 : vector<8x8xf32>, vector<8x8xf32> -> vector<8x16xf32>
    %464 = arith.mulf %455, %25 : vector<8x8xf32>
    %465 = arith.mulf %456, %26 : vector<8x8xf32>
    %466 = arith.subf %464, %465 : vector<8x8xf32>
    %467 = arith.mulf %456, %25 : vector<8x8xf32>
    %468 = arith.mulf %455, %26 : vector<8x8xf32>
    %469 = arith.addf %467, %468 : vector<8x8xf32>
    %470 = tpu.concatenate %466, %469 in 1 : vector<8x8xf32>, vector<8x8xf32> -> vector<8x16xf32>
    %cst_87 = arith.constant 2.500000e-01 : f32
    %471 = vector.broadcast %cst_87 : f32 to vector<8x16xf32>
    %472 = arith.mulf %463, %471 : vector<8x16xf32>
    %473 = arith.truncf %472 : vector<8x16xf32> to vector<8x16xbf16>
    %474 = arith.truncf %470 : vector<8x16xf32> to vector<8x16xbf16>
    %cst_88 = arith.constant dense<0.000000e+00> : vector<8x8xf32>
    %475 = tpu.matmul %473, %474, %cst_88 {dimension_numbers = #tpu.dot_dimension_numbers<[1], [1], [0], [0], [0, 0, 1, 0], [], []>} : vector<8x16xbf16>, vector<8x16xbf16>, vector<8x8xf32> -> vector<8x8xf32>
    %cst_89 = arith.constant -1.000000e+30 : f32
    %476 = vector.broadcast %cst_89 : f32 to vector<8x8xf32>
    %477 = arith.select %29, %475, %476 : vector<8x8xi1>, vector<8x8xf32>
    %cst_90 = arith.constant dense<0xFF800000> : vector<8xf32>
    %478 = vector.multi_reduction <maximumf>, %477, %cst_90 [1] : vector<8x8xf32> to vector<8xf32>
    %479 = vector.shape_cast %478 : vector<8xf32> to vector<8x1xf32>
    %480 = vector.broadcast %479 : vector<8x1xf32> to vector<8x8xf32>
    %481 = arith.subf %477, %480 : vector<8x8xf32>
    %482 = math.exp %481 : vector<8x8xf32>
    %cst_91 = arith.constant dense<0.000000e+00> : vector<8xf32>
    %483 = vector.multi_reduction <add>, %482, %cst_91 [1] : vector<8x8xf32> to vector<8xf32>
    %484 = vector.shape_cast %483 : vector<8xf32> to vector<8x1xf32>
    %485 = tpu.reciprocal %484 {approx = true} : vector<8x1xf32> -> vector<8x1xf32>
    %486 = vector.broadcast %485 : vector<8x1xf32> to vector<8x8xf32>
    %487 = arith.mulf %482, %486 : vector<8x8xf32>
    %488 = arith.truncf %487 : vector<8x8xf32> to vector<8x8xbf16>
    %489 = arith.truncf %452 : vector<8x16xf32> to vector<8x16xbf16>
    %cst_92 = arith.constant dense<0.000000e+00> : vector<8x16xf32>
    %490 = tpu.matmul %488, %489, %cst_92 {dimension_numbers = #tpu.dot_dimension_numbers<[1], [0], [0], [1], [0, 0, 1, 1], [], []>} : vector<8x8xbf16>, vector<8x16xbf16>, vector<8x16xf32> -> vector<8x16xf32>
    %c8_93 = arith.constant 8 : index
    %c32_94 = arith.constant 32 : index
    %491 = vector.load %arg14[%c8_93, %c32_94] : memref<16x128xf32, #tpu.memory_space<vmem>>, vector<8x16xf32>
    tpu.vector_store %arg14[%c8_93, %c32_94], %490 {strides = array<i32>} : memref<16x128xf32, #tpu.memory_space<vmem>>, vector<8x16xf32>,
    %492 = vector.extract_strided_slice %24 {offsets = [8, 48], sizes = [8, 16], strides = [1, 1]} : vector<16x384xf32> to vector<8x16xf32>
    %493 = vector.extract_strided_slice %24 {offsets = [8, 176], sizes = [8, 16], strides = [1, 1]} : vector<16x384xf32> to vector<8x16xf32>
    %494 = vector.extract_strided_slice %24 {offsets = [8, 304], sizes = [8, 16], strides = [1, 1]} : vector<16x384xf32> to vector<8x16xf32>
    %495 = vector.extract_strided_slice %492 {offsets = [0, 0], sizes = [8, 8], strides = [1, 1]} : vector<8x16xf32> to vector<8x8xf32>
    %496 = vector.extract_strided_slice %492 {offsets = [0, 8], sizes = [8, 8], strides = [1, 1]} : vector<8x16xf32> to vector<8x8xf32>
    %497 = vector.extract_strided_slice %493 {offsets = [0, 0], sizes = [8, 8], strides = [1, 1]} : vector<8x16xf32> to vector<8x8xf32>
    %498 = vector.extract_strided_slice %493 {offsets = [0, 8], sizes = [8, 8], strides = [1, 1]} : vector<8x16xf32> to vector<8x8xf32>
    %499 = arith.mulf %495, %25 : vector<8x8xf32>
    %500 = arith.mulf %496, %26 : vector<8x8xf32>
    %501 = arith.subf %499, %500 : vector<8x8xf32>
    %502 = arith.mulf %496, %25 : vector<8x8xf32>
    %503 = arith.mulf %495, %26 : vector<8x8xf32>
    %504 = arith.addf %502, %503 : vector<8x8xf32>
    %505 = tpu.concatenate %501, %504 in 1 : vector<8x8xf32>, vector<8x8xf32> -> vector<8x16xf32>
    %506 = arith.mulf %497, %25 : vector<8x8xf32>
    %507 = arith.mulf %498, %26 : vector<8x8xf32>
    %508 = arith.subf %506, %507 : vector<8x8xf32>
    %509 = arith.mulf %498, %25 : vector<8x8xf32>
    %510 = arith.mulf %497, %26 : vector<8x8xf32>
    %511 = arith.addf %509, %510 : vector<8x8xf32>
    %512 = tpu.concatenate %508, %511 in 1 : vector<8x8xf32>, vector<8x8xf32> -> vector<8x16xf32>
    %cst_95 = arith.constant 2.500000e-01 : f32
    %513 = vector.broadcast %cst_95 : f32 to vector<8x16xf32>
    %514 = arith.mulf %505, %513 : vector<8x16xf32>
    %515 = arith.truncf %514 : vector<8x16xf32> to vector<8x16xbf16>
    %516 = arith.truncf %512 : vector<8x16xf32> to vector<8x16xbf16>
    %cst_96 = arith.constant dense<0.000000e+00> : vector<8x8xf32>
    %517 = tpu.matmul %515, %516, %cst_96 {dimension_numbers = #tpu.dot_dimension_numbers<[1], [1], [0], [0], [0, 0, 1, 0], [], []>} : vector<8x16xbf16>, vector<8x16xbf16>, vector<8x8xf32> -> vector<8x8xf32>
    %cst_97 = arith.constant -1.000000e+30 : f32
    %518 = vector.broadcast %cst_97 : f32 to vector<8x8xf32>
    %519 = arith.select %29, %517, %518 : vector<8x8xi1>, vector<8x8xf32>
    %cst_98 = arith.constant dense<0xFF800000> : vector<8xf32>
    %520 = vector.multi_reduction <maximumf>, %519, %cst_98 [1] : vector<8x8xf32> to vector<8xf32>
    %521 = vector.shape_cast %520 : vector<8xf32> to vector<8x1xf32>
    %522 = vector.broadcast %521 : vector<8x1xf32> to vector<8x8xf32>
    %523 = arith.subf %519, %522 : vector<8x8xf32>
    %524 = math.exp %523 : vector<8x8xf32>
    %cst_99 = arith.constant dense<0.000000e+00> : vector<8xf32>
    %525 = vector.multi_reduction <add>, %524, %cst_99 [1] : vector<8x8xf32> to vector<8xf32>
    %526 = vector.shape_cast %525 : vector<8xf32> to vector<8x1xf32>
    %527 = tpu.reciprocal %526 {approx = true} : vector<8x1xf32> -> vector<8x1xf32>
    %528 = vector.broadcast %527 : vector<8x1xf32> to vector<8x8xf32>
    %529 = arith.mulf %524, %528 : vector<8x8xf32>
    %530 = arith.truncf %529 : vector<8x8xf32> to vector<8x8xbf16>
    %531 = arith.truncf %494 : vector<8x16xf32> to vector<8x16xbf16>
    %cst_100 = arith.constant dense<0.000000e+00> : vector<8x16xf32>
    %532 = tpu.matmul %530, %531, %cst_100 {dimension_numbers = #tpu.dot_dimension_numbers<[1], [0], [0], [1], [0, 0, 1, 1], [], []>} : vector<8x8xbf16>, vector<8x16xbf16>, vector<8x16xf32> -> vector<8x16xf32>
    %c8_101 = arith.constant 8 : index
    %c48_102 = arith.constant 48 : index
    %533 = vector.load %arg14[%c8_101, %c48_102] : memref<16x128xf32, #tpu.memory_space<vmem>>, vector<8x16xf32>
    tpu.vector_store %arg14[%c8_101, %c48_102], %532 {strides = array<i32>} : memref<16x128xf32, #tpu.memory_space<vmem>>, vector<8x16xf32>,
    %534 = vector.extract_strided_slice %24 {offsets = [8, 64], sizes = [8, 16], strides = [1, 1]} : vector<16x384xf32> to vector<8x16xf32>
    %535 = vector.extract_strided_slice %24 {offsets = [8, 192], sizes = [8, 16], strides = [1, 1]} : vector<16x384xf32> to vector<8x16xf32>
    %536 = vector.extract_strided_slice %24 {offsets = [8, 320], sizes = [8, 16], strides = [1, 1]} : vector<16x384xf32> to vector<8x16xf32>
    %537 = vector.extract_strided_slice %534 {offsets = [0, 0], sizes = [8, 8], strides = [1, 1]} : vector<8x16xf32> to vector<8x8xf32>
    %538 = vector.extract_strided_slice %534 {offsets = [0, 8], sizes = [8, 8], strides = [1, 1]} : vector<8x16xf32> to vector<8x8xf32>
    %539 = vector.extract_strided_slice %535 {offsets = [0, 0], sizes = [8, 8], strides = [1, 1]} : vector<8x16xf32> to vector<8x8xf32>
    %540 = vector.extract_strided_slice %535 {offsets = [0, 8], sizes = [8, 8], strides = [1, 1]} : vector<8x16xf32> to vector<8x8xf32>
    %541 = arith.mulf %537, %25 : vector<8x8xf32>
    %542 = arith.mulf %538, %26 : vector<8x8xf32>
    %543 = arith.subf %541, %542 : vector<8x8xf32>
    %544 = arith.mulf %538, %25 : vector<8x8xf32>
    %545 = arith.mulf %537, %26 : vector<8x8xf32>
    %546 = arith.addf %544, %545 : vector<8x8xf32>
    %547 = tpu.concatenate %543, %546 in 1 : vector<8x8xf32>, vector<8x8xf32> -> vector<8x16xf32>
    %548 = arith.mulf %539, %25 : vector<8x8xf32>
    %549 = arith.mulf %540, %26 : vector<8x8xf32>
    %550 = arith.subf %548, %549 : vector<8x8xf32>
    %551 = arith.mulf %540, %25 : vector<8x8xf32>
    %552 = arith.mulf %539, %26 : vector<8x8xf32>
    %553 = arith.addf %551, %552 : vector<8x8xf32>
    %554 = tpu.concatenate %550, %553 in 1 : vector<8x8xf32>, vector<8x8xf32> -> vector<8x16xf32>
    %cst_103 = arith.constant 2.500000e-01 : f32
    %555 = vector.broadcast %cst_103 : f32 to vector<8x16xf32>
    %556 = arith.mulf %547, %555 : vector<8x16xf32>
    %557 = arith.truncf %556 : vector<8x16xf32> to vector<8x16xbf16>
    %558 = arith.truncf %554 : vector<8x16xf32> to vector<8x16xbf16>
    %cst_104 = arith.constant dense<0.000000e+00> : vector<8x8xf32>
    %559 = tpu.matmul %557, %558, %cst_104 {dimension_numbers = #tpu.dot_dimension_numbers<[1], [1], [0], [0], [0, 0, 1, 0], [], []>} : vector<8x16xbf16>, vector<8x16xbf16>, vector<8x8xf32> -> vector<8x8xf32>
    %cst_105 = arith.constant -1.000000e+30 : f32
    %560 = vector.broadcast %cst_105 : f32 to vector<8x8xf32>
    %561 = arith.select %29, %559, %560 : vector<8x8xi1>, vector<8x8xf32>
    %cst_106 = arith.constant dense<0xFF800000> : vector<8xf32>
    %562 = vector.multi_reduction <maximumf>, %561, %cst_106 [1] : vector<8x8xf32> to vector<8xf32>
    %563 = vector.shape_cast %562 : vector<8xf32> to vector<8x1xf32>
    %564 = vector.broadcast %563 : vector<8x1xf32> to vector<8x8xf32>
    %565 = arith.subf %561, %564 : vector<8x8xf32>
    %566 = math.exp %565 : vector<8x8xf32>
    %cst_107 = arith.constant dense<0.000000e+00> : vector<8xf32>
    %567 = vector.multi_reduction <add>, %566, %cst_107 [1] : vector<8x8xf32> to vector<8xf32>
    %568 = vector.shape_cast %567 : vector<8xf32> to vector<8x1xf32>
    %569 = tpu.reciprocal %568 {approx = true} : vector<8x1xf32> -> vector<8x1xf32>
    %570 = vector.broadcast %569 : vector<8x1xf32> to vector<8x8xf32>
    %571 = arith.mulf %566, %570 : vector<8x8xf32>
    %572 = arith.truncf %571 : vector<8x8xf32> to vector<8x8xbf16>
    %573 = arith.truncf %536 : vector<8x16xf32> to vector<8x16xbf16>
    %cst_108 = arith.constant dense<0.000000e+00> : vector<8x16xf32>
    %574 = tpu.matmul %572, %573, %cst_108 {dimension_numbers = #tpu.dot_dimension_numbers<[1], [0], [0], [1], [0, 0, 1, 1], [], []>} : vector<8x8xbf16>, vector<8x16xbf16>, vector<8x16xf32> -> vector<8x16xf32>
    %c8_109 = arith.constant 8 : index
    %c64_110 = arith.constant 64 : index
    %575 = vector.load %arg14[%c8_109, %c64_110] : memref<16x128xf32, #tpu.memory_space<vmem>>, vector<8x16xf32>
    tpu.vector_store %arg14[%c8_109, %c64_110], %574 {strides = array<i32>} : memref<16x128xf32, #tpu.memory_space<vmem>>, vector<8x16xf32>,
    %576 = vector.extract_strided_slice %24 {offsets = [8, 80], sizes = [8, 16], strides = [1, 1]} : vector<16x384xf32> to vector<8x16xf32>
    %577 = vector.extract_strided_slice %24 {offsets = [8, 208], sizes = [8, 16], strides = [1, 1]} : vector<16x384xf32> to vector<8x16xf32>
    %578 = vector.extract_strided_slice %24 {offsets = [8, 336], sizes = [8, 16], strides = [1, 1]} : vector<16x384xf32> to vector<8x16xf32>
    %579 = vector.extract_strided_slice %576 {offsets = [0, 0], sizes = [8, 8], strides = [1, 1]} : vector<8x16xf32> to vector<8x8xf32>
    %580 = vector.extract_strided_slice %576 {offsets = [0, 8], sizes = [8, 8], strides = [1, 1]} : vector<8x16xf32> to vector<8x8xf32>
    %581 = vector.extract_strided_slice %577 {offsets = [0, 0], sizes = [8, 8], strides = [1, 1]} : vector<8x16xf32> to vector<8x8xf32>
    %582 = vector.extract_strided_slice %577 {offsets = [0, 8], sizes = [8, 8], strides = [1, 1]} : vector<8x16xf32> to vector<8x8xf32>
    %583 = arith.mulf %579, %25 : vector<8x8xf32>
    %584 = arith.mulf %580, %26 : vector<8x8xf32>
    %585 = arith.subf %583, %584 : vector<8x8xf32>
    %586 = arith.mulf %580, %25 : vector<8x8xf32>
    %587 = arith.mulf %579, %26 : vector<8x8xf32>
    %588 = arith.addf %586, %587 : vector<8x8xf32>
    %589 = tpu.concatenate %585, %588 in 1 : vector<8x8xf32>, vector<8x8xf32> -> vector<8x16xf32>
    %590 = arith.mulf %581, %25 : vector<8x8xf32>
    %591 = arith.mulf %582, %26 : vector<8x8xf32>
    %592 = arith.subf %590, %591 : vector<8x8xf32>
    %593 = arith.mulf %582, %25 : vector<8x8xf32>
    %594 = arith.mulf %581, %26 : vector<8x8xf32>
    %595 = arith.addf %593, %594 : vector<8x8xf32>
    %596 = tpu.concatenate %592, %595 in 1 : vector<8x8xf32>, vector<8x8xf32> -> vector<8x16xf32>
    %cst_111 = arith.constant 2.500000e-01 : f32
    %597 = vector.broadcast %cst_111 : f32 to vector<8x16xf32>
    %598 = arith.mulf %589, %597 : vector<8x16xf32>
    %599 = arith.truncf %598 : vector<8x16xf32> to vector<8x16xbf16>
    %600 = arith.truncf %596 : vector<8x16xf32> to vector<8x16xbf16>
    %cst_112 = arith.constant dense<0.000000e+00> : vector<8x8xf32>
    %601 = tpu.matmul %599, %600, %cst_112 {dimension_numbers = #tpu.dot_dimension_numbers<[1], [1], [0], [0], [0, 0, 1, 0], [], []>} : vector<8x16xbf16>, vector<8x16xbf16>, vector<8x8xf32> -> vector<8x8xf32>
    %cst_113 = arith.constant -1.000000e+30 : f32
    %602 = vector.broadcast %cst_113 : f32 to vector<8x8xf32>
    %603 = arith.select %29, %601, %602 : vector<8x8xi1>, vector<8x8xf32>
    %cst_114 = arith.constant dense<0xFF800000> : vector<8xf32>
    %604 = vector.multi_reduction <maximumf>, %603, %cst_114 [1] : vector<8x8xf32> to vector<8xf32>
    %605 = vector.shape_cast %604 : vector<8xf32> to vector<8x1xf32>
    %606 = vector.broadcast %605 : vector<8x1xf32> to vector<8x8xf32>
    %607 = arith.subf %603, %606 : vector<8x8xf32>
    %608 = math.exp %607 : vector<8x8xf32>
    %cst_115 = arith.constant dense<0.000000e+00> : vector<8xf32>
    %609 = vector.multi_reduction <add>, %608, %cst_115 [1] : vector<8x8xf32> to vector<8xf32>
    %610 = vector.shape_cast %609 : vector<8xf32> to vector<8x1xf32>
    %611 = tpu.reciprocal %610 {approx = true} : vector<8x1xf32> -> vector<8x1xf32>
    %612 = vector.broadcast %611 : vector<8x1xf32> to vector<8x8xf32>
    %613 = arith.mulf %608, %612 : vector<8x8xf32>
    %614 = arith.truncf %613 : vector<8x8xf32> to vector<8x8xbf16>
    %615 = arith.truncf %578 : vector<8x16xf32> to vector<8x16xbf16>
    %cst_116 = arith.constant dense<0.000000e+00> : vector<8x16xf32>
    %616 = tpu.matmul %614, %615, %cst_116 {dimension_numbers = #tpu.dot_dimension_numbers<[1], [0], [0], [1], [0, 0, 1, 1], [], []>} : vector<8x8xbf16>, vector<8x16xbf16>, vector<8x16xf32> -> vector<8x16xf32>
    %c8_117 = arith.constant 8 : index
    %c80_118 = arith.constant 80 : index
    %617 = vector.load %arg14[%c8_117, %c80_118] : memref<16x128xf32, #tpu.memory_space<vmem>>, vector<8x16xf32>
    tpu.vector_store %arg14[%c8_117, %c80_118], %616 {strides = array<i32>} : memref<16x128xf32, #tpu.memory_space<vmem>>, vector<8x16xf32>,
    %618 = vector.extract_strided_slice %24 {offsets = [8, 96], sizes = [8, 16], strides = [1, 1]} : vector<16x384xf32> to vector<8x16xf32>
    %619 = vector.extract_strided_slice %24 {offsets = [8, 224], sizes = [8, 16], strides = [1, 1]} : vector<16x384xf32> to vector<8x16xf32>
    %620 = vector.extract_strided_slice %24 {offsets = [8, 352], sizes = [8, 16], strides = [1, 1]} : vector<16x384xf32> to vector<8x16xf32>
    %621 = vector.extract_strided_slice %618 {offsets = [0, 0], sizes = [8, 8], strides = [1, 1]} : vector<8x16xf32> to vector<8x8xf32>
    %622 = vector.extract_strided_slice %618 {offsets = [0, 8], sizes = [8, 8], strides = [1, 1]} : vector<8x16xf32> to vector<8x8xf32>
    %623 = vector.extract_strided_slice %619 {offsets = [0, 0], sizes = [8, 8], strides = [1, 1]} : vector<8x16xf32> to vector<8x8xf32>
    %624 = vector.extract_strided_slice %619 {offsets = [0, 8], sizes = [8, 8], strides = [1, 1]} : vector<8x16xf32> to vector<8x8xf32>
    %625 = arith.mulf %621, %25 : vector<8x8xf32>
    %626 = arith.mulf %622, %26 : vector<8x8xf32>
    %627 = arith.subf %625, %626 : vector<8x8xf32>
    %628 = arith.mulf %622, %25 : vector<8x8xf32>
    %629 = arith.mulf %621, %26 : vector<8x8xf32>
    %630 = arith.addf %628, %629 : vector<8x8xf32>
    %631 = tpu.concatenate %627, %630 in 1 : vector<8x8xf32>, vector<8x8xf32> -> vector<8x16xf32>
    %632 = arith.mulf %623, %25 : vector<8x8xf32>
    %633 = arith.mulf %624, %26 : vector<8x8xf32>
    %634 = arith.subf %632, %633 : vector<8x8xf32>
    %635 = arith.mulf %624, %25 : vector<8x8xf32>
    %636 = arith.mulf %623, %26 : vector<8x8xf32>
    %637 = arith.addf %635, %636 : vector<8x8xf32>
    %638 = tpu.concatenate %634, %637 in 1 : vector<8x8xf32>, vector<8x8xf32> -> vector<8x16xf32>
    %cst_119 = arith.constant 2.500000e-01 : f32
    %639 = vector.broadcast %cst_119 : f32 to vector<8x16xf32>
    %640 = arith.mulf %631, %639 : vector<8x16xf32>
    %641 = arith.truncf %640 : vector<8x16xf32> to vector<8x16xbf16>
    %642 = arith.truncf %638 : vector<8x16xf32> to vector<8x16xbf16>
    %cst_120 = arith.constant dense<0.000000e+00> : vector<8x8xf32>
    %643 = tpu.matmul %641, %642, %cst_120 {dimension_numbers = #tpu.dot_dimension_numbers<[1], [1], [0], [0], [0, 0, 1, 0], [], []>} : vector<8x16xbf16>, vector<8x16xbf16>, vector<8x8xf32> -> vector<8x8xf32>
    %cst_121 = arith.constant -1.000000e+30 : f32
    %644 = vector.broadcast %cst_121 : f32 to vector<8x8xf32>
    %645 = arith.select %29, %643, %644 : vector<8x8xi1>, vector<8x8xf32>
    %cst_122 = arith.constant dense<0xFF800000> : vector<8xf32>
    %646 = vector.multi_reduction <maximumf>, %645, %cst_122 [1] : vector<8x8xf32> to vector<8xf32>
    %647 = vector.shape_cast %646 : vector<8xf32> to vector<8x1xf32>
    %648 = vector.broadcast %647 : vector<8x1xf32> to vector<8x8xf32>
    %649 = arith.subf %645, %648 : vector<8x8xf32>
    %650 = math.exp %649 : vector<8x8xf32>
    %cst_123 = arith.constant dense<0.000000e+00> : vector<8xf32>
    %651 = vector.multi_reduction <add>, %650, %cst_123 [1] : vector<8x8xf32> to vector<8xf32>
    %652 = vector.shape_cast %651 : vector<8xf32> to vector<8x1xf32>
    %653 = tpu.reciprocal %652 {approx = true} : vector<8x1xf32> -> vector<8x1xf32>
    %654 = vector.broadcast %653 : vector<8x1xf32> to vector<8x8xf32>
    %655 = arith.mulf %650, %654 : vector<8x8xf32>
    %656 = arith.truncf %655 : vector<8x8xf32> to vector<8x8xbf16>
    %657 = arith.truncf %620 : vector<8x16xf32> to vector<8x16xbf16>
    %cst_124 = arith.constant dense<0.000000e+00> : vector<8x16xf32>
    %658 = tpu.matmul %656, %657, %cst_124 {dimension_numbers = #tpu.dot_dimension_numbers<[1], [0], [0], [1], [0, 0, 1, 1], [], []>} : vector<8x8xbf16>, vector<8x16xbf16>, vector<8x16xf32> -> vector<8x16xf32>
    %c8_125 = arith.constant 8 : index
    %c96_126 = arith.constant 96 : index
    %659 = vector.load %arg14[%c8_125, %c96_126] : memref<16x128xf32, #tpu.memory_space<vmem>>, vector<8x16xf32>
    tpu.vector_store %arg14[%c8_125, %c96_126], %658 {strides = array<i32>} : memref<16x128xf32, #tpu.memory_space<vmem>>, vector<8x16xf32>,
    %660 = vector.extract_strided_slice %24 {offsets = [8, 112], sizes = [8, 16], strides = [1, 1]} : vector<16x384xf32> to vector<8x16xf32>
    %661 = vector.extract_strided_slice %24 {offsets = [8, 240], sizes = [8, 16], strides = [1, 1]} : vector<16x384xf32> to vector<8x16xf32>
    %662 = vector.extract_strided_slice %24 {offsets = [8, 368], sizes = [8, 16], strides = [1, 1]} : vector<16x384xf32> to vector<8x16xf32>
    %663 = vector.extract_strided_slice %660 {offsets = [0, 0], sizes = [8, 8], strides = [1, 1]} : vector<8x16xf32> to vector<8x8xf32>
    %664 = vector.extract_strided_slice %660 {offsets = [0, 8], sizes = [8, 8], strides = [1, 1]} : vector<8x16xf32> to vector<8x8xf32>
    %665 = vector.extract_strided_slice %661 {offsets = [0, 0], sizes = [8, 8], strides = [1, 1]} : vector<8x16xf32> to vector<8x8xf32>
    %666 = vector.extract_strided_slice %661 {offsets = [0, 8], sizes = [8, 8], strides = [1, 1]} : vector<8x16xf32> to vector<8x8xf32>
    %667 = arith.mulf %663, %25 : vector<8x8xf32>
    %668 = arith.mulf %664, %26 : vector<8x8xf32>
    %669 = arith.subf %667, %668 : vector<8x8xf32>
    %670 = arith.mulf %664, %25 : vector<8x8xf32>
    %671 = arith.mulf %663, %26 : vector<8x8xf32>
    %672 = arith.addf %670, %671 : vector<8x8xf32>
    %673 = tpu.concatenate %669, %672 in 1 : vector<8x8xf32>, vector<8x8xf32> -> vector<8x16xf32>
    %674 = arith.mulf %665, %25 : vector<8x8xf32>
    %675 = arith.mulf %666, %26 : vector<8x8xf32>
    %676 = arith.subf %674, %675 : vector<8x8xf32>
    %677 = arith.mulf %666, %25 : vector<8x8xf32>
    %678 = arith.mulf %665, %26 : vector<8x8xf32>
    %679 = arith.addf %677, %678 : vector<8x8xf32>
    %680 = tpu.concatenate %676, %679 in 1 : vector<8x8xf32>, vector<8x8xf32> -> vector<8x16xf32>
    %cst_127 = arith.constant 2.500000e-01 : f32
    %681 = vector.broadcast %cst_127 : f32 to vector<8x16xf32>
    %682 = arith.mulf %673, %681 : vector<8x16xf32>
    %683 = arith.truncf %682 : vector<8x16xf32> to vector<8x16xbf16>
    %684 = arith.truncf %680 : vector<8x16xf32> to vector<8x16xbf16>
    %cst_128 = arith.constant dense<0.000000e+00> : vector<8x8xf32>
    %685 = tpu.matmul %683, %684, %cst_128 {dimension_numbers = #tpu.dot_dimension_numbers<[1], [1], [0], [0], [0, 0, 1, 0], [], []>} : vector<8x16xbf16>, vector<8x16xbf16>, vector<8x8xf32> -> vector<8x8xf32>
    %cst_129 = arith.constant -1.000000e+30 : f32
    %686 = vector.broadcast %cst_129 : f32 to vector<8x8xf32>
    %687 = arith.select %29, %685, %686 : vector<8x8xi1>, vector<8x8xf32>
    %cst_130 = arith.constant dense<0xFF800000> : vector<8xf32>
    %688 = vector.multi_reduction <maximumf>, %687, %cst_130 [1] : vector<8x8xf32> to vector<8xf32>
    %689 = vector.shape_cast %688 : vector<8xf32> to vector<8x1xf32>
    %690 = vector.broadcast %689 : vector<8x1xf32> to vector<8x8xf32>
    %691 = arith.subf %687, %690 : vector<8x8xf32>
    %692 = math.exp %691 : vector<8x8xf32>
    %cst_131 = arith.constant dense<0.000000e+00> : vector<8xf32>
    %693 = vector.multi_reduction <add>, %692, %cst_131 [1] : vector<8x8xf32> to vector<8xf32>
    %694 = vector.shape_cast %693 : vector<8xf32> to vector<8x1xf32>
    %695 = tpu.reciprocal %694 {approx = true} : vector<8x1xf32> -> vector<8x1xf32>
    %696 = vector.broadcast %695 : vector<8x1xf32> to vector<8x8xf32>
    %697 = arith.mulf %692, %696 : vector<8x8xf32>
    %698 = arith.truncf %697 : vector<8x8xf32> to vector<8x8xbf16>
    %699 = arith.truncf %662 : vector<8x16xf32> to vector<8x16xbf16>
    %cst_132 = arith.constant dense<0.000000e+00> : vector<8x16xf32>
    %700 = tpu.matmul %698, %699, %cst_132 {dimension_numbers = #tpu.dot_dimension_numbers<[1], [0], [0], [1], [0, 0, 1, 1], [], []>} : vector<8x8xbf16>, vector<8x16xbf16>, vector<8x16xf32> -> vector<8x16xf32>
    %c8_133 = arith.constant 8 : index
    %c112_134 = arith.constant 112 : index
    %701 = vector.load %arg14[%c8_133, %c112_134] : memref<16x128xf32, #tpu.memory_space<vmem>>, vector<8x16xf32>
    tpu.vector_store %arg14[%c8_133, %c112_134], %700 {strides = array<i32>} : memref<16x128xf32, #tpu.memory_space<vmem>>, vector<8x16xf32>,
    %c0_135 = arith.constant 0 : index
    %c0_136 = arith.constant 0 : index
    %702 = vector.load %arg14[%c0_135, %c0_136] : memref<16x128xf32, #tpu.memory_space<vmem>>, vector<16x128xf32>
    %703 = arith.truncf %702 : vector<16x128xf32> to vector<16x128xbf16>
    %c0_137 = arith.constant 0 : index
    %c0_138 = arith.constant 0 : index
    %704 = vector.load %arg7[%c0_137, %c0_138] : memref<128x128xbf16, #tpu.memory_space<vmem>>, vector<128x128xbf16>
    %cst_139 = arith.constant dense<0.000000e+00> : vector<16x128xf32>
    %705 = tpu.matmul %703, %704, %cst_139 {dimension_numbers = #tpu.dot_dimension_numbers<[1], [0], [0], [1], [0, 0, 1, 1], [], []>} : vector<16x128xbf16>, vector<128x128xbf16>, vector<16x128xf32> -> vector<16x128xf32>
    %c0_140 = arith.constant 0 : index
    %c0_141 = arith.constant 0 : index
    %706 = vector.load %arg8[%c0_140, %c0_141] : memref<1x128xf32, #tpu.memory_space<vmem>>, vector<1x128xf32>
    %707 = vector.shape_cast %706 : vector<1x128xf32> to vector<128xf32>
    %708 = vector.shape_cast %707 : vector<128xf32> to vector<1x128xf32>
    %709 = vector.broadcast %708 : vector<1x128xf32> to vector<16x128xf32>
    %710 = arith.addf %705, %709 : vector<16x128xf32>
    %711 = arith.addf %1, %710 : vector<16x128xf32>
    %712 = arith.mulf %711, %711 : vector<16x128xf32>
    %cst_142 = arith.constant dense<0.000000e+00> : vector<16xf32>
    %713 = vector.multi_reduction <add>, %712, %cst_142 [1] : vector<16x128xf32> to vector<16xf32>
    %714 = vector.shape_cast %713 : vector<16xf32> to vector<16x1xf32>
    %cst_143 = arith.constant 1.280000e+02 : f32
    %715 = vector.broadcast %cst_143 : f32 to vector<16x1xf32>
    %716 = arith.divf %714, %715 : vector<16x1xf32>
    %cst_144 = arith.constant 9.99999974E-6 : f32
    %717 = vector.broadcast %cst_144 : f32 to vector<16x1xf32>
    %718 = arith.addf %716, %717 : vector<16x1xf32>
    %719 = math.rsqrt %718 : vector<16x1xf32>
    %720 = vector.broadcast %719 : vector<16x1xf32> to vector<16x128xf32>
    %721 = arith.mulf %711, %720 : vector<16x128xf32>
    %c0_145 = arith.constant 0 : index
    %c0_146 = arith.constant 0 : index
    %722 = vector.load %arg9[%c0_145, %c0_146] : memref<1x128xf32, #tpu.memory_space<vmem>>, vector<1x128xf32>
    %723 = vector.shape_cast %722 : vector<1x128xf32> to vector<128xf32>
    %724 = vector.shape_cast %723 : vector<128xf32> to vector<1x128xf32>
    %725 = vector.broadcast %724 : vector<1x128xf32> to vector<16x128xf32>
    %726 = arith.mulf %721, %725 : vector<16x128xf32>
    %727 = arith.truncf %726 : vector<16x128xf32> to vector<16x128xbf16>
    %c0_147 = arith.constant 0 : index
    %c0_148 = arith.constant 0 : index
    %728 = vector.load %arg10[%c0_147, %c0_148] : memref<128x1024xbf16, #tpu.memory_space<vmem>>, vector<128x1024xbf16>
    %cst_149 = arith.constant dense<0.000000e+00> : vector<16x1024xf32>
    %729 = tpu.matmul %727, %728, %cst_149 {dimension_numbers = #tpu.dot_dimension_numbers<[1], [0], [0], [1], [0, 0, 1, 1], [], []>} : vector<16x128xbf16>, vector<128x1024xbf16>, vector<16x1024xf32> -> vector<16x1024xf32>
    %730 = vector.extract_strided_slice %729 {offsets = [0, 0], sizes = [16, 512], strides = [1, 1]} : vector<16x1024xf32> to vector<16x512xf32>
    %731 = vector.extract_strided_slice %729 {offsets = [0, 512], sizes = [16, 512], strides = [1, 1]} : vector<16x1024xf32> to vector<16x512xf32>
    %732 = arith.negf %730 : vector<16x512xf32>
    %733 = math.exp %732 : vector<16x512xf32>
    %cst_150 = arith.constant 1.000000e+00 : f32
    %734 = vector.broadcast %cst_150 : f32 to vector<16x512xf32>
    %735 = arith.addf %734, %733 : vector<16x512xf32>
    %736 = arith.divf %734, %735 : vector<16x512xf32>
    %737 = arith.mulf %730, %736 : vector<16x512xf32>
    %738 = arith.negf %731 : vector<16x512xf32>
    %739 = math.exp %738 : vector<16x512xf32>
    %cst_151 = arith.constant 1.000000e+00 : f32
    %740 = vector.broadcast %cst_151 : f32 to vector<16x512xf32>
    %741 = arith.addf %740, %739 : vector<16x512xf32>
    %742 = arith.divf %740, %741 : vector<16x512xf32>
    %743 = arith.mulf %731, %742 : vector<16x512xf32>
    %744 = arith.mulf %737, %743 : vector<16x512xf32>
    %745 = arith.truncf %744 : vector<16x512xf32> to vector<16x512xbf16>
    %c0_152 = arith.constant 0 : index
    %c0_153 = arith.constant 0 : index
    %746 = vector.load %arg11[%c0_152, %c0_153] : memref<512x128xbf16, #tpu.memory_space<vmem>>, vector<512x128xbf16>
    %cst_154 = arith.constant dense<0.000000e+00> : vector<16x128xf32>
    %747 = tpu.matmul %745, %746, %cst_154 {dimension_numbers = #tpu.dot_dimension_numbers<[1], [0], [0], [1], [0, 0, 1, 1], [], []>} : vector<16x512xbf16>, vector<512x128xbf16>, vector<16x128xf32> -> vector<16x128xf32>
    %c0_155 = arith.constant 0 : index
    %c0_156 = arith.constant 0 : index
    %748 = vector.load %arg12[%c0_155, %c0_156] : memref<1x128xf32, #tpu.memory_space<vmem>>, vector<1x128xf32>
    %749 = vector.shape_cast %748 : vector<1x128xf32> to vector<128xf32>
    %750 = vector.shape_cast %749 : vector<128xf32> to vector<1x128xf32>
    %751 = vector.broadcast %750 : vector<1x128xf32> to vector<16x128xf32>
    %752 = arith.addf %747, %751 : vector<16x128xf32>
    %753 = arith.addf %711, %752 : vector<16x128xf32>
    %754 = vector.shape_cast %753 : vector<16x128xf32> to vector<2x8x128xf32>
    %c0_157 = arith.constant 0 : index
    %c0_158 = arith.constant 0 : index
    %c0_159 = arith.constant 0 : index
    %755 = vector.load %arg13[%c0_157, %c0_158, %c0_159] : memref<2x8x128xf32, #tpu.memory_space<vmem>>, vector<2x8x128xf32>
    tpu.vector_store %arg13[%c0_157, %c0_158, %c0_159], %754 {strides = array<i32>} : memref<2x8x128xf32, #tpu.memory_space<vmem>>, vector<2x8x128xf32>,
    return
  }
  func.func @transform_0(%arg0: i32) -> (i32, i32, i32) {
    %c0_i32 = arith.constant 0 : i32
    %c0_i32_0 = arith.constant 0 : i32
    %c0_i32_1 = arith.constant 0 : i32
    return %arg0, %c0_i32, %c0_i32_0 : i32, i32, i32
  }
  func.func @transform_1(%arg0: i32) -> (i32, i32) {
    %c0_i32 = arith.constant 0 : i32
    %c0_i32_0 = arith.constant 0 : i32
    %c0_i32_1 = arith.constant 0 : i32
    return %c0_i32, %c0_i32_0 : i32, i32
  }
  func.func @transform_2(%arg0: i32) -> (i32, i32) {
    %c0_i32 = arith.constant 0 : i32
    %c0_i32_0 = arith.constant 0 : i32
    %c0_i32_1 = arith.constant 0 : i32
    return %c0_i32, %c0_i32_0 : i32, i32
  }
  func.func @transform_3(%arg0: i32) -> (i32, i32) {
    %c0_i32 = arith.constant 0 : i32
    %c0_i32_0 = arith.constant 0 : i32
    %c0_i32_1 = arith.constant 0 : i32
    return %c0_i32, %c0_i32_0 : i32, i32
  }
  func.func @transform_4(%arg0: i32) -> (i32, i32) {
    %c0_i32 = arith.constant 0 : i32
    %c0_i32_0 = arith.constant 0 : i32
    %c0_i32_1 = arith.constant 0 : i32
    return %c0_i32, %c0_i32_0 : i32, i32
  }
  func.func @transform_5(%arg0: i32) -> (i32, i32) {
    %c0_i32 = arith.constant 0 : i32
    %c0_i32_0 = arith.constant 0 : i32
    %c0_i32_1 = arith.constant 0 : i32
    return %c0_i32, %c0_i32_0 : i32, i32
  }
  func.func @transform_6(%arg0: i32) -> (i32, i32) {
    %c0_i32 = arith.constant 0 : i32
    %c0_i32_0 = arith.constant 0 : i32
    %c0_i32_1 = arith.constant 0 : i32
    return %c0_i32, %c0_i32_0 : i32, i32
  }
  func.func @transform_7(%arg0: i32) -> (i32, i32) {
    %c0_i32 = arith.constant 0 : i32
    %c0_i32_0 = arith.constant 0 : i32
    %c0_i32_1 = arith.constant 0 : i32
    return %c0_i32, %c0_i32_0 : i32, i32
  }
  func.func @transform_8(%arg0: i32) -> (i32, i32) {
    %c0_i32 = arith.constant 0 : i32
    %c0_i32_0 = arith.constant 0 : i32
    %c0_i32_1 = arith.constant 0 : i32
    return %c0_i32, %c0_i32_0 : i32, i32
  }
  func.func @transform_9(%arg0: i32) -> (i32, i32) {
    %c0_i32 = arith.constant 0 : i32
    %c0_i32_0 = arith.constant 0 : i32
    %c0_i32_1 = arith.constant 0 : i32
    return %c0_i32, %c0_i32_0 : i32, i32
  }
  func.func @transform_10(%arg0: i32) -> (i32, i32) {
    %c0_i32 = arith.constant 0 : i32
    %c0_i32_0 = arith.constant 0 : i32
    %c0_i32_1 = arith.constant 0 : i32
    return %c0_i32, %c0_i32_0 : i32, i32
  }
  func.func @transform_11(%arg0: i32) -> (i32, i32) {
    %c0_i32 = arith.constant 0 : i32
    %c0_i32_0 = arith.constant 0 : i32
    %c0_i32_1 = arith.constant 0 : i32
    return %c0_i32, %c0_i32_0 : i32, i32
  }
  func.func @transform_12(%arg0: i32) -> (i32, i32, i32) {
    %c0_i32 = arith.constant 0 : i32
    %c0_i32_0 = arith.constant 0 : i32
    %c0_i32_1 = arith.constant 0 : i32
    return %arg0, %c0_i32, %c0_i32_0 : i32, i32, i32
  }
}

</mosaic_0001>

<bundles_post_ra>
// kernel: tpu_custom_call.1
= control target key start
LH: loop header
LB: loop body
LE: loop exit
PB: predicated region body
PF: predicated region fallthrough
CT: control target
= control target key end

     0   :  { %17 = vsyncpa [#allocation4], 0  ;;  %s6594_s0 = inlined_call_operand.hbm [shape: f32[2,8,128], index: 0, kind: input, shape index: {}]   ;;  %s6595_s1 = inlined_call_operand.vmem [shape: f32[1,128], index: 1, kind: input, shape index: {}]   ;;  %s6596_s2 = inlined_call_operand.hbm [shape: bf16[128,384], index: 2, kind: input, shape index: {}]   ;;  %s6597_s3 = inlined_call_operand.hbm [shape: f32[1,384], index: 3, kind: input, shape index: {}]   ;;  %s6598_s4 = inlined_call_operand.hbm [shape: f32[8,8], index: 4, kind: input, shape index: {}]   ;;  %s6599_s5 = inlined_call_operand.vmem [shape: f32[8,8], index: 5, kind: input, shape index: {}]   ;;  %s6600_s6 = inlined_call_operand.hbm [shape: bf16[128,128], index: 6, kind: input, shape index: {}]   ;;  %s6601_s7 = inlined_call_operand.vmem [shape: f32[1,128], index: 7, kind: input, shape index: {}]   ;;  %s6602_s8 = inlined_call_operand.vmem [shape: f32[1,128], index: 8, kind: input, shape index: {}]   ;;  %s6603_s9 = inlined_call_operand.hbm [shape: bf16[128,1024], index: 9, kind: input, shape index: {}]   ;;  %s6604_s10 = inlined_call_operand.hbm [shape: bf16[512,128], index: 10, kind: input, shape index: {}]   ;;  %s6605_s11 = inlined_call_operand.vmem [shape: f32[1,128], index: 11, kind: input, shape index: {}]   ;;  %s6606_s12 = inlined_call_operand.hbm [shape: f32[2,8,128], index: 12, kind: output, shape index: {}]  }
   0x1   :  { %18 = vsyncpa [#allocation7], 0 }
   0x2   :  { %19 = vsyncpa [#allocation10], 0 }
   0x3   :  { %20 = vsyncpa [#allocation13], 0 }
   0x4   :  { %21 = vsyncpa [#allocation5], 0  ;;  %s5277_s21 = smov [#allocation6]  }
   0x5   :  { %s41_s22 = sshll.u32 %s5277_s21, 4  ;;  %s42_s22 = int_to_ptr.vmem [resolvable:$true] %s41_s22 }
   0x6   :  { %s5115_s23 = scalar_lea.vmem %s42_s22, 3072  ;;  %p5120_p1 = scmp.lt.s32.totalorder %s42_s22, %s42_s22 }
   0x7   :  { %p5116_p0 = scmp.ne.s32.totalorder %s42_s22, %s5115_s23  ;;  %p5121_p2 = scmp.lt.s32.totalorder %s5115_s23, %s5115_s23 }
   0x9   :  { %p5122_p3 = por %p5121_p2, %p5120_p1 }
   0xb   :  { %p5123_p4 = pnand %p5122_p3, %p5116_p0 }
   0xd   :  { %5126 = shalt.err (!%p5123_p4)
}
   0xe   :  { %s5278_s24 = smov 192   ;;  %s5279_s25 = smov 12  }
   0xf   :  { %47 = dma.hbm_to_vmem [thread:$0]  %s6596_s2, 3072, %s42_s22, [#allocation7], %s5278_s24, %s5278_s24, %s5279_s25  }
  0x10   :  { %s5280_s28 = smov [#allocation9]   ;;  %s5281_s30 = smov [#allocation12]  }
  0x11   :  { %s64_s29 = sshll.u32 %s5280_s28, 4  ;;  %s91_s13 = sshll.u32 %s5281_s30, 4  ;;  %s65_s29 = int_to_ptr.vmem [resolvable:$true] %s64_s29  ;;  %s92_s13 = int_to_ptr.vmem [resolvable:$true] %s91_s13 }
  0x12   :  { %s5135_s14 = scalar_lea.vmem %s65_s29, 128  ;;  %p5140_p6 = scmp.lt.s32.totalorder %s65_s29, %s65_s29 }
  0x13   :  { %p5136_p5 = scmp.ne.s32.totalorder %s65_s29, %s5135_s14  ;;  %p5141_p7 = scmp.lt.s32.totalorder %s5135_s14, %s5135_s14 }
  0x15   :  { %p5142_p8 = por %p5141_p7, %p5140_p6 }
  0x17   :  { %p5143_p9 = pnand %p5142_p8, %p5136_p5 }
  0x19   :  { %5146 = shalt.err (!%p5143_p9)
}
  0x1a   :  { %67 = dma.hbm_to_vmem [thread:$0]  %s6598_s4, 128, %s65_s29, [#allocation10]  }
  0x1b   :  { %s5155_s17 = scalar_lea.vmem %s92_s13, 8192  ;;  %p5160_p11 = scmp.lt.s32.totalorder %s92_s13, %s92_s13 }
  0x1c   :  { %p5156_p10 = scmp.ne.s32.totalorder %s92_s13, %s5155_s17  ;;  %p5161_p12 = scmp.lt.s32.totalorder %s5155_s17, %s5155_s17 }
  0x1e   :  { %p5162_p13 = por %p5161_p12, %p5160_p11 }
  0x20   :  { %p5163_p0 = pnand %p5162_p13, %p5156_p10 }
  0x22   :  { %5166 = shalt.err (!%p5163_p0)
}
  0x23   :  { %s5282_s2 = smov 512   ;;  %s5283_s18 = smov 32  }
  0x24   :  { %97 = dma.hbm_to_vmem [thread:$0]  %s6603_s9, 8192, %s92_s13, [#allocation13], %s5282_s2, %s5282_s2, %s5283_s18  }
  0x25   :  { %s5284_s21 = smov [#allocation3]  }
  0x26   :  { %s27_s22 = sshll.u32 %s5284_s21, 4  ;;  %s28_s22 = int_to_ptr.vmem [resolvable:$true] %s27_s22 }
  0x27   :  { %s5175_s23 = scalar_lea.vmem %s28_s22, 256  ;;  %p5180_p2 = scmp.lt.s32.totalorder %s28_s22, %s28_s22 }
  0x28   :  { %p5176_p1 = scmp.ne.s32.totalorder %s28_s22, %s5175_s23  ;;  %p5181_p3 = scmp.lt.s32.totalorder %s5175_s23, %s5175_s23 }
  0x2a   :  { %p5182_p4 = por %p5181_p3, %p5180_p2 }
  0x2c   :  { %p5183_p5 = pnand %p5182_p4, %p5176_p1 }
  0x2e   :  { %5186 = shalt.err (!%p5183_p5)
}
  0x2f   :  { %s5285_s4 = smov 128   ;;  %s5286_s24 = smov 8  }
  0x30   :  { %33 = dma.hbm_to_vmem [thread:$0]  %s6594_s0, 256, %s28_s22, [#allocation4], %s5285_s4, %s5285_s4, %s5286_s24  }
  0x31   :  { %s5287_s9 = smov [#allocation8]   ;;  %s5288_s28 = smov [#allocation11]  }
  0x32   :  { %s54_s27 = sshll.u32 %s5287_s9, 4  ;;  %s75_s29 = sshll.u32 %s5288_s28, 4  ;;  %s55_s27 = int_to_ptr.vmem [resolvable:$true] %s54_s27  ;;  %s76_s29 = int_to_ptr.vmem [resolvable:$true] %s75_s29 }
  0x33   :  { %s5195_s30 = scalar_lea.vmem %s55_s27, 48  ;;  %s5199_s13 = scalar_lea.vmem %s55_s27, 64 }
  0x34   :  { %p5196_p6 = scmp.ne.s32.totalorder %s55_s27, %s5195_s30  ;;  %p5200_p7 = scmp.lt.s32.totalorder %s55_s27, %s55_s27 }
  0x35   :  { %p5201_p8 = scmp.lt.s32.totalorder %s5199_s13, %s5195_s30 }
  0x37   :  { %p5202_p9 = por %p5201_p8, %p5200_p7 }
  0x39   :  { %p5203_p10 = pnand %p5202_p9, %p5196_p6 }
  0x3b   :  { %5206 = shalt.err (!%p5203_p10)
}
  0x3c   :  { %57 = dma.hbm_to_vmem [thread:$0]  %s6597_s3, 48, %s55_s27, [#allocation7]  }
  0x3d   :  { %s5215_s16 = scalar_lea.vmem %s76_s29, 1024  ;;  %p5220_p12 = scmp.lt.s32.totalorder %s76_s29, %s76_s29 }
  0x3e   :  { %p5216_p11 = scmp.ne.s32.totalorder %s76_s29, %s5215_s16  ;;  %p5221_p13 = scmp.lt.s32.totalorder %s5215_s16, %s5215_s16 }
  0x40   :  { %p5222_p0 = por %p5221_p13, %p5220_p12 }
  0x42   :  { %p5223_p1 = pnand %p5222_p0, %p5216_p11 }
  0x44   :  { %5226 = shalt.err (!%p5223_p1)
}
  0x45   :  { %s5289_s0 = smov 64   ;;  %s5290_s17 = smov 4  }
  0x46   :  { %81 = dma.hbm_to_vmem [thread:$0]  %s6600_s6, 1024, %s76_s29, [#allocation10], %s5289_s0, %s5289_s0, %s5290_s17  }
  0x47   :  { %s5291_s20 = smov [#allocation14]  }
  0x48   :  { %s103_s21 = sshll.u32 %s5291_s20, 4  ;;  %s104_s21 = int_to_ptr.vmem [resolvable:$true] %s103_s21 }
  0x49   :  { %s5235_s22 = scalar_lea.vmem %s104_s21, 4096  ;;  %p5240_p3 = scmp.lt.s32.totalorder %s104_s21, %s104_s21 }
  0x4a   :  { %p5236_p2 = scmp.ne.s32.totalorder %s104_s21, %s5235_s22  ;;  %p5241_p4 = scmp.lt.s32.totalorder %s5235_s22, %s5235_s22 }
  0x4c   :  { %p5242_p5 = por %p5241_p4, %p5240_p3 }
  0x4e   :  { %p5243_p6 = pnand %p5242_p5, %p5236_p2 }
  0x50   :  { %5246 = shalt.err (!%p5243_p6)
}
  0x51   :  { %109 = dma.hbm_to_vmem [thread:$0]  %s6604_s10, 4096, %s104_s21, [#allocation13], %s5289_s0, %s5289_s0, %s5290_s17  }
  0x52   :  { %5267 = dma.done.wait [#allocation4], 256  }
  0x53   :  { %5268 = vsyncadd [#allocation4], 4294967040 }
  0x54   :  { %5269 = dma.done.wait [#allocation7], 3120  }
  0x55   :  { %5270 = vsyncadd [#allocation7], 4294964176 }
  0x56   :  { %5271 = dma.done.wait [#allocation10], 1152  }
  0x57   :  { %5272 = vsyncadd [#allocation10], 4294966144 }
  0x58   :  { %5273 = dma.done.wait [#allocation13], 12288  }
  0x59   :  { %5274 = vsyncadd [#allocation13], 4294955008  ;;  %v6609_v0 = vmov 0.0   ;;  %v5403_v1 = vld [vmem:[#allocation3] sm:$0xff]  ;;  %v5405_v2 = vld [vmem:[#allocation3 + $0x8] sm:$0xff]  ;;  %v6607_v26 = vmov 0   ;;  %v195_v46 = vlaneseq }
  0x5a   :  { %4563 = vmatprep.subr.bf16.mxu1 %v6609_v0  ;;  %v136_v3 = vmul.f32 %v5403_v1, %v5403_v1  ;;  %v4896_v4 = vld [vmem:[#allocation6 + $0xac] ss:$12 sps:$4 sm:$0xff]   ;;  %v4898_v5 = vld [vmem:[#allocation6 + $0xa8] ss:$12 sps:$4 sm:$0xff]   ;;  %v4899_v6 = vld [vmem:[#allocation6 + $0xb0] ss:$12 sps:$4 sm:$0xff]   ;;  %v137_v7 = vmul.f32 %v5405_v2, %v5405_v2  ;;  %370 = vmatprep.mubr.bf16.mxu0 %v6607_v26 }
  0x5b   :  { %338 = vmatprep.subr.bf16.mxu0 %v4896_v4  ;;  %4564 = vmatpush3.bf16.msra.mxu1 %v4899_v6  ;;  %v4900_v8 = vld [vmem:[#allocation6 + $0x94] ss:$12 sps:$4 sm:$0xff]   ;;  %v4902_v9 = vld [vmem:[#allocation6 + $0x90] ss:$12 sps:$4 sm:$0xff]   ;;  %v4903_v10 = vld [vmem:[#allocation6 + $0x98] ss:$12 sps:$4 sm:$0xff]  }
  0x5c   :  { %138 = vadd.xlane.f32.xlu0 %v136_v3  ;;  %339 = vmatpush1.bf16.msra.mxu0 %v4898_v5  ;;  %v4904_v11 = vld [vmem:[#allocation6 + $0x7c] ss:$12 sps:$4 sm:$0xff]   ;;  %v4906_v12 = vld [vmem:[#allocation6 + $0x78] ss:$12 sps:$4 sm:$0xff]   ;;  %v4907_v13 = vld [vmem:[#allocation6 + $0x80] ss:$12 sps:$4 sm:$0xff]  }
  0x5d   :  { %4565 = vmatprep.subr.bf16.mxu1 %v6609_v0  ;;  %340 = vmatprep.subr.bf16.mxu0 %v4900_v8  ;;  %v4908_v14 = vld [vmem:[#allocation6 + $0x64] ss:$12 sps:$4 sm:$0xff]   ;;  %v4910_v15 = vld [vmem:[#allocation6 + $0x60] ss:$12 sps:$4 sm:$0xff]   ;;  %v4911_v16 = vld [vmem:[#allocation6 + $0x68] ss:$12 sps:$4 sm:$0xff]  }
  0x5e   :  { %v4912_v17 = vld [vmem:[#allocation6 + $0x4c] ss:$12 sps:$4 sm:$0xff]   ;;  %v4914_v18 = vld [vmem:[#allocation6 + $0x48] ss:$12 sps:$4 sm:$0xff]   ;;  %v4915_v19 = vld [vmem:[#allocation6 + $0x50] ss:$12 sps:$4 sm:$0xff]  }
  0x5f   :  { %4566 = vmatpush3.bf16.msra.mxu1 %v4903_v10  ;;  %v4916_v20 = vld [vmem:[#allocation6 + $0x34] ss:$12 sps:$4 sm:$0xff]   ;;  %v4918_v21 = vld [vmem:[#allocation6 + $0x30] ss:$12 sps:$4 sm:$0xff]   ;;  %v4919_v22 = vld [vmem:[#allocation6 + $0x38] ss:$12 sps:$4 sm:$0xff]  }
  0x60   :  { %140 = vadd.xlane.f32.xlu0 %v137_v7  ;;  %341 = vmatpush1.bf16.msra.mxu0 %v4902_v9  ;;  %v4920_v23 = vld [vmem:[#allocation6 + $0x1c] ss:$12 sps:$4 sm:$0xff]   ;;  %v4922_v24 = vld [vmem:[#allocation6 + $0x18] ss:$12 sps:$4 sm:$0xff]   ;;  %v4923_v25 = vld [vmem:[#allocation6 + $0x20] ss:$12 sps:$4 sm:$0xff]  }
  0x61   :  { %4567 = vmatprep.subr.bf16.mxu1 %v6609_v0  ;;  %342 = vmatprep.subr.bf16.mxu0 %v4904_v11  ;;  %vm5294_vm0 = vmmov 0   ;;  %v4924_v27 = vld [vmem:[#allocation6 + $0x4] ss:$12 sps:$4 sm:$0xff]   ;;  %v4926_v28 = vld [vmem:[#allocation6] ss:$12 sps:$4 sm:$0xff]   ;;  %v5444_v47 = vshrl.u32 %v195_v46, 7 }
  0x62   :  { %4579 = vmatprep.mubr.msk.bf16.mxu1 %vm5294_vm0, %v6609_v0  ;;  %v4927_v29 = vld [vmem:[#allocation6 + $0x8] ss:$12 sps:$4 sm:$0xff]   ;;  %v5426_v30 = vld [vmem:[%s6599_s5] sm:$0xff]  ;;  %s5296_s26 = smov 40   ;;  %s5297_s9 = smov 56   ;;  %vm451_vm1 = vcmask 64512  }
  0x63   :  { %4568 = vmatpush3.bf16.msra.mxu1 %v4907_v13  ;;  %431 = vrot.lane.b32.xlu1 %v5426_v30, %s5286_s24  ;;  %v5430_v31 = vld [vmem:[#allocation9] sm:$0xff]  ;;  %v4257_v41 = vld [vmem:[%s6595_s1] ss:$0 sm:$0xff]  ;;  %v201_v48 = vsub.s32 1, %v5444_v47  ;;  %v197_v49 = vsub.s32 0, %v5444_v47  ;;  %v205_v52 = vsub.s32 2, %v5444_v47 }
  0x64   :  { %343 = vmatpush1.bf16.msra.mxu0 %v4906_v12  ;;  %4569 = vmatprep.subr.bf16.mxu1 %v6609_v0  ;;  %v193_v50 = vld [vmem:[#allocation8] sm:$0x7]  ;;  %s5295_s1 = smov 120   ;;  %s5298_s27 = smov 24   ;;  %vm471_vm2 = vcmask 130048   ;;  %vm535_vm3 = vcmask 1043456  }
  0x65   :  { %344 = vmatprep.subr.bf16.mxu0 %v4908_v14  ;;  %v5448_v51 = vrot.slane %v193_v50, %v201_v48  ;;  %v198_v53 = vrot.slane %v193_v50, %v197_v49  ;;  %v206_v59 = vrot.slane %v193_v50, %v205_v52  ;;  %s5299_s28 = smov 48   ;;  %s5300_s29 = smov 16   ;;  %vm753_vm5 = vcmask 261248  }
  0x66   :  { %s5301_s30 = smov 72   ;;  %s5302_s13 = smov 96   ;;  %vm927_vm6 = vcmask 392448   ;;  %vm1101_vm7 = vcmask 523648   ;;  %vm1275_vm8 = vcmask 654848   ;;  %vm1449_vm9 = vcmask 786048  }
  0x67   :  { %4570 = vmatpush3.bf16.msra.mxu1 %v4911_v16  ;;  %441 = vrot.lane.b32.xlu1 %v5430_v31, %s5286_s24  ;;  %s5303_s14 = smov 88   ;;  %s5304_s15 = smov 80   ;;  %vm1623_vm10 = vcmask 917248   ;;  %vm1797_vm11 = vcmask 1048448  }
  0x68   :  { %345 = vmatpush1.bf16.msra.mxu0 %v4910_v15  ;;  %4571 = vmatprep.subr.bf16.mxu1 %v6609_v0  ;;  %s5305_s16 = smov 104   ;;  %s5306_s17 = smov 112  }
  0x69   :  { %346 = vmatprep.subr.bf16.mxu0 %v4912_v17  ;;  %s5307_s20 = smov [#allocation15]  }
  0x6a   :  { %s4242_s21 = sshll.u32 %s5307_s20, 4  ;;  %s4243_s21 = int_to_ptr.vmem [resolvable:$true] %s4242_s21 }
  0x6b   :  { %4572 = vmatpush3.bf16.msra.mxu1 %v4915_v19  ;;  %p5252_p8 = scmp.lt.s32.totalorder %s4243_s21, %s4243_s21 }
  0x6c   :  { %347 = vmatpush1.bf16.msra.mxu0 %v4914_v18  ;;  %4573 = vmatprep.subr.bf16.mxu1 %v6609_v0 }
  0x6d   :  { %348 = vmatprep.subr.bf16.mxu0 %v4916_v20 }
  0x6f   :  { %4574 = vmatpush3.bf16.msra.mxu1 %v4919_v22 }
  0x70   :  { %349 = vmatpush1.bf16.msra.mxu0 %v4918_v21  ;;  %4575 = vmatprep.subr.bf16.mxu1 %v6609_v0 }
  0x71   :  { %350 = vmatprep.subr.bf16.mxu0 %v4920_v23 }
  0x73   :  { %4576 = vmatpush3.bf16.msra.mxu1 %v4923_v25 }
  0x74   :  { %351 = vmatpush1.bf16.msra.mxu0 %v4922_v24  ;;  %4577 = vmatprep.subr.bf16.mxu1 %v6609_v0 }
  0x75   :  { %352 = vmatprep.subr.bf16.mxu0 %v4924_v27 }
  0x77   :  { %4578 = vmatpush3.bf16.msra.mxu1 %v4927_v29 }
  0x78   :  { %353 = vmatpush1.bf16.msra.mxu0 %v4926_v28  ;;  %4583 = vmatprep.subr.bf16.mxu1 %v6609_v0 }
  0x79   :  { %4607 = vmatprep.subr.bf16.mxu0 %v6609_v0 }
  0xd5   :  { %v5453_v58 = vpop.permute.xlu1 %431 }
  0xd9   :  { %v5506_v8 = vpop.permute.xlu1 %441 }
  0xe5   :  { %v139_v32 = vpop.xlane.xlu0 %138 }
  0xe6   :  { %v143_v33 = vmul.f32 0.0078125, %v139_v32 }
  0xe8   :  { %v145_v34 = vadd.f32 1e-05, %v143_v33 }
  0xe9   :  { %v141_v35 = vpop.xlane.xlu0 %140 }
  0xea   :  { %4968 = vrsqrt.f32 %v145_v34  ;;  %v144_v36 = vmul.f32 0.0078125, %v141_v35 }
  0xec   :  { %v146_v37 = vadd.f32 1e-05, %v144_v36 }
  0xee   :  { %4970 = vrsqrt.f32 %v146_v37 }
  0xf7   :  { %v4969_v38 = vpop.eup %4968 }
  0xf8   :  { %v149_v39 = vmul.f32 %v4969_v38, %v5403_v1 }
  0xfa   :  { %v158_v43 = vmul.f32 %v4257_v41, %v149_v39 }
  0xfb   :  { %v4971_v40 = vpop.eup %4970 }
  0xfc   :  { %v150_v42 = vmul.f32 %v4971_v40, %v5405_v2 }
  0xfe   :  { %v159_v44 = vmul.f32 %v4257_v41, %v150_v42 }
 0x100   :  { %v160_v45 = vpack.c.bf16 %v159_v44, %v158_v43 }
 0x102   :  { %371 = vmatmul.mubr.bf16.vlgmr.msra.gmra.mxu0 %v160_v45  ;;  %4580 = vmatmul.mubr.bf16.vlgmr.msra.gmra.mxu1 %v160_v45 }
 0x103   :  { %4585 = vmatprep.mubr.msk.bf16.mxu1 %vm5294_vm0, %v6609_v0  ;;  %4609 = vmatprep.mubr.msk.bf16.mxu0 %vm5294_vm0, %v6609_v0 }
 0x1c2   :  { %v372_v54 = vpop.f32.mrf.mxu0  ;;  %v5451_v55 = vpop.f32.mrf.mxu1 }
 0x1c3   :  { %v5458_v61 = vadd.f32 %v372_v54, %v198_v53  ;;  %v416_v21 = vadd.f32 %v5451_v55, %v206_v59 }
 0x1c4   :  { %v374_v56 = vpop.f32.mrf.mxu0  ;;  %v4581_v57 = vpop.f32.mrf.mxu1 }
 0x1c5   :  { %v5456_v60 = vadd.f32 %v374_v56, %v5448_v51  ;;  %v434_v6 = vmul.f32 %v5453_v58, %v5458_v61  ;;  %v445_v7 = vmul.f32 %v5426_v30, %v5458_v61  ;;  %v429_v19 = vmul.f32 %v5430_v31, %v5458_v61 }
 0x1c6   :  { %v376_v62 = vpop.f32.mrf.mxu0  ;;  %v418_v63 = vpop.f32.mrf.mxu1  ;;  %v444_v20 = vmul.f32 %v5506_v8, %v5458_v61  ;;  %v5523_v28 = vpack.c.bf16 %v416_v21, %v416_v21 }
 0x1c7   :  { %v5460_v1 = vadd.f32 %v376_v62, %v198_v53  ;;  %v5462_v2 = vadd.f32 %v418_v63, %v206_v59  ;;  %v461_v3 = vmul.f32 %v5426_v30, %v5456_v60  ;;  %v454_v4 = vmul.f32 %v5453_v58, %v5456_v60 }
 0x1c8   :  { %v4582_v5 = vpop.f32.mrf.mxu1  ;;  %v460_v9 = vmul.f32 %v5506_v8, %v5456_v60  ;;  %v453_v10 = vmul.f32 %v5430_v31, %v5456_v60  ;;  %6614 = vst [vmem:[#allocation22_spill] sm:$0xff] %v5523_v28  ;;  %v537_v37 = vsel %vm535_vm3, %v5523_v28, 0 }
 0x1c9   :  { %6613 = vst [vmem:[#allocation21_spill] sm:$0xff] %v5462_v2  ;;  %463 = vrot.lane.b32.xlu1 %v461_v3, %s5286_s24  ;;  %456 = vrot.lane.b32.xlu0 %v454_v4, %s5295_s1  ;;  %v378_v3 = vpop.f32.mrf.mxu0 }
 0x1cd   :  { %759 = vrot.lane.b32.xlu0 %v5426_v30, %s5296_s26  ;;  %436 = vrot.lane.b32.xlu1 %v434_v6, %s5295_s1 }
 0x1d1   :  { %772 = vrot.lane.b32.xlu0 %v5426_v30, %s5283_s18  ;;  %447 = vrot.lane.b32.xlu1 %v445_v7, %s5286_s24  ;;  %v5622_v7 = vadd.f32 %v378_v3, %v5448_v51 }
 0x1d5   :  { %933 = vrot.lane.b32.xlu0 %v5426_v30, %s5297_s9  ;;  %584 = vrot.lane.b32.xlu1 %v5426_v30, %s5298_s27 }
 0x1d9   :  { %946 = vrot.lane.b32.xlu0 %v5426_v30, %s5299_s28  ;;  %597 = vrot.lane.b32.xlu1 %v5426_v30, %s5300_s29 }
 0x1dd   :  { %1107 = vrot.lane.b32.xlu0 %v5426_v30, %s5301_s30  ;;  %1468 = vrot.lane.b32.xlu1 %v5426_v30, %s5302_s13 }
 0x1e1   :  { %1120 = vrot.lane.b32.xlu0 %v5426_v30, %s5289_s0 }
 0x1e5   :  { %1281 = vrot.lane.b32.xlu0 %v5426_v30, %s5303_s14 }
 0x1e9   :  { %1294 = vrot.lane.b32.xlu0 %v5426_v30, %s5304_s15 }
 0x1ed   :  { %1455 = vrot.lane.b32.xlu0 %v5426_v30, %s5305_s16 }
 0x1f1   :  { %1629 = vrot.lane.b32.xlu0 %v5426_v30, %s5295_s1 }
 0x1f5   :  { %1642 = vrot.lane.b32.xlu0 %v5426_v30, %s5306_s17 }
 0x1f9   :  { %580 = vrot.lane.b32.xlu0 %v5430_v31, %s5300_s29 }
 0x1fd   :  { %593 = vrot.lane.b32.xlu0 %v5430_v31, %s5298_s27 }
 0x23b   :  { %v464_v11 = vpop.permute.xlu1 %463  ;;  %v457_v12 = vpop.permute.xlu0 %456 }
 0x23c   :  { %v466_v13 = vadd.f32 %v464_v11, %v460_v9  ;;  %v459_v14 = vsub.f32 %v453_v10, %v457_v12 }
 0x23e   :  { %v467_v15 = vsel %vm451_vm1, %v459_v14, %v466_v13 }
 0x23f   :  { %v437_v16 = vpop.permute.xlu1 %436  ;;  %v470_v17 = vpack.c.bf16 %v467_v15, %v467_v15  ;;  %v5519_v22 = vpop.permute.xlu0 %759 }
 0x240   :  { %v439_v24 = vsub.f32 %v429_v19, %v437_v16  ;;  %v762_v40 = vmul.f32 %v5519_v22, %v5458_v61  ;;  %v791_v56 = vmul.f32 %v5519_v22, %v5456_v60 }
 0x241   :  { %v476_v18 = vsel %vm471_vm2, %v470_v17, 0 }
 0x242   :  { %4584 = vmatpush3.bf16.xpose.msra.mxu1 %v476_v18 }
 0x243   :  { %v448_v23 = vpop.permute.xlu1 %447  ;;  %4589 = vmatprep.subr.bf16.mxu1 %v6609_v0  ;;  %v5529_v34 = vpop.permute.xlu0 %772 }
 0x244   :  { %v450_v25 = vadd.f32 %v448_v23, %v444_v20  ;;  %v775_v41 = vmul.f32 %v5529_v34, %v5458_v61 }
 0x246   :  { %v452_v27 = vsel %vm451_vm1, %v439_v24, %v450_v25 }
 0x247   :  { %v468_v29 = vmul.f32 0.25, %v452_v27  ;;  %v5525_v32 = vpop.permute.xlu1 %584  ;;  %v5544_v39 = vpop.permute.xlu0 %933 }
 0x248   :  { %v587_v33 = vmul.f32 %v5525_v32, %v5458_v61  ;;  %v936_v43 = vmul.f32 %v5544_v39, %v5458_v61  ;;  %v616_v53 = vmul.f32 %v5525_v32, %v5456_v60  ;;  %v965_v59 = vmul.f32 %v5544_v39, %v5456_v60 }
 0x249   :  { %v469_v35 = vpack.c.bf16 %v468_v29, %v468_v29  ;;  %v1963_v9 = vmul.f32 %v5525_v32, %v5622_v7  ;;  %v1940_v26 = vmul.f32 %v5525_v32, %v5460_v1 }
 0x24a   :  { %589 = vrot.lane.b32.xlu1 %v587_v33, %s5295_s1 }
 0x24b   :  { %v5532_v36 = vpop.permute.xlu1 %597  ;;  %4586 = vmatmul.mubr.msk.bf16.vlgmr.msra.gmra.mxu1 %vm471_vm2, %v469_v35  ;;  %v5554_v42 = vpop.permute.xlu0 %946 }
 0x24c   :  { %4590 = vmatpush3.bf16.msra.mxu1 %v537_v37  ;;  %v600_v38 = vmul.f32 %v5532_v36, %v5458_v61  ;;  %4591 = vmatprep.mubr.msk.bf16.mxu1 %vm5294_vm0, %v6609_v0  ;;  %v949_v45 = vmul.f32 %v5554_v42, %v5458_v61  ;;  %v623_v14 = vmul.f32 %v5532_v36, %v5456_v60 }
 0x24d   :  { %4595 = vmatprep.subr.bf16.mxu1 %v6609_v0  ;;  %v972_v15 = vmul.f32 %v5554_v42, %v5456_v60  ;;  %v1970_v23 = vmul.f32 %v5532_v36, %v5622_v7 }
 0x24e   :  { %755 = vrot.lane.b32.xlu1 %v5430_v31, %s5283_s18  ;;  %602 = vrot.lane.b32.xlu0 %v600_v38, %s5286_s24 }
 0x24f   :  { %v5564_v44 = vpop.permute.xlu0 %1107  ;;  %v5619_v6 = vpop.permute.xlu1 %1468 }
 0x250   :  { %v1110_v48 = vmul.f32 %v5564_v44, %v5458_v61  ;;  %v1139_v62 = vmul.f32 %v5564_v44, %v5456_v60  ;;  %v1471_v10 = vmul.f32 %v5619_v6, %v5458_v61  ;;  %v1494_v19 = vmul.f32 %v5619_v6, %v5456_v60 }
 0x252   :  { %764 = vrot.lane.b32.xlu1 %v762_v40, %s5295_s1  ;;  %768 = vrot.lane.b32.xlu0 %v5430_v31, %s5296_s26 }
 0x253   :  { %v5573_v49 = vpop.permute.xlu0 %1120 }
 0x254   :  { %v1123_v50 = vmul.f32 %v5573_v49, %v5458_v61  ;;  %v1146_v16 = vmul.f32 %v5573_v49, %v5456_v60 }
 0x256   :  { %929 = vrot.lane.b32.xlu1 %v5430_v31, %s5299_s28  ;;  %777 = vrot.lane.b32.xlu0 %v775_v41, %s5286_s24 }
 0x257   :  { %v5583_v52 = vpop.permute.xlu0 %1281 }
 0x258   :  { %v1284_v54 = vmul.f32 %v5583_v52, %v5458_v61  ;;  %v1313_v4 = vmul.f32 %v5583_v52, %v5456_v60 }
 0x25a   :  { %938 = vrot.lane.b32.xlu1 %v936_v43, %s5295_s1  ;;  %942 = vrot.lane.b32.xlu0 %v5430_v31, %s5297_s9 }
 0x25b   :  { %v5593_v55 = vpop.permute.xlu0 %1294 }
 0x25c   :  { %v1297_v57 = vmul.f32 %v5593_v55, %v5458_v61  ;;  %v1320_v17 = vmul.f32 %v5593_v55, %v5456_v60 }
 0x25e   :  { %1103 = vrot.lane.b32.xlu1 %v5430_v31, %s5289_s0  ;;  %951 = vrot.lane.b32.xlu0 %v949_v45, %s5286_s24 }
 0x25f   :  { %v5610_v63 = vpop.permute.xlu0 %1455 }
 0x260   :  { %v1458_v5 = vmul.f32 %v5610_v63, %v5458_v61  ;;  %v1487_v18 = vmul.f32 %v5610_v63, %v5456_v60 }
 0x262   :  { %1112 = vrot.lane.b32.xlu1 %v1110_v48, %s5295_s1  ;;  %1116 = vrot.lane.b32.xlu0 %v5430_v31, %s5301_s30 }
 0x263   :  { %v5632_v11 = vpop.permute.xlu0 %1629 }
 0x264   :  { %v1632_v51 = vmul.f32 %v5632_v11, %v5458_v61  ;;  %v1661_v20 = vmul.f32 %v5632_v11, %v5456_v60 }
 0x266   :  { %1277 = vrot.lane.b32.xlu1 %v5430_v31, %s5304_s15  ;;  %1125 = vrot.lane.b32.xlu0 %v1123_v50, %s5286_s24 }
 0x267   :  { %v5638_v12 = vpop.permute.xlu0 %1642 }
 0x268   :  { %v1645_v13 = vmul.f32 %v5638_v12, %v5458_v61  ;;  %v1668_v21 = vmul.f32 %v5638_v12, %v5456_v60 }
 0x26a   :  { %1638 = vrot.lane.b32.xlu1 %v5430_v31, %s5295_s1  ;;  %1290 = vrot.lane.b32.xlu0 %v5430_v31, %s5303_s14 }
 0x26b   :  { %v5673_v24 = vpop.permute.xlu0 %580 }
 0x26c   :  { %v583_v25 = vmul.f32 %v5673_v24, %v5458_v61 }
 0x26e   :  { %618 = vrot.lane.b32.xlu1 %v616_v53, %s5295_s1  ;;  %1286 = vrot.lane.b32.xlu0 %v1284_v54, %s5295_s1 }
 0x26f   :  { %v5678_v27 = vpop.permute.xlu0 %593 }
 0x270   :  { %v596_v35 = vmul.f32 %v5678_v27, %v5458_v61 }
 0x272   :  { %793 = vrot.lane.b32.xlu1 %v791_v56, %s5295_s1  ;;  %1299 = vrot.lane.b32.xlu0 %v1297_v57, %s5286_s24 }
 0x276   :  { %967 = vrot.lane.b32.xlu1 %v965_v59, %s5295_s1  ;;  %1451 = vrot.lane.b32.xlu0 %v5430_v31, %s5302_s13 }
 0x27a   :  { %1141 = vrot.lane.b32.xlu1 %v1139_v62, %s5295_s1  ;;  %1464 = vrot.lane.b32.xlu0 %v5430_v31, %s5305_s16 }
 0x27e   :  { %1315 = vrot.lane.b32.xlu1 %v1313_v4, %s5295_s1  ;;  %1460 = vrot.lane.b32.xlu0 %v1458_v5, %s5295_s1 }
 0x282   :  { %1965 = vrot.lane.b32.xlu1 %v1963_v9, %s5295_s1  ;;  %1473 = vrot.lane.b32.xlu0 %v1471_v10, %s5286_s24 }
 0x286   :  { %1625 = vrot.lane.b32.xlu0 %v5430_v31, %s5306_s17  ;;  %v798_v31 = vmul.f32 %v5529_v34, %v5456_v60 }
 0x28a   :  { %1634 = vrot.lane.b32.xlu0 %v1632_v51, %s5295_s1 }
 0x28e   :  { %1647 = vrot.lane.b32.xlu0 %v1645_v13, %s5286_s24 }
 0x292   :  { %625 = vrot.lane.b32.xlu0 %v623_v14, %s5286_s24 }
 0x296   :  { %800 = vrot.lane.b32.xlu0 %v798_v31, %s5286_s24 }
 0x29a   :  { %974 = vrot.lane.b32.xlu0 %v972_v15, %s5286_s24 }
 0x29e   :  { %1148 = vrot.lane.b32.xlu0 %v1146_v16, %s5286_s24 }
 0x2a2   :  { %1322 = vrot.lane.b32.xlu0 %v1320_v17, %s5286_s24 }
 0x2a6   :  { %1489 = vrot.lane.b32.xlu0 %v1487_v18, %s5295_s1 }
 0x2aa   :  { %1496 = vrot.lane.b32.xlu0 %v1494_v19, %s5286_s24  ;;  %v615_v19 = vmul.f32 %v5673_v24, %v5456_v60 }
 0x2ae   :  { %1663 = vrot.lane.b32.xlu0 %v1661_v20, %s5295_s1  ;;  %v622_v20 = vmul.f32 %v5678_v27, %v5456_v60 }
 0x2b2   :  { %1670 = vrot.lane.b32.xlu0 %v1668_v21, %s5286_s24 }
 0x2b6   :  { %1972 = vrot.lane.b32.xlu0 %v1970_v23, %s5286_s24  ;;  %v427_v23 = vand.u32 127, %v195_v46 }
 0x2b8   :  { %vm5736_vm4 = vcmp.le.s32.totalorder %v427_v23, %v5444_v47 }
 0x2bc   :  { %v590_v29 = vpop.permute.xlu1 %589 }
 0x2bd   :  { %v592_v33 = vsub.f32 %v583_v25, %v590_v29 }
 0x2bf   :  { %607 = vrot.lane.b32.xlu1 %v592_v33, %s5306_s17 }
 0x2c0   :  { %v603_v37 = vpop.permute.xlu0 %602  ;;  %v5692_v48 = vpop.permute.xlu1 %755 }
 0x2c1   :  { %v605_v38 = vadd.f32 %v603_v37, %v596_v35  ;;  %v758_v32 = vmul.f32 %v5692_v48, %v5458_v61 }
 0x2c3   :  { %611 = vrot.lane.b32.xlu0 %v605_v38, %s5306_s17 }
 0x2c4   :  { %v5684_v40 = vpop.permute.xlu0 %768  ;;  %v765_v53 = vpop.permute.xlu1 %764 }
 0x2c8   :  { %v5686_v41 = vpop.permute.xlu0 %777  ;;  %v5700_v57 = vpop.permute.xlu1 %929 }
 0x2cc   :  { %v5688_v43 = vpop.permute.xlu0 %942  ;;  %v5704_v62 = vpop.permute.xlu1 %938 }
 0x2d0   :  { %v5690_v45 = vpop.permute.xlu0 %951  ;;  %v5710_v5 = vpop.permute.xlu1 %1103 }
 0x2d4   :  { %v5694_v50 = vpop.permute.xlu0 %1116  ;;  %v5714_v10 = vpop.permute.xlu1 %1112 }
 0x2d8   :  { %v5696_v54 = vpop.permute.xlu0 %1125  ;;  %v5720_v14 = vpop.permute.xlu1 %1277 }
 0x2dc   :  { %v5698_v56 = vpop.permute.xlu0 %1290  ;;  %v5724_v15 = vpop.permute.xlu1 %1638 }
 0x2e0   :  { %v5702_v59 = vpop.permute.xlu0 %1286  ;;  %v619_v18 = vpop.permute.xlu1 %618 }
 0x2e1   :  { %v621_v25 = vsub.f32 %v615_v19, %v619_v18  ;;  %v2125_v19 = vmul.f32 %v5519_v22, %v5622_v7 }
 0x2e4   :  { %v5706_v3 = vpop.permute.xlu0 %1299  ;;  %v794_v0 = vpop.permute.xlu1 %793 }
 0x2e8   :  { %v5708_v4 = vpop.permute.xlu0 %1451 }
 0x2ec   :  { %v5712_v9 = vpop.permute.xlu0 %1464 }
 0x2f0   :  { %v5716_v51 = vpop.permute.xlu0 %1460 }
 0x2f4   :  { %v5718_v13 = vpop.permute.xlu0 %1473 }
 0x2f8   :  { %v5722_v31 = vpop.permute.xlu0 %1625 }
 0x2fc   :  { %v5726_v16 = vpop.permute.xlu0 %1634 }
 0x300   :  { %v5728_v17 = vpop.permute.xlu0 %1647 }
 0x304   :  { %v626_v21 = vpop.permute.xlu0 %625 }
 0x305   :  { %v628_v29 = vadd.f32 %v626_v21, %v622_v20  ;;  %v971_v21 = vmul.f32 %v5688_v43, %v5456_v60 }
 0x307   :  { %v4826_v33 = vpack.i.bf16 %v628_v29, %v621_v25  ;;  %v767_v25 = vsub.f32 %v758_v32, %v765_v53  ;;  %v964_v29 = vmul.f32 %v5700_v57, %v5456_v60  ;;  %v2109_v53 = vmul.f32 %v5529_v34, %v5460_v1 }
 0x308   :  { %v801_v37 = vpop.permute.xlu0 %800 }
 0x309   :  { %4827 = vrot.lane.b32.xlu0 %v4826_v33, %s5306_s17 }
 0x30b   :  { %v512_v38 = vpop.f32.mrf.mxu1 }
 0x30c   :  { %v5745_v2 = vsel %vm5736_vm4, %v512_v38, -1e+30  ;;  %v975_v20 = vpop.permute.xlu0 %974 }
 0x30d   :  { %1942 = vrot.lane.b32.xlu0 %v1940_v26, %s5295_s1  ;;  %v4587_v46 = vpop.f32.mrf.mxu1  ;;  %v519_v47 = vsel %vm451_vm1, %v5745_v2, -inf  ;;  %v968_v26 = vpop.permute.xlu1 %967  ;;  %v977_v33 = vadd.f32 %v975_v20, %v971_v21  ;;  %v2293_v20 = vmul.f32 %v5554_v42, %v5622_v7  ;;  %v945_v21 = vmul.f32 %v5688_v43, %v5458_v61 }
 0x30e   :  { %520 = vmax.xlane.f32.xlu1 %v519_v47  ;;  %v970_v38 = vsub.f32 %v964_v29, %v968_v26  ;;  %v797_v46 = vmul.f32 %v5684_v40, %v5456_v60  ;;  %v771_v26 = vmul.f32 %v5684_v40, %v5458_v61 }
 0x30f   :  { %v515_v18 = vpop.f32.mrf.mxu1 }
 0x310   :  { %v4836_v47 = vpack.i.bf16 %v977_v33, %v970_v38  ;;  %v790_v18 = vmul.f32 %v5692_v48, %v5456_v60  ;;  %v803_v28 = vadd.f32 %v801_v37, %v797_v46  ;;  %v1947_v37 = vmul.f32 %v5532_v36, %v5460_v1 }
 0x311   :  { %2127 = vrot.lane.b32.xlu0 %v2125_v19, %s5295_s1  ;;  %v4588_v23 = vpop.f32.mrf.mxu1  ;;  %v1142_v29 = vpop.permute.xlu1 %1141  ;;  %v780_v36 = vadd.f32 %v5686_v41, %v771_v26  ;;  %v1106_v33 = vmul.f32 %v5710_v5, %v5458_v61  ;;  %v1319_v38 = vmul.f32 %v5698_v56, %v5456_v60  ;;  %v2102_v46 = vmul.f32 %v5519_v22, %v5460_v1 }
 0x312   :  { %v796_v19 = vsub.f32 %v790_v18, %v794_v0  ;;  %v954_v0 = vadd.f32 %v5690_v45, %v945_v21  ;;  %v1149_v23 = vpop.permute.xlu0 %1148  ;;  %v2447_v45 = vmul.f32 %v5564_v44, %v5622_v7  ;;  %v1312_v18 = vmul.f32 %v5720_v14, %v5456_v60 }
 0x313   :  { %v1145_v22 = vmul.f32 %v5694_v50, %v5456_v60  ;;  %v2431_v26 = vmul.f32 %v5573_v49, %v5460_v1 }
 0x314   :  { %v4831_v32 = vpack.i.bf16 %v803_v28, %v796_v19  ;;  %v2132_v28 = vmul.f32 %v5529_v34, %v5622_v7 }
 0x315   :  { %782 = vrot.lane.b32.xlu0 %v767_v25, %s5302_s13  ;;  %v2263_v25 = vmul.f32 %v5544_v39, %v5460_v1  ;;  %v1316_v41 = vpop.permute.xlu1 %1315 }
 0x316   :  { %v1323_v34 = vpop.permute.xlu0 %1322 }
 0x317   :  { %v1325_v19 = vadd.f32 %v1323_v34, %v1319_v38  ;;  %v2454_v34 = vmul.f32 %v5573_v49, %v5622_v7  ;;  %v2585_v38 = vmul.f32 %v5583_v52, %v5460_v1 }
 0x319   :  { %4837 = vrot.lane.b32.xlu0 %v4836_v47, %s5304_s15  ;;  %v1115_v47 = vsub.f32 %v1106_v33, %v5714_v10 }
 0x31d   :  { %2111 = vrot.lane.b32.xlu0 %v2109_v53, %s5286_s24  ;;  %v1318_v53 = vsub.f32 %v1312_v18, %v1316_v41  ;;  %v1667_v41 = vmul.f32 %v5724_v15, %v5456_v60 }
 0x31f   :  { %4832 = vrot.lane.b32.xlu1 %v4831_v32, %s5302_s13  ;;  %v2286_v32 = vmul.f32 %v5544_v39, %v5622_v7  ;;  %v4846_v21 = vpack.i.bf16 %v1325_v19, %v1318_v53 }
 0x321   :  { %2295 = vrot.lane.b32.xlu0 %v2293_v20, %s5286_s24  ;;  %v932_v20 = vmul.f32 %v5700_v57, %v5458_v61 }
 0x323   :  { %1949 = vrot.lane.b32.xlu1 %v1947_v37, %s5286_s24  ;;  %v941_v10 = vsub.f32 %v932_v20, %v5704_v62  ;;  %v1138_v37 = vmul.f32 %v5710_v5, %v5456_v60  ;;  %v2615_v62 = vmul.f32 %v5593_v55, %v5622_v7  ;;  %v2937_v20 = vmul.f32 %v5638_v12, %v5622_v7 }
 0x325   :  { %960 = vrot.lane.b32.xlu0 %v954_v0, %s5304_s15  ;;  %v1151_v0 = vadd.f32 %v1149_v23, %v1145_v22  ;;  %v1144_v39 = vsub.f32 %v1138_v37, %v1142_v29  ;;  %v1293_v23 = vmul.f32 %v5698_v56, %v5458_v61  ;;  %v2270_v29 = vmul.f32 %v5554_v42, %v5460_v1 }
 0x326   :  { %v2769_v42 = vmul.f32 %v5610_v63, %v5622_v7  ;;  %v1807_v37 = vmul.f32 %v5426_v30, %v5460_v1 }
 0x327   :  { %2134 = vrot.lane.b32.xlu1 %v2132_v28, %s5286_s24  ;;  %v5814_v28 = vpop.permute.xlu0 %1489 }
 0x329   :  { %2265 = vrot.lane.b32.xlu0 %v2263_v25, %s5295_s1  ;;  %v4841_v25 = vpack.i.bf16 %v1151_v0, %v1144_v39 }
 0x32b   :  { %786 = vrot.lane.b32.xlu1 %v780_v36, %s5302_s13  ;;  %v5823_v36 = vpop.permute.xlu0 %1496 }
 0x32d   :  { %2449 = vrot.lane.b32.xlu0 %v2447_v45, %s5295_s1  ;;  %v1302_v45 = vadd.f32 %v5706_v3, %v1293_v23  ;;  %v1454_v3 = vmul.f32 %v5708_v4, %v5458_v61 }
 0x32f   :  { %2104 = vrot.lane.b32.xlu1 %v2102_v46, %s5295_s1  ;;  %v1664_v33 = vpop.permute.xlu0 %1663  ;;  %v1463_v49 = vsub.f32 %v1454_v3, %v5716_v51  ;;  %v1641_v51 = vmul.f32 %v5724_v15, %v5458_v61 }
 0x331   :  { %1130 = vrot.lane.b32.xlu0 %v1115_v47, %s5289_s0  ;;  %v1660_v47 = vmul.f32 %v5722_v31, %v5456_v60  ;;  %v1650_v22 = vadd.f32 %v5728_v17, %v1641_v51  ;;  %v2124_v51 = vmul.f32 %v5692_v48, %v5622_v7 }
 0x333   :  { %2288 = vrot.lane.b32.xlu1 %v2286_v32, %s5295_s1  ;;  %v1671_v46 = vpop.permute.xlu0 %1670  ;;  %v1666_v19 = vsub.f32 %v1660_v47, %v1664_v33  ;;  %v2753_v32 = vmul.f32 %v5619_v6, %v5460_v1 }
 0x334   :  { %v1673_v18 = vadd.f32 %v1671_v46, %v1667_v41 }
 0x335   :  { %4847 = vrot.lane.b32.xlu0 %v4846_v21, %s5299_s28  ;;  %v1822_v21 = vmul.f32 %v5426_v30, %v5622_v7 }
 0x336   :  { %v4856_v53 = vpack.i.bf16 %v1673_v18, %v1666_v19 }
 0x337   :  { %956 = vrot.lane.b32.xlu1 %v941_v10, %s5304_s15  ;;  %v2914_v10 = vmul.f32 %v5638_v12, %v5460_v1  ;;  %v5870_v0 = vpop.permute.xlu0 %1972 }
 0x339   :  { %2433 = vrot.lane.b32.xlu0 %v2431_v26, %s5286_s24  ;;  %v1939_v26 = vmul.f32 %v5673_v24, %v5460_v1 }
 0x33b   :  { %4842 = vrot.lane.b32.xlu1 %v4841_v25, %s5289_s0  ;;  %v5872_v17 = vpop.permute.xlu0 %611 }
 0x33d   :  { %2617 = vrot.lane.b32.xlu0 %v2615_v62, %s5286_s24 }
 0x33f   :  { %2272 = vrot.lane.b32.xlu1 %v2270_v29, %s5286_s24 }
 0x341   :  { %1308 = vrot.lane.b32.xlu0 %v1302_v45, %s5299_s28  ;;  %v5879_v45 = vpop.permute.xlu1 %1965 }
 0x343   :  { %2456 = vrot.lane.b32.xlu1 %v2454_v34, %s5286_s24 }
 0x345   :  { %2587 = vrot.lane.b32.xlu0 %v2585_v38, %s5295_s1  ;;  %v5881_v34 = vpop.permute.xlu1 %607 }
 0x349   :  { %2771 = vrot.lane.b32.xlu0 %v2769_v42, %s5295_s1 }
 0x34d   :  { %1478 = vrot.lane.b32.xlu0 %v1463_v49, %s5283_s18 }
 0x351   :  { %4857 = vrot.lane.b32.xlu0 %v4856_v53, %s5300_s29 }
 0x355   :  { %2755 = vrot.lane.b32.xlu0 %v2753_v32, %s5286_s24 }
 0x359   :  { %2939 = vrot.lane.b32.xlu0 %v2937_v20, %s5286_s24 }
 0x35d   :  { %1656 = vrot.lane.b32.xlu0 %v1650_v22, %s5300_s29 }
 0x361   :  { %1824 = vrot.lane.b32.xlu0 %v1822_v21, %s5286_s24 }
 0x365   :  { %2916 = vrot.lane.b32.xlu0 %v2914_v10, %s5286_s24 }
 0x369   :  { %1809 = vrot.lane.b32.xlu0 %v1807_v37, %s5286_s24 }
 0x37b   :  { %v5874_v39 = vpop.permute.xlu0 %4827 }
 0x37f   :  { %v1943_v25 = vpop.permute.xlu0 %1942 }
 0x380   :  { %v1945_v62 = vsub.f32 %v1939_v26, %v1943_v25  ;;  %v6617_v26 = vmov 0.0  }
 0x382   :  { %1954 = vrot.lane.b32.xlu0 %v1945_v62, %s5306_s17 }
 0x383   :  { %v2128_v12 = vpop.permute.xlu0 %2127 }
 0x384   :  { %v2130_v25 = vsub.f32 %v2124_v51, %v2128_v12 }
 0x387   :  { %v783_v23 = vpop.permute.xlu0 %782 }
 0x38b   :  { %v4838_v29 = vpop.permute.xlu0 %4837 }
 0x38c   :  { %v4840_v22 = vunpack.i.h.bf16 %v4838_v29  ;;  %v4839_v21 = vunpack.i.l.bf16 %v4838_v29 }
 0x38f   :  { %v2112_v30 = vpop.permute.xlu0 %2111 }
 0x393   :  { %v5883_v33 = vpop.permute.xlu0 %2295 }
 0x397   :  { %v961_v38 = vpop.permute.xlu0 %960  ;;  %v521_v42 = vpop.xlane.xlu1 %520 }
 0x398   :  { %v522_v46 = vsub.f32 %v5745_v2, %v521_v42  ;;  %v2131_v2 = vmul.f32 %v5684_v40, %v5622_v7 }
 0x39a   :  { %v523_v3 = vmul.f32 1.442695, %v522_v46  ;;  %v986_v46 = vsel %vm451_vm1, %v4839_v21, %v4840_v22 }
 0x39b   :  { %v4833_v41 = vpop.permute.xlu1 %4832  ;;  %v2266_v18 = vpop.permute.xlu0 %2265 }
 0x39c   :  { %4972 = vpow2.f32 %v523_v3  ;;  %v4835_v49 = vunpack.i.h.bf16 %v4833_v41  ;;  %v4834_v47 = vunpack.i.l.bf16 %v4833_v41  ;;  %v2108_v41 = vmul.f32 %v5684_v40, %v5460_v1 }
 0x39d   :  { %v2262_v40 = vmul.f32 %v5700_v57, %v5460_v1 }
 0x39e   :  { %v812_v19 = vsel %vm451_vm1, %v4834_v47, %v4835_v49 }
 0x39f   :  { %v5887_v53 = vpop.permute.xlu1 %1949  ;;  %v815_v32 = vpack.c.bf16 %v812_v19, %v812_v19  ;;  %v2450_v10 = vpop.permute.xlu0 %2449  ;;  %v2268_v21 = vsub.f32 %v2262_v40, %v2266_v18  ;;  %v2446_v40 = vmul.f32 %v5710_v5, %v5622_v7 }
 0x3a1   :  { %v820_v20 = vsel %vm471_vm2, %v815_v32, 0  ;;  %v989_v32 = vpack.c.bf16 %v986_v46, %v986_v46 }
 0x3a2   :  { %4608 = vmatpush3.bf16.xpose.msra.mxu0 %v820_v20  ;;  %v2114_v20 = vadd.f32 %v2112_v30, %v2108_v41 }
 0x3a3   :  { %v2135_v37 = vpop.permute.xlu1 %2134  ;;  %4619 = vmatprep.subr.bf16.mxu0 %v6617_v26  ;;  %v5902_v47 = vpop.permute.xlu0 %1130 }
 0x3a4   :  { %v2137_v62 = vadd.f32 %v2135_v37, %v2131_v2 }
 0x3a6   :  { %v4866_v42 = vpack.i.bf16 %v2137_v62, %v2130_v25 }
 0x3a7   :  { %v787_v3 = vpop.permute.xlu1 %786  ;;  %v5915_v30 = vpop.permute.xlu0 %4847 }
 0x3a8   :  { %v789_v49 = vsel %vm451_vm1, %v783_v23, %v787_v3  ;;  %4867 = vrot.lane.b32.xlu0 %v4866_v42, %s5302_s13  ;;  %v994_v23 = vsel %vm471_vm2, %v989_v32, 0 }
 0x3a9   :  { %v5900_v29 = vpop.eup %4972  ;;  %v813_v19 = vmul.f32 0.25, %v789_v49  ;;  %v1119_v49 = vmul.f32 %v5694_v50, %v5458_v61 }
 0x3aa   :  { %v525_v12 = vsel %vm451_vm1, %v5900_v29, 0.0 }
 0x3ab   :  { %v814_v51 = vpack.c.bf16 %v813_v19, %v813_v19  ;;  %526 = vadd.xlane.f32.xlu1 %v525_v12  ;;  %v5906_v22 = vpop.permute.xlu1 %2104  ;;  %v2434_v62 = vpop.permute.xlu0 %2433  ;;  %v1128_v19 = vadd.f32 %v5696_v54, %v1119_v49  ;;  %v2453_v54 = vmul.f32 %v5694_v50, %v5622_v7  ;;  %v1486_v49 = vmul.f32 %v5708_v4, %v5456_v60 }
 0x3ac   :  { %2120 = vrot.lane.b32.xlu0 %v2114_v20, %s5302_s13 }
 0x3ad   :  { %4610 = vmatmul.mubr.msk.bf16.vlgmr.msra.gmra.mxu0 %vm471_vm2, %v814_v51 }
 0x3ae   :  { %4620 = vmatpush3.bf16.xpose.msra.mxu0 %v994_v23  ;;  %4621 = vmatprep.mubr.msk.bf16.mxu0 %vm5294_vm0, %v6617_v26  ;;  %v2424_v23 = vmul.f32 %v5564_v44, %v5460_v1  ;;  %v2430_v44 = vmul.f32 %v5694_v50, %v5460_v1 }
 0x3af   :  { %v5917_v2 = vpop.permute.xlu1 %2288  ;;  %4631 = vmatprep.subr.bf16.mxu0 %v6617_v26  ;;  %v5929_v20 = vpop.permute.xlu0 %2617 }
 0x3b0   :  { %2277 = vrot.lane.b32.xlu0 %v2268_v21, %s5304_s15 }
 0x3b3   :  { %v957_v37 = vpop.permute.xlu1 %956 }
 0x3b4   :  { %v963_v25 = vsel %vm451_vm1, %v957_v37, %v961_v38  ;;  %v2452_v37 = vsub.f32 %v2446_v40, %v2450_v10 }
 0x3b5   :  { %v987_v42 = vmul.f32 0.25, %v963_v25 }
 0x3b7   :  { %v988_v46 = vpack.c.bf16 %v987_v42, %v987_v42  ;;  %v4843_v3 = vpop.permute.xlu1 %4842  ;;  %v5943_v42 = vpop.permute.xlu0 %1308 }
 0x3b8   :  { %v4845_v18 = vunpack.i.h.bf16 %v4843_v3  ;;  %v4844_v41 = vunpack.i.l.bf16 %v4843_v3  ;;  %v2608_v3 = vmul.f32 %v5583_v52, %v5622_v7 }
 0x3b9   :  { %4622 = vmatmul.mubr.msk.bf16.vlgmr.msra.gmra.mxu0 %vm471_vm2, %v988_v46 }
 0x3ba   :  { %v1160_v32 = vsel %vm451_vm1, %v4844_v41, %v4845_v18  ;;  %4633 = vmatprep.mubr.msk.bf16.mxu0 %vm5294_vm0, %v6617_v26  ;;  %v1280_v18 = vmul.f32 %v5720_v14, %v5458_v61  ;;  %v1493_v41 = vmul.f32 %v5712_v9, %v5456_v60  ;;  %v2592_v60 = vmul.f32 %v5593_v55, %v5460_v1 }
 0x3bb   :  { %v5931_v38 = vpop.permute.xlu1 %2272  ;;  %v1163_v12 = vpack.c.bf16 %v1160_v32, %v1160_v32  ;;  %v2588_v32 = vpop.permute.xlu0 %2587  ;;  %v2930_v55 = vmul.f32 %v5632_v11, %v5622_v7 }
 0x3bc   :  { %1134 = vrot.lane.b32.xlu1 %v1128_v19, %s5289_s0  ;;  %v1289_v10 = vsub.f32 %v1280_v18, %v5702_v59  ;;  %v1499_v52 = vadd.f32 %v5823_v36, %v1493_v41  ;;  %v2436_v19 = vadd.f32 %v2434_v62, %v2430_v44  ;;  %v2776_v59 = vmul.f32 %v5619_v6, %v5622_v7 }
 0x3bd   :  { %v1168_v51 = vsel %vm471_vm2, %v1163_v12, 0  ;;  %v1492_v12 = vsub.f32 %v1486_v49, %v5814_v28  ;;  %v1467_v28 = vmul.f32 %v5712_v9, %v5458_v61  ;;  %v2746_v62 = vmul.f32 %v5610_v63, %v5460_v1 }
 0x3be   :  { %4632 = vmatpush3.bf16.xpose.msra.mxu0 %v1168_v51  ;;  %v2584_v51 = vmul.f32 %v5720_v14, %v5460_v1  ;;  %v1628_v6 = vmul.f32 %v5722_v31, %v5458_v61  ;;  %v2907_v63 = vmul.f32 %v5632_v11, %v5460_v1  ;;  %v1962_v61 = vmul.f32 %v5673_v24, %v5622_v7 }
 0x3bf   :  { %v2457_v21 = vpop.permute.xlu1 %2456  ;;  %4643 = vmatprep.subr.bf16.mxu0 %v6617_v26  ;;  %v4851_v40 = vpack.i.bf16 %v1499_v52, %v1492_v12  ;;  %v1476_v36 = vadd.f32 %v5718_v13, %v1467_v28  ;;  %v1815_v13 = vmul.f32 %v5453_v58, %v5622_v7  ;;  %v1946_v11 = vmul.f32 %v5678_v27, %v5460_v1 }
 0x3c0   :  { %v2459_v25 = vadd.f32 %v2457_v21, %v2453_v54  ;;  %2426 = vrot.lane.b32.xlu1 %v2424_v23, %s5295_s1  ;;  %v2590_v50 = vsub.f32 %v2584_v51, %v2588_v32  ;;  %v1637_v54 = vsub.f32 %v1628_v6, %v5726_v16  ;;  %v1969_v23 = vmul.f32 %v5678_v27, %v5622_v7 }
 0x3c1   :  { %v1800_v21 = vmul.f32 %v5453_v58, %v5460_v1  ;;  %v2101_v24 = vmul.f32 %v5692_v48, %v5460_v1  ;;  %v2292_v58 = vmul.f32 %v5688_v43, %v5622_v7  ;;  %v2269_v48 = vmul.f32 %v5688_v43, %v5460_v1 }
 0x3c2   :  { %v4876_v46 = vpack.i.bf16 %v2459_v25, %v2452_v37  ;;  %v1975_v16 = vadd.f32 %v5870_v0, %v1969_v23  ;;  %v1968_v37 = vsub.f32 %v1962_v61, %v5879_v45  ;;  %v2285_v0 = vmul.f32 %v5700_v57, %v5622_v7 }
 0x3c3   :  { %v2107_v45 = vsub.f32 %v2101_v24, %v5906_v22  ;;  %v2298_v27 = vadd.f32 %v5883_v33, %v2292_v58  ;;  %v2275_v57 = vadd.f32 %v5931_v38, %v2269_v48  ;;  %v4850_v18 = vunpack.i.h.bf16 %v5915_v30 }
 0x3c4   :  { %2610 = vrot.lane.b32.xlu1 %v2608_v3, %s5295_s1  ;;  %4877 = vrot.lane.b32.xlu0 %v4876_v46, %s5289_s0  ;;  %v4861_v25 = vpack.i.bf16 %v1975_v16, %v1968_v37  ;;  %v1952_v46 = vadd.f32 %v5887_v53, %v1946_v11  ;;  %v2291_v3 = vsub.f32 %v2285_v0, %v5917_v2  ;;  %v4849_v22 = vunpack.i.l.bf16 %v5915_v30  ;;  %v6023_v2 = vpop.permute.xlu0 %2771 }
 0x3c5   :  { %v2423_v38 = vmul.f32 %v5710_v5, %v5460_v1  ;;  %v4830_v52 = vunpack.i.h.bf16 %v5874_v39  ;;  %v2607_v5 = vmul.f32 %v5720_v14, %v5622_v7 }
 0x3c6   :  { %v4871_v53 = vpack.i.bf16 %v2298_v27, %v2291_v3  ;;  %v1334_v33 = vsel %vm451_vm1, %v4849_v22, %v4850_v18 }
 0x3c7   :  { %v1337_v49 = vpack.c.bf16 %v1334_v33, %v1334_v33 }
 0x3c8   :  { %1304 = vrot.lane.b32.xlu1 %v1289_v10, %s5299_s28  ;;  %2442 = vrot.lane.b32.xlu0 %v2436_v19, %s5289_s0  ;;  %v4829_v19 = vunpack.i.l.bf16 %v5874_v39  ;;  %v6032_v30 = vpop.permute.xlu0 %1478 }
 0x3ca   :  { %v637_v39 = vsel %vm451_vm1, %v4829_v19, %v4830_v52 }
 0x3cb   :  { %v640_v6 = vpack.c.bf16 %v637_v39, %v637_v39 }
 0x3cc   :  { %4852 = vrot.lane.b32.xlu1 %v4851_v40, %s5283_s18  ;;  %2599 = vrot.lane.b32.xlu0 %v2590_v50, %s5299_s28  ;;  %v1342_v50 = vsel %vm471_vm2, %v1337_v49, 0 }
 0x3d0   :  { %2594 = vrot.lane.b32.xlu1 %v2592_v60, %s5286_s24 }
 0x3d4   :  { %2778 = vrot.lane.b32.xlu1 %v2776_v59, %s5286_s24 }
 0x3d8   :  { %1482 = vrot.lane.b32.xlu1 %v1476_v36, %s5283_s18  ;;  %v4858_v36 = vpop.permute.xlu0 %4857 }
 0x3d9   :  { %v4860_v3 = vunpack.i.h.bf16 %v4858_v36  ;;  %v4859_v27 = vunpack.i.l.bf16 %v4858_v36  ;;  %v1821_v36 = vmul.f32 %v5506_v8, %v5622_v7 }
 0x3db   :  { %v1682_v22 = vsel %vm451_vm1, %v4859_v27, %v4860_v3 }
 0x3dc   :  { %2748 = vrot.lane.b32.xlu1 %v2746_v62, %s5295_s1  ;;  %v2756_v61 = vpop.permute.xlu0 %2755  ;;  %v1685_v49 = vpack.c.bf16 %v1682_v22, %v1682_v22 }
 0x3e0   :  { %2932 = vrot.lane.b32.xlu1 %v2930_v55, %s5295_s1  ;;  %v2940_v0 = vpop.permute.xlu0 %2939 }
 0x3e4   :  { %1652 = vrot.lane.b32.xlu1 %v1637_v54, %s5300_s29 }
 0x3e8   :  { %1817 = vrot.lane.b32.xlu1 %v1815_v13, %s5295_s1 }
 0x3ec   :  { %2909 = vrot.lane.b32.xlu1 %v2907_v63, %s5295_s1  ;;  %v614_v63 = vsel %vm451_vm1, %v5881_v34, %v5872_v17  ;;  %v2591_v17 = vmul.f32 %v5698_v56, %v5460_v1 }
 0x3f0   :  { %1802 = vrot.lane.b32.xlu1 %v1800_v21, %s5295_s1 }
 0x3f4   :  { %4862 = vrot.lane.b32.xlu1 %v4861_v25, %s5306_s17 }
 0x3f8   :  { %1958 = vrot.lane.b32.xlu1 %v1952_v46, %s5306_s17 }
 0x3fc   :  { %2116 = vrot.lane.b32.xlu1 %v2107_v45, %s5302_s13  ;;  %v2768_v45 = vmul.f32 %v5708_v4, %v5622_v7 }
 0x3fe   :  { %v2774_v48 = vsub.f32 %v2768_v45, %v6023_v2  ;;  %v2745_v2 = vmul.f32 %v5708_v4, %v5460_v1 }
 0x400   :  { %4872 = vrot.lane.b32.xlu1 %v4871_v53, %s5304_s15 }
 0x404   :  { %2281 = vrot.lane.b32.xlu1 %v2275_v57, %s5304_s15 }
 0x434   :  { %v527_v41 = vpop.xlane.xlu1 %526 }
 0x435   :  { %4974 = vrcp.f32 %v527_v41  ;;  %v1657_v41 = vpop.permute.xlu0 %1656 }
 0x438   :  { %v1135_v44 = vpop.permute.xlu1 %1134 }
 0x439   :  { %v1137_v43 = vsel %vm451_vm1, %v5902_v47, %v1135_v44  ;;  %v2614_v47 = vmul.f32 %v5698_v56, %v5622_v7  ;;  %v2775_v56 = vmul.f32 %v5712_v9, %v5622_v7  ;;  %v2752_v44 = vmul.f32 %v5712_v9, %v5460_v1 }
 0x43a   :  { %v1161_v10 = vmul.f32 0.25, %v1137_v43  ;;  %v1690_v9 = vsel %vm471_vm2, %v1685_v49, 0 }
 0x43b   :  { %v2620_v60 = vadd.f32 %v5929_v20, %v2614_v47  ;;  %v645_v20 = vsel %vm471_vm2, %v640_v6, 0 }
 0x43c   :  { %v1162_v32 = vpack.c.bf16 %v1161_v10, %v1161_v10  ;;  %v2427_v12 = vpop.permute.xlu1 %2426 }
 0x43d   :  { %v2429_v51 = vsub.f32 %v2423_v38, %v2427_v12  ;;  %v2758_v38 = vadd.f32 %v2756_v61, %v2752_v44  ;;  %v1825_v12 = vpop.permute.xlu0 %1824 }
 0x43e   :  { %4634 = vmatmul.mubr.msk.bf16.vlgmr.msra.gmra.mxu0 %vm471_vm2, %v1162_v32 }
 0x43f   :  { %4644 = vmatpush3.bf16.xpose.msra.mxu0 %v1342_v50  ;;  %2438 = vrot.lane.b32.xlu1 %v2429_v51, %s5289_s0  ;;  %v2929_v51 = vmul.f32 %v5722_v31, %v5622_v7 }
 0x440   :  { %v2611_v40 = vpop.permute.xlu1 %2610  ;;  %4645 = vmatprep.mubr.msk.bf16.mxu0 %vm5294_vm0, %v6617_v26  ;;  %4655 = vmatprep.subr.bf16.mxu0 %v6617_v26 }
 0x441   :  { %v2613_v59 = vsub.f32 %v2607_v5, %v2611_v40  ;;  %v2917_v40 = vpop.permute.xlu0 %2916 }
 0x442   :  { %v4975_v28 = vpop.eup %4974 }
 0x443   :  { %v4881_v62 = vpack.i.bf16 %v2620_v60, %v2613_v59  ;;  %v529_v55 = vmul.f32 %v4975_v28, %v5900_v29  ;;  %v2913_v60 = vmul.f32 %v5724_v15, %v5460_v1 }
 0x444   :  { %v1305_v54 = vpop.permute.xlu1 %1304 }
 0x445   :  { %v1311_v14 = vsel %vm451_vm1, %v1305_v54, %v5943_v42  ;;  %4882 = vrot.lane.b32.xlu1 %v4881_v62, %s5299_s28  ;;  %v530_v13 = vpack.c.bf16 %v529_v55, %v529_v55  ;;  %v638_v42 = vmul.f32 0.25, %v614_v63  ;;  %v2919_v62 = vadd.f32 %v2917_v40, %v2913_v60  ;;  %v5104_v55 = vld [vmem:[#allocation9] sm:$0xff] }
 0x446   :  { %v1335_v23 = vmul.f32 0.25, %v1311_v14  ;;  %v1814_v6 = vmul.f32 %v5104_v55, %v5622_v7 }
 0x447   :  { %4592 = vmatmul.mubr.msk.bf16.vlgmr.msra.gmra.mxu1 %vm451_vm1, %v530_v13  ;;  %v639_v46 = vpack.c.bf16 %v638_v42, %v638_v42  ;;  %v1827_v13 = vadd.f32 %v1825_v12, %v1821_v36  ;;  %v1806_v42 = vmul.f32 %v5506_v8, %v5460_v1 }
 0x448   :  { %v1336_v16 = vpack.c.bf16 %v1335_v23, %v1335_v23  ;;  %4596 = vmatpush3.bf16.xpose.msra.mxu1 %v645_v20  ;;  %v4853_v29 = vpop.permute.xlu1 %4852  ;;  %4597 = vmatprep.mubr.msk.bf16.mxu1 %vm5294_vm0, %v6617_v26  ;;  %v2906_v23 = vmul.f32 %v5722_v31, %v5460_v1  ;;  %v1810_v20 = vpop.permute.xlu0 %1809 }
 0x449   :  { %v4855_v21 = vunpack.i.h.bf16 %v4853_v29  ;;  %v4854_v37 = vunpack.i.l.bf16 %v4853_v29  ;;  %4601 = vmatprep.subr.bf16.mxu1 %v6617_v26  ;;  %v1812_v31 = vadd.f32 %v1810_v20, %v1806_v42 }
 0x44a   :  { %4646 = vmatmul.mubr.msk.bf16.vlgmr.msra.gmra.mxu0 %vm471_vm2, %v1336_v16 }
 0x44b   :  { %v1508_v34 = vsel %vm451_vm1, %v4854_v37, %v4855_v21  ;;  %4657 = vmatprep.mubr.msk.bf16.mxu0 %vm5294_vm0, %v6617_v26  ;;  %v1799_v21 = vmul.f32 %v5104_v55, %v5460_v1 }
 0x44c   :  { %v2595_v25 = vpop.permute.xlu1 %2594  ;;  %v1511_v11 = vpack.c.bf16 %v1508_v34, %v1508_v34  ;;  %v1955_v37 = vpop.permute.xlu0 %1954 }
 0x44d   :  { %v2597_v24 = vadd.f32 %v2595_v25, %v2591_v17 }
 0x44e   :  { %v1516_v58 = vsel %vm471_vm2, %v1511_v11, 0 }
 0x44f   :  { %4598 = vmatmul.mubr.msk.bf16.vlgmr.msra.gmra.mxu1 %vm471_vm2, %v639_v46  ;;  %2603 = vrot.lane.b32.xlu1 %v2597_v24, %s5299_s28 }
 0x450   :  { %4656 = vmatpush3.bf16.xpose.msra.mxu0 %v1516_v58  ;;  %v2779_v53 = vpop.permute.xlu1 %2778  ;;  %4603 = vmatprep.mubr.msk.bf16.mxu1 %vm5294_vm0, %v6617_v26  ;;  %v4868_v24 = vpop.permute.xlu0 %4867 }
 0x451   :  { %v2781_v57 = vadd.f32 %v2779_v53, %v2775_v56  ;;  %4667 = vmatprep.subr.bf16.mxu0 %v6617_v26  ;;  %v4870_v56 = vunpack.i.h.bf16 %v4868_v24  ;;  %v4869_v53 = vunpack.i.l.bf16 %v4868_v24 }
 0x453   :  { %v4886_v18 = vpack.i.bf16 %v2781_v57, %v2774_v48  ;;  %v2146_v44 = vsel %vm451_vm1, %v4869_v53, %v4870_v56 }
 0x454   :  { %v1483_v33 = vpop.permute.xlu1 %1482 }
 0x455   :  { %v1485_v43 = vsel %vm451_vm1, %v6032_v30, %v1483_v33  ;;  %4887 = vrot.lane.b32.xlu0 %v4886_v18, %s5283_s18  ;;  %v2936_v30 = vmul.f32 %v5724_v15, %v5622_v7 }
 0x456   :  { %v1509_v10 = vmul.f32 0.25, %v1485_v43 }
 0x457   :  { %v2942_v50 = vadd.f32 %v2940_v0, %v2936_v30 }
 0x458   :  { %v1510_v52 = vpack.c.bf16 %v1509_v10, %v1509_v10  ;;  %v2749_v19 = vpop.permute.xlu1 %2748 }
 0x459   :  { %v2751_v32 = vsub.f32 %v2745_v2, %v2749_v19  ;;  %2764 = vrot.lane.b32.xlu0 %v2758_v38, %s5283_s18  ;;  %v2149_v38 = vpack.c.bf16 %v2146_v44, %v2146_v44 }
 0x45a   :  { %4658 = vmatmul.mubr.msk.bf16.vlgmr.msra.gmra.mxu0 %vm471_vm2, %v1510_v52 }
 0x45b   :  { %4668 = vmatpush3.bf16.xpose.msra.mxu0 %v1690_v9  ;;  %2760 = vrot.lane.b32.xlu1 %v2751_v32, %s5283_s18 }
 0x45c   :  { %v2933_v4 = vpop.permute.xlu1 %2932  ;;  %4669 = vmatprep.mubr.msk.bf16.mxu0 %vm5294_vm0, %v6617_v26  ;;  %4679 = vmatprep.subr.bf16.mxu0 %v6617_v26 }
 0x45d   :  { %v2935_v47 = vsub.f32 %v2929_v51, %v2933_v4  ;;  %v2154_v4 = vsel %vm471_vm2, %v2149_v38, 0 }
 0x45f   :  { %v4891_v5 = vpack.i.bf16 %v2942_v50, %v2935_v47 }
 0x460   :  { %v1653_v39 = vpop.permute.xlu1 %1652 }
 0x461   :  { %v1659_v59 = vsel %vm451_vm1, %v1653_v39, %v1657_v41  ;;  %4892 = vrot.lane.b32.xlu1 %v4891_v5, %s5300_s29  ;;  %v2121_v41 = vpop.permute.xlu0 %2120 }
 0x462   :  { %v1683_v28 = vmul.f32 0.25, %v1659_v59 }
 0x464   :  { %v1684_v54 = vpack.c.bf16 %v1683_v28, %v1683_v28  ;;  %v1818_v14 = vpop.permute.xlu1 %1817 }
 0x465   :  { %v1820_v63 = vsub.f32 %v1814_v6, %v1818_v14  ;;  %2925 = vrot.lane.b32.xlu1 %v2919_v62, %s5300_s29  ;;  %v2278_v52 = vpop.permute.xlu0 %2277 }
 0x466   :  { %4670 = vmatmul.mubr.msk.bf16.vlgmr.msra.gmra.mxu0 %vm471_vm2, %v1684_v54 }
 0x467   :  { %v1828_v15 = vsel %vm451_vm1, %v1820_v63, %v1827_v13  ;;  %4681 = vmatprep.mubr.msk.bf16.mxu0 %vm5294_vm0, %v6617_v26 }
 0x468   :  { %v1831_v61 = vpack.c.bf16 %v1828_v15, %v1828_v15  ;;  %v2910_v16 = vpop.permute.xlu1 %2909 }
 0x469   :  { %v2912_v7 = vsub.f32 %v2906_v23, %v2910_v16  ;;  %v4878_v5 = vpop.permute.xlu0 %4877 }
 0x46a   :  { %v1836_v29 = vsel %vm471_vm2, %v1831_v61, 0  ;;  %v4880_v59 = vunpack.i.h.bf16 %v4878_v5  ;;  %v4879_v28 = vunpack.i.l.bf16 %v4878_v5 }
 0x46b   :  { %2921 = vrot.lane.b32.xlu0 %v2912_v7, %s5300_s29  ;;  %4680 = vmatpush3.bf16.xpose.msra.mxu0 %v1836_v29 }
 0x46c   :  { %v1803_v17 = vpop.permute.xlu1 %1802  ;;  %4691 = vmatprep.subr.bf16.mxu0 %v6617_v26  ;;  %v2468_v14 = vsel %vm451_vm1, %v4879_v28, %v4880_v59 }
 0x46d   :  { %v1805_v34 = vsub.f32 %v1799_v21, %v1803_v17  ;;  %v856_v25 = vpop.f32.mrf.mxu0  ;;  %v2471_v23 = vpack.c.bf16 %v2468_v14, %v2468_v14  ;;  %v2443_v16 = vpop.permute.xlu0 %2442 }
 0x46e   :  { %v6132_v62 = vsel %vm5736_vm4, %v856_v25, -1e+30 }
 0x46f   :  { %v1813_v11 = vsel %vm451_vm1, %v1805_v34, %v1812_v31  ;;  %v4611_v46 = vpop.f32.mrf.mxu0  ;;  %v863_v13 = vsel %vm451_vm1, %v6132_v62, -inf  ;;  %v2476_v61 = vsel %vm471_vm2, %v2471_v23, 0 }
 0x470   :  { %v1829_v0 = vmul.f32 0.25, %v1813_v11  ;;  %v4863_v58 = vpop.permute.xlu1 %4862 }
 0x471   :  { %v4865_v45 = vunpack.i.h.bf16 %v4863_v58  ;;  %v4864_v8 = vunpack.i.l.bf16 %v4863_v58  ;;  %v859_v3 = vpop.f32.mrf.mxu0  ;;  %v2600_v46 = vpop.permute.xlu0 %2599 }
 0x472   :  { %v1830_v27 = vpack.c.bf16 %v1829_v0, %v1829_v0 }
 0x473   :  { %v4612_v1 = vpop.f32.mrf.mxu0  ;;  %v1984_v48 = vsel %vm451_vm1, %v4864_v8, %v4865_v45 }
 0x474   :  { %v1959_v57 = vpop.permute.xlu1 %1958  ;;  %4682 = vmatmul.mubr.msk.bf16.vlgmr.msra.gmra.mxu0 %vm471_vm2, %v1830_v27  ;;  %v1987_v18 = vpack.c.bf16 %v1984_v48, %v1984_v48 }
 0x475   :  { %v1961_v22 = vsel %vm451_vm1, %v1955_v37, %v1959_v57  ;;  %4693 = vmatprep.mubr.msk.bf16.mxu0 %vm5294_vm0, %v6617_v26 }
 0x476   :  { %v1992_v33 = vsel %vm471_vm2, %v1987_v18, 0  ;;  %v1985_v43 = vmul.f32 0.25, %v1961_v22 }
 0x477   :  { %4692 = vmatpush3.bf16.xpose.msra.mxu0 %v1992_v33 }
 0x478   :  { %v2117_v10 = vpop.permute.xlu1 %2116  ;;  %4703 = vmatprep.subr.bf16.mxu0 %v6617_v26  ;;  %v1986_v19 = vpack.c.bf16 %v1985_v43, %v1985_v43 }
 0x479   :  { %v1030_v49 = vpop.f32.mrf.mxu0  ;;  %v2123_v12 = vsel %vm451_vm1, %v2117_v10, %v2121_v41 }
 0x47a   :  { %v2147_v40 = vmul.f32 0.25, %v2123_v12  ;;  %v6137_v6 = vsel %vm5736_vm4, %v1030_v49, -1e+30 }
 0x47b   :  { %v4623_v2 = vpop.f32.mrf.mxu0  ;;  %v1037_v15 = vsel %vm451_vm1, %v6137_v6, -inf }
 0x47c   :  { %v4873_v32 = vpop.permute.xlu1 %4872  ;;  %v2148_v36 = vpack.c.bf16 %v2147_v40, %v2147_v40 }
 0x47d   :  { %v4875_v9 = vunpack.i.h.bf16 %v4873_v32  ;;  %v4874_v30 = vunpack.i.l.bf16 %v4873_v32  ;;  %v1033_v51 = vpop.f32.mrf.mxu0 }
 0x47e   :  { %4694 = vmatmul.mubr.msk.bf16.vlgmr.msra.gmra.mxu0 %vm471_vm2, %v1986_v19 }
 0x47f   :  { %v4624_v50 = vpop.f32.mrf.mxu0  ;;  %4704 = vmatpush3.bf16.xpose.msra.mxu0 %v2154_v4  ;;  %4705 = vmatprep.mubr.msk.bf16.mxu0 %vm5294_vm0, %v6617_v26  ;;  %v2307_v47 = vsel %vm451_vm1, %v4874_v30, %v4875_v9 }
 0x480   :  { %4715 = vmatprep.subr.bf16.mxu0 %v6617_v26  ;;  %v2282_v39 = vpop.permute.xlu1 %2281  ;;  %v2310_v60 = vpack.c.bf16 %v2307_v47, %v2307_v47 }
 0x481   :  { %v2284_v55 = vsel %vm451_vm1, %v2278_v52, %v2282_v39 }
 0x482   :  { %v2315_v54 = vsel %vm471_vm2, %v2310_v60, 0  ;;  %v2308_v63 = vmul.f32 0.25, %v2284_v55 }
 0x484   :  { %v2309_v20 = vpack.c.bf16 %v2308_v63, %v2308_v63 }
 0x486   :  { %4706 = vmatmul.mubr.msk.bf16.vlgmr.msra.gmra.mxu0 %vm471_vm2, %v2148_v36 }
 0x487   :  { %4716 = vmatpush3.bf16.xpose.msra.mxu0 %v2315_v54  ;;  %4717 = vmatprep.mubr.msk.bf16.mxu0 %vm5294_vm0, %v6617_v26 }
 0x488   :  { %4727 = vmatprep.subr.bf16.mxu0 %v6617_v26 }
 0x489   :  { %864 = vmax.xlane.f32.xlu1 %v863_v13 }
 0x48a   :  { %1038 = vmax.xlane.f32.xlu0 %v1037_v15 }
 0x48e   :  { %4718 = vmatmul.mubr.msk.bf16.vlgmr.msra.gmra.mxu0 %vm471_vm2, %v2309_v20 }
 0x48f   :  { %4728 = vmatpush3.bf16.xpose.msra.mxu0 %v2476_v61  ;;  %4729 = vmatprep.mubr.msk.bf16.mxu0 %vm5294_vm0, %v6617_v26 }
 0x490   :  { %4739 = vmatprep.subr.bf16.mxu0 %v6617_v26 }
 0x4b1   :  { %v2439_v7 = vpop.permute.xlu1 %2438 }
 0x4b2   :  { %v2445_v29 = vsel %vm451_vm1, %v2439_v7, %v2443_v16 }
 0x4b3   :  { %v2469_v42 = vmul.f32 0.25, %v2445_v29 }
 0x4b5   :  { %v2470_v21 = vpack.c.bf16 %v2469_v42, %v2469_v42 }
 0x4b7   :  { %v4883_v37 = vpop.permute.xlu1 %4882  ;;  %4730 = vmatmul.mubr.msk.bf16.vlgmr.msra.gmra.mxu0 %vm471_vm2, %v2470_v21 }
 0x4b8   :  { %v4885_v17 = vunpack.i.h.bf16 %v4883_v37  ;;  %v4884_v31 = vunpack.i.l.bf16 %v4883_v37  ;;  %4741 = vmatprep.mubr.msk.bf16.mxu0 %vm5294_vm0, %v6617_v26 }
 0x4ba   :  { %v2629_v34 = vsel %vm451_vm1, %v4884_v31, %v4885_v17 }
 0x4bb   :  { %v2632_v25 = vpack.c.bf16 %v2629_v34, %v2629_v34 }
 0x4bd   :  { %v2637_v11 = vsel %vm471_vm2, %v2632_v25, 0 }
 0x4be   :  { %4740 = vmatpush3.bf16.xpose.msra.mxu0 %v2637_v11 }
 0x4bf   :  { %4751 = vmatprep.subr.bf16.mxu0 %v6617_v26 }
 0x4c1   :  { %v2604_v24 = vpop.permute.xlu1 %2603 }
 0x4c2   :  { %v2606_v0 = vsel %vm451_vm1, %v2600_v46, %v2604_v24 }
 0x4c3   :  { %v2630_v58 = vmul.f32 0.25, %v2606_v0 }
 0x4c5   :  { %v2631_v45 = vpack.c.bf16 %v2630_v58, %v2630_v58 }
 0x4c7   :  { %v4888_v8 = vpop.permute.xlu0 %4887  ;;  %4742 = vmatmul.mubr.msk.bf16.vlgmr.msra.gmra.mxu0 %vm471_vm2, %v2631_v45 }
 0x4c8   :  { %v4890_v3 = vunpack.i.h.bf16 %v4888_v8  ;;  %v4889_v27 = vunpack.i.l.bf16 %v4888_v8  ;;  %4753 = vmatprep.mubr.msk.bf16.mxu0 %vm5294_vm0, %v6617_v26 }
 0x4ca   :  { %v2790_v56 = vsel %vm451_vm1, %v4889_v27, %v4890_v3 }
 0x4cb   :  { %v2793_v53 = vpack.c.bf16 %v2790_v56, %v2790_v56  ;;  %v2765_v1 = vpop.permute.xlu0 %2764 }
 0x4cd   :  { %v2761_v48 = vpop.permute.xlu1 %2760  ;;  %v2798_v57 = vsel %vm471_vm2, %v2793_v53, 0 }
 0x4ce   :  { %v2767_v18 = vsel %vm451_vm1, %v2761_v48, %v2765_v1  ;;  %4752 = vmatpush3.bf16.xpose.msra.mxu0 %v2798_v57 }
 0x4cf   :  { %v2791_v22 = vmul.f32 0.25, %v2767_v18  ;;  %4763 = vmatprep.subr.bf16.mxu0 %v6617_v26 }
 0x4d1   :  { %v2792_v41 = vpack.c.bf16 %v2791_v22, %v2791_v22 }
 0x4d3   :  { %v4893_v33 = vpop.permute.xlu1 %4892 }
 0x4d4   :  { %v4895_v44 = vunpack.i.h.bf16 %v4893_v33  ;;  %v4894_v43 = vunpack.i.l.bf16 %v4893_v33 }
 0x4d5   :  { %4754 = vmatmul.mubr.msk.bf16.vlgmr.msra.gmra.mxu0 %vm471_vm2, %v2792_v41 }
 0x4d6   :  { %v2951_v10 = vsel %vm451_vm1, %v4894_v43, %v4895_v44  ;;  %4765 = vmatprep.mubr.msk.bf16.mxu0 %vm5294_vm0, %v6617_v26 }
 0x4d7   :  { %v2954_v49 = vpack.c.bf16 %v2951_v10, %v2951_v10  ;;  %v2926_v2 = vpop.permute.xlu1 %2925 }
 0x4d9   :  { %v2959_v38 = vsel %vm471_vm2, %v2954_v49, 0 }
 0x4da   :  { %4764 = vmatpush3.bf16.xpose.msra.mxu0 %v2959_v38 }
 0x4db   :  { %4775 = vmatprep.subr.bf16.mxu0 %v6617_v26 }
 0x4dd   :  { %v2922_v52 = vpop.permute.xlu0 %2921 }
 0x4de   :  { %v2928_v19 = vsel %vm451_vm1, %v2922_v52, %v2926_v2 }
 0x4df   :  { %v2952_v32 = vmul.f32 0.25, %v2928_v19 }
 0x4e1   :  { %v2953_v12 = vpack.c.bf16 %v2952_v32, %v2952_v32 }
 0x4e3   :  { %4766 = vmatmul.mubr.msk.bf16.vlgmr.msra.gmra.mxu0 %vm471_vm2, %v2953_v12 }
 0x4e4   :  { %4791 = vmatprep.mubr.msk.bf16.mxu0 %vm5294_vm0, %v6617_v26 }
 0x4fe   :  { %v1204_v9 = vpop.f32.mrf.mxu0 }
 0x4ff   :  { %v6181_v30 = vsel %vm5736_vm4, %v1204_v9, -1e+30 }
 0x500   :  { %v1211_v51 = vsel %vm451_vm1, %v6181_v30, -inf  ;;  %v4635_v4 = vpop.f32.mrf.mxu0 }
 0x501   :  { %1212 = vmax.xlane.f32.xlu0 %v1211_v51 }
 0x502   :  { %v1207_v50 = vpop.f32.mrf.mxu0 }
 0x504   :  { %v4636_v47 = vpop.f32.mrf.mxu0 }
 0x507   :  { %v573_v5 = vpop.f32.mrf.mxu1 }
 0x508   :  { %579 = vst.msk [vmem:[#allocation2] sm:$0xff] %vm471_vm2, %v573_v5 }
 0x509   :  { %v4593_v40 = vpop.f32.mrf.mxu1 }
 0x50a   :  { %v1378_v39 = vpop.f32.mrf.mxu0 }
 0x50b   :  { %v6188_v60 = vsel %vm5736_vm4, %v1378_v39, -1e+30  ;;  %v576_v59 = vpop.f32.mrf.mxu1 }
 0x50c   :  { %v1385_v28 = vsel %vm451_vm1, %v6188_v60, -inf  ;;  %v4647_v36 = vpop.f32.mrf.mxu0 }
 0x50d   :  { %1386 = vmax.xlane.f32.xlu1 %v1385_v28  ;;  %v4594_v55 = vpop.f32.mrf.mxu1 }
 0x50e   :  { %v1381_v54 = vpop.f32.mrf.mxu0 }
 0x50f   :  { %v681_v14 = vpop.f32.mrf.mxu1 }
 0x510   :  { %v6194_v13 = vsel %vm5736_vm4, %v681_v14, -1e+30  ;;  %v4648_v63 = vpop.f32.mrf.mxu0 }
 0x511   :  { %v688_v15 = vsel %vm451_vm1, %v6194_v13, -inf  ;;  %v4599_v23 = vpop.f32.mrf.mxu1 }
 0x512   :  { %689 = vmax.xlane.f32.xlu0 %v688_v15  ;;  %v865_v3 = vpop.xlane.xlu1 %864 }
 0x513   :  { %v684_v20 = vpop.f32.mrf.mxu1  ;;  %v866_v56 = vsub.f32 %v6132_v62, %v865_v3  ;;  %v1039_v53 = vpop.xlane.xlu0 %1038 }
 0x514   :  { %v1040_v18 = vsub.f32 %v6137_v6, %v1039_v53 }
 0x515   :  { %v4600_v61 = vpop.f32.mrf.mxu1  ;;  %v867_v57 = vmul.f32 1.442695, %v866_v56 }
 0x516   :  { %v1041_v44 = vmul.f32 1.442695, %v1040_v18  ;;  %v6618_v18 = vld [vmem:[#allocation22_spill] sm:$0xff] }
 0x517   :  { %4976 = vpow2.f32 %v867_v57 }
 0x518   :  { %4978 = vpow2.f32 %v1041_v44 }
 0x51a   :  { %v1552_v16 = vpop.f32.mrf.mxu0 }
 0x51b   :  { %v6200_v7 = vsel %vm5736_vm4, %v1552_v16, -1e+30 }
 0x51c   :  { %v1559_v29 = vsel %vm451_vm1, %v6200_v7, -inf  ;;  %v4659_v42 = vpop.f32.mrf.mxu0 }
 0x51d   :  { %1560 = vmax.xlane.f32.xlu0 %v1559_v29 }
 0x51e   :  { %v1555_v21 = vpop.f32.mrf.mxu0 }
 0x520   :  { %v4660_v37 = vpop.f32.mrf.mxu0 }
 0x524   :  { %v6236_v9 = vpop.eup %4976 }
 0x525   :  { %v869_v50 = vsel %vm451_vm1, %v6236_v9, 0.0  ;;  %v6240_v47 = vpop.eup %4978 }
 0x526   :  { %v1726_v17 = vpop.f32.mrf.mxu0  ;;  %v1043_v5 = vsel %vm451_vm1, %v6240_v47, 0.0 }
 0x527   :  { %v6206_v31 = vsel %vm5736_vm4, %v1726_v17, -1e+30 }
 0x528   :  { %v1733_v34 = vsel %vm451_vm1, %v6206_v31, -inf  ;;  %v4671_v25 = vpop.f32.mrf.mxu0 }
 0x529   :  { %1734 = vmax.xlane.f32.xlu1 %v1733_v34 }
 0x52a   :  { %v1729_v11 = vpop.f32.mrf.mxu0 }
 0x52c   :  { %v4672_v46 = vpop.f32.mrf.mxu0 }
 0x534   :  { %v1872_v24 = vpop.f32.mrf.mxu0 }
 0x535   :  { %v6212_v0 = vsel %vm5736_vm4, %v1872_v24, -1e+30 }
 0x536   :  { %v1879_v58 = vsel %vm451_vm1, %v6212_v0, -inf  ;;  %v4683_v45 = vpop.f32.mrf.mxu0 }
 0x537   :  { %1880 = vmax.xlane.f32.xlu0 %v1879_v58 }
 0x538   :  { %v1875_v8 = vpop.f32.mrf.mxu0 }
 0x53a   :  { %v4684_v27 = vpop.f32.mrf.mxu0 }
 0x53e   :  { %v2028_v1 = vpop.f32.mrf.mxu0 }
 0x53f   :  { %v6219_v48 = vsel %vm5736_vm4, %v2028_v1, -1e+30 }
 0x540   :  { %v2035_v22 = vsel %vm451_vm1, %v6219_v48, -inf  ;;  %v4695_v41 = vpop.f32.mrf.mxu0 }
 0x541   :  { %2036 = vmax.xlane.f32.xlu1 %v2035_v22 }
 0x542   :  { %v2031_v33 = vpop.f32.mrf.mxu0 }
 0x544   :  { %v4696_v43 = vpop.f32.mrf.mxu0 }
 0x546   :  { %v2190_v10 = vpop.f32.mrf.mxu0 }
 0x547   :  { %v6226_v62 = vsel %vm5736_vm4, %v2190_v10, -1e+30 }
 0x548   :  { %v2197_v49 = vsel %vm451_vm1, %v6226_v62, -inf  ;;  %v4707_v38 = vpop.f32.mrf.mxu0 }
 0x549   :  { %2198 = vmax.xlane.f32.xlu0 %v2197_v49 }
 0x54a   :  { %v2193_v6 = vpop.f32.mrf.mxu0 }
 0x54c   :  { %v4708_v2 = vpop.f32.mrf.mxu0 }
 0x54e   :  { %v2351_v52 = vpop.f32.mrf.mxu0 }
 0x54f   :  { %v6232_v19 = vsel %vm5736_vm4, %v2351_v52, -1e+30 }
 0x550   :  { %v2358_v32 = vsel %vm451_vm1, %v6232_v19, -inf  ;;  %v4719_v12 = vpop.f32.mrf.mxu0 }
 0x551   :  { %2359 = vmax.xlane.f32.xlu1 %v2358_v32 }
 0x552   :  { %v2354_v51 = vpop.f32.mrf.mxu0 }
 0x554   :  { %v4720_v4 = vpop.f32.mrf.mxu0 }
 0x555   :  { %870 = vadd.xlane.f32.xlu1 %v869_v50 }
 0x559   :  { %1044 = vadd.xlane.f32.xlu1 %v1043_v5 }
 0x577   :  { %v2512_v40 = vpop.f32.mrf.mxu0 }
 0x578   :  { %v6246_v39 = vsel %vm5736_vm4, %v2512_v40, -1e+30 }
 0x579   :  { %v2519_v59 = vsel %vm451_vm1, %v6246_v39, -inf  ;;  %v4731_v28 = vpop.f32.mrf.mxu0 }
 0x57a   :  { %2520 = vmax.xlane.f32.xlu0 %v2519_v59 }
 0x57b   :  { %v2515_v36 = vpop.f32.mrf.mxu0 }
 0x57d   :  { %v4732_v55 = vpop.f32.mrf.mxu0 }
 0x57e   :  { %v6619_v55 = vld [vmem:[#allocation21_spill] sm:$0xff] }
 0x587   :  { %v2673_v54 = vpop.f32.mrf.mxu0 }
 0x588   :  { %v6252_v14 = vsel %vm5736_vm4, %v2673_v54, -1e+30  ;;  %v6315_v54 = vpack.c.bf16 %v6619_v55, %v6619_v55 }
 0x589   :  { %v2680_v63 = vsel %vm451_vm1, %v6252_v14, -inf  ;;  %v4743_v15 = vpop.f32.mrf.mxu0 }
 0x58a   :  { %v1213_v23 = vpop.xlane.xlu0 %1212  ;;  %2681 = vmax.xlane.f32.xlu0 %v2680_v63 }
 0x58b   :  { %v1214_v20 = vsub.f32 %v6181_v30, %v1213_v23  ;;  %v2676_v61 = vpop.f32.mrf.mxu0 }
 0x58d   :  { %v1215_v16 = vmul.f32 1.442695, %v1214_v20  ;;  %v4744_v29 = vpop.f32.mrf.mxu0 }
 0x58f   :  { %4980 = vpow2.f32 %v1215_v16 }
 0x595   :  { %v2834_v42 = vpop.f32.mrf.mxu0 }
 0x596   :  { %v6259_v21 = vsel %vm5736_vm4, %v2834_v42, -1e+30  ;;  %v1387_v37 = vpop.xlane.xlu1 %1386 }
 0x597   :  { %v2841_v17 = vsel %vm451_vm1, %v6259_v21, -inf  ;;  %v1388_v34 = vsub.f32 %v6188_v60, %v1387_v37  ;;  %v4755_v25 = vpop.f32.mrf.mxu0 }
 0x598   :  { %2842 = vmax.xlane.f32.xlu0 %v2841_v17 }
 0x599   :  { %v1389_v11 = vmul.f32 1.442695, %v1388_v34  ;;  %v2837_v46 = vpop.f32.mrf.mxu0 }
 0x59b   :  { %4982 = vpow2.f32 %v1389_v11  ;;  %v4756_v30 = vpop.f32.mrf.mxu0  ;;  %v690_v57 = vpop.xlane.xlu0 %689 }
 0x59c   :  { %v6264_v24 = vpop.eup %4980  ;;  %v691_v41 = vsub.f32 %v6194_v13, %v690_v57 }
 0x59d   :  { %v1217_v58 = vsel %vm451_vm1, %v6264_v24, 0.0 }
 0x59e   :  { %1218 = vadd.xlane.f32.xlu1 %v1217_v58  ;;  %v692_v44 = vmul.f32 1.442695, %v691_v41 }
 0x5a3   :  { %v2995_v45 = vpop.f32.mrf.mxu0 }
 0x5a4   :  { %v6270_v8 = vsel %vm5736_vm4, %v2995_v45, -1e+30 }
 0x5a5   :  { %v3002_v60 = vsel %vm451_vm1, %v6270_v8, -inf  ;;  %v4767_v3 = vpop.f32.mrf.mxu0 }
 0x5a6   :  { %3003 = vmax.xlane.f32.xlu0 %v3002_v60  ;;  %v1561_v35 = vpop.xlane.xlu0 %1560 }
 0x5a7   :  { %v2998_v27 = vpop.f32.mrf.mxu0  ;;  %v1562_v22 = vsub.f32 %v6200_v7, %v1561_v35 }
 0x5a8   :  { %v6274_v56 = vpop.eup %4982 }
 0x5a9   :  { %v4768_v53 = vpop.f32.mrf.mxu0  ;;  %v1391_v1 = vsel %vm451_vm1, %v6274_v56, 0.0  ;;  %v1563_v33 = vmul.f32 1.442695, %v1562_v22 }
 0x5aa   :  { %1392 = vadd.xlane.f32.xlu1 %v1391_v1 }
 0x5ab   :  { %4984 = vpow2.f32 %v1563_v33 }
 0x5ac   :  { %4986 = vpow2.f32 %v692_v44 }
 0x5b2   :  { %v1735_v6 = vpop.xlane.xlu1 %1734 }
 0x5b3   :  { %v1736_v2 = vsub.f32 %v6206_v31, %v1735_v6 }
 0x5b5   :  { %v1737_v12 = vmul.f32 1.442695, %v1736_v2 }
 0x5b8   :  { %v6284_v43 = vpop.eup %4984 }
 0x5b9   :  { %v1565_v10 = vsel %vm451_vm1, %v6284_v43, 0.0  ;;  %v6288_v49 = vpop.eup %4986 }
 0x5ba   :  { %v694_v38 = vsel %vm451_vm1, %v6288_v49, 0.0 }
 0x5bb   :  { %875 = vrot.lane.b32.xlu1 %v6618_v18, %s5302_s13 }
 0x5bc   :  { %701 = vrot.lane.b32.xlu0 %v6618_v18, %s5306_s17 }
 0x5c0   :  { %v1881_v32 = vpop.xlane.xlu0 %1880 }
 0x5c1   :  { %v1882_v51 = vsub.f32 %v6212_v0, %v1881_v32 }
 0x5c3   :  { %v1883_v4 = vmul.f32 1.442695, %v1882_v51 }
 0x5ca   :  { %v2037_v13 = vpop.xlane.xlu1 %2036 }
 0x5cb   :  { %v2038_v7 = vsub.f32 %v6219_v48, %v2037_v13 }
 0x5cd   :  { %v2039_v52 = vmul.f32 1.442695, %v2038_v7 }
 0x5cf   :  { %4988 = vpow2.f32 %v2039_v52 }
 0x5d0   :  { %4990 = vpow2.f32 %v1737_v12 }
 0x5d1   :  { %4992 = vpow2.f32 %v1883_v4 }
 0x5d2   :  { %v2199_v59 = vpop.xlane.xlu0 %2198 }
 0x5d3   :  { %v2200_v61 = vsub.f32 %v6226_v62, %v2199_v59 }
 0x5d5   :  { %v2201_v29 = vmul.f32 1.442695, %v2200_v61 }
 0x5d7   :  { %4994 = vpow2.f32 %v2201_v29 }
 0x5da   :  { %v2360_v16 = vpop.xlane.xlu1 %2359 }
 0x5db   :  { %1566 = vadd.xlane.f32.xlu0 %v1565_v10  ;;  %v2361_v42 = vsub.f32 %v6232_v19, %v2360_v16 }
 0x5dc   :  { %v6299_v50 = vpop.eup %4988 }
 0x5dd   :  { %v2041_v5 = vsel %vm451_vm1, %v6299_v50, 0.0  ;;  %v6303_v40 = vpop.eup %4990  ;;  %v2362_v37 = vmul.f32 1.442695, %v2361_v42 }
 0x5de   :  { %v1739_v31 = vsel %vm451_vm1, %v6303_v40, 0.0  ;;  %v6307_v48 = vpop.eup %4992  ;;  %v871_v58 = vpop.xlane.xlu1 %870 }
 0x5df   :  { %695 = vadd.xlane.f32.xlu1 %v694_v38  ;;  %v1885_v0 = vsel %vm451_vm1, %v6307_v48, 0.0  ;;  %4996 = vpow2.f32 %v2362_v37 }
 0x5e2   :  { %v1045_v3 = vpop.xlane.xlu1 %1044 }
 0x5e4   :  { %v6341_v19 = vpop.eup %4994 }
 0x5ec   :  { %v6345_v60 = vpop.eup %4996 }
 0x5f0   :  { %1049 = vrot.lane.b32.xlu1 %v6618_v18, %s5304_s15 }
 0x5f1   :  { %1223 = vrot.lane.b32.xlu0 %v6618_v18, %s5289_s0 }
 0x603   :  { %v2521_v28 = vpop.xlane.xlu0 %2520 }
 0x604   :  { %v2522_v17 = vsub.f32 %v6246_v39, %v2521_v28  ;;  %v2203_v39 = vsel %vm451_vm1, %v6341_v19, 0.0 }
 0x606   :  { %v2523_v34 = vmul.f32 1.442695, %v2522_v17 }
 0x608   :  { %4998 = vpow2.f32 %v2523_v34 }
 0x610   :  { %2042 = vadd.xlane.f32.xlu0 %v2041_v5 }
 0x613   :  { %v2682_v36 = vpop.xlane.xlu0 %2681 }
 0x614   :  { %1740 = vadd.xlane.f32.xlu1 %v1739_v31  ;;  %v2683_v25 = vsub.f32 %v6252_v14, %v2682_v36  ;;  %v2364_v14 = vsel %vm451_vm1, %v6345_v60, 0.0 }
 0x616   :  { %v2684_v62 = vmul.f32 1.442695, %v2683_v25 }
 0x618   :  { %1886 = vadd.xlane.f32.xlu1 %v1885_v0  ;;  %5000 = vpow2.f32 %v2684_v62 }
 0x621   :  { %v2843_v63 = vpop.xlane.xlu0 %2842 }
 0x622   :  { %v2844_v11 = vsub.f32 %v6259_v21, %v2843_v63  ;;  %v6349_v21 = vpop.eup %4998 }
 0x624   :  { %v2845_v46 = vmul.f32 1.442695, %v2844_v11 }
 0x625   :  { %v6353_v27 = vpop.eup %5000 }
 0x626   :  { %1745 = vrot.lane.b32.xlu0 %v6618_v18, %s5300_s29  ;;  %5002 = vpow2.f32 %v2845_v46  ;;  %v2686_v1 = vsel %vm451_vm1, %v6353_v27, 0.0 }
 0x627   :  { %v1219_v53 = vpop.xlane.xlu1 %1218 }
 0x629   :  { %1397 = vrot.lane.b32.xlu1 %v6618_v18, %s5299_s28 }
 0x62a   :  { %2048 = vrot.lane.b32.xlu0 %v6315_v54, %s5306_s17 }
 0x62d   :  { %1571 = vrot.lane.b32.xlu1 %v6618_v18, %s5283_s18 }
 0x62e   :  { %2209 = vrot.lane.b32.xlu0 %v6315_v54, %s5302_s13 }
 0x62f   :  { %v3004_v15 = vpop.xlane.xlu0 %3003 }
 0x630   :  { %v3005_v30 = vsub.f32 %v6270_v8, %v3004_v15  ;;  %v2525_v8 = vsel %vm451_vm1, %v6349_v21, 0.0 }
 0x632   :  { %2370 = vrot.lane.b32.xlu0 %v6315_v54, %s5304_s15  ;;  %v3006_v45 = vmul.f32 1.442695, %v3005_v30 }
 0x633   :  { %v702_v23 = vpop.permute.xlu0 %701  ;;  %v6357_v57 = vpop.eup %5002 }
 0x634   :  { %v707_v20 = vsel %vm535_vm3, %v702_v23, 0  ;;  %5004 = vpow2.f32 %v3006_v45  ;;  %v1393_v18 = vpop.xlane.xlu1 %1392  ;;  %v2847_v35 = vsel %vm451_vm1, %v6357_v57, 0.0 }
 0x635   :  { %4602 = vmatpush3.bf16.msra.mxu1 %v707_v20 }
 0x636   :  { %2531 = vrot.lane.b32.xlu0 %v6315_v54, %s5289_s0  ;;  %4613 = vmatprep.subr.bf16.mxu1 %v6617_v26 }
 0x638   :  { %v876_v41 = vpop.permute.xlu1 %875 }
 0x639   :  { %v881_v7 = vsel %vm535_vm3, %v876_v41, 0 }
 0x63a   :  { %2853 = vrot.lane.b32.xlu0 %v6315_v54, %s5283_s18 }
 0x63e   :  { %3014 = vrot.lane.b32.xlu0 %v6315_v54, %s5300_s29 }
 0x641   :  { %v6361_v22 = vpop.eup %5004 }
 0x642   :  { %v3008_v33 = vsel %vm451_vm1, %v6361_v22, 0.0 }
 0x651   :  { %2204 = vadd.xlane.f32.xlu1 %v2203_v39 }
 0x655   :  { %2365 = vadd.xlane.f32.xlu1 %v2364_v14 }
 0x659   :  { %2526 = vadd.xlane.f32.xlu1 %v2525_v8 }
 0x65d   :  { %2687 = vadd.xlane.f32.xlu1 %v2686_v1 }
 0x661   :  { %2848 = vadd.xlane.f32.xlu1 %v2847_v35 }
 0x664   :  { %v1567_v51 = vpop.xlane.xlu0 %1566 }
 0x665   :  { %3009 = vadd.xlane.f32.xlu1 %v3008_v33 }
 0x668   :  { %v696_v44 = vpop.xlane.xlu1 %695  ;;  %v1224_v5 = vpop.permute.xlu0 %1223 }
 0x669   :  { %5006 = vrcp.f32 %v696_v44 }
 0x66a   :  { %5008 = vrcp.f32 %v871_v58 }
 0x66b   :  { %5010 = vrcp.f32 %v1045_v3 }
 0x66c   :  { %5012 = vrcp.f32 %v1219_v53  ;;  %v1050_v52 = vpop.permute.xlu1 %1049 }
 0x66d   :  { %5014 = vrcp.f32 %v1393_v18 }
 0x66e   :  { %5016 = vrcp.f32 %v1567_v51 }
 0x676   :  { %v5007_v10 = vpop.eup %5006  ;;  %2692 = vrot.lane.b32.xlu1 %v6315_v54, %s5299_s28 }
 0x677   :  { %v698_v38 = vmul.f32 %v5007_v10, %v6288_v49  ;;  %v5009_v13 = vpop.eup %5008  ;;  %v1055_v49 = vsel %vm535_vm3, %v1050_v52, 0 }
 0x678   :  { %v873_v2 = vmul.f32 %v5009_v13, %v6236_v9  ;;  %v5011_v12 = vpop.eup %5010  ;;  %v1229_v9 = vsel %vm535_vm3, %v1224_v5, 0 }
 0x679   :  { %v699_v6 = vpack.c.bf16 %v698_v38, %v698_v38  ;;  %v1047_v4 = vmul.f32 %v5011_v12, %v6240_v47  ;;  %v5013_v0 = vpop.eup %5012 }
 0x67a   :  { %v874_v32 = vpack.c.bf16 %v873_v2, %v873_v2  ;;  %v1221_v59 = vmul.f32 %v5013_v0, %v6264_v24  ;;  %v5015_v36 = vpop.eup %5014 }
 0x67b   :  { %4604 = vmatmul.mubr.msk.bf16.vlgmr.msra.gmra.mxu1 %vm451_vm1, %v699_v6  ;;  %v1048_v31 = vpack.c.bf16 %v1047_v4, %v1047_v4  ;;  %v1395_v63 = vmul.f32 %v5015_v36, %v6274_v56  ;;  %v5017_v20 = vpop.eup %5016 }
 0x67c   :  { %4614 = vmatpush3.bf16.msra.mxu1 %v881_v7  ;;  %4615 = vmatprep.mubr.msk.bf16.mxu1 %vm5294_vm0, %v6617_v26  ;;  %v1222_v28 = vpack.c.bf16 %v1221_v59, %v1221_v59  ;;  %v1569_v56 = vmul.f32 %v5017_v20, %v6284_v43  ;;  %v1896_v43 = vsel %vm535_vm3, %v6315_v54, 0 }
 0x67d   :  { %4625 = vmatprep.subr.bf16.mxu1 %v6617_v26  ;;  %v1396_v24 = vpack.c.bf16 %v1395_v63, %v1395_v63 }
 0x67e   :  { %v1570_v37 = vpack.c.bf16 %v1569_v56, %v1569_v56 }
 0x683   :  { %4616 = vmatmul.mubr.msk.bf16.vlgmr.msra.gmra.mxu1 %vm451_vm1, %v874_v32 }
 0x684   :  { %4626 = vmatpush3.bf16.msra.mxu1 %v1055_v49  ;;  %4627 = vmatprep.mubr.msk.bf16.mxu1 %vm5294_vm0, %v6617_v26 }
 0x685   :  { %4637 = vmatprep.subr.bf16.mxu1 %v6617_v26 }
 0x68b   :  { %4628 = vmatmul.mubr.msk.bf16.vlgmr.msra.gmra.mxu1 %vm451_vm1, %v1048_v31 }
 0x68c   :  { %4638 = vmatpush3.bf16.msra.mxu1 %v1229_v9  ;;  %4639 = vmatprep.mubr.msk.bf16.mxu1 %vm5294_vm0, %v6617_v26 }
 0x68d   :  { %4649 = vmatprep.subr.bf16.mxu1 %v6617_v26 }
 0x693   :  { %4640 = vmatmul.mubr.msk.bf16.vlgmr.msra.gmra.mxu1 %vm451_vm1, %v1222_v28 }
 0x694   :  { %4651 = vmatprep.mubr.msk.bf16.mxu1 %vm5294_vm0, %v6617_v26 }
 0x699   :  { %v2043_v61 = vpop.xlane.xlu0 %2042 }
 0x69d   :  { %v1741_v47 = vpop.xlane.xlu1 %1740  ;;  %v1746_v42 = vpop.permute.xlu0 %1745 }
 0x69e   :  { %5018 = vrcp.f32 %v1741_v47  ;;  %v1751_v34 = vsel %vm535_vm3, %v1746_v42, 0 }
 0x6a1   :  { %v1887_v55 = vpop.xlane.xlu1 %1886  ;;  %v2049_v30 = vpop.permute.xlu0 %2048 }
 0x6a2   :  { %5020 = vrcp.f32 %v1887_v55  ;;  %v6620_v55 = vmov 0  }
 0x6a3   :  { %5022 = vrcp.f32 %v2043_v61 }
 0x6a5   :  { %v1398_v15 = vpop.permute.xlu1 %1397  ;;  %v2210_v39 = vpop.permute.xlu0 %2209 }
 0x6a6   :  { %v1403_v23 = vsel %vm535_vm3, %v1398_v15, 0  ;;  %v2215_v3 = vsel %vm535_vm3, %v2210_v39, 0 }
 0x6a7   :  { %4650 = vmatpush3.bf16.msra.mxu1 %v1403_v23 }
 0x6a8   :  { %4661 = vmatprep.subr.bf16.mxu1 %v6617_v26 }
 0x6a9   :  { %v1572_v16 = vpop.permute.xlu1 %1571  ;;  %v2371_v35 = vpop.permute.xlu0 %2370 }
 0x6aa   :  { %v1577_v29 = vsel %vm535_vm3, %v1572_v16, 0  ;;  %4652 = vmatmul.mubr.msk.bf16.vlgmr.msra.gmra.mxu1 %vm451_vm1, %v1396_v24  ;;  %v2376_v44 = vsel %vm535_vm3, %v2371_v35, 0 }
 0x6ab   :  { %4662 = vmatpush3.bf16.msra.mxu1 %v1577_v29  ;;  %4663 = vmatprep.mubr.msk.bf16.mxu1 %vm5294_vm0, %v6617_v26  ;;  %v5019_v17 = vpop.eup %5018 }
 0x6ac   :  { %4673 = vmatprep.subr.bf16.mxu1 %v6617_v26  ;;  %v1743_v25 = vmul.f32 %v5019_v17, %v6303_v40  ;;  %v2054_v40 = vsel %vm535_vm3, %v2049_v30, 0 }
 0x6ad   :  { %v2532_v6 = vpop.permute.xlu0 %2531 }
 0x6ae   :  { %v1744_v62 = vpack.c.bf16 %v1743_v25, %v1743_v25  ;;  %v2537_v2 = vsel %vm535_vm3, %v2532_v6, 0  ;;  %v4928_v6 = vld [vmem:[#allocation11 + $0x38] sm:$0xff]  }
 0x6af   :  { %v5021_v11 = vpop.eup %5020  ;;  %4776 = vmatpush3.bf16.msra.mxu0 %v4928_v6 }
 0x6b0   :  { %v1889_v46 = vmul.f32 %v5021_v11, %v6307_v48  ;;  %v5023_v45 = vpop.eup %5022  ;;  %4777 = vmatprep.subr.bf16.mxu0 %v6617_v26 }
 0x6b1   :  { %v2045_v54 = vmul.f32 %v5023_v45, %v6299_v50  ;;  %v2854_v4 = vpop.permute.xlu0 %2853 }
 0x6b2   :  { %4664 = vmatmul.mubr.msk.bf16.vlgmr.msra.gmra.mxu1 %vm451_vm1, %v1570_v37  ;;  %v1890_v58 = vpack.c.bf16 %v1889_v46, %v1889_v46 }
 0x6b3   :  { %4674 = vmatpush3.bf16.msra.mxu1 %v1751_v34  ;;  %4675 = vmatprep.mubr.msk.bf16.mxu1 %vm5294_vm0, %v6617_v26  ;;  %v2046_v14 = vpack.c.bf16 %v2045_v54, %v2045_v54 }
 0x6b4   :  { %4685 = vmatprep.subr.bf16.mxu1 %v6617_v26 }
 0x6b5   :  { %v3015_v9 = vpop.permute.xlu0 %3014 }
 0x6ba   :  { %4676 = vmatmul.mubr.msk.bf16.vlgmr.msra.gmra.mxu1 %vm451_vm1, %v1744_v62 }
 0x6bb   :  { %4686 = vmatpush3.bf16.msra.mxu1 %v1896_v43  ;;  %4687 = vmatprep.mubr.msk.bf16.mxu1 %vm5294_vm0, %v6617_v26 }
 0x6bc   :  { %4697 = vmatprep.subr.bf16.mxu1 %v6617_v26 }
 0x6c2   :  { %4688 = vmatmul.mubr.msk.bf16.vlgmr.msra.gmra.mxu1 %vm451_vm1, %v1890_v58 }
 0x6c3   :  { %4698 = vmatpush3.bf16.msra.mxu1 %v2054_v40  ;;  %4699 = vmatprep.mubr.msk.bf16.mxu1 %vm5294_vm0, %v6617_v26 }
 0x6c4   :  { %4709 = vmatprep.subr.bf16.mxu1 %v6617_v26 }
 0x6ca   :  { %4700 = vmatmul.mubr.msk.bf16.vlgmr.msra.gmra.mxu1 %vm451_vm1, %v2046_v14 }
 0x6cb   :  { %4710 = vmatpush3.bf16.msra.mxu1 %v2215_v3  ;;  %4711 = vmatprep.mubr.msk.bf16.mxu1 %vm5294_vm0, %v6617_v26 }
 0x6cc   :  { %4721 = vmatprep.subr.bf16.mxu1 %v6617_v26 }
 0x6da   :  { %v2205_v48 = vpop.xlane.xlu1 %2204 }
 0x6db   :  { %5024 = vrcp.f32 %v2205_v48 }
 0x6de   :  { %v2366_v8 = vpop.xlane.xlu1 %2365 }
 0x6df   :  { %5026 = vrcp.f32 %v2366_v8 }
 0x6e2   :  { %v2527_v53 = vpop.xlane.xlu1 %2526 }
 0x6e3   :  { %5028 = vrcp.f32 %v2527_v53 }
 0x6e6   :  { %v2688_v50 = vpop.xlane.xlu1 %2687 }
 0x6e7   :  { %5030 = vrcp.f32 %v2688_v50 }
 0x6e8   :  { %v5025_v1 = vpop.eup %5024 }
 0x6e9   :  { %v2207_v18 = vmul.f32 %v5025_v1, %v6341_v19 }
 0x6ea   :  { %v2849_v10 = vpop.xlane.xlu1 %2848 }
 0x6eb   :  { %v2208_v41 = vpack.c.bf16 %v2207_v18, %v2207_v18  ;;  %5032 = vrcp.f32 %v2849_v10 }
 0x6ec   :  { %v5027_v33 = vpop.eup %5026 }
 0x6ed   :  { %4712 = vmatmul.mubr.msk.bf16.vlgmr.msra.gmra.mxu1 %vm451_vm1, %v2208_v41  ;;  %v2368_v38 = vmul.f32 %v5027_v33, %v6345_v60 }
 0x6ee   :  { %4722 = vmatpush3.bf16.msra.mxu1 %v2376_v44  ;;  %4723 = vmatprep.mubr.msk.bf16.mxu1 %vm5294_vm0, %v6617_v26  ;;  %v3010_v7 = vpop.xlane.xlu1 %3009 }
 0x6ef   :  { %4733 = vmatprep.subr.bf16.mxu1 %v6617_v26  ;;  %v2369_v13 = vpack.c.bf16 %v2368_v38, %v2368_v38  ;;  %5034 = vrcp.f32 %v3010_v7 }
 0x6f0   :  { %v5029_v19 = vpop.eup %5028 }
 0x6f1   :  { %v2529_v52 = vmul.f32 %v5029_v19, %v6349_v21  ;;  %v2859_v21 = vsel %vm535_vm3, %v2854_v4, 0  ;;  %v4929_v19 = vld [vmem:[#allocation11 + $0x30] sm:$0xff]  }
 0x6f2   :  { %v2693_v32 = vpop.permute.xlu1 %2692  ;;  %4778 = vmatpush3.bf16.msra.mxu0 %v4929_v19  ;;  %v5105_v19 = vld [vmem:[#allocation3] sm:$0xff] }
 0x6f3   :  { %v2530_v12 = vpack.c.bf16 %v2529_v52, %v2529_v52  ;;  %v2698_v51 = vsel %vm535_vm3, %v2693_v32, 0  ;;  %4779 = vmatprep.subr.bf16.mxu0 %v6617_v26 }
 0x6f4   :  { %v5031_v60 = vpop.eup %5030 }
 0x6f5   :  { %4724 = vmatmul.mubr.msk.bf16.vlgmr.msra.gmra.mxu1 %vm451_vm1, %v2369_v13  ;;  %v2690_v49 = vmul.f32 %v5031_v60, %v6353_v27  ;;  %v3020_v27 = vsel %vm535_vm3, %v3015_v9, 0  ;;  %v4933_v9 = vld [vmem:[#allocation11 + $0x10] sm:$0xff]  }
 0x6f6   :  { %4734 = vmatpush3.bf16.msra.mxu1 %v2537_v2  ;;  %4735 = vmatprep.mubr.msk.bf16.mxu1 %vm5294_vm0, %v6617_v26 }
 0x6f7   :  { %4745 = vmatprep.subr.bf16.mxu1 %v6617_v26  ;;  %v2691_v5 = vpack.c.bf16 %v2690_v49, %v2690_v49 }
 0x6f8   :  { %v5033_v31 = vpop.eup %5032 }
 0x6f9   :  { %v2851_v0 = vmul.f32 %v5033_v31, %v6357_v57 }
 0x6fb   :  { %v2852_v59 = vpack.c.bf16 %v2851_v0, %v2851_v0 }
 0x6fc   :  { %v5035_v28 = vpop.eup %5034 }
 0x6fd   :  { %4736 = vmatmul.mubr.msk.bf16.vlgmr.msra.gmra.mxu1 %vm451_vm1, %v2530_v12  ;;  %v3012_v47 = vmul.f32 %v5035_v28, %v6361_v22  ;;  %v4930_v12 = vld [vmem:[#allocation11 + $0x28] sm:$0xff]  }
 0x6fe   :  { %4746 = vmatpush3.bf16.msra.mxu1 %v2698_v51  ;;  %4747 = vmatprep.mubr.msk.bf16.mxu1 %vm5294_vm0, %v6617_v26  ;;  %v4931_v51 = vld [vmem:[#allocation11 + $0x20] sm:$0xff]  }
 0x6ff   :  { %4757 = vmatprep.subr.bf16.mxu1 %v6617_v26  ;;  %v3013_v36 = vpack.c.bf16 %v3012_v47, %v3012_v47  ;;  %4780 = vmatpush3.bf16.msra.mxu0 %v4930_v12 }
 0x700   :  { %4781 = vmatprep.subr.bf16.mxu0 %v6617_v26 }
 0x703   :  { %4782 = vmatpush3.bf16.msra.mxu0 %v4931_v51 }
 0x704   :  { %4783 = vmatprep.subr.bf16.mxu0 %v6617_v26 }
 0x705   :  { %4748 = vmatmul.mubr.msk.bf16.vlgmr.msra.gmra.mxu1 %vm451_vm1, %v2691_v5 }
 0x706   :  { %4758 = vmatpush3.bf16.msra.mxu1 %v2859_v21  ;;  %4759 = vmatprep.mubr.msk.bf16.mxu1 %vm5294_vm0, %v6617_v26  ;;  %v4932_v21 = vld [vmem:[#allocation11 + $0x18] sm:$0xff]  }
 0x707   :  { %4769 = vmatprep.subr.bf16.mxu1 %v6617_v26  ;;  %4784 = vmatpush3.bf16.msra.mxu0 %v4932_v21 }
 0x708   :  { %4785 = vmatprep.subr.bf16.mxu0 %v6617_v26 }
 0x70b   :  { %4786 = vmatpush3.bf16.msra.mxu0 %v4933_v9 }
 0x70c   :  { %4787 = vmatprep.subr.bf16.mxu0 %v6617_v26 }
 0x70d   :  { %4760 = vmatmul.mubr.msk.bf16.vlgmr.msra.gmra.mxu1 %vm451_vm1, %v2852_v59 }
 0x70e   :  { %4770 = vmatpush3.bf16.msra.mxu1 %v3020_v27  ;;  %4771 = vmatprep.mubr.msk.bf16.mxu1 %vm5294_vm0, %v6617_v26 }
 0x715   :  { %4772 = vmatmul.mubr.msk.bf16.vlgmr.msra.gmra.mxu1 %vm451_vm1, %v3013_v36  ;;  %v4934_v36 = vld [vmem:[#allocation11 + $0x8] sm:$0xff]  }
 0x716   :  { %3624 = vmatprep.mubr.bf16.mxu1 %v6620_v55  ;;  %4788 = vmatpush3.bf16.msra.mxu0 %v4934_v36  ;;  %v3241_v36 = vld [vmem:[#allocation12 + $0x108] sm:$0xff] }
 0x717   :  { %4789 = vmatprep.subr.bf16.mxu0 %v6617_v26 }
 0x73b   :  { %v743_v63 = vpop.f32.mrf.mxu1 }
 0x73c   :  { %750 = vrot.lane.b32.xlu0 %v743_v63, %s5300_s29 }
 0x73d   :  { %v4605_v57 = vpop.f32.mrf.mxu1 }
 0x73e   :  { %v4935_v57 = vld [vmem:[#allocation11] sm:$0xff]  }
 0x73f   :  { %v746_v15 = vpop.f32.mrf.mxu1  ;;  %4790 = vmatpush3.bf16.msra.mxu0 %v4935_v57  ;;  %v3245_v57 = vld [vmem:[#allocation12 + $0x128] sm:$0xff] }
 0x741   :  { %v4606_v23 = vpop.f32.mrf.mxu1 }
 0x743   :  { %v917_v24 = vpop.f32.mrf.mxu1 }
 0x744   :  { %924 = vrot.lane.b32.xlu0 %v917_v24, %s5283_s18 }
 0x745   :  { %v4617_v20 = vpop.f32.mrf.mxu1 }
 0x747   :  { %v920_v61 = vpop.f32.mrf.mxu1 }
 0x749   :  { %v4618_v16 = vpop.f32.mrf.mxu1 }
 0x74b   :  { %v1091_v29 = vpop.f32.mrf.mxu1 }
 0x74c   :  { %1098 = vrot.lane.b32.xlu0 %v1091_v29, %s5299_s28 }
 0x74d   :  { %v4629_v22 = vpop.f32.mrf.mxu1 }
 0x74f   :  { %v1094_v56 = vpop.f32.mrf.mxu1 }
 0x751   :  { %v4630_v42 = vpop.f32.mrf.mxu1 }
 0x753   :  { %v1265_v37 = vpop.f32.mrf.mxu1 }
 0x754   :  { %1272 = vrot.lane.b32.xlu0 %v1265_v37, %s5289_s0 }
 0x755   :  { %v4641_v17 = vpop.f32.mrf.mxu1 }
 0x757   :  { %v1268_v34 = vpop.f32.mrf.mxu1 }
 0x759   :  { %v4642_v25 = vpop.f32.mrf.mxu1 }
 0x76a   :  { %v1439_v62 = vpop.f32.mrf.mxu1 }
 0x76b   :  { %1446 = vrot.lane.b32.xlu0 %v1439_v62, %s5304_s15 }
 0x76c   :  { %v4653_v11 = vpop.f32.mrf.mxu1 }
 0x76e   :  { %v1442_v43 = vpop.f32.mrf.mxu1 }
 0x770   :  { %v4654_v46 = vpop.f32.mrf.mxu1 }
 0x772   :  { %v1613_v30 = vpop.f32.mrf.mxu1 }
 0x774   :  { %v4665_v58 = vpop.f32.mrf.mxu1 }
 0x776   :  { %v1616_v45 = vpop.f32.mrf.mxu1 }
 0x777   :  { %v3264_v45 = vld [vmem:[#allocation12 + $0x1c0] sm:$0xff] }
 0x778   :  { %v4666_v40 = vpop.f32.mrf.mxu1 }
 0x779   :  { %v3268_v40 = vld [vmem:[#allocation12 + $0x1e0] sm:$0xff] }
 0x77a   :  { %v1787_v54 = vpop.f32.mrf.mxu1 }
 0x77c   :  { %v4677_v39 = vpop.f32.mrf.mxu1 }
 0x77d   :  { %v4380_v39 = vcombine.low %v3264_v45, %v3268_v40 }
 0x77e   :  { %v1790_v14 = vpop.f32.mrf.mxu1 }
 0x77f   :  { %v4381_v14 = vcombine.high %v3264_v45, %v3268_v40  ;;  %v6498_v45 = vld [vmem:[#allocation12 + $0x1d0] sm:$0xff] }
 0x780   :  { %v4678_v3 = vpop.f32.mrf.mxu1  ;;  %v6500_v40 = vld [vmem:[#allocation12 + $0x1f0] sm:$0xff] }
 0x781   :  { %v3269_v3 = vld [vmem:[#allocation12 + $0x1e8] sm:$0xff]  ;;  %3592 = vmatprep.subr.bf16.mxu1 %v4381_v14  ;;  %v3267_v14 = vld [vmem:[#allocation12 + $0x1d8] sm:$0xff] }
 0x782   :  { %v1932_v48 = vpop.f32.mrf.mxu1  ;;  %3593 = vmatpush1.bf16.msra.mxu1 %v4380_v39  ;;  %v4384_v39 = vcombine.low %v6498_v45, %v6500_v40 }
 0x783   :  { %1938 = vst.msk [vmem:[#allocation2 + $0x8] sm:$0xff] %vm471_vm2, %v1932_v48  ;;  %v3256_v48 = vld [vmem:[#allocation12 + $0x180] sm:$0xff] }
 0x784   :  { %v4689_v8 = vpop.f32.mrf.mxu1 }
 0x785   :  { %v3260_v8 = vld [vmem:[#allocation12 + $0x1a0] sm:$0xff] }
 0x786   :  { %v1935_v53 = vpop.f32.mrf.mxu1 }
 0x788   :  { %v4690_v1 = vpop.f32.mrf.mxu1 }
 0x78a   :  { %v2090_v50 = vpop.f32.mrf.mxu1 }
 0x78b   :  { %2097 = vrot.lane.b32.xlu0 %v2090_v50, %s5300_s29  ;;  %v4373_v50 = vcombine.high %v3256_v48, %v3260_v8 }
 0x78c   :  { %v4701_v18 = vpop.f32.mrf.mxu1 }
 0x78d   :  { %v3257_v18 = vld [vmem:[#allocation12 + $0x188] sm:$0xff]  ;;  %3594 = vmatprep.subr.bf16.mxu1 %v4373_v50  ;;  %v3208_v50 = vld [vmem:[#allocation12] sm:$0xff] }
 0x78e   :  { %v2093_v35 = vpop.f32.mrf.mxu1 }
 0x78f   :  { %1620 = vrot.lane.b32.xlu0 %v1613_v30, %s5302_s13  ;;  %v3261_v35 = vld [vmem:[#allocation12 + $0x1a8] sm:$0xff] }
 0x790   :  { %v4702_v41 = vpop.f32.mrf.mxu1 }
 0x791   :  { %v4375_v41 = vcombine.high %v3257_v18, %v3261_v35 }
 0x793   :  { %1794 = vrot.lane.b32.xlu0 %v1787_v54, %s5306_s17  ;;  %v3265_v54 = vld [vmem:[#allocation12 + $0x1c8] sm:$0xff] }
 0x794   :  { %v4382_v53 = vcombine.low %v3265_v54, %v3269_v3  ;;  %v4383_v1 = vcombine.high %v3265_v54, %v3269_v3  ;;  %v3271_v3 = vld [vmem:[#allocation12 + $0x1f8] sm:$0xff] }
 0x796   :  { %3635 = vmatprep.subr.bf16.mxu0 %v4383_v1 }
 0x7ad   :  { %v2251_v33 = vpop.f32.mrf.mxu1 }
 0x7ae   :  { %v751_v44 = vpop.permute.xlu0 %750  ;;  %2258 = vrot.lane.b32.xlu1 %v2251_v33, %s5283_s18  ;;  %v4372_v33 = vcombine.low %v3256_v48, %v3260_v8 }
 0x7af   :  { %754 = vst.msk [vmem:[#allocation2] sm:$0xff] %vm753_vm5, %v751_v44  ;;  %v4713_v10 = vpop.f32.mrf.mxu1  ;;  %v4374_v44 = vcombine.low %v3257_v18, %v3261_v35  ;;  %v3212_v18 = vld [vmem:[#allocation12 + $0x20] sm:$0xff]  ;;  %v3209_v35 = vld [vmem:[#allocation12 + $0x8] sm:$0xff] }
 0x7b0   :  { %3595 = vmatpush1.bf16.msra.mxu1 %v4372_v33  ;;  %v4314_v10 = vld [vmem:[%s6601_s7] ss:$0 sm:$0xff] }
 0x7b1   :  { %v2254_v38 = vpop.f32.mrf.mxu1 }
 0x7b3   :  { %v4714_v13 = vpop.f32.mrf.mxu1 }
 0x7b5   :  { %v2412_v7 = vpop.f32.mrf.mxu1 }
 0x7b6   :  { %v925_v2 = vpop.permute.xlu0 %924  ;;  %2419 = vrot.lane.b32.xlu1 %v2412_v7, %s5299_s28 }
 0x7b7   :  { %928 = vst.msk [vmem:[#allocation2] sm:$0xff] %vm927_vm6, %v925_v2  ;;  %v4725_v52 = vpop.f32.mrf.mxu1 }
 0x7b9   :  { %v2415_v32 = vpop.f32.mrf.mxu1 }
 0x7bb   :  { %v4726_v60 = vpop.f32.mrf.mxu1 }
 0x7bc   :  { %v5106_v60 = vld [vmem:[#allocation3 + $0x8] sm:$0xff] }
 0x7bd   :  { %v2573_v49 = vpop.f32.mrf.mxu1 }
 0x7be   :  { %v1099_v4 = vpop.permute.xlu0 %1098  ;;  %2580 = vrot.lane.b32.xlu1 %v2573_v49, %s5289_s0 }
 0x7bf   :  { %1102 = vst.msk [vmem:[#allocation2] sm:$0xff] %vm1101_vm7, %v1099_v4  ;;  %v4737_v5 = vpop.f32.mrf.mxu1  ;;  %v3248_v4 = vld [vmem:[#allocation12 + $0x140] sm:$0xff] }
 0x7c0   :  { %v3252_v5 = vld [vmem:[#allocation12 + $0x160] sm:$0xff] }
 0x7c1   :  { %v2576_v31 = vpop.f32.mrf.mxu1  ;;  %v4365_v21 = vcombine.high %v3248_v4, %v3252_v5  ;;  %v4364_v9 = vcombine.low %v3248_v4, %v3252_v5 }
 0x7c2   :  { %v3249_v31 = vld [vmem:[#allocation12 + $0x148] sm:$0xff] }
 0x7c3   :  { %v4738_v0 = vpop.f32.mrf.mxu1  ;;  %3596 = vmatprep.subr.bf16.mxu1 %v4365_v21 }
 0x7c4   :  { %v3253_v0 = vld [vmem:[#allocation12 + $0x168] sm:$0xff]  ;;  %3597 = vmatpush1.bf16.msra.mxu1 %v4364_v9 }
 0x7c5   :  { %v2734_v59 = vpop.f32.mrf.mxu1 }
 0x7c6   :  { %v1273_v28 = vpop.permute.xlu0 %1272  ;;  %2741 = vrot.lane.b32.xlu1 %v2734_v59, %s5304_s15  ;;  %v4366_v59 = vcombine.low %v3249_v31, %v3253_v0 }
 0x7c7   :  { %1276 = vst.msk [vmem:[#allocation2] sm:$0xff] %vm1275_vm8, %v1273_v28  ;;  %v4749_v27 = vpop.f32.mrf.mxu1  ;;  %v4367_v28 = vcombine.high %v3249_v31, %v3253_v0  ;;  %v4323_v0 = vld [vmem:[%s6602_s8] ss:$0 sm:$0xff] }
 0x7c8   :  { %v3240_v27 = vld [vmem:[#allocation12 + $0x100] sm:$0xff] }
 0x7c9   :  { %v2737_v47 = vpop.f32.mrf.mxu1 }
 0x7ca   :  { %v3244_v47 = vld [vmem:[#allocation12 + $0x120] sm:$0xff] }
 0x7cb   :  { %v4750_v63 = vpop.f32.mrf.mxu1 }
 0x7cc   :  { %v4357_v63 = vcombine.high %v3240_v27, %v3244_v47 }
 0x7cd   :  { %v2895_v15 = vpop.f32.mrf.mxu1 }
 0x7ce   :  { %2902 = vrot.lane.b32.xlu1 %v2895_v15, %s5302_s13  ;;  %v4356_v15 = vcombine.low %v3240_v27, %v3244_v47  ;;  %3598 = vmatprep.subr.bf16.mxu1 %v4357_v63  ;;  %v3259_v27 = vld [vmem:[#allocation12 + $0x198] sm:$0xff] }
 0x7cf   :  { %v4761_v23 = vpop.f32.mrf.mxu1  ;;  %v3263_v47 = vld [vmem:[#allocation12 + $0x1b8] sm:$0xff] }
 0x7d0   :  { %v4358_v23 = vcombine.low %v3241_v36, %v3245_v57  ;;  %3599 = vmatpush1.bf16.msra.mxu1 %v4356_v15 }
 0x7d1   :  { %v2898_v24 = vpop.f32.mrf.mxu1 }
 0x7d2   :  { %v4359_v24 = vcombine.high %v3241_v36, %v3245_v57 }
 0x7d3   :  { %v4762_v20 = vpop.f32.mrf.mxu1 }
 0x7d4   :  { %v3232_v20 = vld [vmem:[#allocation12 + $0xc0] sm:$0xff] }
 0x7d5   :  { %v3056_v61 = vpop.f32.mrf.mxu1 }
 0x7d6   :  { %3063 = vrot.lane.b32.xlu1 %v3056_v61, %s5306_s17  ;;  %v3236_v61 = vld [vmem:[#allocation12 + $0xe0] sm:$0xff] }
 0x7d7   :  { %v4773_v16 = vpop.f32.mrf.mxu1 }
 0x7d8   :  { %v3233_v16 = vld [vmem:[#allocation12 + $0xc8] sm:$0xff] }
 0x7d9   :  { %v3059_v29 = vpop.f32.mrf.mxu1 }
 0x7da   :  { %v4349_v29 = vcombine.high %v3232_v20, %v3236_v61 }
 0x7db   :  { %v4774_v22 = vpop.f32.mrf.mxu1 }
 0x7dc   :  { %v3237_v22 = vld [vmem:[#allocation12 + $0xe8] sm:$0xff]  ;;  %3600 = vmatprep.subr.bf16.mxu1 %v4349_v29 }
 0x7dd   :  { %v1447_v56 = vpop.permute.xlu0 %1446 }
 0x7de   :  { %1450 = vst.msk [vmem:[#allocation2] sm:$0xff] %vm1449_vm9, %v1447_v56  ;;  %v3224_v56 = vld [vmem:[#allocation12 + $0x80] sm:$0xff] }
 0x7fd   :  { %v2098_v42 = vpop.permute.xlu0 %2097 }
 0x7fe   :  { %2100 = vst.msk [vmem:[#allocation2 + $0x8] sm:$0xff] %vm753_vm5, %v2098_v42  ;;  %v3228_v42 = vld [vmem:[#allocation12 + $0xa0] sm:$0xff] }
 0x7ff   :  { %v4340_v54 = vcombine.low %v3224_v56, %v3228_v42 }
 0x801   :  { %v1621_v26 = vpop.permute.xlu0 %1620 }
 0x802   :  { %1624 = vst.msk [vmem:[#allocation2] sm:$0xff] %vm1623_vm10, %v1621_v26  ;;  %v4348_v26 = vcombine.low %v3232_v20, %v3236_v61  ;;  %v3254_v20 = vld [vmem:[#allocation12 + $0x170] sm:$0xff]  ;;  %v3251_v61 = vld [vmem:[#allocation12 + $0x158] sm:$0xff] }
 0x804   :  { %3601 = vmatpush1.bf16.msra.mxu1 %v4348_v26  ;;  %v3242_v26 = vld [vmem:[#allocation12 + $0x110] sm:$0xff] }
 0x805   :  { %v1795_v37 = vpop.permute.xlu0 %1794 }
 0x806   :  { %1798 = vst.msk [vmem:[#allocation2] sm:$0xff] %vm1797_vm11, %v1795_v37  ;;  %v4351_v37 = vcombine.high %v3233_v16, %v3237_v22 }
 0x80d   :  { %v3067_v46 = vld [vmem:[#allocation2] sm:$0xff] }
 0x820   :  { %v2259_v17 = vpop.permute.xlu1 %2258 }
 0x821   :  { %2261 = vst.msk [vmem:[#allocation2 + $0x8] sm:$0xff] %vm927_vm6, %v2259_v17  ;;  %v3225_v17 = vld [vmem:[#allocation12 + $0x88] sm:$0xff] }
 0x828   :  { %v2420_v34 = vpop.permute.xlu1 %2419 }
 0x829   :  { %2422 = vst.msk [vmem:[#allocation2 + $0x8] sm:$0xff] %vm1101_vm7, %v2420_v34  ;;  %v3229_v34 = vld [vmem:[#allocation12 + $0xa8] sm:$0xff] }
 0x82a   :  { %v4342_v48 = vcombine.low %v3225_v17, %v3229_v34 }
 0x830   :  { %v2581_v25 = vpop.permute.xlu1 %2580 }
 0x831   :  { %2583 = vst.msk [vmem:[#allocation2 + $0x8] sm:$0xff] %vm1275_vm8, %v2581_v25  ;;  %v4350_v25 = vcombine.low %v3233_v16, %v3237_v22  ;;  %v3255_v16 = vld [vmem:[#allocation12 + $0x178] sm:$0xff]  ;;  %v4378_v22 = vcombine.low %v3259_v27, %v3263_v47 }
 0x838   :  { %v2742_v62 = vpop.permute.xlu1 %2741 }
 0x839   :  { %2744 = vst.msk [vmem:[#allocation2 + $0x8] sm:$0xff] %vm1449_vm9, %v2742_v62  ;;  %v4341_v62 = vcombine.high %v3224_v56, %v3228_v42  ;;  %v4371_v42 = vcombine.high %v3251_v61, %v3255_v16 }
 0x83b   :  { %3602 = vmatprep.subr.bf16.mxu1 %v4341_v62  ;;  %v4370_v62 = vcombine.low %v3251_v61, %v3255_v16  ;;  %v4950_v61 = vld [vmem:[#allocation14 + $0x20] sm:$0xff]  }
 0x83c   :  { %3603 = vmatpush1.bf16.msra.mxu1 %v4340_v54  ;;  %v4951_v16 = vld [vmem:[#allocation14 + $0xa0] sm:$0xff]  }
 0x840   :  { %v2903_v11 = vpop.permute.xlu1 %2902 }
 0x841   :  { %2905 = vst.msk [vmem:[#allocation2 + $0x8] sm:$0xff] %vm1623_vm10, %v2903_v11  ;;  %v4343_v11 = vcombine.high %v3225_v17, %v3229_v34  ;;  %v3243_v17 = vld [vmem:[#allocation12 + $0x118] sm:$0xff] }
 0x842   :  { %v3247_v34 = vld [vmem:[#allocation12 + $0x138] sm:$0xff] }
 0x843   :  { %v4362_v54 = vcombine.low %v3243_v17, %v3247_v34 }
 0x848   :  { %v3064_v43 = vpop.permute.xlu1 %3063 }
 0x849   :  { %3066 = vst.msk [vmem:[#allocation2 + $0x8] sm:$0xff] %vm1797_vm11, %v3064_v43  ;;  %v3216_v43 = vld [vmem:[#allocation12 + $0x40] sm:$0xff] }
 0x850   :  { %v3068_v30 = vld [vmem:[#allocation2 + $0x8] sm:$0xff] }
 0x851   :  { %v3069_v58 = vpack.c.bf16 %v3068_v30, %v3067_v46  ;;  %v3220_v46 = vld [vmem:[#allocation12 + $0x60] sm:$0xff]  ;;  %v3217_v30 = vld [vmem:[#allocation12 + $0x48] sm:$0xff] }
 0x852   :  { %v4333_v8 = vcombine.high %v3216_v43, %v3220_v46  ;;  %v4332_v33 = vcombine.low %v3216_v43, %v3220_v46  ;;  %v4363_v43 = vcombine.high %v3243_v17, %v3247_v34  ;;  %v3234_v46 = vld [vmem:[#allocation12 + $0xd0] sm:$0xff] }
 0x853   :  { %4792 = vmatmul.mubr.bf16.vlgmr.msra.gmra.mxu0 %v3069_v58  ;;  %v3221_v58 = vld [vmem:[#allocation12 + $0x68] sm:$0xff]  ;;  %v4958_v17 = vld [vmem:[#allocation14 + $0x10] sm:$0xff]  }
 0x854   :  { %3667 = vmatprep.mubr.bf16.mxu0 %v6620_v55  ;;  %3636 = vmatpush1.bf16.msra.mxu0 %v4382_v53  ;;  %v4386_v53 = vcombine.low %v3267_v14, %v3271_v3  ;;  %v4335_v1 = vcombine.high %v3217_v30, %v3221_v58  ;;  %v4959_v34 = vld [vmem:[#allocation14 + $0x90] sm:$0xff]  }
 0x855   :  { %3637 = vmatprep.subr.bf16.mxu0 %v4375_v41  ;;  %v3213_v41 = vld [vmem:[#allocation12 + $0x28] sm:$0xff]  ;;  %3604 = vmatprep.subr.bf16.mxu1 %v4333_v8  ;;  %v3231_v8 = vld [vmem:[#allocation12 + $0xb8] sm:$0xff] }
 0x856   :  { %3605 = vmatpush1.bf16.msra.mxu1 %v4332_v33  ;;  %v3219_v33 = vld [vmem:[#allocation12 + $0x58] sm:$0xff] }
 0x858   :  { %3638 = vmatpush1.bf16.msra.mxu0 %v4374_v44  ;;  %v4334_v44 = vcombine.low %v3217_v30, %v3221_v58  ;;  %v3238_v30 = vld [vmem:[#allocation12 + $0xf0] sm:$0xff]  ;;  %v3235_v58 = vld [vmem:[#allocation12 + $0xd8] sm:$0xff] }
 0x859   :  { %3639 = vmatprep.subr.bf16.mxu0 %v4367_v28  ;;  %v3262_v28 = vld [vmem:[#allocation12 + $0x1b0] sm:$0xff] }
 0x85c   :  { %3640 = vmatpush1.bf16.msra.mxu0 %v4366_v59  ;;  %v3258_v59 = vld [vmem:[#allocation12 + $0x190] sm:$0xff] }
 0x85d   :  { %3641 = vmatprep.subr.bf16.mxu0 %v4359_v24  ;;  %v4377_v15 = vcombine.high %v3258_v59, %v3262_v28  ;;  %v3250_v24 = vld [vmem:[#allocation12 + $0x150] sm:$0xff]  ;;  %v4376_v29 = vcombine.low %v3258_v59, %v3262_v28  ;;  %v4939_v59 = vld [vmem:[#allocation14 + $0xb8] sm:$0xff]  }
 0x85e   :  { %v4369_v56 = vcombine.high %v3250_v24, %v3254_v20  ;;  %v4940_v28 = vld [vmem:[#allocation14 + $0x70] sm:$0xff]  }
 0x860   :  { %3642 = vmatpush1.bf16.msra.mxu0 %v4358_v23  ;;  %v4379_v23 = vcombine.high %v3259_v27, %v3263_v47  ;;  %v4941_v27 = vld [vmem:[#allocation14 + $0xf0] sm:$0xff]  }
 0x861   :  { %3643 = vmatprep.subr.bf16.mxu0 %v4351_v37  ;;  %v3246_v37 = vld [vmem:[#allocation12 + $0x130] sm:$0xff] }
 0x862   :  { %v4942_v47 = vld [vmem:[#allocation14 + $0x30] sm:$0xff]  }
 0x864   :  { %3644 = vmatpush1.bf16.msra.mxu0 %v4350_v25  ;;  %v4368_v25 = vcombine.low %v3250_v24, %v3254_v20  ;;  %v4948_v24 = vld [vmem:[#allocation14 + $0x60] sm:$0xff]  }
 0x865   :  { %3645 = vmatprep.subr.bf16.mxu0 %v4343_v11  ;;  %v4361_v11 = vcombine.high %v3242_v26, %v3246_v37  ;;  %v4949_v20 = vld [vmem:[#allocation14 + $0xe0] sm:$0xff]  }
 0x868   :  { %3646 = vmatpush1.bf16.msra.mxu0 %v4342_v48  ;;  %v3227_v48 = vld [vmem:[#allocation12 + $0x98] sm:$0xff] }
 0x869   :  { %3647 = vmatprep.subr.bf16.mxu0 %v4335_v1 }
 0x86c   :  { %3648 = vmatpush1.bf16.msra.mxu0 %v4334_v44  ;;  %v3223_v44 = vld [vmem:[#allocation12 + $0x78] sm:$0xff] }
 0x913   :  { %v3175_v38 = vpop.f32.mrf.mxu0 }
 0x914   :  { %v3176_v6 = vadd.f32 %v4314_v10, %v3175_v38  ;;  %v4327_v38 = vcombine.high %v3209_v35, %v3213_v41 }
 0x915   :  { %v4793_v13 = vpop.f32.mrf.mxu0 }
 0x916   :  { %v6490_v7 = vadd.f32 %v5105_v19, %v3176_v6  ;;  %v4324_v6 = vcombine.low %v3208_v50, %v3212_v18  ;;  %v4326_v13 = vcombine.low %v3209_v35, %v3213_v41  ;;  %v4385_v19 = vcombine.high %v6498_v45, %v6500_v40  ;;  %3649 = vmatprep.subr.bf16.mxu0 %v4327_v38  ;;  %v3239_v45 = vld [vmem:[#allocation12 + $0xf8] sm:$0xff]  ;;  %v3218_v35 = vld [vmem:[#allocation12 + $0x50] sm:$0xff] }
 0x917   :  { %v3178_v2 = vpop.f32.mrf.mxu0  ;;  %v4360_v40 = vcombine.low %v3242_v26, %v3246_v37  ;;  %v4354_v1 = vcombine.low %v3235_v58, %v3239_v45  ;;  %v3222_v41 = vld [vmem:[#allocation12 + $0x70] sm:$0xff]  ;;  %v4346_v38 = vcombine.low %v3227_v48, %v3231_v8 }
 0x918   :  { %v3179_v52 = vadd.f32 %v4314_v10, %v3178_v2  ;;  %v3184_v32 = vmul.f32 %v6490_v7, %v6490_v7  ;;  %v4325_v10 = vcombine.high %v3208_v50, %v3212_v18  ;;  %v4387_v2 = vcombine.high %v3267_v14, %v3271_v3  ;;  %3650 = vmatpush1.bf16.msra.mxu0 %v4326_v13  ;;  %v3226_v14 = vld [vmem:[#allocation12 + $0x90] sm:$0xff] }
 0x919   :  { %v4794_v12 = vpop.f32.mrf.mxu0  ;;  %v3230_v3 = vld [vmem:[#allocation12 + $0xb0] sm:$0xff]  ;;  %v4347_v18 = vcombine.high %v3227_v48, %v3231_v8  ;;  %v4339_v13 = vcombine.high %v3219_v33, %v3223_v44 }
 0x91a   :  { %v6494_v51 = vadd.f32 %v5106_v60, %v3179_v52  ;;  %3186 = vadd.xlane.f32.xlu0 %v3184_v32  ;;  %3606 = vmatprep.subr.bf16.mxu1 %v4325_v10  ;;  %v4345_v50 = vcombine.high %v3226_v14, %v3230_v3  ;;  %v4344_v10 = vcombine.low %v3226_v14, %v3230_v3  ;;  %v4956_v26 = vld [vmem:[#allocation14 + $0x50] sm:$0xff]  }
 0x91b   :  { %3607 = vmatpush1.bf16.msra.mxu1 %v4324_v6  ;;  %3721 = vmatprep.subr.bf16.mxu0 %v4387_v2  ;;  %v4337_v6 = vcombine.high %v3218_v35, %v3222_v41  ;;  %v3214_v2 = vld [vmem:[#allocation12 + $0x30] sm:$0xff] }
 0x91c   :  { %v3185_v49 = vmul.f32 %v6494_v51, %v6494_v51  ;;  %3678 = vmatprep.subr.bf16.mxu1 %v4385_v19  ;;  %v3210_v19 = vld [vmem:[#allocation12 + $0x10] sm:$0xff] }
 0x91d   :  { %v4957_v37 = vld [vmem:[#allocation14 + $0xd0] sm:$0xff]  }
 0x91e   :  { %3188 = vadd.xlane.f32.xlu1 %v3185_v49 }
 0x9a3   :  { %v3187_v52 = vpop.xlane.xlu0 %3186 }
 0x9a4   :  { %v3190_v32 = vmul.f32 0.0078125, %v3187_v52  ;;  %v3211_v52 = vld [vmem:[#allocation12 + $0x18] sm:$0xff] }
 0x9a6   :  { %v3192_v12 = vadd.f32 1e-05, %v3190_v32  ;;  %v3215_v32 = vld [vmem:[#allocation12 + $0x38] sm:$0xff] }
 0x9a7   :  { %v3189_v60 = vpop.xlane.xlu1 %3188 }
 0x9a8   :  { %5036 = vrsqrt.f32 %v3192_v12  ;;  %v3191_v49 = vmul.f32 0.0078125, %v3189_v60  ;;  %v4336_v12 = vcombine.low %v3218_v35, %v3222_v41  ;;  %v4338_v60 = vcombine.low %v3219_v33, %v3223_v44 }
 0x9aa   :  { %v3193_v4 = vadd.f32 1e-05, %v3191_v49  ;;  %v4329_v49 = vcombine.high %v3210_v19, %v3214_v2 }
 0x9ac   :  { %5038 = vrsqrt.f32 %v3193_v4  ;;  %v4331_v4 = vcombine.high %v3211_v52, %v3215_v32 }
 0x9b5   :  { %v5037_v5 = vpop.eup %5036 }
 0x9b6   :  { %v3196_v31 = vmul.f32 %v5037_v5, %v6490_v7  ;;  %v4328_v5 = vcombine.low %v3210_v19, %v3214_v2 }
 0x9b8   :  { %v3205_v36 = vmul.f32 %v4323_v0, %v3196_v31  ;;  %v4330_v31 = vcombine.low %v3211_v52, %v3215_v32 }
 0x9b9   :  { %v5039_v21 = vpop.eup %5038 }
 0x9ba   :  { %v3197_v9 = vmul.f32 %v5039_v21, %v6494_v51  ;;  %v4936_v21 = vld [vmem:[#allocation14 + $0x78] sm:$0xff]  }
 0x9bc   :  { %v3206_v63 = vmul.f32 %v4323_v0, %v3197_v9  ;;  %v4937_v0 = vld [vmem:[#allocation14 + $0xf8] sm:$0xff]  }
 0x9bd   :  { %v4938_v9 = vld [vmem:[#allocation14 + $0x38] sm:$0xff]  }
 0x9be   :  { %v6511_v57 = vpack.c.bf16 %v3206_v63, %v3205_v36  ;;  %v4943_v36 = vld [vmem:[#allocation14 + $0xb0] sm:$0xff]   ;;  %v4944_v63 = vld [vmem:[#allocation14 + $0x68] sm:$0xff]  }
 0x9c0   :  { %3625 = vmatmul.mubr.bf16.vlgmr.msra.gmra.mxu1 %v6511_v57  ;;  %3668 = vmatmul.mubr.bf16.vlgmr.msra.gmra.mxu0 %v6511_v57 }
 0x9c1   :  { %3679 = vmatpush1.bf16.msra.mxu1 %v4384_v39  ;;  %3722 = vmatpush1.bf16.msra.mxu0 %v4386_v53  ;;  %v4353_v39 = vcombine.high %v3234_v46, %v3238_v30  ;;  %v4352_v53 = vcombine.low %v3234_v46, %v3238_v30  ;;  %v4964_v46 = vld [vmem:[#allocation14 + $0x40] sm:$0xff]  }
 0x9c2   :  { %3680 = vmatprep.subr.bf16.mxu1 %v4377_v15  ;;  %3723 = vmatprep.subr.bf16.mxu0 %v4379_v23  ;;  %v4945_v15 = vld [vmem:[#allocation14 + $0xe8] sm:$0xff]   ;;  %v4965_v30 = vld [vmem:[#allocation14 + $0xc0] sm:$0xff]  }
 0x9c3   :  { %3710 = vmatprep.mubr.bf16.mxu1 %v6620_v55  ;;  %3753 = vmatprep.mubr.bf16.mxu0 %v6620_v55  ;;  %v4355_v55 = vcombine.high %v3235_v58, %v3239_v45  ;;  %v4946_v23 = vld [vmem:[#allocation14 + $0x28] sm:$0xff]   ;;  %v4966_v58 = vld [vmem:[#allocation14] sm:$0xff]  }
 0x9c4   :  { %v4967_v45 = vld [vmem:[#allocation14 + $0x80] sm:$0xff]  }
 0x9c5   :  { %3681 = vmatpush1.bf16.msra.mxu1 %v4376_v29  ;;  %3724 = vmatpush1.bf16.msra.mxu0 %v4378_v22  ;;  %v4952_v29 = vld [vmem:[#allocation14 + $0x58] sm:$0xff]  }
 0x9c6   :  { %3682 = vmatprep.subr.bf16.mxu1 %v4369_v56  ;;  %3725 = vmatprep.subr.bf16.mxu0 %v4371_v42  ;;  %v4953_v22 = vld [vmem:[#allocation14 + $0xd8] sm:$0xff]  }
 0x9c7   :  { %v4954_v56 = vld [vmem:[#allocation14 + $0x18] sm:$0xff]  }
 0x9c8   :  { %v4955_v42 = vld [vmem:[#allocation14 + $0x98] sm:$0xff]  }
 0x9c9   :  { %3683 = vmatpush1.bf16.msra.mxu1 %v4368_v25  ;;  %3726 = vmatpush1.bf16.msra.mxu0 %v4370_v62  ;;  %v4960_v25 = vld [vmem:[#allocation14 + $0x48] sm:$0xff]  }
 0x9ca   :  { %3684 = vmatprep.subr.bf16.mxu1 %v4361_v11  ;;  %3727 = vmatprep.subr.bf16.mxu0 %v4363_v43  ;;  %v4961_v62 = vld [vmem:[#allocation14 + $0xc8] sm:$0xff]  }
 0x9cb   :  { %v4962_v11 = vld [vmem:[#allocation14 + $0x8] sm:$0xff]  }
 0x9cc   :  { %v4963_v43 = vld [vmem:[#allocation14 + $0x88] sm:$0xff]  }
 0x9cd   :  { %3685 = vmatpush1.bf16.msra.mxu1 %v4360_v40  ;;  %3728 = vmatpush1.bf16.msra.mxu0 %v4362_v54 }
 0x9ce   :  { %3686 = vmatprep.subr.bf16.mxu1 %v4353_v39  ;;  %3729 = vmatprep.subr.bf16.mxu0 %v4355_v55 }
 0x9d1   :  { %3687 = vmatpush1.bf16.msra.mxu1 %v4352_v53  ;;  %3730 = vmatpush1.bf16.msra.mxu0 %v4354_v1 }
 0x9d2   :  { %3688 = vmatprep.subr.bf16.mxu1 %v4345_v50  ;;  %3731 = vmatprep.subr.bf16.mxu0 %v4347_v18 }
 0x9d5   :  { %3689 = vmatpush1.bf16.msra.mxu1 %v4344_v10  ;;  %3732 = vmatpush1.bf16.msra.mxu0 %v4346_v38 }
 0x9d6   :  { %3690 = vmatprep.subr.bf16.mxu1 %v4337_v6  ;;  %3733 = vmatprep.subr.bf16.mxu0 %v4339_v13 }
 0x9d9   :  { %3691 = vmatpush1.bf16.msra.mxu1 %v4336_v12  ;;  %3734 = vmatpush1.bf16.msra.mxu0 %v4338_v60 }
 0x9da   :  { %3692 = vmatprep.subr.bf16.mxu1 %v4329_v49  ;;  %3735 = vmatprep.subr.bf16.mxu0 %v4331_v4 }
 0x9dd   :  { %3693 = vmatpush1.bf16.msra.mxu1 %v4328_v5  ;;  %3736 = vmatpush1.bf16.msra.mxu0 %v4330_v31 }
 0x9de   :  { %4519 = vmatprep.subr.bf16.mxu1 %v4936_v21  ;;  %4541 = vmatprep.subr.bf16.mxu0 %v4937_v0 }
 0x9e0   :  { %3711 = vmatmul.mubr.bf16.vlgmr.msra.gmra.mxu1 %v6511_v57  ;;  %3754 = vmatmul.mubr.bf16.vlgmr.msra.gmra.mxu0 %v6511_v57  ;;  %v4947_v57 = vld [vmem:[#allocation14 + $0xa8] sm:$0xff]  }
 0x9e1   :  { %4520 = vmatpush3.bf16.msra.mxu1 %v4938_v9  ;;  %4542 = vmatpush3.bf16.msra.mxu0 %v4939_v59 }
 0x9e2   :  { %4521 = vmatprep.subr.bf16.mxu1 %v4940_v28  ;;  %4543 = vmatprep.subr.bf16.mxu0 %v4941_v27 }
 0x9e5   :  { %4522 = vmatpush3.bf16.msra.mxu1 %v4942_v47  ;;  %4544 = vmatpush3.bf16.msra.mxu0 %v4943_v36 }
 0x9e6   :  { %4523 = vmatprep.subr.bf16.mxu1 %v4944_v63  ;;  %4545 = vmatprep.subr.bf16.mxu0 %v4945_v15 }
 0x9e9   :  { %4524 = vmatpush3.bf16.msra.mxu1 %v4946_v23  ;;  %4546 = vmatpush3.bf16.msra.mxu0 %v4947_v57 }
 0x9ea   :  { %4525 = vmatprep.subr.bf16.mxu1 %v4948_v24  ;;  %4547 = vmatprep.subr.bf16.mxu0 %v4949_v20 }
 0x9ed   :  { %4526 = vmatpush3.bf16.msra.mxu1 %v4950_v61  ;;  %4548 = vmatpush3.bf16.msra.mxu0 %v4951_v16 }
 0x9ee   :  { %4527 = vmatprep.subr.bf16.mxu1 %v4952_v29  ;;  %4549 = vmatprep.subr.bf16.mxu0 %v4953_v22 }
 0x9f1   :  { %4528 = vmatpush3.bf16.msra.mxu1 %v4954_v56  ;;  %4550 = vmatpush3.bf16.msra.mxu0 %v4955_v42 }
 0x9f2   :  { %4529 = vmatprep.subr.bf16.mxu1 %v4956_v26  ;;  %4551 = vmatprep.subr.bf16.mxu0 %v4957_v37 }
 0x9f5   :  { %4530 = vmatpush3.bf16.msra.mxu1 %v4958_v17  ;;  %4552 = vmatpush3.bf16.msra.mxu0 %v4959_v34 }
 0x9f6   :  { %4531 = vmatprep.subr.bf16.mxu1 %v4960_v25  ;;  %4553 = vmatprep.subr.bf16.mxu0 %v4961_v62 }
 0x9f9   :  { %4532 = vmatpush3.bf16.msra.mxu1 %v4962_v11  ;;  %4554 = vmatpush3.bf16.msra.mxu0 %v4963_v43 }
 0x9fa   :  { %4533 = vmatprep.subr.bf16.mxu1 %v4964_v46  ;;  %4555 = vmatprep.subr.bf16.mxu0 %v4965_v30 }
 0x9fd   :  { %4534 = vmatpush3.bf16.msra.mxu1 %v4966_v58  ;;  %4556 = vmatpush3.bf16.msra.mxu0 %v4967_v45 }
 0xa80   :  { %v6519_v40 = vpop.f32.mrf.mxu1  ;;  %v6521_v54 = vpop.f32.mrf.mxu0 }
 0xa81   :  { %v4388_v3 = vmul.f32 -1.442695, %v6519_v40  ;;  %v4390_v8 = vmul.f32 -1.442695, %v6521_v54 }
 0xa82   :  { %v6523_v39 = vpop.f32.mrf.mxu1  ;;  %v6525_v55 = vpop.f32.mrf.mxu0 }
 0xa83   :  { %v4389_v53 = vmul.f32 -1.442695, %v6523_v39  ;;  %v4391_v1 = vmul.f32 -1.442695, %v6525_v55  ;;  %5040 = vpow2.f32 %v4388_v3 }
 0xa84   :  { %v6527_v14 = vpop.f32.mrf.mxu1  ;;  %v6530_v48 = vpop.f32.mrf.mxu0  ;;  %5042 = vpow2.f32 %v4390_v8 }
 0xa85   :  { %v4392_v18 = vmul.f32 -1.442695, %v6527_v14  ;;  %v4394_v41 = vmul.f32 -1.442695, %v6530_v48  ;;  %5044 = vpow2.f32 %v4389_v53 }
 0xa86   :  { %v6535_v50 = vpop.f32.mrf.mxu1  ;;  %v6538_v35 = vpop.f32.mrf.mxu0  ;;  %5046 = vpow2.f32 %v4391_v1 }
 0xa87   :  { %v4393_v33 = vmul.f32 -1.442695, %v6535_v50  ;;  %v4395_v44 = vmul.f32 -1.442695, %v6538_v35  ;;  %5048 = vpow2.f32 %v4392_v18 }
 0xa88   :  { %5050 = vpow2.f32 %v4394_v41 }
 0xa89   :  { %5052 = vpow2.f32 %v4393_v33 }
 0xa8a   :  { %5054 = vpow2.f32 %v4395_v44 }
 0xa90   :  { %v5041_v12 = vpop.eup %5040 }
 0xa91   :  { %v5043_v4 = vpop.eup %5042  ;;  %v3788_v28 = vadd.f32 1.0, %v5041_v12 }
 0xa92   :  { %v5045_v21 = vpop.eup %5044  ;;  %v3790_v63 = vadd.f32 1.0, %v5043_v4 }
 0xa93   :  { %v5047_v59 = vpop.eup %5046  ;;  %v3789_v23 = vadd.f32 1.0, %v5045_v21 }
 0xa94   :  { %v5049_v36 = vpop.eup %5048  ;;  %v3791_v24 = vadd.f32 1.0, %v5047_v59 }
 0xa95   :  { %v5051_v15 = vpop.eup %5050  ;;  %v3792_v61 = vadd.f32 1.0, %v5049_v36 }
 0xa96   :  { %v5053_v57 = vpop.eup %5052  ;;  %v3794_v16 = vadd.f32 1.0, %v5051_v15 }
 0xa97   :  { %v5055_v20 = vpop.eup %5054  ;;  %v3793_v29 = vadd.f32 1.0, %v5053_v57 }
 0xa98   :  { %v3795_v22 = vadd.f32 1.0, %v5055_v20 }
 0xaa0   :  { %v6543_v10 = vpop.f32.mrf.mxu1  ;;  %v6545_v38 = vpop.f32.mrf.mxu0 }
 0xaa1   :  { %v4396_v6 = vmul.f32 -1.442695, %v6543_v10  ;;  %v4398_v13 = vmul.f32 -1.442695, %v6545_v38 }
 0xaa2   :  { %v6549_v19 = vpop.f32.mrf.mxu1  ;;  %v6551_v2 = vpop.f32.mrf.mxu0 }
 0xaa3   :  { %5056 = vpow2.f32 %v4396_v6  ;;  %v4397_v52 = vmul.f32 -1.442695, %v6549_v19  ;;  %v4399_v32 = vmul.f32 -1.442695, %v6551_v2 }
 0xaa4   :  { %5058 = vpow2.f32 %v4398_v13  ;;  %v6555_v60 = vpop.f32.mrf.mxu1  ;;  %v6557_v49 = vpop.f32.mrf.mxu0 }
 0xaa5   :  { %5060 = vpow2.f32 %v4397_v52  ;;  %v4400_v5 = vmul.f32 -1.442695, %v6555_v60  ;;  %v4402_v31 = vmul.f32 -1.442695, %v6557_v49 }
 0xaa6   :  { %5062 = vpow2.f32 %v4399_v32  ;;  %v6561_v0 = vpop.f32.mrf.mxu1  ;;  %v6563_v9 = vpop.f32.mrf.mxu0 }
 0xaa7   :  { %5064 = vpow2.f32 %v4400_v5  ;;  %v4401_v27 = vmul.f32 -1.442695, %v6561_v0  ;;  %v4403_v47 = vmul.f32 -1.442695, %v6563_v9 }
 0xaa8   :  { %5066 = vpow2.f32 %v4402_v31 }
 0xaa9   :  { %5068 = vpow2.f32 %v4401_v27 }
 0xaaa   :  { %5070 = vpow2.f32 %v4403_v47 }
 0xaab   :  { %5072 = vrcp.f32 %v3788_v28 }
 0xaac   :  { %5074 = vrcp.f32 %v3790_v63 }
 0xaad   :  { %5076 = vrcp.f32 %v3789_v23 }
 0xaae   :  { %5078 = vrcp.f32 %v3791_v24 }
 0xaaf   :  { %5080 = vrcp.f32 %v3792_v61 }
 0xab0   :  { %v5057_v56 = vpop.eup %5056  ;;  %5082 = vrcp.f32 %v3794_v16 }
 0xab1   :  { %v5059_v42 = vpop.eup %5058  ;;  %5084 = vrcp.f32 %v3793_v29  ;;  %v3844_v26 = vadd.f32 1.0, %v5057_v56 }
 0xab2   :  { %v5061_v37 = vpop.eup %5060  ;;  %5086 = vrcp.f32 %v3795_v22  ;;  %v3846_v17 = vadd.f32 1.0, %v5059_v42 }
 0xab3   :  { %v5063_v34 = vpop.eup %5062  ;;  %5088 = vrcp.f32 %v3844_v26  ;;  %v3845_v25 = vadd.f32 1.0, %v5061_v37 }
 0xab4   :  { %v5065_v62 = vpop.eup %5064  ;;  %5090 = vrcp.f32 %v3846_v17  ;;  %v3847_v11 = vadd.f32 1.0, %v5063_v34 }
 0xab5   :  { %v5067_v43 = vpop.eup %5066  ;;  %5092 = vrcp.f32 %v3845_v25  ;;  %v3848_v46 = vadd.f32 1.0, %v5065_v62 }
 0xab6   :  { %v5069_v30 = vpop.eup %5068  ;;  %5094 = vrcp.f32 %v3847_v11  ;;  %v3850_v58 = vadd.f32 1.0, %v5067_v43 }
 0xab7   :  { %v5071_v45 = vpop.eup %5070  ;;  %5096 = vrcp.f32 %v3848_v46  ;;  %v3849_v3 = vadd.f32 1.0, %v5069_v30 }
 0xab8   :  { %v5073_v8 = vpop.eup %5072  ;;  %5098 = vrcp.f32 %v3850_v58  ;;  %v3851_v53 = vadd.f32 1.0, %v5071_v45 }
 0xab9   :  { %v5075_v1 = vpop.eup %5074  ;;  %5100 = vrcp.f32 %v3849_v3  ;;  %v3812_v21 = vmul.f32 %v5073_v8, %v6519_v40 }
 0xaba   :  { %v5077_v18 = vpop.eup %5076  ;;  %5102 = vrcp.f32 %v3851_v53 }
 0xabb   :  { %v5079_v41 = vpop.eup %5078  ;;  %v3813_v59 = vmul.f32 %v5077_v18, %v6523_v39 }
 0xabc   :  { %v5081_v33 = vpop.eup %5080 }
 0xabd   :  { %v5083_v44 = vpop.eup %5082  ;;  %v3816_v36 = vmul.f32 %v5081_v33, %v6527_v14 }
 0xabe   :  { %v5085_v6 = vpop.eup %5084  ;;  %v3818_v24 = vmul.f32 %v5083_v44, %v6530_v48 }
 0xabf   :  { %v5087_v13 = vpop.eup %5086  ;;  %v3817_v40 = vmul.f32 %v5085_v6, %v6535_v50 }
 0xac0   :  { %v5089_v52 = vpop.eup %5088  ;;  %v3819_v20 = vmul.f32 %v5087_v13, %v6538_v35 }
 0xac1   :  { %v5091_v32 = vpop.eup %5090  ;;  %v3868_v63 = vmul.f32 %v5089_v52, %v6543_v10 }
 0xac2   :  { %v5093_v12 = vpop.eup %5092  ;;  %v3870_v39 = vmul.f32 %v5091_v32, %v6545_v38 }
 0xac3   :  { %v5095_v4 = vpop.eup %5094  ;;  %v3869_v28 = vmul.f32 %v5093_v12, %v6549_v19  ;;  %v3876_v29 = vmul.f32 %v3868_v63, %v3812_v21 }
 0xac4   :  { %v5097_v5 = vpop.eup %5096  ;;  %v3871_v15 = vmul.f32 %v5095_v4, %v6551_v2  ;;  %v3814_v2 = vmul.f32 %v5075_v1, %v6521_v54  ;;  %v4404_v54 = vld [vmem:[%s6605_s11] ss:$0 sm:$0xff]  ;;  %s5247_s11 = scalar_lea.vmem %s4243_s21, 256 }
 0xac5   :  { %v5099_v31 = vpop.eup %5098  ;;  %v3872_v27 = vmul.f32 %v5097_v5, %v6555_v60  ;;  %v3815_v60 = vmul.f32 %v5079_v41, %v6525_v55  ;;  %v3877_v61 = vmul.f32 %v3869_v28, %v3813_v59  ;;  %p5248_p7 = scmp.ne.s32.totalorder %s4243_s21, %s5247_s11  ;;  %p5253_p9 = scmp.lt.s32.totalorder %s5247_s11, %s5247_s11 }
 0xac6   :  { %v5101_v47 = vpop.eup %5100  ;;  %v3874_v23 = vmul.f32 %v5099_v31, %v6557_v49  ;;  %v3878_v50 = vmul.f32 %v3870_v39, %v3814_v2 }
 0xac7   :  { %v5103_v57 = vpop.eup %5102  ;;  %v3873_v19 = vmul.f32 %v5101_v47, %v6561_v0  ;;  %v3880_v14 = vmul.f32 %v3872_v27, %v3816_v36  ;;  %v3879_v48 = vmul.f32 %v3871_v15, %v3815_v60  ;;  %p5254_p10 = por %p5253_p9, %p5252_p8 }
 0xac8   :  { %v3875_v10 = vmul.f32 %v5103_v57, %v6563_v9  ;;  %v3882_v49 = vmul.f32 %v3874_v23, %v3818_v24 }
 0xac9   :  { %v3881_v16 = vmul.f32 %v3873_v19, %v3817_v40  ;;  %v3884_v38 = vpack.c.bf16 %v3880_v14, %v3876_v29  ;;  %p5255_p11 = pnand %p5254_p10, %p5248_p7 }
 0xaca   :  { %v3883_v22 = vmul.f32 %v3875_v10, %v3819_v20  ;;  %v3886_v0 = vpack.c.bf16 %v3882_v49, %v3878_v50 }
 0xacb   :  { %v3885_v56 = vpack.c.bf16 %v3881_v16, %v3877_v61 }
 0xacc   :  { %v3887_v42 = vpack.c.bf16 %v3883_v22, %v3879_v48 }
 0xacd   :  { %4183 = vmatprep.mubr.bf16.mxu1 %v3885_v56 }
 0xace   :  { %4224 = vmatprep.mubr.bf16.mxu0 %v3887_v42  ;;  %4184 = vmatmul.mubr.bf16.vlgmr.msra.gmra.mxu1 %v3884_v38 }
 0xacf   :  { %4225 = vmatmul.mubr.bf16.vlgmr.msra.gmra.mxu0 %v3886_v0 }
 0xb8e   :  { %v4535_v55 = vpop.f32.mrf.mxu1 }
 0xb8f   :  { %v4557_v35 = vpop.f32.mrf.mxu0 }
 0xb90   :  { %v4536_v9 = vpop.f32.mrf.mxu1 }
 0xb91   :  { %v4537_v26 = vadd.f32 %v4536_v9, %v4535_v55  ;;  %v4558_v37 = vpop.f32.mrf.mxu0 }
 0xb92   :  { %v4538_v17 = vpop.f32.mrf.mxu1  ;;  %v4559_v25 = vadd.f32 %v4558_v37, %v4557_v35 }
 0xb93   :  { %v4186_v34 = vadd.f32 %v4537_v26, %v4404_v54  ;;  %v4560_v62 = vpop.f32.mrf.mxu0 }
 0xb94   :  { %v4539_v11 = vpop.f32.mrf.mxu1 }
 0xb95   :  { %v4227_v43 = vadd.f32 %v4559_v25, %v4186_v34  ;;  %v4540_v46 = vadd.f32 %v4539_v11, %v4538_v17  ;;  %v4561_v30 = vpop.f32.mrf.mxu0 }
 0xb96   :  { %v4562_v3 = vadd.f32 %v4561_v30, %v4560_v62 }
 0xb97   :  { %v4233_v58 = vadd.f32 %v4227_v43, %v6490_v7  ;;  %v4189_v45 = vadd.f32 %v4540_v46, %v4404_v54 }
 0xb99   :  { %4235 = vst [vmem:[#allocation15] sm:$0xff] %v4233_v58  ;;  %v4230_v8 = vadd.f32 %v4562_v3, %v4189_v45 }
 0xb9b   :  { %v4234_v53 = vadd.f32 %v4230_v8, %v6494_v51 }
 0xb9d   :  { %4236 = vst [vmem:[#allocation15 + $0x8] sm:$0xff] %v4234_v53 }
 0xb9e   :  { %5258 = shalt.err (!%p5255_p11)
}
 0xb9f   :  { %4248 = dma.vmem_to_hbm [thread:$0]  %s4243_s21, 256, %s6606_s12, [#allocation5], %s5285_s4, %s5285_s4, %s5286_s24  }
 0xba0   :  { %5275 = dma.done.wait [#allocation5], 256  }
 0xba1   :  { %5276 = vsyncadd [#allocation5], 4294967040 }
 0xba2   :  { %4252 = vsyncpa [#allocation4], 1 }
 0xba3   :  { %4253 = vsyncpa [#allocation7], 1 }
 0xba4   :  { %4254 = vsyncpa [#allocation10], 1 }
 0xba5   :  { %4255 = vsyncpa [#allocation13], 1 }
 0xba6   :  { %4256 = vsyncpa [#allocation5], 1 }

// kernel: tpu_custom_call.1
= control target key start
LH: loop header
LB: loop body
LE: loop exit
PB: predicated region body
PF: predicated region fallthrough
CT: control target
= control target key end

     0   :  { %17 = vsyncpa [#allocation4], 0  ;;  %s6594_s0 = inlined_call_operand.hbm [shape: f32[2,8,128], index: 0, kind: input, shape index: {}]   ;;  %s6595_s1 = inlined_call_operand.vmem [shape: f32[1,128], index: 1, kind: input, shape index: {}]   ;;  %s6596_s2 = inlined_call_operand.hbm [shape: bf16[128,384], index: 2, kind: input, shape index: {}]   ;;  %s6597_s3 = inlined_call_operand.hbm [shape: f32[1,384], index: 3, kind: input, shape index: {}]   ;;  %s6598_s4 = inlined_call_operand.hbm [shape: f32[8,8], index: 4, kind: input, shape index: {}]   ;;  %s6599_s5 = inlined_call_operand.vmem [shape: f32[8,8], index: 5, kind: input, shape index: {}]   ;;  %s6600_s6 = inlined_call_operand.hbm [shape: bf16[128,128], index: 6, kind: input, shape index: {}]   ;;  %s6601_s7 = inlined_call_operand.vmem [shape: f32[1,128], index: 7, kind: input, shape index: {}]   ;;  %s6602_s8 = inlined_call_operand.vmem [shape: f32[1,128], index: 8, kind: input, shape index: {}]   ;;  %s6603_s9 = inlined_call_operand.hbm [shape: bf16[128,1024], index: 9, kind: input, shape index: {}]   ;;  %s6604_s10 = inlined_call_operand.hbm [shape: bf16[512,128], index: 10, kind: input, shape index: {}]   ;;  %s6605_s11 = inlined_call_operand.vmem [shape: f32[1,128], index: 11, kind: input, shape index: {}]   ;;  %s6606_s12 = inlined_call_operand.hbm [shape: f32[2,8,128], index: 12, kind: output, shape index: {}]  }
   0x1   :  { %18 = vsyncpa [#allocation7], 0 }
   0x2   :  { %19 = vsyncpa [#allocation10], 0 }
   0x3   :  { %20 = vsyncpa [#allocation13], 0 }
   0x4   :  { %21 = vsyncpa [#allocation5], 0  ;;  %s5277_s21 = smov [#allocation6]  }
   0x5   :  { %s41_s22 = sshll.u32 %s5277_s21, 4  ;;  %s42_s22 = int_to_ptr.vmem [resolvable:$true] %s41_s22 }
   0x6   :  { %s5115_s23 = scalar_lea.vmem %s42_s22, 3072  ;;  %p5120_p1 = scmp.lt.s32.totalorder %s42_s22, %s42_s22 }
   0x7   :  { %p5116_p0 = scmp.ne.s32.totalorder %s42_s22, %s5115_s23  ;;  %p5121_p2 = scmp.lt.s32.totalorder %s5115_s23, %s5115_s23 }
   0x9   :  { %p5122_p3 = por %p5121_p2, %p5120_p1 }
   0xb   :  { %p5123_p4 = pnand %p5122_p3, %p5116_p0 }
   0xd   :  { %5126 = shalt.err (!%p5123_p4)
}
   0xe   :  { %s5278_s24 = smov 192   ;;  %s5279_s25 = smov 12  }
   0xf   :  { %47 = dma.hbm_to_vmem [thread:$0]  %s6596_s2, 3072, %s42_s22, [#allocation7], %s5278_s24, %s5278_s24, %s5279_s25  }
  0x10   :  { %s5280_s28 = smov [#allocation9]   ;;  %s5281_s30 = smov [#allocation12]  }
  0x11   :  { %s64_s29 = sshll.u32 %s5280_s28, 4  ;;  %s91_s13 = sshll.u32 %s5281_s30, 4  ;;  %s65_s29 = int_to_ptr.vmem [resolvable:$true] %s64_s29  ;;  %s92_s13 = int_to_ptr.vmem [resolvable:$true] %s91_s13 }
  0x12   :  { %s5135_s14 = scalar_lea.vmem %s65_s29, 128  ;;  %p5140_p6 = scmp.lt.s32.totalorder %s65_s29, %s65_s29 }
  0x13   :  { %p5136_p5 = scmp.ne.s32.totalorder %s65_s29, %s5135_s14  ;;  %p5141_p7 = scmp.lt.s32.totalorder %s5135_s14, %s5135_s14 }
  0x15   :  { %p5142_p8 = por %p5141_p7, %p5140_p6 }
  0x17   :  { %p5143_p9 = pnand %p5142_p8, %p5136_p5 }
  0x19   :  { %5146 = shalt.err (!%p5143_p9)
}
  0x1a   :  { %67 = dma.hbm_to_vmem [thread:$0]  %s6598_s4, 128, %s65_s29, [#allocation10]  }
  0x1b   :  { %s5155_s17 = scalar_lea.vmem %s92_s13, 8192  ;;  %p5160_p11 = scmp.lt.s32.totalorder %s92_s13, %s92_s13 }
  0x1c   :  { %p5156_p10 = scmp.ne.s32.totalorder %s92_s13, %s5155_s17  ;;  %p5161_p12 = scmp.lt.s32.totalorder %s5155_s17, %s5155_s17 }
  0x1e   :  { %p5162_p13 = por %p5161_p12, %p5160_p11 }
  0x20   :  { %p5163_p0 = pnand %p5162_p13, %p5156_p10 }
  0x22   :  { %5166 = shalt.err (!%p5163_p0)
}
  0x23   :  { %s5282_s2 = smov 512   ;;  %s5283_s18 = smov 32  }
  0x24   :  { %97 = dma.hbm_to_vmem [thread:$0]  %s6603_s9, 8192, %s92_s13, [#allocation13], %s5282_s2, %s5282_s2, %s5283_s18  }
  0x25   :  { %s5284_s21 = smov [#allocation3]  }
  0x26   :  { %s27_s22 = sshll.u32 %s5284_s21, 4  ;;  %s28_s22 = int_to_ptr.vmem [resolvable:$true] %s27_s22 }
  0x27   :  { %s5175_s23 = scalar_lea.vmem %s28_s22, 256  ;;  %p5180_p2 = scmp.lt.s32.totalorder %s28_s22, %s28_s22 }
  0x28   :  { %p5176_p1 = scmp.ne.s32.totalorder %s28_s22, %s5175_s23  ;;  %p5181_p3 = scmp.lt.s32.totalorder %s5175_s23, %s5175_s23 }
  0x2a   :  { %p5182_p4 = por %p5181_p3, %p5180_p2 }
  0x2c   :  { %p5183_p5 = pnand %p5182_p4, %p5176_p1 }
  0x2e   :  { %5186 = shalt.err (!%p5183_p5)
}
  0x2f   :  { %s5285_s4 = smov 128   ;;  %s5286_s24 = smov 8  }
  0x30   :  { %33 = dma.hbm_to_vmem [thread:$0]  %s6594_s0, 256, %s28_s22, [#allocation4], %s5285_s4, %s5285_s4, %s5286_s24  }
  0x31   :  { %s5287_s9 = smov [#allocation8]   ;;  %s5288_s28 = smov [#allocation11]  }
  0x32   :  { %s54_s27 = sshll.u32 %s5287_s9, 4  ;;  %s75_s29 = sshll.u32 %s5288_s28, 4  ;;  %s55_s27 = int_to_ptr.vmem [resolvable:$true] %s54_s27  ;;  %s76_s29 = int_to_ptr.vmem [resolvable:$true] %s75_s29 }
  0x33   :  { %s5195_s30 = scalar_lea.vmem %s55_s27, 48  ;;  %s5199_s13 = scalar_lea.vmem %s55_s27, 64 }
  0x34   :  { %p5196_p6 = scmp.ne.s32.totalorder %s55_s27, %s5195_s30  ;;  %p5200_p7 = scmp.lt.s32.totalorder %s55_s27, %s55_s27 }
  0x35   :  { %p5201_p8 = scmp.lt.s32.totalorder %s5199_s13, %s5195_s30 }
  0x37   :  { %p5202_p9 = por %p5201_p8, %p5200_p7 }
  0x39   :  { %p5203_p10 = pnand %p5202_p9, %p5196_p6 }
  0x3b   :  { %5206 = shalt.err (!%p5203_p10)
}
  0x3c   :  { %57 = dma.hbm_to_vmem [thread:$0]  %s6597_s3, 48, %s55_s27, [#allocation7]  }
  0x3d   :  { %s5215_s16 = scalar_lea.vmem %s76_s29, 1024  ;;  %p5220_p12 = scmp.lt.s32.totalorder %s76_s29, %s76_s29 }
  0x3e   :  { %p5216_p11 = scmp.ne.s32.totalorder %s76_s29, %s5215_s16  ;;  %p5221_p13 = scmp.lt.s32.totalorder %s5215_s16, %s5215_s16 }
  0x40   :  { %p5222_p0 = por %p5221_p13, %p5220_p12 }
  0x42   :  { %p5223_p1 = pnand %p5222_p0, %p5216_p11 }
  0x44   :  { %5226 = shalt.err (!%p5223_p1)
}
  0x45   :  { %s5289_s0 = smov 64   ;;  %s5290_s17 = smov 4  }
  0x46   :  { %81 = dma.hbm_to_vmem [thread:$0]  %s6600_s6, 1024, %s76_s29, [#allocation10], %s5289_s0, %s5289_s0, %s5290_s17  }
  0x47   :  { %s5291_s20 = smov [#allocation14]  }
  0x48   :  { %s103_s21 = sshll.u32 %s5291_s20, 4  ;;  %s104_s21 = int_to_ptr.vmem [resolvable:$true] %s103_s21 }
  0x49   :  { %s5235_s22 = scalar_lea.vmem %s104_s21, 4096  ;;  %p5240_p3 = scmp.lt.s32.totalorder %s104_s21, %s104_s21 }
  0x4a   :  { %p5236_p2 = scmp.ne.s32.totalorder %s104_s21, %s5235_s22  ;;  %p5241_p4 = scmp.lt.s32.totalorder %s5235_s22, %s5235_s22 }
  0x4c   :  { %p5242_p5 = por %p5241_p4, %p5240_p3 }
  0x4e   :  { %p5243_p6 = pnand %p5242_p5, %p5236_p2 }
  0x50   :  { %5246 = shalt.err (!%p5243_p6)
}
  0x51   :  { %109 = dma.hbm_to_vmem [thread:$0]  %s6604_s10, 4096, %s104_s21, [#allocation13], %s5289_s0, %s5289_s0, %s5290_s17  }
  0x52   :  { %5267 = dma.done.wait [#allocation4], 256  }
  0x53   :  { %5268 = vsyncadd [#allocation4], 4294967040 }
  0x54   :  { %5269 = dma.done.wait [#allocation7], 3120  }
  0x55   :  { %5270 = vsyncadd [#allocation7], 4294964176 }
  0x56   :  { %5271 = dma.done.wait [#allocation10], 1152  }
  0x57   :  { %5272 = vsyncadd [#allocation10], 4294966144 }
  0x58   :  { %5273 = dma.done.wait [#allocation13], 12288  }
  0x59   :  { %5274 = vsyncadd [#allocation13], 4294955008  ;;  %v6609_v0 = vmov 0.0   ;;  %v5403_v1 = vld [vmem:[#allocation3] sm:$0xff]  ;;  %v5405_v2 = vld [vmem:[#allocation3 + $0x8] sm:$0xff]  ;;  %v6607_v26 = vmov 0   ;;  %v195_v46 = vlaneseq }
  0x5a   :  { %4563 = vmatprep.subr.bf16.mxu1 %v6609_v0  ;;  %v136_v3 = vmul.f32 %v5403_v1, %v5403_v1  ;;  %v4896_v4 = vld [vmem:[#allocation6 + $0xac] ss:$12 sps:$4 sm:$0xff]   ;;  %v4898_v5 = vld [vmem:[#allocation6 + $0xa8] ss:$12 sps:$4 sm:$0xff]   ;;  %v4899_v6 = vld [vmem:[#allocation6 + $0xb0] ss:$12 sps:$4 sm:$0xff]   ;;  %v137_v7 = vmul.f32 %v5405_v2, %v5405_v2  ;;  %370 = vmatprep.mubr.bf16.mxu0 %v6607_v26 }
  0x5b   :  { %338 = vmatprep.subr.bf16.mxu0 %v4896_v4  ;;  %4564 = vmatpush3.bf16.msra.mxu1 %v4899_v6  ;;  %v4900_v8 = vld [vmem:[#allocation6 + $0x94] ss:$12 sps:$4 sm:$0xff]   ;;  %v4902_v9 = vld [vmem:[#allocation6 + $0x90] ss:$12 sps:$4 sm:$0xff]   ;;  %v4903_v10 = vld [vmem:[#allocation6 + $0x98] ss:$12 sps:$4 sm:$0xff]  }
  0x5c   :  { %138 = vadd.xlane.f32.xlu0 %v136_v3  ;;  %339 = vmatpush1.bf16.msra.mxu0 %v4898_v5  ;;  %v4904_v11 = vld [vmem:[#allocation6 + $0x7c] ss:$12 sps:$4 sm:$0xff]   ;;  %v4906_v12 = vld [vmem:[#allocation6 + $0x78] ss:$12 sps:$4 sm:$0xff]   ;;  %v4907_v13 = vld [vmem:[#allocation6 + $0x80] ss:$12 sps:$4 sm:$0xff]  }
  0x5d   :  { %4565 = vmatprep.subr.bf16.mxu1 %v6609_v0  ;;  %340 = vmatprep.subr.bf16.mxu0 %v4900_v8  ;;  %v4908_v14 = vld [vmem:[#allocation6 + $0x64] ss:$12 sps:$4 sm:$0xff]   ;;  %v4910_v15 = vld [vmem:[#allocation6 + $0x60] ss:$12 sps:$4 sm:$0xff]   ;;  %v4911_v16 = vld [vmem:[#allocation6 + $0x68] ss:$12 sps:$4 sm:$0xff]  }
  0x5e   :  { %v4912_v17 = vld [vmem:[#allocation6 + $0x4c] ss:$12 sps:$4 sm:$0xff]   ;;  %v4914_v18 = vld [vmem:[#allocation6 + $0x48] ss:$12 sps:$4 sm:$0xff]   ;;  %v4915_v19 = vld [vmem:[#allocation6 + $0x50] ss:$12 sps:$4 sm:$0xff]  }
  0x5f   :  { %4566 = vmatpush3.bf16.msra.mxu1 %v4903_v10  ;;  %v4916_v20 = vld [vmem:[#allocation6 + $0x34] ss:$12 sps:$4 sm:$0xff]   ;;  %v4918_v21 = vld [vmem:[#allocation6 + $0x30] ss:$12 sps:$4 sm:$0xff]   ;;  %v4919_v22 = vld [vmem:[#allocation6 + $0x38] ss:$12 sps:$4 sm:$0xff]  }
  0x60   :  { %140 = vadd.xlane.f32.xlu0 %v137_v7  ;;  %341 = vmatpush1.bf16.msra.mxu0 %v4902_v9  ;;  %v4920_v23 = vld [vmem:[#allocation6 + $0x1c] ss:$12 sps:$4 sm:$0xff]   ;;  %v4922_v24 = vld [vmem:[#allocation6 + $0x18] ss:$12 sps:$4 sm:$0xff]   ;;  %v4923_v25 = vld [vmem:[#allocation6 + $0x20] ss:$12 sps:$4 sm:$0xff]  }
  0x61   :  { %4567 = vmatprep.subr.bf16.mxu1 %v6609_v0  ;;  %342 = vmatprep.subr.bf16.mxu0 %v4904_v11  ;;  %vm5294_vm0 = vmmov 0   ;;  %v4924_v27 = vld [vmem:[#allocation6 + $0x4] ss:$12 sps:$4 sm:$0xff]   ;;  %v4926_v28 = vld [vmem:[#allocation6] ss:$12 sps:$4 sm:$0xff]   ;;  %v5444_v47 = vshrl.u32 %v195_v46, 7 }
  0x62   :  { %4579 = vmatprep.mubr.msk.bf16.mxu1 %vm5294_vm0, %v6609_v0  ;;  %v4927_v29 = vld [vmem:[#allocation6 + $0x8] ss:$12 sps:$4 sm:$0xff]   ;;  %v5426_v30 = vld [vmem:[%s6599_s5] sm:$0xff]  ;;  %s5296_s26 = smov 40   ;;  %s5297_s9 = smov 56   ;;  %vm451_vm1 = vcmask 64512  }
  0x63   :  { %4568 = vmatpush3.bf16.msra.mxu1 %v4907_v13  ;;  %431 = vrot.lane.b32.xlu1 %v5426_v30, %s5286_s24  ;;  %v5430_v31 = vld [vmem:[#allocation9] sm:$0xff]  ;;  %v4257_v41 = vld [vmem:[%s6595_s1] ss:$0 sm:$0xff]  ;;  %v201_v48 = vsub.s32 1, %v5444_v47  ;;  %v197_v49 = vsub.s32 0, %v5444_v47  ;;  %v205_v52 = vsub.s32 2, %v5444_v47 }
  0x64   :  { %343 = vmatpush1.bf16.msra.mxu0 %v4906_v12  ;;  %4569 = vmatprep.subr.bf16.mxu1 %v6609_v0  ;;  %v193_v50 = vld [vmem:[#allocation8] sm:$0x7]  ;;  %s5295_s1 = smov 120   ;;  %s5298_s27 = smov 24   ;;  %vm471_vm2 = vcmask 130048   ;;  %vm535_vm3 = vcmask 1043456  }
  0x65   :  { %344 = vmatprep.subr.bf16.mxu0 %v4908_v14  ;;  %v5448_v51 = vrot.slane %v193_v50, %v201_v48  ;;  %v198_v53 = vrot.slane %v193_v50, %v197_v49  ;;  %v206_v59 = vrot.slane %v193_v50, %v205_v52  ;;  %s5299_s28 = smov 48   ;;  %s5300_s29 = smov 16   ;;  %vm753_vm5 = vcmask 261248  }
  0x66   :  { %s5301_s30 = smov 72   ;;  %s5302_s13 = smov 96   ;;  %vm927_vm6 = vcmask 392448   ;;  %vm1101_vm7 = vcmask 523648   ;;  %vm1275_vm8 = vcmask 654848   ;;  %vm1449_vm9 = vcmask 786048  }
  0x67   :  { %4570 = vmatpush3.bf16.msra.mxu1 %v4911_v16  ;;  %441 = vrot.lane.b32.xlu1 %v5430_v31, %s5286_s24  ;;  %s5303_s14 = smov 88   ;;  %s5304_s15 = smov 80   ;;  %vm1623_vm10 = vcmask 917248   ;;  %vm1797_vm11 = vcmask 1048448  }
  0x68   :  { %345 = vmatpush1.bf16.msra.mxu0 %v4910_v15  ;;  %4571 = vmatprep.subr.bf16.mxu1 %v6609_v0  ;;  %s5305_s16 = smov 104   ;;  %s5306_s17 = smov 112  }
  0x69   :  { %346 = vmatprep.subr.bf16.mxu0 %v4912_v17  ;;  %s5307_s20 = smov [#allocation15]  }
  0x6a   :  { %s4242_s21 = sshll.u32 %s5307_s20, 4  ;;  %s4243_s21 = int_to_ptr.vmem [resolvable:$true] %s4242_s21 }
  0x6b   :  { %4572 = vmatpush3.bf16.msra.mxu1 %v4915_v19  ;;  %p5252_p8 = scmp.lt.s32.totalorder %s4243_s21, %s4243_s21 }
  0x6c   :  { %347 = vmatpush1.bf16.msra.mxu0 %v4914_v18  ;;  %4573 = vmatprep.subr.bf16.mxu1 %v6609_v0 }
  0x6d   :  { %348 = vmatprep.subr.bf16.mxu0 %v4916_v20 }
  0x6f   :  { %4574 = vmatpush3.bf16.msra.mxu1 %v4919_v22 }
  0x70   :  { %349 = vmatpush1.bf16.msra.mxu0 %v4918_v21  ;;  %4575 = vmatprep.subr.bf16.mxu1 %v6609_v0 }
  0x71   :  { %350 = vmatprep.subr.bf16.mxu0 %v4920_v23 }
  0x73   :  { %4576 = vmatpush3.bf16.msra.mxu1 %v4923_v25 }
  0x74   :  { %351 = vmatpush1.bf16.msra.mxu0 %v4922_v24  ;;  %4577 = vmatprep.subr.bf16.mxu1 %v6609_v0 }
  0x75   :  { %352 = vmatprep.subr.bf16.mxu0 %v4924_v27 }
  0x77   :  { %4578 = vmatpush3.bf16.msra.mxu1 %v4927_v29 }
  0x78   :  { %353 = vmatpush1.bf16.msra.mxu0 %v4926_v28  ;;  %4583 = vmatprep.subr.bf16.mxu1 %v6609_v0 }
  0x79   :  { %4607 = vmatprep.subr.bf16.mxu0 %v6609_v0 }
  0xd5   :  { %v5453_v58 = vpop.permute.xlu1 %431 }
  0xd9   :  { %v5506_v8 = vpop.permute.xlu1 %441 }
  0xe5   :  { %v139_v32 = vpop.xlane.xlu0 %138 }
  0xe6   :  { %v143_v33 = vmul.f32 0.0078125, %v139_v32 }
  0xe8   :  { %v145_v34 = vadd.f32 1e-05, %v143_v33 }
  0xe9   :  { %v141_v35 = vpop.xlane.xlu0 %140 }
  0xea   :  { %4968 = vrsqrt.f32 %v145_v34  ;;  %v144_v36 = vmul.f32 0.0078125, %v141_v35 }
  0xec   :  { %v146_v37 = vadd.f32 1e-05, %v144_v36 }
  0xee   :  { %4970 = vrsqrt.f32 %v146_v37 }
  0xf7   :  { %v4969_v38 = vpop.eup %4968 }
  0xf8   :  { %v149_v39 = vmul.f32 %v4969_v38, %v5403_v1 }
  0xfa   :  { %v158_v43 = vmul.f32 %v4257_v41, %v149_v39 }
  0xfb   :  { %v4971_v40 = vpop.eup %4970 }
  0xfc   :  { %v150_v42 = vmul.f32 %v4971_v40, %v5405_v2 }
  0xfe   :  { %v159_v44 = vmul.f32 %v4257_v41, %v150_v42 }
 0x100   :  { %v160_v45 = vpack.c.bf16 %v159_v44, %v158_v43 }
 0x102   :  { %371 = vmatmul.mubr.bf16.vlgmr.msra.gmra.mxu0 %v160_v45  ;;  %4580 = vmatmul.mubr.bf16.vlgmr.msra.gmra.mxu1 %v160_v45 }
 0x103   :  { %4585 = vmatprep.mubr.msk.bf16.mxu1 %vm5294_vm0, %v6609_v0  ;;  %4609 = vmatprep.mubr.msk.bf16.mxu0 %vm5294_vm0, %v6609_v0 }
 0x1c2   :  { %v372_v54 = vpop.f32.mrf.mxu0  ;;  %v5451_v55 = vpop.f32.mrf.mxu1 }
 0x1c3   :  { %v5458_v61 = vadd.f32 %v372_v54, %v198_v53  ;;  %v416_v21 = vadd.f32 %v5451_v55, %v206_v59 }
 0x1c4   :  { %v374_v56 = vpop.f32.mrf.mxu0  ;;  %v4581_v57 = vpop.f32.mrf.mxu1 }
 0x1c5   :  { %v5456_v60 = vadd.f32 %v374_v56, %v5448_v51  ;;  %v434_v6 = vmul.f32 %v5453_v58, %v5458_v61  ;;  %v445_v7 = vmul.f32 %v5426_v30, %v5458_v61  ;;  %v429_v19 = vmul.f32 %v5430_v31, %v5458_v61 }
 0x1c6   :  { %v376_v62 = vpop.f32.mrf.mxu0  ;;  %v418_v63 = vpop.f32.mrf.mxu1  ;;  %v444_v20 = vmul.f32 %v5506_v8, %v5458_v61  ;;  %v5523_v28 = vpack.c.bf16 %v416_v21, %v416_v21 }
 0x1c7   :  { %v5460_v1 = vadd.f32 %v376_v62, %v198_v53  ;;  %v5462_v2 = vadd.f32 %v418_v63, %v206_v59  ;;  %v461_v3 = vmul.f32 %v5426_v30, %v5456_v60  ;;  %v454_v4 = vmul.f32 %v5453_v58, %v5456_v60 }
 0x1c8   :  { %v4582_v5 = vpop.f32.mrf.mxu1  ;;  %v460_v9 = vmul.f32 %v5506_v8, %v5456_v60  ;;  %v453_v10 = vmul.f32 %v5430_v31, %v5456_v60  ;;  %6614 = vst [vmem:[#allocation22_spill] sm:$0xff] %v5523_v28  ;;  %v537_v37 = vsel %vm535_vm3, %v5523_v28, 0 }
 0x1c9   :  { %6613 = vst [vmem:[#allocation21_spill] sm:$0xff] %v5462_v2  ;;  %463 = vrot.lane.b32.xlu1 %v461_v3, %s5286_s24  ;;  %456 = vrot.lane.b32.xlu0 %v454_v4, %s5295_s1  ;;  %v378_v3 = vpop.f32.mrf.mxu0 }
 0x1cd   :  { %759 = vrot.lane.b32.xlu0 %v5426_v30, %s5296_s26  ;;  %436 = vrot.lane.b32.xlu1 %v434_v6, %s5295_s1 }
 0x1d1   :  { %772 = vrot.lane.b32.xlu0 %v5426_v30, %s5283_s18  ;;  %447 = vrot.lane.b32.xlu1 %v445_v7, %s5286_s24  ;;  %v5622_v7 = vadd.f32 %v378_v3, %v5448_v51 }
 0x1d5   :  { %933 = vrot.lane.b32.xlu0 %v5426_v30, %s5297_s9  ;;  %584 = vrot.lane.b32.xlu1 %v5426_v30, %s5298_s27 }
 0x1d9   :  { %946 = vrot.lane.b32.xlu0 %v5426_v30, %s5299_s28  ;;  %597 = vrot.lane.b32.xlu1 %v5426_v30, %s5300_s29 }
 0x1dd   :  { %1107 = vrot.lane.b32.xlu0 %v5426_v30, %s5301_s30  ;;  %1468 = vrot.lane.b32.xlu1 %v5426_v30, %s5302_s13 }
 0x1e1   :  { %1120 = vrot.lane.b32.xlu0 %v5426_v30, %s5289_s0 }
 0x1e5   :  { %1281 = vrot.lane.b32.xlu0 %v5426_v30, %s5303_s14 }
 0x1e9   :  { %1294 = vrot.lane.b32.xlu0 %v5426_v30, %s5304_s15 }
 0x1ed   :  { %1455 = vrot.lane.b32.xlu0 %v5426_v30, %s5305_s16 }
 0x1f1   :  { %1629 = vrot.lane.b32.xlu0 %v5426_v30, %s5295_s1 }
 0x1f5   :  { %1642 = vrot.lane.b32.xlu0 %v5426_v30, %s5306_s17 }
 0x1f9   :  { %580 = vrot.lane.b32.xlu0 %v5430_v31, %s5300_s29 }
 0x1fd   :  { %593 = vrot.lane.b32.xlu0 %v5430_v31, %s5298_s27 }
 0x23b   :  { %v464_v11 = vpop.permute.xlu1 %463  ;;  %v457_v12 = vpop.permute.xlu0 %456 }
 0x23c   :  { %v466_v13 = vadd.f32 %v464_v11, %v460_v9  ;;  %v459_v14 = vsub.f32 %v453_v10, %v457_v12 }
 0x23e   :  { %v467_v15 = vsel %vm451_vm1, %v459_v14, %v466_v13 }
 0x23f   :  { %v437_v16 = vpop.permute.xlu1 %436  ;;  %v470_v17 = vpack.c.bf16 %v467_v15, %v467_v15  ;;  %v5519_v22 = vpop.permute.xlu0 %759 }
 0x240   :  { %v439_v24 = vsub.f32 %v429_v19, %v437_v16  ;;  %v762_v40 = vmul.f32 %v5519_v22, %v5458_v61  ;;  %v791_v56 = vmul.f32 %v5519_v22, %v5456_v60 }
 0x241   :  { %v476_v18 = vsel %vm471_vm2, %v470_v17, 0 }
 0x242   :  { %4584 = vmatpush3.bf16.xpose.msra.mxu1 %v476_v18 }
 0x243   :  { %v448_v23 = vpop.permute.xlu1 %447  ;;  %4589 = vmatprep.subr.bf16.mxu1 %v6609_v0  ;;  %v5529_v34 = vpop.permute.xlu0 %772 }
 0x244   :  { %v450_v25 = vadd.f32 %v448_v23, %v444_v20  ;;  %v775_v41 = vmul.f32 %v5529_v34, %v5458_v61 }
 0x246   :  { %v452_v27 = vsel %vm451_vm1, %v439_v24, %v450_v25 }
 0x247   :  { %v468_v29 = vmul.f32 0.25, %v452_v27  ;;  %v5525_v32 = vpop.permute.xlu1 %584  ;;  %v5544_v39 = vpop.permute.xlu0 %933 }
 0x248   :  { %v587_v33 = vmul.f32 %v5525_v32, %v5458_v61  ;;  %v936_v43 = vmul.f32 %v5544_v39, %v5458_v61  ;;  %v616_v53 = vmul.f32 %v5525_v32, %v5456_v60  ;;  %v965_v59 = vmul.f32 %v5544_v39, %v5456_v60 }
 0x249   :  { %v469_v35 = vpack.c.bf16 %v468_v29, %v468_v29  ;;  %v1963_v9 = vmul.f32 %v5525_v32, %v5622_v7  ;;  %v1940_v26 = vmul.f32 %v5525_v32, %v5460_v1 }
 0x24a   :  { %589 = vrot.lane.b32.xlu1 %v587_v33, %s5295_s1 }
 0x24b   :  { %v5532_v36 = vpop.permute.xlu1 %597  ;;  %4586 = vmatmul.mubr.msk.bf16.vlgmr.msra.gmra.mxu1 %vm471_vm2, %v469_v35  ;;  %v5554_v42 = vpop.permute.xlu0 %946 }
 0x24c   :  { %4590 = vmatpush3.bf16.msra.mxu1 %v537_v37  ;;  %v600_v38 = vmul.f32 %v5532_v36, %v5458_v61  ;;  %4591 = vmatprep.mubr.msk.bf16.mxu1 %vm5294_vm0, %v6609_v0  ;;  %v949_v45 = vmul.f32 %v5554_v42, %v5458_v61  ;;  %v623_v14 = vmul.f32 %v5532_v36, %v5456_v60 }
 0x24d   :  { %4595 = vmatprep.subr.bf16.mxu1 %v6609_v0  ;;  %v972_v15 = vmul.f32 %v5554_v42, %v5456_v60  ;;  %v1970_v23 = vmul.f32 %v5532_v36, %v5622_v7 }
 0x24e   :  { %755 = vrot.lane.b32.xlu1 %v5430_v31, %s5283_s18  ;;  %602 = vrot.lane.b32.xlu0 %v600_v38, %s5286_s24 }
 0x24f   :  { %v5564_v44 = vpop.permute.xlu0 %1107  ;;  %v5619_v6 = vpop.permute.xlu1 %1468 }
 0x250   :  { %v1110_v48 = vmul.f32 %v5564_v44, %v5458_v61  ;;  %v1139_v62 = vmul.f32 %v5564_v44, %v5456_v60  ;;  %v1471_v10 = vmul.f32 %v5619_v6, %v5458_v61  ;;  %v1494_v19 = vmul.f32 %v5619_v6, %v5456_v60 }
 0x252   :  { %764 = vrot.lane.b32.xlu1 %v762_v40, %s5295_s1  ;;  %768 = vrot.lane.b32.xlu0 %v5430_v31, %s5296_s26 }
 0x253   :  { %v5573_v49 = vpop.permute.xlu0 %1120 }
 0x254   :  { %v1123_v50 = vmul.f32 %v5573_v49, %v5458_v61  ;;  %v1146_v16 = vmul.f32 %v5573_v49, %v5456_v60 }
 0x256   :  { %929 = vrot.lane.b32.xlu1 %v5430_v31, %s5299_s28  ;;  %777 = vrot.lane.b32.xlu0 %v775_v41, %s5286_s24 }
 0x257   :  { %v5583_v52 = vpop.permute.xlu0 %1281 }
 0x258   :  { %v1284_v54 = vmul.f32 %v5583_v52, %v5458_v61  ;;  %v1313_v4 = vmul.f32 %v5583_v52, %v5456_v60 }
 0x25a   :  { %938 = vrot.lane.b32.xlu1 %v936_v43, %s5295_s1  ;;  %942 = vrot.lane.b32.xlu0 %v5430_v31, %s5297_s9 }
 0x25b   :  { %v5593_v55 = vpop.permute.xlu0 %1294 }
 0x25c   :  { %v1297_v57 = vmul.f32 %v5593_v55, %v5458_v61  ;;  %v1320_v17 = vmul.f32 %v5593_v55, %v5456_v60 }
 0x25e   :  { %1103 = vrot.lane.b32.xlu1 %v5430_v31, %s5289_s0  ;;  %951 = vrot.lane.b32.xlu0 %v949_v45, %s5286_s24 }
 0x25f   :  { %v5610_v63 = vpop.permute.xlu0 %1455 }
 0x260   :  { %v1458_v5 = vmul.f32 %v5610_v63, %v5458_v61  ;;  %v1487_v18 = vmul.f32 %v5610_v63, %v5456_v60 }
 0x262   :  { %1112 = vrot.lane.b32.xlu1 %v1110_v48, %s5295_s1  ;;  %1116 = vrot.lane.b32.xlu0 %v5430_v31, %s5301_s30 }
 0x263   :  { %v5632_v11 = vpop.permute.xlu0 %1629 }
 0x264   :  { %v1632_v51 = vmul.f32 %v5632_v11, %v5458_v61  ;;  %v1661_v20 = vmul.f32 %v5632_v11, %v5456_v60 }
 0x266   :  { %1277 = vrot.lane.b32.xlu1 %v5430_v31, %s5304_s15  ;;  %1125 = vrot.lane.b32.xlu0 %v1123_v50, %s5286_s24 }
 0x267   :  { %v5638_v12 = vpop.permute.xlu0 %1642 }
 0x268   :  { %v1645_v13 = vmul.f32 %v5638_v12, %v5458_v61  ;;  %v1668_v21 = vmul.f32 %v5638_v12, %v5456_v60 }
 0x26a   :  { %1638 = vrot.lane.b32.xlu1 %v5430_v31, %s5295_s1  ;;  %1290 = vrot.lane.b32.xlu0 %v5430_v31, %s5303_s14 }
 0x26b   :  { %v5673_v24 = vpop.permute.xlu0 %580 }
 0x26c   :  { %v583_v25 = vmul.f32 %v5673_v24, %v5458_v61 }
 0x26e   :  { %618 = vrot.lane.b32.xlu1 %v616_v53, %s5295_s1  ;;  %1286 = vrot.lane.b32.xlu0 %v1284_v54, %s5295_s1 }
 0x26f   :  { %v5678_v27 = vpop.permute.xlu0 %593 }
 0x270   :  { %v596_v35 = vmul.f32 %v5678_v27, %v5458_v61 }
 0x272   :  { %793 = vrot.lane.b32.xlu1 %v791_v56, %s5295_s1  ;;  %1299 = vrot.lane.b32.xlu0 %v1297_v57, %s5286_s24 }
 0x276   :  { %967 = vrot.lane.b32.xlu1 %v965_v59, %s5295_s1  ;;  %1451 = vrot.lane.b32.xlu0 %v5430_v31, %s5302_s13 }
 0x27a   :  { %1141 = vrot.lane.b32.xlu1 %v1139_v62, %s5295_s1  ;;  %1464 = vrot.lane.b32.xlu0 %v5430_v31, %s5305_s16 }
 0x27e   :  { %1315 = vrot.lane.b32.xlu1 %v1313_v4, %s5295_s1  ;;  %1460 = vrot.lane.b32.xlu0 %v1458_v5, %s5295_s1 }
 0x282   :  { %1965 = vrot.lane.b32.xlu1 %v1963_v9, %s5295_s1  ;;  %1473 = vrot.lane.b32.xlu0 %v1471_v10, %s5286_s24 }
 0x286   :  { %1625 = vrot.lane.b32.xlu0 %v5430_v31, %s5306_s17  ;;  %v798_v31 = vmul.f32 %v5529_v34, %v5456_v60 }
 0x28a   :  { %1634 = vrot.lane.b32.xlu0 %v1632_v51, %s5295_s1 }
 0x28e   :  { %1647 = vrot.lane.b32.xlu0 %v1645_v13, %s5286_s24 }
 0x292   :  { %625 = vrot.lane.b32.xlu0 %v623_v14, %s5286_s24 }
 0x296   :  { %800 = vrot.lane.b32.xlu0 %v798_v31, %s5286_s24 }
 0x29a   :  { %974 = vrot.lane.b32.xlu0 %v972_v15, %s5286_s24 }
 0x29e   :  { %1148 = vrot.lane.b32.xlu0 %v1146_v16, %s5286_s24 }
 0x2a2   :  { %1322 = vrot.lane.b32.xlu0 %v1320_v17, %s5286_s24 }
 0x2a6   :  { %1489 = vrot.lane.b32.xlu0 %v1487_v18, %s5295_s1 }
 0x2aa   :  { %1496 = vrot.lane.b32.xlu0 %v1494_v19, %s5286_s24  ;;  %v615_v19 = vmul.f32 %v5673_v24, %v5456_v60 }
 0x2ae   :  { %1663 = vrot.lane.b32.xlu0 %v1661_v20, %s5295_s1  ;;  %v622_v20 = vmul.f32 %v5678_v27, %v5456_v60 }
 0x2b2   :  { %1670 = vrot.lane.b32.xlu0 %v1668_v21, %s5286_s24 }
 0x2b6   :  { %1972 = vrot.lane.b32.xlu0 %v1970_v23, %s5286_s24  ;;  %v427_v23 = vand.u32 127, %v195_v46 }
 0x2b8   :  { %vm5736_vm4 = vcmp.le.s32.totalorder %v427_v23, %v5444_v47 }
 0x2bc   :  { %v590_v29 = vpop.permute.xlu1 %589 }
 0x2bd   :  { %v592_v33 = vsub.f32 %v583_v25, %v590_v29 }
 0x2bf   :  { %607 = vrot.lane.b32.xlu1 %v592_v33, %s5306_s17 }
 0x2c0   :  { %v603_v37 = vpop.permute.xlu0 %602  ;;  %v5692_v48 = vpop.permute.xlu1 %755 }
 0x2c1   :  { %v605_v38 = vadd.f32 %v603_v37, %v596_v35  ;;  %v758_v32 = vmul.f32 %v5692_v48, %v5458_v61 }
 0x2c3   :  { %611 = vrot.lane.b32.xlu0 %v605_v38, %s5306_s17 }
 0x2c4   :  { %v5684_v40 = vpop.permute.xlu0 %768  ;;  %v765_v53 = vpop.permute.xlu1 %764 }
 0x2c8   :  { %v5686_v41 = vpop.permute.xlu0 %777  ;;  %v5700_v57 = vpop.permute.xlu1 %929 }
 0x2cc   :  { %v5688_v43 = vpop.permute.xlu0 %942  ;;  %v5704_v62 = vpop.permute.xlu1 %938 }
 0x2d0   :  { %v5690_v45 = vpop.permute.xlu0 %951  ;;  %v5710_v5 = vpop.permute.xlu1 %1103 }
 0x2d4   :  { %v5694_v50 = vpop.permute.xlu0 %1116  ;;  %v5714_v10 = vpop.permute.xlu1 %1112 }
 0x2d8   :  { %v5696_v54 = vpop.permute.xlu0 %1125  ;;  %v5720_v14 = vpop.permute.xlu1 %1277 }
 0x2dc   :  { %v5698_v56 = vpop.permute.xlu0 %1290  ;;  %v5724_v15 = vpop.permute.xlu1 %1638 }
 0x2e0   :  { %v5702_v59 = vpop.permute.xlu0 %1286  ;;  %v619_v18 = vpop.permute.xlu1 %618 }
 0x2e1   :  { %v621_v25 = vsub.f32 %v615_v19, %v619_v18  ;;  %v2125_v19 = vmul.f32 %v5519_v22, %v5622_v7 }
 0x2e4   :  { %v5706_v3 = vpop.permute.xlu0 %1299  ;;  %v794_v0 = vpop.permute.xlu1 %793 }
 0x2e8   :  { %v5708_v4 = vpop.permute.xlu0 %1451 }
 0x2ec   :  { %v5712_v9 = vpop.permute.xlu0 %1464 }
 0x2f0   :  { %v5716_v51 = vpop.permute.xlu0 %1460 }
 0x2f4   :  { %v5718_v13 = vpop.permute.xlu0 %1473 }
 0x2f8   :  { %v5722_v31 = vpop.permute.xlu0 %1625 }
 0x2fc   :  { %v5726_v16 = vpop.permute.xlu0 %1634 }
 0x300   :  { %v5728_v17 = vpop.permute.xlu0 %1647 }
 0x304   :  { %v626_v21 = vpop.permute.xlu0 %625 }
 0x305   :  { %v628_v29 = vadd.f32 %v626_v21, %v622_v20  ;;  %v971_v21 = vmul.f32 %v5688_v43, %v5456_v60 }
 0x307   :  { %v4826_v33 = vpack.i.bf16 %v628_v29, %v621_v25  ;;  %v767_v25 = vsub.f32 %v758_v32, %v765_v53  ;;  %v964_v29 = vmul.f32 %v5700_v57, %v5456_v60  ;;  %v2109_v53 = vmul.f32 %v5529_v34, %v5460_v1 }
 0x308   :  { %v801_v37 = vpop.permute.xlu0 %800 }
 0x309   :  { %4827 = vrot.lane.b32.xlu0 %v4826_v33, %s5306_s17 }
 0x30b   :  { %v512_v38 = vpop.f32.mrf.mxu1 }
 0x30c   :  { %v5745_v2 = vsel %vm5736_vm4, %v512_v38, -1e+30  ;;  %v975_v20 = vpop.permute.xlu0 %974 }
 0x30d   :  { %1942 = vrot.lane.b32.xlu0 %v1940_v26, %s5295_s1  ;;  %v4587_v46 = vpop.f32.mrf.mxu1  ;;  %v519_v47 = vsel %vm451_vm1, %v5745_v2, -inf  ;;  %v968_v26 = vpop.permute.xlu1 %967  ;;  %v977_v33 = vadd.f32 %v975_v20, %v971_v21  ;;  %v2293_v20 = vmul.f32 %v5554_v42, %v5622_v7  ;;  %v945_v21 = vmul.f32 %v5688_v43, %v5458_v61 }
 0x30e   :  { %520 = vmax.xlane.f32.xlu1 %v519_v47  ;;  %v970_v38 = vsub.f32 %v964_v29, %v968_v26  ;;  %v797_v46 = vmul.f32 %v5684_v40, %v5456_v60  ;;  %v771_v26 = vmul.f32 %v5684_v40, %v5458_v61 }
 0x30f   :  { %v515_v18 = vpop.f32.mrf.mxu1 }
 0x310   :  { %v4836_v47 = vpack.i.bf16 %v977_v33, %v970_v38  ;;  %v790_v18 = vmul.f32 %v5692_v48, %v5456_v60  ;;  %v803_v28 = vadd.f32 %v801_v37, %v797_v46  ;;  %v1947_v37 = vmul.f32 %v5532_v36, %v5460_v1 }
 0x311   :  { %2127 = vrot.lane.b32.xlu0 %v2125_v19, %s5295_s1  ;;  %v4588_v23 = vpop.f32.mrf.mxu1  ;;  %v1142_v29 = vpop.permute.xlu1 %1141  ;;  %v780_v36 = vadd.f32 %v5686_v41, %v771_v26  ;;  %v1106_v33 = vmul.f32 %v5710_v5, %v5458_v61  ;;  %v1319_v38 = vmul.f32 %v5698_v56, %v5456_v60  ;;  %v2102_v46 = vmul.f32 %v5519_v22, %v5460_v1 }
 0x312   :  { %v796_v19 = vsub.f32 %v790_v18, %v794_v0  ;;  %v954_v0 = vadd.f32 %v5690_v45, %v945_v21  ;;  %v1149_v23 = vpop.permute.xlu0 %1148  ;;  %v2447_v45 = vmul.f32 %v5564_v44, %v5622_v7  ;;  %v1312_v18 = vmul.f32 %v5720_v14, %v5456_v60 }
 0x313   :  { %v1145_v22 = vmul.f32 %v5694_v50, %v5456_v60  ;;  %v2431_v26 = vmul.f32 %v5573_v49, %v5460_v1 }
 0x314   :  { %v4831_v32 = vpack.i.bf16 %v803_v28, %v796_v19  ;;  %v2132_v28 = vmul.f32 %v5529_v34, %v5622_v7 }
 0x315   :  { %782 = vrot.lane.b32.xlu0 %v767_v25, %s5302_s13  ;;  %v2263_v25 = vmul.f32 %v5544_v39, %v5460_v1  ;;  %v1316_v41 = vpop.permute.xlu1 %1315 }
 0x316   :  { %v1323_v34 = vpop.permute.xlu0 %1322 }
 0x317   :  { %v1325_v19 = vadd.f32 %v1323_v34, %v1319_v38  ;;  %v2454_v34 = vmul.f32 %v5573_v49, %v5622_v7  ;;  %v2585_v38 = vmul.f32 %v5583_v52, %v5460_v1 }
 0x319   :  { %4837 = vrot.lane.b32.xlu0 %v4836_v47, %s5304_s15  ;;  %v1115_v47 = vsub.f32 %v1106_v33, %v5714_v10 }
 0x31d   :  { %2111 = vrot.lane.b32.xlu0 %v2109_v53, %s5286_s24  ;;  %v1318_v53 = vsub.f32 %v1312_v18, %v1316_v41  ;;  %v1667_v41 = vmul.f32 %v5724_v15, %v5456_v60 }
 0x31f   :  { %4832 = vrot.lane.b32.xlu1 %v4831_v32, %s5302_s13  ;;  %v2286_v32 = vmul.f32 %v5544_v39, %v5622_v7  ;;  %v4846_v21 = vpack.i.bf16 %v1325_v19, %v1318_v53 }
 0x321   :  { %2295 = vrot.lane.b32.xlu0 %v2293_v20, %s5286_s24  ;;  %v932_v20 = vmul.f32 %v5700_v57, %v5458_v61 }
 0x323   :  { %1949 = vrot.lane.b32.xlu1 %v1947_v37, %s5286_s24  ;;  %v941_v10 = vsub.f32 %v932_v20, %v5704_v62  ;;  %v1138_v37 = vmul.f32 %v5710_v5, %v5456_v60  ;;  %v2615_v62 = vmul.f32 %v5593_v55, %v5622_v7  ;;  %v2937_v20 = vmul.f32 %v5638_v12, %v5622_v7 }
 0x325   :  { %960 = vrot.lane.b32.xlu0 %v954_v0, %s5304_s15  ;;  %v1151_v0 = vadd.f32 %v1149_v23, %v1145_v22  ;;  %v1144_v39 = vsub.f32 %v1138_v37, %v1142_v29  ;;  %v1293_v23 = vmul.f32 %v5698_v56, %v5458_v61  ;;  %v2270_v29 = vmul.f32 %v5554_v42, %v5460_v1 }
 0x326   :  { %v2769_v42 = vmul.f32 %v5610_v63, %v5622_v7  ;;  %v1807_v37 = vmul.f32 %v5426_v30, %v5460_v1 }
 0x327   :  { %2134 = vrot.lane.b32.xlu1 %v2132_v28, %s5286_s24  ;;  %v5814_v28 = vpop.permute.xlu0 %1489 }
 0x329   :  { %2265 = vrot.lane.b32.xlu0 %v2263_v25, %s5295_s1  ;;  %v4841_v25 = vpack.i.bf16 %v1151_v0, %v1144_v39 }
 0x32b   :  { %786 = vrot.lane.b32.xlu1 %v780_v36, %s5302_s13  ;;  %v5823_v36 = vpop.permute.xlu0 %1496 }
 0x32d   :  { %2449 = vrot.lane.b32.xlu0 %v2447_v45, %s5295_s1  ;;  %v1302_v45 = vadd.f32 %v5706_v3, %v1293_v23  ;;  %v1454_v3 = vmul.f32 %v5708_v4, %v5458_v61 }
 0x32f   :  { %2104 = vrot.lane.b32.xlu1 %v2102_v46, %s5295_s1  ;;  %v1664_v33 = vpop.permute.xlu0 %1663  ;;  %v1463_v49 = vsub.f32 %v1454_v3, %v5716_v51  ;;  %v1641_v51 = vmul.f32 %v5724_v15, %v5458_v61 }
 0x331   :  { %1130 = vrot.lane.b32.xlu0 %v1115_v47, %s5289_s0  ;;  %v1660_v47 = vmul.f32 %v5722_v31, %v5456_v60  ;;  %v1650_v22 = vadd.f32 %v5728_v17, %v1641_v51  ;;  %v2124_v51 = vmul.f32 %v5692_v48, %v5622_v7 }
 0x333   :  { %2288 = vrot.lane.b32.xlu1 %v2286_v32, %s5295_s1  ;;  %v1671_v46 = vpop.permute.xlu0 %1670  ;;  %v1666_v19 = vsub.f32 %v1660_v47, %v1664_v33  ;;  %v2753_v32 = vmul.f32 %v5619_v6, %v5460_v1 }
 0x334   :  { %v1673_v18 = vadd.f32 %v1671_v46, %v1667_v41 }
 0x335   :  { %4847 = vrot.lane.b32.xlu0 %v4846_v21, %s5299_s28  ;;  %v1822_v21 = vmul.f32 %v5426_v30, %v5622_v7 }
 0x336   :  { %v4856_v53 = vpack.i.bf16 %v1673_v18, %v1666_v19 }
 0x337   :  { %956 = vrot.lane.b32.xlu1 %v941_v10, %s5304_s15  ;;  %v2914_v10 = vmul.f32 %v5638_v12, %v5460_v1  ;;  %v5870_v0 = vpop.permute.xlu0 %1972 }
 0x339   :  { %2433 = vrot.lane.b32.xlu0 %v2431_v26, %s5286_s24  ;;  %v1939_v26 = vmul.f32 %v5673_v24, %v5460_v1 }
 0x33b   :  { %4842 = vrot.lane.b32.xlu1 %v4841_v25, %s5289_s0  ;;  %v5872_v17 = vpop.permute.xlu0 %611 }
 0x33d   :  { %2617 = vrot.lane.b32.xlu0 %v2615_v62, %s5286_s24 }
 0x33f   :  { %2272 = vrot.lane.b32.xlu1 %v2270_v29, %s5286_s24 }
 0x341   :  { %1308 = vrot.lane.b32.xlu0 %v1302_v45, %s5299_s28  ;;  %v5879_v45 = vpop.permute.xlu1 %1965 }
 0x343   :  { %2456 = vrot.lane.b32.xlu1 %v2454_v34, %s5286_s24 }
 0x345   :  { %2587 = vrot.lane.b32.xlu0 %v2585_v38, %s5295_s1  ;;  %v5881_v34 = vpop.permute.xlu1 %607 }
 0x349   :  { %2771 = vrot.lane.b32.xlu0 %v2769_v42, %s5295_s1 }
 0x34d   :  { %1478 = vrot.lane.b32.xlu0 %v1463_v49, %s5283_s18 }
 0x351   :  { %4857 = vrot.lane.b32.xlu0 %v4856_v53, %s5300_s29 }
 0x355   :  { %2755 = vrot.lane.b32.xlu0 %v2753_v32, %s5286_s24 }
 0x359   :  { %2939 = vrot.lane.b32.xlu0 %v2937_v20, %s5286_s24 }
 0x35d   :  { %1656 = vrot.lane.b32.xlu0 %v1650_v22, %s5300_s29 }
 0x361   :  { %1824 = vrot.lane.b32.xlu0 %v1822_v21, %s5286_s24 }
 0x365   :  { %2916 = vrot.lane.b32.xlu0 %v2914_v10, %s5286_s24 }
 0x369   :  { %1809 = vrot.lane.b32.xlu0 %v1807_v37, %s5286_s24 }
 0x37b   :  { %v5874_v39 = vpop.permute.xlu0 %4827 }
 0x37f   :  { %v1943_v25 = vpop.permute.xlu0 %1942 }
 0x380   :  { %v1945_v62 = vsub.f32 %v1939_v26, %v1943_v25  ;;  %v6617_v26 = vmov 0.0  }
 0x382   :  { %1954 = vrot.lane.b32.xlu0 %v1945_v62, %s5306_s17 }
 0x383   :  { %v2128_v12 = vpop.permute.xlu0 %2127 }
 0x384   :  { %v2130_v25 = vsub.f32 %v2124_v51, %v2128_v12 }
 0x387   :  { %v783_v23 = vpop.permute.xlu0 %782 }
 0x38b   :  { %v4838_v29 = vpop.permute.xlu0 %4837 }
 0x38c   :  { %v4840_v22 = vunpack.i.h.bf16 %v4838_v29  ;;  %v4839_v21 = vunpack.i.l.bf16 %v4838_v29 }
 0x38f   :  { %v2112_v30 = vpop.permute.xlu0 %2111 }
 0x393   :  { %v5883_v33 = vpop.permute.xlu0 %2295 }
 0x397   :  { %v961_v38 = vpop.permute.xlu0 %960  ;;  %v521_v42 = vpop.xlane.xlu1 %520 }
 0x398   :  { %v522_v46 = vsub.f32 %v5745_v2, %v521_v42  ;;  %v2131_v2 = vmul.f32 %v5684_v40, %v5622_v7 }
 0x39a   :  { %v523_v3 = vmul.f32 1.442695, %v522_v46  ;;  %v986_v46 = vsel %vm451_vm1, %v4839_v21, %v4840_v22 }
 0x39b   :  { %v4833_v41 = vpop.permute.xlu1 %4832  ;;  %v2266_v18 = vpop.permute.xlu0 %2265 }
 0x39c   :  { %4972 = vpow2.f32 %v523_v3  ;;  %v4835_v49 = vunpack.i.h.bf16 %v4833_v41  ;;  %v4834_v47 = vunpack.i.l.bf16 %v4833_v41  ;;  %v2108_v41 = vmul.f32 %v5684_v40, %v5460_v1 }
 0x39d   :  { %v2262_v40 = vmul.f32 %v5700_v57, %v5460_v1 }
 0x39e   :  { %v812_v19 = vsel %vm451_vm1, %v4834_v47, %v4835_v49 }
 0x39f   :  { %v5887_v53 = vpop.permute.xlu1 %1949  ;;  %v815_v32 = vpack.c.bf16 %v812_v19, %v812_v19  ;;  %v2450_v10 = vpop.permute.xlu0 %2449  ;;  %v2268_v21 = vsub.f32 %v2262_v40, %v2266_v18  ;;  %v2446_v40 = vmul.f32 %v5710_v5, %v5622_v7 }
 0x3a1   :  { %v820_v20 = vsel %vm471_vm2, %v815_v32, 0  ;;  %v989_v32 = vpack.c.bf16 %v986_v46, %v986_v46 }
 0x3a2   :  { %4608 = vmatpush3.bf16.xpose.msra.mxu0 %v820_v20  ;;  %v2114_v20 = vadd.f32 %v2112_v30, %v2108_v41 }
 0x3a3   :  { %v2135_v37 = vpop.permute.xlu1 %2134  ;;  %4619 = vmatprep.subr.bf16.mxu0 %v6617_v26  ;;  %v5902_v47 = vpop.permute.xlu0 %1130 }
 0x3a4   :  { %v2137_v62 = vadd.f32 %v2135_v37, %v2131_v2 }
 0x3a6   :  { %v4866_v42 = vpack.i.bf16 %v2137_v62, %v2130_v25 }
 0x3a7   :  { %v787_v3 = vpop.permute.xlu1 %786  ;;  %v5915_v30 = vpop.permute.xlu0 %4847 }
 0x3a8   :  { %v789_v49 = vsel %vm451_vm1, %v783_v23, %v787_v3  ;;  %4867 = vrot.lane.b32.xlu0 %v4866_v42, %s5302_s13  ;;  %v994_v23 = vsel %vm471_vm2, %v989_v32, 0 }
 0x3a9   :  { %v5900_v29 = vpop.eup %4972  ;;  %v813_v19 = vmul.f32 0.25, %v789_v49  ;;  %v1119_v49 = vmul.f32 %v5694_v50, %v5458_v61 }
 0x3aa   :  { %v525_v12 = vsel %vm451_vm1, %v5900_v29, 0.0 }
 0x3ab   :  { %v814_v51 = vpack.c.bf16 %v813_v19, %v813_v19  ;;  %526 = vadd.xlane.f32.xlu1 %v525_v12  ;;  %v5906_v22 = vpop.permute.xlu1 %2104  ;;  %v2434_v62 = vpop.permute.xlu0 %2433  ;;  %v1128_v19 = vadd.f32 %v5696_v54, %v1119_v49  ;;  %v2453_v54 = vmul.f32 %v5694_v50, %v5622_v7  ;;  %v1486_v49 = vmul.f32 %v5708_v4, %v5456_v60 }
 0x3ac   :  { %2120 = vrot.lane.b32.xlu0 %v2114_v20, %s5302_s13 }
 0x3ad   :  { %4610 = vmatmul.mubr.msk.bf16.vlgmr.msra.gmra.mxu0 %vm471_vm2, %v814_v51 }
 0x3ae   :  { %4620 = vmatpush3.bf16.xpose.msra.mxu0 %v994_v23  ;;  %4621 = vmatprep.mubr.msk.bf16.mxu0 %vm5294_vm0, %v6617_v26  ;;  %v2424_v23 = vmul.f32 %v5564_v44, %v5460_v1  ;;  %v2430_v44 = vmul.f32 %v5694_v50, %v5460_v1 }
 0x3af   :  { %v5917_v2 = vpop.permute.xlu1 %2288  ;;  %4631 = vmatprep.subr.bf16.mxu0 %v6617_v26  ;;  %v5929_v20 = vpop.permute.xlu0 %2617 }
 0x3b0   :  { %2277 = vrot.lane.b32.xlu0 %v2268_v21, %s5304_s15 }
 0x3b3   :  { %v957_v37 = vpop.permute.xlu1 %956 }
 0x3b4   :  { %v963_v25 = vsel %vm451_vm1, %v957_v37, %v961_v38  ;;  %v2452_v37 = vsub.f32 %v2446_v40, %v2450_v10 }
 0x3b5   :  { %v987_v42 = vmul.f32 0.25, %v963_v25 }
 0x3b7   :  { %v988_v46 = vpack.c.bf16 %v987_v42, %v987_v42  ;;  %v4843_v3 = vpop.permute.xlu1 %4842  ;;  %v5943_v42 = vpop.permute.xlu0 %1308 }
 0x3b8   :  { %v4845_v18 = vunpack.i.h.bf16 %v4843_v3  ;;  %v4844_v41 = vunpack.i.l.bf16 %v4843_v3  ;;  %v2608_v3 = vmul.f32 %v5583_v52, %v5622_v7 }
 0x3b9   :  { %4622 = vmatmul.mubr.msk.bf16.vlgmr.msra.gmra.mxu0 %vm471_vm2, %v988_v46 }
 0x3ba   :  { %v1160_v32 = vsel %vm451_vm1, %v4844_v41, %v4845_v18  ;;  %4633 = vmatprep.mubr.msk.bf16.mxu0 %vm5294_vm0, %v6617_v26  ;;  %v1280_v18 = vmul.f32 %v5720_v14, %v5458_v61  ;;  %v1493_v41 = vmul.f32 %v5712_v9, %v5456_v60  ;;  %v2592_v60 = vmul.f32 %v5593_v55, %v5460_v1 }
 0x3bb   :  { %v5931_v38 = vpop.permute.xlu1 %2272  ;;  %v1163_v12 = vpack.c.bf16 %v1160_v32, %v1160_v32  ;;  %v2588_v32 = vpop.permute.xlu0 %2587  ;;  %v2930_v55 = vmul.f32 %v5632_v11, %v5622_v7 }
 0x3bc   :  { %1134 = vrot.lane.b32.xlu1 %v1128_v19, %s5289_s0  ;;  %v1289_v10 = vsub.f32 %v1280_v18, %v5702_v59  ;;  %v1499_v52 = vadd.f32 %v5823_v36, %v1493_v41  ;;  %v2436_v19 = vadd.f32 %v2434_v62, %v2430_v44  ;;  %v2776_v59 = vmul.f32 %v5619_v6, %v5622_v7 }
 0x3bd   :  { %v1168_v51 = vsel %vm471_vm2, %v1163_v12, 0  ;;  %v1492_v12 = vsub.f32 %v1486_v49, %v5814_v28  ;;  %v1467_v28 = vmul.f32 %v5712_v9, %v5458_v61  ;;  %v2746_v62 = vmul.f32 %v5610_v63, %v5460_v1 }
 0x3be   :  { %4632 = vmatpush3.bf16.xpose.msra.mxu0 %v1168_v51  ;;  %v2584_v51 = vmul.f32 %v5720_v14, %v5460_v1  ;;  %v1628_v6 = vmul.f32 %v5722_v31, %v5458_v61  ;;  %v2907_v63 = vmul.f32 %v5632_v11, %v5460_v1  ;;  %v1962_v61 = vmul.f32 %v5673_v24, %v5622_v7 }
 0x3bf   :  { %v2457_v21 = vpop.permute.xlu1 %2456  ;;  %4643 = vmatprep.subr.bf16.mxu0 %v6617_v26  ;;  %v4851_v40 = vpack.i.bf16 %v1499_v52, %v1492_v12  ;;  %v1476_v36 = vadd.f32 %v5718_v13, %v1467_v28  ;;  %v1815_v13 = vmul.f32 %v5453_v58, %v5622_v7  ;;  %v1946_v11 = vmul.f32 %v5678_v27, %v5460_v1 }
 0x3c0   :  { %v2459_v25 = vadd.f32 %v2457_v21, %v2453_v54  ;;  %2426 = vrot.lane.b32.xlu1 %v2424_v23, %s5295_s1  ;;  %v2590_v50 = vsub.f32 %v2584_v51, %v2588_v32  ;;  %v1637_v54 = vsub.f32 %v1628_v6, %v5726_v16  ;;  %v1969_v23 = vmul.f32 %v5678_v27, %v5622_v7 }
 0x3c1   :  { %v1800_v21 = vmul.f32 %v5453_v58, %v5460_v1  ;;  %v2101_v24 = vmul.f32 %v5692_v48, %v5460_v1  ;;  %v2292_v58 = vmul.f32 %v5688_v43, %v5622_v7  ;;  %v2269_v48 = vmul.f32 %v5688_v43, %v5460_v1 }
 0x3c2   :  { %v4876_v46 = vpack.i.bf16 %v2459_v25, %v2452_v37  ;;  %v1975_v16 = vadd.f32 %v5870_v0, %v1969_v23  ;;  %v1968_v37 = vsub.f32 %v1962_v61, %v5879_v45  ;;  %v2285_v0 = vmul.f32 %v5700_v57, %v5622_v7 }
 0x3c3   :  { %v2107_v45 = vsub.f32 %v2101_v24, %v5906_v22  ;;  %v2298_v27 = vadd.f32 %v5883_v33, %v2292_v58  ;;  %v2275_v57 = vadd.f32 %v5931_v38, %v2269_v48  ;;  %v4850_v18 = vunpack.i.h.bf16 %v5915_v30 }
 0x3c4   :  { %2610 = vrot.lane.b32.xlu1 %v2608_v3, %s5295_s1  ;;  %4877 = vrot.lane.b32.xlu0 %v4876_v46, %s5289_s0  ;;  %v4861_v25 = vpack.i.bf16 %v1975_v16, %v1968_v37  ;;  %v1952_v46 = vadd.f32 %v5887_v53, %v1946_v11  ;;  %v2291_v3 = vsub.f32 %v2285_v0, %v5917_v2  ;;  %v4849_v22 = vunpack.i.l.bf16 %v5915_v30  ;;  %v6023_v2 = vpop.permute.xlu0 %2771 }
 0x3c5   :  { %v2423_v38 = vmul.f32 %v5710_v5, %v5460_v1  ;;  %v4830_v52 = vunpack.i.h.bf16 %v5874_v39  ;;  %v2607_v5 = vmul.f32 %v5720_v14, %v5622_v7 }
 0x3c6   :  { %v4871_v53 = vpack.i.bf16 %v2298_v27, %v2291_v3  ;;  %v1334_v33 = vsel %vm451_vm1, %v4849_v22, %v4850_v18 }
 0x3c7   :  { %v1337_v49 = vpack.c.bf16 %v1334_v33, %v1334_v33 }
 0x3c8   :  { %1304 = vrot.lane.b32.xlu1 %v1289_v10, %s5299_s28  ;;  %2442 = vrot.lane.b32.xlu0 %v2436_v19, %s5289_s0  ;;  %v4829_v19 = vunpack.i.l.bf16 %v5874_v39  ;;  %v6032_v30 = vpop.permute.xlu0 %1478 }
 0x3ca   :  { %v637_v39 = vsel %vm451_vm1, %v4829_v19, %v4830_v52 }
 0x3cb   :  { %v640_v6 = vpack.c.bf16 %v637_v39, %v637_v39 }
 0x3cc   :  { %4852 = vrot.lane.b32.xlu1 %v4851_v40, %s5283_s18  ;;  %2599 = vrot.lane.b32.xlu0 %v2590_v50, %s5299_s28  ;;  %v1342_v50 = vsel %vm471_vm2, %v1337_v49, 0 }
 0x3d0   :  { %2594 = vrot.lane.b32.xlu1 %v2592_v60, %s5286_s24 }
 0x3d4   :  { %2778 = vrot.lane.b32.xlu1 %v2776_v59, %s5286_s24 }
 0x3d8   :  { %1482 = vrot.lane.b32.xlu1 %v1476_v36, %s5283_s18  ;;  %v4858_v36 = vpop.permute.xlu0 %4857 }
 0x3d9   :  { %v4860_v3 = vunpack.i.h.bf16 %v4858_v36  ;;  %v4859_v27 = vunpack.i.l.bf16 %v4858_v36  ;;  %v1821_v36 = vmul.f32 %v5506_v8, %v5622_v7 }
 0x3db   :  { %v1682_v22 = vsel %vm451_vm1, %v4859_v27, %v4860_v3 }
 0x3dc   :  { %2748 = vrot.lane.b32.xlu1 %v2746_v62, %s5295_s1  ;;  %v2756_v61 = vpop.permute.xlu0 %2755  ;;  %v1685_v49 = vpack.c.bf16 %v1682_v22, %v1682_v22 }
 0x3e0   :  { %2932 = vrot.lane.b32.xlu1 %v2930_v55, %s5295_s1  ;;  %v2940_v0 = vpop.permute.xlu0 %2939 }
 0x3e4   :  { %1652 = vrot.lane.b32.xlu1 %v1637_v54, %s5300_s29 }
 0x3e8   :  { %1817 = vrot.lane.b32.xlu1 %v1815_v13, %s5295_s1 }
 0x3ec   :  { %2909 = vrot.lane.b32.xlu1 %v2907_v63, %s5295_s1  ;;  %v614_v63 = vsel %vm451_vm1, %v5881_v34, %v5872_v17  ;;  %v2591_v17 = vmul.f32 %v5698_v56, %v5460_v1 }
 0x3f0   :  { %1802 = vrot.lane.b32.xlu1 %v1800_v21, %s5295_s1 }
 0x3f4   :  { %4862 = vrot.lane.b32.xlu1 %v4861_v25, %s5306_s17 }
 0x3f8   :  { %1958 = vrot.lane.b32.xlu1 %v1952_v46, %s5306_s17 }
 0x3fc   :  { %2116 = vrot.lane.b32.xlu1 %v2107_v45, %s5302_s13  ;;  %v2768_v45 = vmul.f32 %v5708_v4, %v5622_v7 }
 0x3fe   :  { %v2774_v48 = vsub.f32 %v2768_v45, %v6023_v2  ;;  %v2745_v2 = vmul.f32 %v5708_v4, %v5460_v1 }
 0x400   :  { %4872 = vrot.lane.b32.xlu1 %v4871_v53, %s5304_s15 }
 0x404   :  { %2281 = vrot.lane.b32.xlu1 %v2275_v57, %s5304_s15 }
 0x434   :  { %v527_v41 = vpop.xlane.xlu1 %526 }
 0x435   :  { %4974 = vrcp.f32 %v527_v41  ;;  %v1657_v41 = vpop.permute.xlu0 %1656 }
 0x438   :  { %v1135_v44 = vpop.permute.xlu1 %1134 }
 0x439   :  { %v1137_v43 = vsel %vm451_vm1, %v5902_v47, %v1135_v44  ;;  %v2614_v47 = vmul.f32 %v5698_v56, %v5622_v7  ;;  %v2775_v56 = vmul.f32 %v5712_v9, %v5622_v7  ;;  %v2752_v44 = vmul.f32 %v5712_v9, %v5460_v1 }
 0x43a   :  { %v1161_v10 = vmul.f32 0.25, %v1137_v43  ;;  %v1690_v9 = vsel %vm471_vm2, %v1685_v49, 0 }
 0x43b   :  { %v2620_v60 = vadd.f32 %v5929_v20, %v2614_v47  ;;  %v645_v20 = vsel %vm471_vm2, %v640_v6, 0 }
 0x43c   :  { %v1162_v32 = vpack.c.bf16 %v1161_v10, %v1161_v10  ;;  %v2427_v12 = vpop.permute.xlu1 %2426 }
 0x43d   :  { %v2429_v51 = vsub.f32 %v2423_v38, %v2427_v12  ;;  %v2758_v38 = vadd.f32 %v2756_v61, %v2752_v44  ;;  %v1825_v12 = vpop.permute.xlu0 %1824 }
 0x43e   :  { %4634 = vmatmul.mubr.msk.bf16.vlgmr.msra.gmra.mxu0 %vm471_vm2, %v1162_v32 }
 0x43f   :  { %4644 = vmatpush3.bf16.xpose.msra.mxu0 %v1342_v50  ;;  %2438 = vrot.lane.b32.xlu1 %v2429_v51, %s5289_s0  ;;  %v2929_v51 = vmul.f32 %v5722_v31, %v5622_v7 }
 0x440   :  { %v2611_v40 = vpop.permute.xlu1 %2610  ;;  %4645 = vmatprep.mubr.msk.bf16.mxu0 %vm5294_vm0, %v6617_v26  ;;  %4655 = vmatprep.subr.bf16.mxu0 %v6617_v26 }
 0x441   :  { %v2613_v59 = vsub.f32 %v2607_v5, %v2611_v40  ;;  %v2917_v40 = vpop.permute.xlu0 %2916 }
 0x442   :  { %v4975_v28 = vpop.eup %4974 }
 0x443   :  { %v4881_v62 = vpack.i.bf16 %v2620_v60, %v2613_v59  ;;  %v529_v55 = vmul.f32 %v4975_v28, %v5900_v29  ;;  %v2913_v60 = vmul.f32 %v5724_v15, %v5460_v1 }
 0x444   :  { %v1305_v54 = vpop.permute.xlu1 %1304 }
 0x445   :  { %v1311_v14 = vsel %vm451_vm1, %v1305_v54, %v5943_v42  ;;  %4882 = vrot.lane.b32.xlu1 %v4881_v62, %s5299_s28  ;;  %v530_v13 = vpack.c.bf16 %v529_v55, %v529_v55  ;;  %v638_v42 = vmul.f32 0.25, %v614_v63  ;;  %v2919_v62 = vadd.f32 %v2917_v40, %v2913_v60  ;;  %v5104_v55 = vld [vmem:[#allocation9] sm:$0xff] }
 0x446   :  { %v1335_v23 = vmul.f32 0.25, %v1311_v14  ;;  %v1814_v6 = vmul.f32 %v5104_v55, %v5622_v7 }
 0x447   :  { %4592 = vmatmul.mubr.msk.bf16.vlgmr.msra.gmra.mxu1 %vm451_vm1, %v530_v13  ;;  %v639_v46 = vpack.c.bf16 %v638_v42, %v638_v42  ;;  %v1827_v13 = vadd.f32 %v1825_v12, %v1821_v36  ;;  %v1806_v42 = vmul.f32 %v5506_v8, %v5460_v1 }
 0x448   :  { %v1336_v16 = vpack.c.bf16 %v1335_v23, %v1335_v23  ;;  %4596 = vmatpush3.bf16.xpose.msra.mxu1 %v645_v20  ;;  %v4853_v29 = vpop.permute.xlu1 %4852  ;;  %4597 = vmatprep.mubr.msk.bf16.mxu1 %vm5294_vm0, %v6617_v26  ;;  %v2906_v23 = vmul.f32 %v5722_v31, %v5460_v1  ;;  %v1810_v20 = vpop.permute.xlu0 %1809 }
 0x449   :  { %v4855_v21 = vunpack.i.h.bf16 %v4853_v29  ;;  %v4854_v37 = vunpack.i.l.bf16 %v4853_v29  ;;  %4601 = vmatprep.subr.bf16.mxu1 %v6617_v26  ;;  %v1812_v31 = vadd.f32 %v1810_v20, %v1806_v42 }
 0x44a   :  { %4646 = vmatmul.mubr.msk.bf16.vlgmr.msra.gmra.mxu0 %vm471_vm2, %v1336_v16 }
 0x44b   :  { %v1508_v34 = vsel %vm451_vm1, %v4854_v37, %v4855_v21  ;;  %4657 = vmatprep.mubr.msk.bf16.mxu0 %vm5294_vm0, %v6617_v26  ;;  %v1799_v21 = vmul.f32 %v5104_v55, %v5460_v1 }
 0x44c   :  { %v2595_v25 = vpop.permute.xlu1 %2594  ;;  %v1511_v11 = vpack.c.bf16 %v1508_v34, %v1508_v34  ;;  %v1955_v37 = vpop.permute.xlu0 %1954 }
 0x44d   :  { %v2597_v24 = vadd.f32 %v2595_v25, %v2591_v17 }
 0x44e   :  { %v1516_v58 = vsel %vm471_vm2, %v1511_v11, 0 }
 0x44f   :  { %4598 = vmatmul.mubr.msk.bf16.vlgmr.msra.gmra.mxu1 %vm471_vm2, %v639_v46  ;;  %2603 = vrot.lane.b32.xlu1 %v2597_v24, %s5299_s28 }
 0x450   :  { %4656 = vmatpush3.bf16.xpose.msra.mxu0 %v1516_v58  ;;  %v2779_v53 = vpop.permute.xlu1 %2778  ;;  %4603 = vmatprep.mubr.msk.bf16.mxu1 %vm5294_vm0, %v6617_v26  ;;  %v4868_v24 = vpop.permute.xlu0 %4867 }
 0x451   :  { %v2781_v57 = vadd.f32 %v2779_v53, %v2775_v56  ;;  %4667 = vmatprep.subr.bf16.mxu0 %v6617_v26  ;;  %v4870_v56 = vunpack.i.h.bf16 %v4868_v24  ;;  %v4869_v53 = vunpack.i.l.bf16 %v4868_v24 }
 0x453   :  { %v4886_v18 = vpack.i.bf16 %v2781_v57, %v2774_v48  ;;  %v2146_v44 = vsel %vm451_vm1, %v4869_v53, %v4870_v56 }
 0x454   :  { %v1483_v33 = vpop.permute.xlu1 %1482 }
 0x455   :  { %v1485_v43 = vsel %vm451_vm1, %v6032_v30, %v1483_v33  ;;  %4887 = vrot.lane.b32.xlu0 %v4886_v18, %s5283_s18  ;;  %v2936_v30 = vmul.f32 %v5724_v15, %v5622_v7 }
 0x456   :  { %v1509_v10 = vmul.f32 0.25, %v1485_v43 }
 0x457   :  { %v2942_v50 = vadd.f32 %v2940_v0, %v2936_v30 }
 0x458   :  { %v1510_v52 = vpack.c.bf16 %v1509_v10, %v1509_v10  ;;  %v2749_v19 = vpop.permute.xlu1 %2748 }
 0x459   :  { %v2751_v32 = vsub.f32 %v2745_v2, %v2749_v19  ;;  %2764 = vrot.lane.b32.xlu0 %v2758_v38, %s5283_s18  ;;  %v2149_v38 = vpack.c.bf16 %v2146_v44, %v2146_v44 }
 0x45a   :  { %4658 = vmatmul.mubr.msk.bf16.vlgmr.msra.gmra.mxu0 %vm471_vm2, %v1510_v52 }
 0x45b   :  { %4668 = vmatpush3.bf16.xpose.msra.mxu0 %v1690_v9  ;;  %2760 = vrot.lane.b32.xlu1 %v2751_v32, %s5283_s18 }
 0x45c   :  { %v2933_v4 = vpop.permute.xlu1 %2932  ;;  %4669 = vmatprep.mubr.msk.bf16.mxu0 %vm5294_vm0, %v6617_v26  ;;  %4679 = vmatprep.subr.bf16.mxu0 %v6617_v26 }
 0x45d   :  { %v2935_v47 = vsub.f32 %v2929_v51, %v2933_v4  ;;  %v2154_v4 = vsel %vm471_vm2, %v2149_v38, 0 }
 0x45f   :  { %v4891_v5 = vpack.i.bf16 %v2942_v50, %v2935_v47 }
 0x460   :  { %v1653_v39 = vpop.permute.xlu1 %1652 }
 0x461   :  { %v1659_v59 = vsel %vm451_vm1, %v1653_v39, %v1657_v41  ;;  %4892 = vrot.lane.b32.xlu1 %v4891_v5, %s5300_s29  ;;  %v2121_v41 = vpop.permute.xlu0 %2120 }
 0x462   :  { %v1683_v28 = vmul.f32 0.25, %v1659_v59 }
 0x464   :  { %v1684_v54 = vpack.c.bf16 %v1683_v28, %v1683_v28  ;;  %v1818_v14 = vpop.permute.xlu1 %1817 }
 0x465   :  { %v1820_v63 = vsub.f32 %v1814_v6, %v1818_v14  ;;  %2925 = vrot.lane.b32.xlu1 %v2919_v62, %s5300_s29  ;;  %v2278_v52 = vpop.permute.xlu0 %2277 }
 0x466   :  { %4670 = vmatmul.mubr.msk.bf16.vlgmr.msra.gmra.mxu0 %vm471_vm2, %v1684_v54 }
 0x467   :  { %v1828_v15 = vsel %vm451_vm1, %v1820_v63, %v1827_v13  ;;  %4681 = vmatprep.mubr.msk.bf16.mxu0 %vm5294_vm0, %v6617_v26 }
 0x468   :  { %v1831_v61 = vpack.c.bf16 %v1828_v15, %v1828_v15  ;;  %v2910_v16 = vpop.permute.xlu1 %2909 }
 0x469   :  { %v2912_v7 = vsub.f32 %v2906_v23, %v2910_v16  ;;  %v4878_v5 = vpop.permute.xlu0 %4877 }
 0x46a   :  { %v1836_v29 = vsel %vm471_vm2, %v1831_v61, 0  ;;  %v4880_v59 = vunpack.i.h.bf16 %v4878_v5  ;;  %v4879_v28 = vunpack.i.l.bf16 %v4878_v5 }
 0x46b   :  { %2921 = vrot.lane.b32.xlu0 %v2912_v7, %s5300_s29  ;;  %4680 = vmatpush3.bf16.xpose.msra.mxu0 %v1836_v29 }
 0x46c   :  { %v1803_v17 = vpop.permute.xlu1 %1802  ;;  %4691 = vmatprep.subr.bf16.mxu0 %v6617_v26  ;;  %v2468_v14 = vsel %vm451_vm1, %v4879_v28, %v4880_v59 }
 0x46d   :  { %v1805_v34 = vsub.f32 %v1799_v21, %v1803_v17  ;;  %v856_v25 = vpop.f32.mrf.mxu0  ;;  %v2471_v23 = vpack.c.bf16 %v2468_v14, %v2468_v14  ;;  %v2443_v16 = vpop.permute.xlu0 %2442 }
 0x46e   :  { %v6132_v62 = vsel %vm5736_vm4, %v856_v25, -1e+30 }
 0x46f   :  { %v1813_v11 = vsel %vm451_vm1, %v1805_v34, %v1812_v31  ;;  %v4611_v46 = vpop.f32.mrf.mxu0  ;;  %v863_v13 = vsel %vm451_vm1, %v6132_v62, -inf  ;;  %v2476_v61 = vsel %vm471_vm2, %v2471_v23, 0 }
 0x470   :  { %v1829_v0 = vmul.f32 0.25, %v1813_v11  ;;  %v4863_v58 = vpop.permute.xlu1 %4862 }
 0x471   :  { %v4865_v45 = vunpack.i.h.bf16 %v4863_v58  ;;  %v4864_v8 = vunpack.i.l.bf16 %v4863_v58  ;;  %v859_v3 = vpop.f32.mrf.mxu0  ;;  %v2600_v46 = vpop.permute.xlu0 %2599 }
 0x472   :  { %v1830_v27 = vpack.c.bf16 %v1829_v0, %v1829_v0 }
 0x473   :  { %v4612_v1 = vpop.f32.mrf.mxu0  ;;  %v1984_v48 = vsel %vm451_vm1, %v4864_v8, %v4865_v45 }
 0x474   :  { %v1959_v57 = vpop.permute.xlu1 %1958  ;;  %4682 = vmatmul.mubr.msk.bf16.vlgmr.msra.gmra.mxu0 %vm471_vm2, %v1830_v27  ;;  %v1987_v18 = vpack.c.bf16 %v1984_v48, %v1984_v48 }
 0x475   :  { %v1961_v22 = vsel %vm451_vm1, %v1955_v37, %v1959_v57  ;;  %4693 = vmatprep.mubr.msk.bf16.mxu0 %vm5294_vm0, %v6617_v26 }
 0x476   :  { %v1992_v33 = vsel %vm471_vm2, %v1987_v18, 0  ;;  %v1985_v43 = vmul.f32 0.25, %v1961_v22 }
 0x477   :  { %4692 = vmatpush3.bf16.xpose.msra.mxu0 %v1992_v33 }
 0x478   :  { %v2117_v10 = vpop.permute.xlu1 %2116  ;;  %4703 = vmatprep.subr.bf16.mxu0 %v6617_v26  ;;  %v1986_v19 = vpack.c.bf16 %v1985_v43, %v1985_v43 }
 0x479   :  { %v1030_v49 = vpop.f32.mrf.mxu0  ;;  %v2123_v12 = vsel %vm451_vm1, %v2117_v10, %v2121_v41 }
 0x47a   :  { %v2147_v40 = vmul.f32 0.25, %v2123_v12  ;;  %v6137_v6 = vsel %vm5736_vm4, %v1030_v49, -1e+30 }
 0x47b   :  { %v4623_v2 = vpop.f32.mrf.mxu0  ;;  %v1037_v15 = vsel %vm451_vm1, %v6137_v6, -inf }
 0x47c   :  { %v4873_v32 = vpop.permute.xlu1 %4872  ;;  %v2148_v36 = vpack.c.bf16 %v2147_v40, %v2147_v40 }
 0x47d   :  { %v4875_v9 = vunpack.i.h.bf16 %v4873_v32  ;;  %v4874_v30 = vunpack.i.l.bf16 %v4873_v32  ;;  %v1033_v51 = vpop.f32.mrf.mxu0 }
 0x47e   :  { %4694 = vmatmul.mubr.msk.bf16.vlgmr.msra.gmra.mxu0 %vm471_vm2, %v1986_v19 }
 0x47f   :  { %v4624_v50 = vpop.f32.mrf.mxu0  ;;  %4704 = vmatpush3.bf16.xpose.msra.mxu0 %v2154_v4  ;;  %4705 = vmatprep.mubr.msk.bf16.mxu0 %vm5294_vm0, %v6617_v26  ;;  %v2307_v47 = vsel %vm451_vm1, %v4874_v30, %v4875_v9 }
 0x480   :  { %4715 = vmatprep.subr.bf16.mxu0 %v6617_v26  ;;  %v2282_v39 = vpop.permute.xlu1 %2281  ;;  %v2310_v60 = vpack.c.bf16 %v2307_v47, %v2307_v47 }
 0x481   :  { %v2284_v55 = vsel %vm451_vm1, %v2278_v52, %v2282_v39 }
 0x482   :  { %v2315_v54 = vsel %vm471_vm2, %v2310_v60, 0  ;;  %v2308_v63 = vmul.f32 0.25, %v2284_v55 }
 0x484   :  { %v2309_v20 = vpack.c.bf16 %v2308_v63, %v2308_v63 }
 0x486   :  { %4706 = vmatmul.mubr.msk.bf16.vlgmr.msra.gmra.mxu0 %vm471_vm2, %v2148_v36 }
 0x487   :  { %4716 = vmatpush3.bf16.xpose.msra.mxu0 %v2315_v54  ;;  %4717 = vmatprep.mubr.msk.bf16.mxu0 %vm5294_vm0, %v6617_v26 }
 0x488   :  { %4727 = vmatprep.subr.bf16.mxu0 %v6617_v26 }
 0x489   :  { %864 = vmax.xlane.f32.xlu1 %v863_v13 }
 0x48a   :  { %1038 = vmax.xlane.f32.xlu0 %v1037_v15 }
 0x48e   :  { %4718 = vmatmul.mubr.msk.bf16.vlgmr.msra.gmra.mxu0 %vm471_vm2, %v2309_v20 }
 0x48f   :  { %4728 = vmatpush3.bf16.xpose.msra.mxu0 %v2476_v61  ;;  %4729 = vmatprep.mubr.msk.bf16.mxu0 %vm5294_vm0, %v6617_v26 }
 0x490   :  { %4739 = vmatprep.subr.bf16.mxu0 %v6617_v26 }
 0x4b1   :  { %v2439_v7 = vpop.permute.xlu1 %2438 }
 0x4b2   :  { %v2445_v29 = vsel %vm451_vm1, %v2439_v7, %v2443_v16 }
 0x4b3   :  { %v2469_v42 = vmul.f32 0.25, %v2445_v29 }
 0x4b5   :  { %v2470_v21 = vpack.c.bf16 %v2469_v42, %v2469_v42 }
 0x4b7   :  { %v4883_v37 = vpop.permute.xlu1 %4882  ;;  %4730 = vmatmul.mubr.msk.bf16.vlgmr.msra.gmra.mxu0 %vm471_vm2, %v2470_v21 }
 0x4b8   :  { %v4885_v17 = vunpack.i.h.bf16 %v4883_v37  ;;  %v4884_v31 = vunpack.i.l.bf16 %v4883_v37  ;;  %4741 = vmatprep.mubr.msk.bf16.mxu0 %vm5294_vm0, %v6617_v26 }
 0x4ba   :  { %v2629_v34 = vsel %vm451_vm1, %v4884_v31, %v4885_v17 }
 0x4bb   :  { %v2632_v25 = vpack.c.bf16 %v2629_v34, %v2629_v34 }
 0x4bd   :  { %v2637_v11 = vsel %vm471_vm2, %v2632_v25, 0 }
 0x4be   :  { %4740 = vmatpush3.bf16.xpose.msra.mxu0 %v2637_v11 }
 0x4bf   :  { %4751 = vmatprep.subr.bf16.mxu0 %v6617_v26 }
 0x4c1   :  { %v2604_v24 = vpop.permute.xlu1 %2603 }
 0x4c2   :  { %v2606_v0 = vsel %vm451_vm1, %v2600_v46, %v2604_v24 }
 0x4c3   :  { %v2630_v58 = vmul.f32 0.25, %v2606_v0 }
 0x4c5   :  { %v2631_v45 = vpack.c.bf16 %v2630_v58, %v2630_v58 }
 0x4c7   :  { %v4888_v8 = vpop.permute.xlu0 %4887  ;;  %4742 = vmatmul.mubr.msk.bf16.vlgmr.msra.gmra.mxu0 %vm471_vm2, %v2631_v45 }
 0x4c8   :  { %v4890_v3 = vunpack.i.h.bf16 %v4888_v8  ;;  %v4889_v27 = vunpack.i.l.bf16 %v4888_v8  ;;  %4753 = vmatprep.mubr.msk.bf16.mxu0 %vm5294_vm0, %v6617_v26 }
 0x4ca   :  { %v2790_v56 = vsel %vm451_vm1, %v4889_v27, %v4890_v3 }
 0x4cb   :  { %v2793_v53 = vpack.c.bf16 %v2790_v56, %v2790_v56  ;;  %v2765_v1 = vpop.permute.xlu0 %2764 }
 0x4cd   :  { %v2761_v48 = vpop.permute.xlu1 %2760  ;;  %v2798_v57 = vsel %vm471_vm2, %v2793_v53, 0 }
 0x4ce   :  { %v2767_v18 = vsel %vm451_vm1, %v2761_v48, %v2765_v1  ;;  %4752 = vmatpush3.bf16.xpose.msra.mxu0 %v2798_v57 }
 0x4cf   :  { %v2791_v22 = vmul.f32 0.25, %v2767_v18  ;;  %4763 = vmatprep.subr.bf16.mxu0 %v6617_v26 }
 0x4d1   :  { %v2792_v41 = vpack.c.bf16 %v2791_v22, %v2791_v22 }
 0x4d3   :  { %v4893_v33 = vpop.permute.xlu1 %4892 }
 0x4d4   :  { %v4895_v44 = vunpack.i.h.bf16 %v4893_v33  ;;  %v4894_v43 = vunpack.i.l.bf16 %v4893_v33 }
 0x4d5   :  { %4754 = vmatmul.mubr.msk.bf16.vlgmr.msra.gmra.mxu0 %vm471_vm2, %v2792_v41 }
 0x4d6   :  { %v2951_v10 = vsel %vm451_vm1, %v4894_v43, %v4895_v44  ;;  %4765 = vmatprep.mubr.msk.bf16.mxu0 %vm5294_vm0, %v6617_v26 }
 0x4d7   :  { %v2954_v49 = vpack.c.bf16 %v2951_v10, %v2951_v10  ;;  %v2926_v2 = vpop.permute.xlu1 %2925 }
 0x4d9   :  { %v2959_v38 = vsel %vm471_vm2, %v2954_v49, 0 }
 0x4da   :  { %4764 = vmatpush3.bf16.xpose.msra.mxu0 %v2959_v38 }
 0x4db   :  { %4775 = vmatprep.subr.bf16.mxu0 %v6617_v26 }
 0x4dd   :  { %v2922_v52 = vpop.permute.xlu0 %2921 }
 0x4de   :  { %v2928_v19 = vsel %vm451_vm1, %v2922_v52, %v2926_v2 }
 0x4df   :  { %v2952_v32 = vmul.f32 0.25, %v2928_v19 }
 0x4e1   :  { %v2953_v12 = vpack.c.bf16 %v2952_v32, %v2952_v32 }
 0x4e3   :  { %4766 = vmatmul.mubr.msk.bf16.vlgmr.msra.gmra.mxu0 %vm471_vm2, %v2953_v12 }
 0x4e4   :  { %4791 = vmatprep.mubr.msk.bf16.mxu0 %vm5294_vm0, %v6617_v26 }
 0x4fe   :  { %v1204_v9 = vpop.f32.mrf.mxu0 }
 0x4ff   :  { %v6181_v30 = vsel %vm5736_vm4, %v1204_v9, -1e+30 }
 0x500   :  { %v1211_v51 = vsel %vm451_vm1, %v6181_v30, -inf  ;;  %v4635_v4 = vpop.f32.mrf.mxu0 }
 0x501   :  { %1212 = vmax.xlane.f32.xlu0 %v1211_v51 }
 0x502   :  { %v1207_v50 = vpop.f32.mrf.mxu0 }
 0x504   :  { %v4636_v47 = vpop.f32.mrf.mxu0 }
 0x507   :  { %v573_v5 = vpop.f32.mrf.mxu1 }
 0x508   :  { %579 = vst.msk [vmem:[#allocation2] sm:$0xff] %vm471_vm2, %v573_v5 }
 0x509   :  { %v4593_v40 = vpop.f32.mrf.mxu1 }
 0x50a   :  { %v1378_v39 = vpop.f32.mrf.mxu0 }
 0x50b   :  { %v6188_v60 = vsel %vm5736_vm4, %v1378_v39, -1e+30  ;;  %v576_v59 = vpop.f32.mrf.mxu1 }
 0x50c   :  { %v1385_v28 = vsel %vm451_vm1, %v6188_v60, -inf  ;;  %v4647_v36 = vpop.f32.mrf.mxu0 }
 0x50d   :  { %1386 = vmax.xlane.f32.xlu1 %v1385_v28  ;;  %v4594_v55 = vpop.f32.mrf.mxu1 }
 0x50e   :  { %v1381_v54 = vpop.f32.mrf.mxu0 }
 0x50f   :  { %v681_v14 = vpop.f32.mrf.mxu1 }
 0x510   :  { %v6194_v13 = vsel %vm5736_vm4, %v681_v14, -1e+30  ;;  %v4648_v63 = vpop.f32.mrf.mxu0 }
 0x511   :  { %v688_v15 = vsel %vm451_vm1, %v6194_v13, -inf  ;;  %v4599_v23 = vpop.f32.mrf.mxu1 }
 0x512   :  { %689 = vmax.xlane.f32.xlu0 %v688_v15  ;;  %v865_v3 = vpop.xlane.xlu1 %864 }
 0x513   :  { %v684_v20 = vpop.f32.mrf.mxu1  ;;  %v866_v56 = vsub.f32 %v6132_v62, %v865_v3  ;;  %v1039_v53 = vpop.xlane.xlu0 %1038 }
 0x514   :  { %v1040_v18 = vsub.f32 %v6137_v6, %v1039_v53 }
 0x515   :  { %v4600_v61 = vpop.f32.mrf.mxu1  ;;  %v867_v57 = vmul.f32 1.442695, %v866_v56 }
 0x516   :  { %v1041_v44 = vmul.f32 1.442695, %v1040_v18  ;;  %v6618_v18 = vld [vmem:[#allocation22_spill] sm:$0xff] }
 0x517   :  { %4976 = vpow2.f32 %v867_v57 }
 0x518   :  { %4978 = vpow2.f32 %v1041_v44 }
 0x51a   :  { %v1552_v16 = vpop.f32.mrf.mxu0 }
 0x51b   :  { %v6200_v7 = vsel %vm5736_vm4, %v1552_v16, -1e+30 }
 0x51c   :  { %v1559_v29 = vsel %vm451_vm1, %v6200_v7, -inf  ;;  %v4659_v42 = vpop.f32.mrf.mxu0 }
 0x51d   :  { %1560 = vmax.xlane.f32.xlu0 %v1559_v29 }
 0x51e   :  { %v1555_v21 = vpop.f32.mrf.mxu0 }
 0x520   :  { %v4660_v37 = vpop.f32.mrf.mxu0 }
 0x524   :  { %v6236_v9 = vpop.eup %4976 }
 0x525   :  { %v869_v50 = vsel %vm451_vm1, %v6236_v9, 0.0  ;;  %v6240_v47 = vpop.eup %4978 }
 0x526   :  { %v1726_v17 = vpop.f32.mrf.mxu0  ;;  %v1043_v5 = vsel %vm451_vm1, %v6240_v47, 0.0 }
 0x527   :  { %v6206_v31 = vsel %vm5736_vm4, %v1726_v17, -1e+30 }
 0x528   :  { %v1733_v34 = vsel %vm451_vm1, %v6206_v31, -inf  ;;  %v4671_v25 = vpop.f32.mrf.mxu0 }
 0x529   :  { %1734 = vmax.xlane.f32.xlu1 %v1733_v34 }
 0x52a   :  { %v1729_v11 = vpop.f32.mrf.mxu0 }
 0x52c   :  { %v4672_v46 = vpop.f32.mrf.mxu0 }
 0x534   :  { %v1872_v24 = vpop.f32.mrf.mxu0 }
 0x535   :  { %v6212_v0 = vsel %vm5736_vm4, %v1872_v24, -1e+30 }
 0x536   :  { %v1879_v58 = vsel %vm451_vm1, %v6212_v0, -inf  ;;  %v4683_v45 = vpop.f32.mrf.mxu0 }
 0x537   :  { %1880 = vmax.xlane.f32.xlu0 %v1879_v58 }
 0x538   :  { %v1875_v8 = vpop.f32.mrf.mxu0 }
 0x53a   :  { %v4684_v27 = vpop.f32.mrf.mxu0 }
 0x53e   :  { %v2028_v1 = vpop.f32.mrf.mxu0 }
 0x53f   :  { %v6219_v48 = vsel %vm5736_vm4, %v2028_v1, -1e+30 }
 0x540   :  { %v2035_v22 = vsel %vm451_vm1, %v6219_v48, -inf  ;;  %v4695_v41 = vpop.f32.mrf.mxu0 }
 0x541   :  { %2036 = vmax.xlane.f32.xlu1 %v2035_v22 }
 0x542   :  { %v2031_v33 = vpop.f32.mrf.mxu0 }
 0x544   :  { %v4696_v43 = vpop.f32.mrf.mxu0 }
 0x546   :  { %v2190_v10 = vpop.f32.mrf.mxu0 }
 0x547   :  { %v6226_v62 = vsel %vm5736_vm4, %v2190_v10, -1e+30 }
 0x548   :  { %v2197_v49 = vsel %vm451_vm1, %v6226_v62, -inf  ;;  %v4707_v38 = vpop.f32.mrf.mxu0 }
 0x549   :  { %2198 = vmax.xlane.f32.xlu0 %v2197_v49 }
 0x54a   :  { %v2193_v6 = vpop.f32.mrf.mxu0 }
 0x54c   :  { %v4708_v2 = vpop.f32.mrf.mxu0 }
 0x54e   :  { %v2351_v52 = vpop.f32.mrf.mxu0 }
 0x54f   :  { %v6232_v19 = vsel %vm5736_vm4, %v2351_v52, -1e+30 }
 0x550   :  { %v2358_v32 = vsel %vm451_vm1, %v6232_v19, -inf  ;;  %v4719_v12 = vpop.f32.mrf.mxu0 }
 0x551   :  { %2359 = vmax.xlane.f32.xlu1 %v2358_v32 }
 0x552   :  { %v2354_v51 = vpop.f32.mrf.mxu0 }
 0x554   :  { %v4720_v4 = vpop.f32.mrf.mxu0 }
 0x555   :  { %870 = vadd.xlane.f32.xlu1 %v869_v50 }
 0x559   :  { %1044 = vadd.xlane.f32.xlu1 %v1043_v5 }
 0x577   :  { %v2512_v40 = vpop.f32.mrf.mxu0 }
 0x578   :  { %v6246_v39 = vsel %vm5736_vm4, %v2512_v40, -1e+30 }
 0x579   :  { %v2519_v59 = vsel %vm451_vm1, %v6246_v39, -inf  ;;  %v4731_v28 = vpop.f32.mrf.mxu0 }
 0x57a   :  { %2520 = vmax.xlane.f32.xlu0 %v2519_v59 }
 0x57b   :  { %v2515_v36 = vpop.f32.mrf.mxu0 }
 0x57d   :  { %v4732_v55 = vpop.f32.mrf.mxu0 }
 0x57e   :  { %v6619_v55 = vld [vmem:[#allocation21_spill] sm:$0xff] }
 0x587   :  { %v2673_v54 = vpop.f32.mrf.mxu0 }
 0x588   :  { %v6252_v14 = vsel %vm5736_vm4, %v2673_v54, -1e+30  ;;  %v6315_v54 = vpack.c.bf16 %v6619_v55, %v6619_v55 }
 0x589   :  { %v2680_v63 = vsel %vm451_vm1, %v6252_v14, -inf  ;;  %v4743_v15 = vpop.f32.mrf.mxu0 }
 0x58a   :  { %v1213_v23 = vpop.xlane.xlu0 %1212  ;;  %2681 = vmax.xlane.f32.xlu0 %v2680_v63 }
 0x58b   :  { %v1214_v20 = vsub.f32 %v6181_v30, %v1213_v23  ;;  %v2676_v61 = vpop.f32.mrf.mxu0 }
 0x58d   :  { %v1215_v16 = vmul.f32 1.442695, %v1214_v20  ;;  %v4744_v29 = vpop.f32.mrf.mxu0 }
 0x58f   :  { %4980 = vpow2.f32 %v1215_v16 }
 0x595   :  { %v2834_v42 = vpop.f32.mrf.mxu0 }
 0x596   :  { %v6259_v21 = vsel %vm5736_vm4, %v2834_v42, -1e+30  ;;  %v1387_v37 = vpop.xlane.xlu1 %1386 }
 0x597   :  { %v2841_v17 = vsel %vm451_vm1, %v6259_v21, -inf  ;;  %v1388_v34 = vsub.f32 %v6188_v60, %v1387_v37  ;;  %v4755_v25 = vpop.f32.mrf.mxu0 }
 0x598   :  { %2842 = vmax.xlane.f32.xlu0 %v2841_v17 }
 0x599   :  { %v1389_v11 = vmul.f32 1.442695, %v1388_v34  ;;  %v2837_v46 = vpop.f32.mrf.mxu0 }
 0x59b   :  { %4982 = vpow2.f32 %v1389_v11  ;;  %v4756_v30 = vpop.f32.mrf.mxu0  ;;  %v690_v57 = vpop.xlane.xlu0 %689 }
 0x59c   :  { %v6264_v24 = vpop.eup %4980  ;;  %v691_v41 = vsub.f32 %v6194_v13, %v690_v57 }
 0x59d   :  { %v1217_v58 = vsel %vm451_vm1, %v6264_v24, 0.0 }
 0x59e   :  { %1218 = vadd.xlane.f32.xlu1 %v1217_v58  ;;  %v692_v44 = vmul.f32 1.442695, %v691_v41 }
 0x5a3   :  { %v2995_v45 = vpop.f32.mrf.mxu0 }
 0x5a4   :  { %v6270_v8 = vsel %vm5736_vm4, %v2995_v45, -1e+30 }
 0x5a5   :  { %v3002_v60 = vsel %vm451_vm1, %v6270_v8, -inf  ;;  %v4767_v3 = vpop.f32.mrf.mxu0 }
 0x5a6   :  { %3003 = vmax.xlane.f32.xlu0 %v3002_v60  ;;  %v1561_v35 = vpop.xlane.xlu0 %1560 }
 0x5a7   :  { %v2998_v27 = vpop.f32.mrf.mxu0  ;;  %v1562_v22 = vsub.f32 %v6200_v7, %v1561_v35 }
 0x5a8   :  { %v6274_v56 = vpop.eup %4982 }
 0x5a9   :  { %v4768_v53 = vpop.f32.mrf.mxu0  ;;  %v1391_v1 = vsel %vm451_vm1, %v6274_v56, 0.0  ;;  %v1563_v33 = vmul.f32 1.442695, %v1562_v22 }
 0x5aa   :  { %1392 = vadd.xlane.f32.xlu1 %v1391_v1 }
 0x5ab   :  { %4984 = vpow2.f32 %v1563_v33 }
 0x5ac   :  { %4986 = vpow2.f32 %v692_v44 }
 0x5b2   :  { %v1735_v6 = vpop.xlane.xlu1 %1734 }
 0x5b3   :  { %v1736_v2 = vsub.f32 %v6206_v31, %v1735_v6 }
 0x5b5   :  { %v1737_v12 = vmul.f32 1.442695, %v1736_v2 }
 0x5b8   :  { %v6284_v43 = vpop.eup %4984 }
 0x5b9   :  { %v1565_v10 = vsel %vm451_vm1, %v6284_v43, 0.0  ;;  %v6288_v49 = vpop.eup %4986 }
 0x5ba   :  { %v694_v38 = vsel %vm451_vm1, %v6288_v49, 0.0 }
 0x5bb   :  { %875 = vrot.lane.b32.xlu1 %v6618_v18, %s5302_s13 }
 0x5bc   :  { %701 = vrot.lane.b32.xlu0 %v6618_v18, %s5306_s17 }
 0x5c0   :  { %v1881_v32 = vpop.xlane.xlu0 %1880 }
 0x5c1   :  { %v1882_v51 = vsub.f32 %v6212_v0, %v1881_v32 }
 0x5c3   :  { %v1883_v4 = vmul.f32 1.442695, %v1882_v51 }
 0x5ca   :  { %v2037_v13 = vpop.xlane.xlu1 %2036 }
 0x5cb   :  { %v2038_v7 = vsub.f32 %v6219_v48, %v2037_v13 }
 0x5cd   :  { %v2039_v52 = vmul.f32 1.442695, %v2038_v7 }
 0x5cf   :  { %4988 = vpow2.f32 %v2039_v52 }
 0x5d0   :  { %4990 = vpow2.f32 %v1737_v12 }
 0x5d1   :  { %4992 = vpow2.f32 %v1883_v4 }
 0x5d2   :  { %v2199_v59 = vpop.xlane.xlu0 %2198 }
 0x5d3   :  { %v2200_v61 = vsub.f32 %v6226_v62, %v2199_v59 }
 0x5d5   :  { %v2201_v29 = vmul.f32 1.442695, %v2200_v61 }
 0x5d7   :  { %4994 = vpow2.f32 %v2201_v29 }
 0x5da   :  { %v2360_v16 = vpop.xlane.xlu1 %2359 }
 0x5db   :  { %1566 = vadd.xlane.f32.xlu0 %v1565_v10  ;;  %v2361_v42 = vsub.f32 %v6232_v19, %v2360_v16 }
 0x5dc   :  { %v6299_v50 = vpop.eup %4988 }
 0x5dd   :  { %v2041_v5 = vsel %vm451_vm1, %v6299_v50, 0.0  ;;  %v6303_v40 = vpop.eup %4990  ;;  %v2362_v37 = vmul.f32 1.442695, %v2361_v42 }
 0x5de   :  { %v1739_v31 = vsel %vm451_vm1, %v6303_v40, 0.0  ;;  %v6307_v48 = vpop.eup %4992  ;;  %v871_v58 = vpop.xlane.xlu1 %870 }
 0x5df   :  { %695 = vadd.xlane.f32.xlu1 %v694_v38  ;;  %v1885_v0 = vsel %vm451_vm1, %v6307_v48, 0.0  ;;  %4996 = vpow2.f32 %v2362_v37 }
 0x5e2   :  { %v1045_v3 = vpop.xlane.xlu1 %1044 }
 0x5e4   :  { %v6341_v19 = vpop.eup %4994 }
 0x5ec   :  { %v6345_v60 = vpop.eup %4996 }
 0x5f0   :  { %1049 = vrot.lane.b32.xlu1 %v6618_v18, %s5304_s15 }
 0x5f1   :  { %1223 = vrot.lane.b32.xlu0 %v6618_v18, %s5289_s0 }
 0x603   :  { %v2521_v28 = vpop.xlane.xlu0 %2520 }
 0x604   :  { %v2522_v17 = vsub.f32 %v6246_v39, %v2521_v28  ;;  %v2203_v39 = vsel %vm451_vm1, %v6341_v19, 0.0 }
 0x606   :  { %v2523_v34 = vmul.f32 1.442695, %v2522_v17 }
 0x608   :  { %4998 = vpow2.f32 %v2523_v34 }
 0x610   :  { %2042 = vadd.xlane.f32.xlu0 %v2041_v5 }
 0x613   :  { %v2682_v36 = vpop.xlane.xlu0 %2681 }
 0x614   :  { %1740 = vadd.xlane.f32.xlu1 %v1739_v31  ;;  %v2683_v25 = vsub.f32 %v6252_v14, %v2682_v36  ;;  %v2364_v14 = vsel %vm451_vm1, %v6345_v60, 0.0 }
 0x616   :  { %v2684_v62 = vmul.f32 1.442695, %v2683_v25 }
 0x618   :  { %1886 = vadd.xlane.f32.xlu1 %v1885_v0  ;;  %5000 = vpow2.f32 %v2684_v62 }
 0x621   :  { %v2843_v63 = vpop.xlane.xlu0 %2842 }
 0x622   :  { %v2844_v11 = vsub.f32 %v6259_v21, %v2843_v63  ;;  %v6349_v21 = vpop.eup %4998 }
 0x624   :  { %v2845_v46 = vmul.f32 1.442695, %v2844_v11 }
 0x625   :  { %v6353_v27 = vpop.eup %5000 }
 0x626   :  { %1745 = vrot.lane.b32.xlu0 %v6618_v18, %s5300_s29  ;;  %5002 = vpow2.f32 %v2845_v46  ;;  %v2686_v1 = vsel %vm451_vm1, %v6353_v27, 0.0 }
 0x627   :  { %v1219_v53 = vpop.xlane.xlu1 %1218 }
 0x629   :  { %1397 = vrot.lane.b32.xlu1 %v6618_v18, %s5299_s28 }
 0x62a   :  { %2048 = vrot.lane.b32.xlu0 %v6315_v54, %s5306_s17 }
 0x62d   :  { %1571 = vrot.lane.b32.xlu1 %v6618_v18, %s5283_s18 }
 0x62e   :  { %2209 = vrot.lane.b32.xlu0 %v6315_v54, %s5302_s13 }
 0x62f   :  { %v3004_v15 = vpop.xlane.xlu0 %3003 }
 0x630   :  { %v3005_v30 = vsub.f32 %v6270_v8, %v3004_v15  ;;  %v2525_v8 = vsel %vm451_vm1, %v6349_v21, 0.0 }
 0x632   :  { %2370 = vrot.lane.b32.xlu0 %v6315_v54, %s5304_s15  ;;  %v3006_v45 = vmul.f32 1.442695, %v3005_v30 }
 0x633   :  { %v702_v23 = vpop.permute.xlu0 %701  ;;  %v6357_v57 = vpop.eup %5002 }
 0x634   :  { %v707_v20 = vsel %vm535_vm3, %v702_v23, 0  ;;  %5004 = vpow2.f32 %v3006_v45  ;;  %v1393_v18 = vpop.xlane.xlu1 %1392  ;;  %v2847_v35 = vsel %vm451_vm1, %v6357_v57, 0.0 }
 0x635   :  { %4602 = vmatpush3.bf16.msra.mxu1 %v707_v20 }
 0x636   :  { %2531 = vrot.lane.b32.xlu0 %v6315_v54, %s5289_s0  ;;  %4613 = vmatprep.subr.bf16.mxu1 %v6617_v26 }
 0x638   :  { %v876_v41 = vpop.permute.xlu1 %875 }
 0x639   :  { %v881_v7 = vsel %vm535_vm3, %v876_v41, 0 }
 0x63a   :  { %2853 = vrot.lane.b32.xlu0 %v6315_v54, %s5283_s18 }
 0x63e   :  { %3014 = vrot.lane.b32.xlu0 %v6315_v54, %s5300_s29 }
 0x641   :  { %v6361_v22 = vpop.eup %5004 }
 0x642   :  { %v3008_v33 = vsel %vm451_vm1, %v6361_v22, 0.0 }
 0x651   :  { %2204 = vadd.xlane.f32.xlu1 %v2203_v39 }
 0x655   :  { %2365 = vadd.xlane.f32.xlu1 %v2364_v14 }
 0x659   :  { %2526 = vadd.xlane.f32.xlu1 %v2525_v8 }
 0x65d   :  { %2687 = vadd.xlane.f32.xlu1 %v2686_v1 }
 0x661   :  { %2848 = vadd.xlane.f32.xlu1 %v2847_v35 }
 0x664   :  { %v1567_v51 = vpop.xlane.xlu0 %1566 }
 0x665   :  { %3009 = vadd.xlane.f32.xlu1 %v3008_v33 }
 0x668   :  { %v696_v44 = vpop.xlane.xlu1 %695  ;;  %v1224_v5 = vpop.permute.xlu0 %1223 }
 0x669   :  { %5006 = vrcp.f32 %v696_v44 }
 0x66a   :  { %5008 = vrcp.f32 %v871_v58 }
 0x66b   :  { %5010 = vrcp.f32 %v1045_v3 }
 0x66c   :  { %5012 = vrcp.f32 %v1219_v53  ;;  %v1050_v52 = vpop.permute.xlu1 %1049 }
 0x66d   :  { %5014 = vrcp.f32 %v1393_v18 }
 0x66e   :  { %5016 = vrcp.f32 %v1567_v51 }
 0x676   :  { %v5007_v10 = vpop.eup %5006  ;;  %2692 = vrot.lane.b32.xlu1 %v6315_v54, %s5299_s28 }
 0x677   :  { %v698_v38 = vmul.f32 %v5007_v10, %v6288_v49  ;;  %v5009_v13 = vpop.eup %5008  ;;  %v1055_v49 = vsel %vm535_vm3, %v1050_v52, 0 }
 0x678   :  { %v873_v2 = vmul.f32 %v5009_v13, %v6236_v9  ;;  %v5011_v12 = vpop.eup %5010  ;;  %v1229_v9 = vsel %vm535_vm3, %v1224_v5, 0 }
 0x679   :  { %v699_v6 = vpack.c.bf16 %v698_v38, %v698_v38  ;;  %v1047_v4 = vmul.f32 %v5011_v12, %v6240_v47  ;;  %v5013_v0 = vpop.eup %5012 }
 0x67a   :  { %v874_v32 = vpack.c.bf16 %v873_v2, %v873_v2  ;;  %v1221_v59 = vmul.f32 %v5013_v0, %v6264_v24  ;;  %v5015_v36 = vpop.eup %5014 }
 0x67b   :  { %4604 = vmatmul.mubr.msk.bf16.vlgmr.msra.gmra.mxu1 %vm451_vm1, %v699_v6  ;;  %v1048_v31 = vpack.c.bf16 %v1047_v4, %v1047_v4  ;;  %v1395_v63 = vmul.f32 %v5015_v36, %v6274_v56  ;;  %v5017_v20 = vpop.eup %5016 }
 0x67c   :  { %4614 = vmatpush3.bf16.msra.mxu1 %v881_v7  ;;  %4615 = vmatprep.mubr.msk.bf16.mxu1 %vm5294_vm0, %v6617_v26  ;;  %v1222_v28 = vpack.c.bf16 %v1221_v59, %v1221_v59  ;;  %v1569_v56 = vmul.f32 %v5017_v20, %v6284_v43  ;;  %v1896_v43 = vsel %vm535_vm3, %v6315_v54, 0 }
 0x67d   :  { %4625 = vmatprep.subr.bf16.mxu1 %v6617_v26  ;;  %v1396_v24 = vpack.c.bf16 %v1395_v63, %v1395_v63 }
 0x67e   :  { %v1570_v37 = vpack.c.bf16 %v1569_v56, %v1569_v56 }
 0x683   :  { %4616 = vmatmul.mubr.msk.bf16.vlgmr.msra.gmra.mxu1 %vm451_vm1, %v874_v32 }
 0x684   :  { %4626 = vmatpush3.bf16.msra.mxu1 %v1055_v49  ;;  %4627 = vmatprep.mubr.msk.bf16.mxu1 %vm5294_vm0, %v6617_v26 }
 0x685   :  { %4637 = vmatprep.subr.bf16.mxu1 %v6617_v26 }
 0x68b   :  { %4628 = vmatmul.mubr.msk.bf16.vlgmr.msra.gmra.mxu1 %vm451_vm1, %v1048_v31 }
 0x68c   :  { %4638 = vmatpush3.bf16.msra.mxu1 %v1229_v9  ;;  %4639 = vmatprep.mubr.msk.bf16.mxu1 %vm5294_vm0, %v6617_v26 }
 0x68d   :  { %4649 = vmatprep.subr.bf16.mxu1 %v6617_v26 }
 0x693   :  { %4640 = vmatmul.mubr.msk.bf16.vlgmr.msra.gmra.mxu1 %vm451_vm1, %v1222_v28 }
 0x694   :  { %4651 = vmatprep.mubr.msk.bf16.mxu1 %vm5294_vm0, %v6617_v26 }
 0x699   :  { %v2043_v61 = vpop.xlane.xlu0 %2042 }
 0x69d   :  { %v1741_v47 = vpop.xlane.xlu1 %1740  ;;  %v1746_v42 = vpop.permute.xlu0 %1745 }
 0x69e   :  { %5018 = vrcp.f32 %v1741_v47  ;;  %v1751_v34 = vsel %vm535_vm3, %v1746_v42, 0 }
 0x6a1   :  { %v1887_v55 = vpop.xlane.xlu1 %1886  ;;  %v2049_v30 = vpop.permute.xlu0 %2048 }
 0x6a2   :  { %5020 = vrcp.f32 %v1887_v55  ;;  %v6620_v55 = vmov 0  }
 0x6a3   :  { %5022 = vrcp.f32 %v2043_v61 }
 0x6a5   :  { %v1398_v15 = vpop.permute.xlu1 %1397  ;;  %v2210_v39 = vpop.permute.xlu0 %2209 }
 0x6a6   :  { %v1403_v23 = vsel %vm535_vm3, %v1398_v15, 0  ;;  %v2215_v3 = vsel %vm535_vm3, %v2210_v39, 0 }
 0x6a7   :  { %4650 = vmatpush3.bf16.msra.mxu1 %v1403_v23 }
 0x6a8   :  { %4661 = vmatprep.subr.bf16.mxu1 %v6617_v26 }
 0x6a9   :  { %v1572_v16 = vpop.permute.xlu1 %1571  ;;  %v2371_v35 = vpop.permute.xlu0 %2370 }
 0x6aa   :  { %v1577_v29 = vsel %vm535_vm3, %v1572_v16, 0  ;;  %4652 = vmatmul.mubr.msk.bf16.vlgmr.msra.gmra.mxu1 %vm451_vm1, %v1396_v24  ;;  %v2376_v44 = vsel %vm535_vm3, %v2371_v35, 0 }
 0x6ab   :  { %4662 = vmatpush3.bf16.msra.mxu1 %v1577_v29  ;;  %4663 = vmatprep.mubr.msk.bf16.mxu1 %vm5294_vm0, %v6617_v26  ;;  %v5019_v17 = vpop.eup %5018 }
 0x6ac   :  { %4673 = vmatprep.subr.bf16.mxu1 %v6617_v26  ;;  %v1743_v25 = vmul.f32 %v5019_v17, %v6303_v40  ;;  %v2054_v40 = vsel %vm535_vm3, %v2049_v30, 0 }
 0x6ad   :  { %v2532_v6 = vpop.permute.xlu0 %2531 }
 0x6ae   :  { %v1744_v62 = vpack.c.bf16 %v1743_v25, %v1743_v25  ;;  %v2537_v2 = vsel %vm535_vm3, %v2532_v6, 0  ;;  %v4928_v6 = vld [vmem:[#allocation11 + $0x38] sm:$0xff]  }
 0x6af   :  { %v5021_v11 = vpop.eup %5020  ;;  %4776 = vmatpush3.bf16.msra.mxu0 %v4928_v6 }
 0x6b0   :  { %v1889_v46 = vmul.f32 %v5021_v11, %v6307_v48  ;;  %v5023_v45 = vpop.eup %5022  ;;  %4777 = vmatprep.subr.bf16.mxu0 %v6617_v26 }
 0x6b1   :  { %v2045_v54 = vmul.f32 %v5023_v45, %v6299_v50  ;;  %v2854_v4 = vpop.permute.xlu0 %2853 }
 0x6b2   :  { %4664 = vmatmul.mubr.msk.bf16.vlgmr.msra.gmra.mxu1 %vm451_vm1, %v1570_v37  ;;  %v1890_v58 = vpack.c.bf16 %v1889_v46, %v1889_v46 }
 0x6b3   :  { %4674 = vmatpush3.bf16.msra.mxu1 %v1751_v34  ;;  %4675 = vmatprep.mubr.msk.bf16.mxu1 %vm5294_vm0, %v6617_v26  ;;  %v2046_v14 = vpack.c.bf16 %v2045_v54, %v2045_v54 }
 0x6b4   :  { %4685 = vmatprep.subr.bf16.mxu1 %v6617_v26 }
 0x6b5   :  { %v3015_v9 = vpop.permute.xlu0 %3014 }
 0x6ba   :  { %4676 = vmatmul.mubr.msk.bf16.vlgmr.msra.gmra.mxu1 %vm451_vm1, %v1744_v62 }
 0x6bb   :  { %4686 = vmatpush3.bf16.msra.mxu1 %v1896_v43  ;;  %4687 = vmatprep.mubr.msk.bf16.mxu1 %vm5294_vm0, %v6617_v26 }
 0x6bc   :  { %4697 = vmatprep.subr.bf16.mxu1 %v6617_v26 }
 0x6c2   :  { %4688 = vmatmul.mubr.msk.bf16.vlgmr.msra.gmra.mxu1 %vm451_vm1, %v1890_v58 }
 0x6c3   :  { %4698 = vmatpush3.bf16.msra.mxu1 %v2054_v40  ;;  %4699 = vmatprep.mubr.msk.bf16.mxu1 %vm5294_vm0, %v6617_v26 }
 0x6c4   :  { %4709 = vmatprep.subr.bf16.mxu1 %v6617_v26 }
 0x6ca   :  { %4700 = vmatmul.mubr.msk.bf16.vlgmr.msra.gmra.mxu1 %vm451_vm1, %v2046_v14 }
 0x6cb   :  { %4710 = vmatpush3.bf16.msra.mxu1 %v2215_v3  ;;  %4711 = vmatprep.mubr.msk.bf16.mxu1 %vm5294_vm0, %v6617_v26 }
 0x6cc   :  { %4721 = vmatprep.subr.bf16.mxu1 %v6617_v26 }
 0x6da   :  { %v2205_v48 = vpop.xlane.xlu1 %2204 }
 0x6db   :  { %5024 = vrcp.f32 %v2205_v48 }
 0x6de   :  { %v2366_v8 = vpop.xlane.xlu1 %2365 }
 0x6df   :  { %5026 = vrcp.f32 %v2366_v8 }
 0x6e2   :  { %v2527_v53 = vpop.xlane.xlu1 %2526 }
 0x6e3   :  { %5028 = vrcp.f32 %v2527_v53 }
 0x6e6   :  { %v2688_v50 = vpop.xlane.xlu1 %2687 }
 0x6e7   :  { %5030 = vrcp.f32 %v2688_v50 }
 0x6e8   :  { %v5025_v1 = vpop.eup %5024 }
 0x6e9   :  { %v2207_v18 = vmul.f32 %v5025_v1, %v6341_v19 }
 0x6ea   :  { %v2849_v10 = vpop.xlane.xlu1 %2848 }
 0x6eb   :  { %v2208_v41 = vpack.c.bf16 %v2207_v18, %v2207_v18  ;;  %5032 = vrcp.f32 %v2849_v10 }
 0x6ec   :  { %v5027_v33 = vpop.eup %5026 }
 0x6ed   :  { %4712 = vmatmul.mubr.msk.bf16.vlgmr.msra.gmra.mxu1 %vm451_vm1, %v2208_v41  ;;  %v2368_v38 = vmul.f32 %v5027_v33, %v6345_v60 }
 0x6ee   :  { %4722 = vmatpush3.bf16.msra.mxu1 %v2376_v44  ;;  %4723 = vmatprep.mubr.msk.bf16.mxu1 %vm5294_vm0, %v6617_v26  ;;  %v3010_v7 = vpop.xlane.xlu1 %3009 }
 0x6ef   :  { %4733 = vmatprep.subr.bf16.mxu1 %v6617_v26  ;;  %v2369_v13 = vpack.c.bf16 %v2368_v38, %v2368_v38  ;;  %5034 = vrcp.f32 %v3010_v7 }
 0x6f0   :  { %v5029_v19 = vpop.eup %5028 }
 0x6f1   :  { %v2529_v52 = vmul.f32 %v5029_v19, %v6349_v21  ;;  %v2859_v21 = vsel %vm535_vm3, %v2854_v4, 0  ;;  %v4929_v19 = vld [vmem:[#allocation11 + $0x30] sm:$0xff]  }
 0x6f2   :  { %v2693_v32 = vpop.permute.xlu1 %2692  ;;  %4778 = vmatpush3.bf16.msra.mxu0 %v4929_v19  ;;  %v5105_v19 = vld [vmem:[#allocation3] sm:$0xff] }
 0x6f3   :  { %v2530_v12 = vpack.c.bf16 %v2529_v52, %v2529_v52  ;;  %v2698_v51 = vsel %vm535_vm3, %v2693_v32, 0  ;;  %4779 = vmatprep.subr.bf16.mxu0 %v6617_v26 }
 0x6f4   :  { %v5031_v60 = vpop.eup %5030 }
 0x6f5   :  { %4724 = vmatmul.mubr.msk.bf16.vlgmr.msra.gmra.mxu1 %vm451_vm1, %v2369_v13  ;;  %v2690_v49 = vmul.f32 %v5031_v60, %v6353_v27  ;;  %v3020_v27 = vsel %vm535_vm3, %v3015_v9, 0  ;;  %v4933_v9 = vld [vmem:[#allocation11 + $0x10] sm:$0xff]  }
 0x6f6   :  { %4734 = vmatpush3.bf16.msra.mxu1 %v2537_v2  ;;  %4735 = vmatprep.mubr.msk.bf16.mxu1 %vm5294_vm0, %v6617_v26 }
 0x6f7   :  { %4745 = vmatprep.subr.bf16.mxu1 %v6617_v26  ;;  %v2691_v5 = vpack.c.bf16 %v2690_v49, %v2690_v49 }
 0x6f8   :  { %v5033_v31 = vpop.eup %5032 }
 0x6f9   :  { %v2851_v0 = vmul.f32 %v5033_v31, %v6357_v57 }
 0x6fb   :  { %v2852_v59 = vpack.c.bf16 %v2851_v0, %v2851_v0 }
 0x6fc   :  { %v5035_v28 = vpop.eup %5034 }
 0x6fd   :  { %4736 = vmatmul.mubr.msk.bf16.vlgmr.msra.gmra.mxu1 %vm451_vm1, %v2530_v12  ;;  %v3012_v47 = vmul.f32 %v5035_v28, %v6361_v22  ;;  %v4930_v12 = vld [vmem:[#allocation11 + $0x28] sm:$0xff]  }
 0x6fe   :  { %4746 = vmatpush3.bf16.msra.mxu1 %v2698_v51  ;;  %4747 = vmatprep.mubr.msk.bf16.mxu1 %vm5294_vm0, %v6617_v26  ;;  %v4931_v51 = vld [vmem:[#allocation11 + $0x20] sm:$0xff]  }
 0x6ff   :  { %4757 = vmatprep.subr.bf16.mxu1 %v6617_v26  ;;  %v3013_v36 = vpack.c.bf16 %v3012_v47, %v3012_v47  ;;  %4780 = vmatpush3.bf16.msra.mxu0 %v4930_v12 }
 0x700   :  { %4781 = vmatprep.subr.bf16.mxu0 %v6617_v26 }
 0x703   :  { %4782 = vmatpush3.bf16.msra.mxu0 %v4931_v51 }
 0x704   :  { %4783 = vmatprep.subr.bf16.mxu0 %v6617_v26 }
 0x705   :  { %4748 = vmatmul.mubr.msk.bf16.vlgmr.msra.gmra.mxu1 %vm451_vm1, %v2691_v5 }
 0x706   :  { %4758 = vmatpush3.bf16.msra.mxu1 %v2859_v21  ;;  %4759 = vmatprep.mubr.msk.bf16.mxu1 %vm5294_vm0, %v6617_v26  ;;  %v4932_v21 = vld [vmem:[#allocation11 + $0x18] sm:$0xff]  }
 0x707   :  { %4769 = vmatprep.subr.bf16.mxu1 %v6617_v26  ;;  %4784 = vmatpush3.bf16.msra.mxu0 %v4932_v21 }
 0x708   :  { %4785 = vmatprep.subr.bf16.mxu0 %v6617_v26 }
 0x70b   :  { %4786 = vmatpush3.bf16.msra.mxu0 %v4933_v9 }
 0x70c   :  { %4787 = vmatprep.subr.bf16.mxu0 %v6617_v26 }
 0x70d   :  { %4760 = vmatmul.mubr.msk.bf16.vlgmr.msra.gmra.mxu1 %vm451_vm1, %v2852_v59 }
 0x70e   :  { %4770 = vmatpush3.bf16.msra.mxu1 %v3020_v27  ;;  %4771 = vmatprep.mubr.msk.bf16.mxu1 %vm5294_vm0, %v6617_v26 }
 0x715   :  { %4772 = vmatmul.mubr.msk.bf16.vlgmr.msra.gmra.mxu1 %vm451_vm1, %v3013_v36  ;;  %v4934_v36 = vld [vmem:[#allocation11 + $0x8] sm:$0xff]  }
 0x716   :  { %3624 = vmatprep.mubr.bf16.mxu1 %v6620_v55  ;;  %4788 = vmatpush3.bf16.msra.mxu0 %v4934_v36  ;;  %v3241_v36 = vld [vmem:[#allocation12 + $0x108] sm:$0xff] }
 0x717   :  { %4789 = vmatprep.subr.bf16.mxu0 %v6617_v26 }
 0x73b   :  { %v743_v63 = vpop.f32.mrf.mxu1 }
 0x73c   :  { %750 = vrot.lane.b32.xlu0 %v743_v63, %s5300_s29 }
 0x73d   :  { %v4605_v57 = vpop.f32.mrf.mxu1 }
 0x73e   :  { %v4935_v57 = vld [vmem:[#allocation11] sm:$0xff]  }
 0x73f   :  { %v746_v15 = vpop.f32.mrf.mxu1  ;;  %4790 = vmatpush3.bf16.msra.mxu0 %v4935_v57  ;;  %v3245_v57 = vld [vmem:[#allocation12 + $0x128] sm:$0xff] }
 0x741   :  { %v4606_v23 = vpop.f32.mrf.mxu1 }
 0x743   :  { %v917_v24 = vpop.f32.mrf.mxu1 }
 0x744   :  { %924 = vrot.lane.b32.xlu0 %v917_v24, %s5283_s18 }
 0x745   :  { %v4617_v20 = vpop.f32.mrf.mxu1 }
 0x747   :  { %v920_v61 = vpop.f32.mrf.mxu1 }
 0x749   :  { %v4618_v16 = vpop.f32.mrf.mxu1 }
 0x74b   :  { %v1091_v29 = vpop.f32.mrf.mxu1 }
 0x74c   :  { %1098 = vrot.lane.b32.xlu0 %v1091_v29, %s5299_s28 }
 0x74d   :  { %v4629_v22 = vpop.f32.mrf.mxu1 }
 0x74f   :  { %v1094_v56 = vpop.f32.mrf.mxu1 }
 0x751   :  { %v4630_v42 = vpop.f32.mrf.mxu1 }
 0x753   :  { %v1265_v37 = vpop.f32.mrf.mxu1 }
 0x754   :  { %1272 = vrot.lane.b32.xlu0 %v1265_v37, %s5289_s0 }
 0x755   :  { %v4641_v17 = vpop.f32.mrf.mxu1 }
 0x757   :  { %v1268_v34 = vpop.f32.mrf.mxu1 }
 0x759   :  { %v4642_v25 = vpop.f32.mrf.mxu1 }
 0x76a   :  { %v1439_v62 = vpop.f32.mrf.mxu1 }
 0x76b   :  { %1446 = vrot.lane.b32.xlu0 %v1439_v62, %s5304_s15 }
 0x76c   :  { %v4653_v11 = vpop.f32.mrf.mxu1 }
 0x76e   :  { %v1442_v43 = vpop.f32.mrf.mxu1 }
 0x770   :  { %v4654_v46 = vpop.f32.mrf.mxu1 }
 0x772   :  { %v1613_v30 = vpop.f32.mrf.mxu1 }
 0x774   :  { %v4665_v58 = vpop.f32.mrf.mxu1 }
 0x776   :  { %v1616_v45 = vpop.f32.mrf.mxu1 }
 0x777   :  { %v3264_v45 = vld [vmem:[#allocation12 + $0x1c0] sm:$0xff] }
 0x778   :  { %v4666_v40 = vpop.f32.mrf.mxu1 }
 0x779   :  { %v3268_v40 = vld [vmem:[#allocation12 + $0x1e0] sm:$0xff] }
 0x77a   :  { %v1787_v54 = vpop.f32.mrf.mxu1 }
 0x77c   :  { %v4677_v39 = vpop.f32.mrf.mxu1 }
 0x77d   :  { %v4380_v39 = vcombine.low %v3264_v45, %v3268_v40 }
 0x77e   :  { %v1790_v14 = vpop.f32.mrf.mxu1 }
 0x77f   :  { %v4381_v14 = vcombine.high %v3264_v45, %v3268_v40  ;;  %v6498_v45 = vld [vmem:[#allocation12 + $0x1d0] sm:$0xff] }
 0x780   :  { %v4678_v3 = vpop.f32.mrf.mxu1  ;;  %v6500_v40 = vld [vmem:[#allocation12 + $0x1f0] sm:$0xff] }
 0x781   :  { %v3269_v3 = vld [vmem:[#allocation12 + $0x1e8] sm:$0xff]  ;;  %3592 = vmatprep.subr.bf16.mxu1 %v4381_v14  ;;  %v3267_v14 = vld [vmem:[#allocation12 + $0x1d8] sm:$0xff] }
 0x782   :  { %v1932_v48 = vpop.f32.mrf.mxu1  ;;  %3593 = vmatpush1.bf16.msra.mxu1 %v4380_v39  ;;  %v4384_v39 = vcombine.low %v6498_v45, %v6500_v40 }
 0x783   :  { %1938 = vst.msk [vmem:[#allocation2 + $0x8] sm:$0xff] %vm471_vm2, %v1932_v48  ;;  %v3256_v48 = vld [vmem:[#allocation12 + $0x180] sm:$0xff] }
 0x784   :  { %v4689_v8 = vpop.f32.mrf.mxu1 }
 0x785   :  { %v3260_v8 = vld [vmem:[#allocation12 + $0x1a0] sm:$0xff] }
 0x786   :  { %v1935_v53 = vpop.f32.mrf.mxu1 }
 0x788   :  { %v4690_v1 = vpop.f32.mrf.mxu1 }
 0x78a   :  { %v2090_v50 = vpop.f32.mrf.mxu1 }
 0x78b   :  { %2097 = vrot.lane.b32.xlu0 %v2090_v50, %s5300_s29  ;;  %v4373_v50 = vcombine.high %v3256_v48, %v3260_v8 }
 0x78c   :  { %v4701_v18 = vpop.f32.mrf.mxu1 }
 0x78d   :  { %v3257_v18 = vld [vmem:[#allocation12 + $0x188] sm:$0xff]  ;;  %3594 = vmatprep.subr.bf16.mxu1 %v4373_v50  ;;  %v3208_v50 = vld [vmem:[#allocation12] sm:$0xff] }
 0x78e   :  { %v2093_v35 = vpop.f32.mrf.mxu1 }
 0x78f   :  { %1620 = vrot.lane.b32.xlu0 %v1613_v30, %s5302_s13  ;;  %v3261_v35 = vld [vmem:[#allocation12 + $0x1a8] sm:$0xff] }
 0x790   :  { %v4702_v41 = vpop.f32.mrf.mxu1 }
 0x791   :  { %v4375_v41 = vcombine.high %v3257_v18, %v3261_v35 }
 0x793   :  { %1794 = vrot.lane.b32.xlu0 %v1787_v54, %s5306_s17  ;;  %v3265_v54 = vld [vmem:[#allocation12 + $0x1c8] sm:$0xff] }
 0x794   :  { %v4382_v53 = vcombine.low %v3265_v54, %v3269_v3  ;;  %v4383_v1 = vcombine.high %v3265_v54, %v3269_v3  ;;  %v3271_v3 = vld [vmem:[#allocation12 + $0x1f8] sm:$0xff] }
 0x796   :  { %3635 = vmatprep.subr.bf16.mxu0 %v4383_v1 }
 0x7ad   :  { %v2251_v33 = vpop.f32.mrf.mxu1 }
 0x7ae   :  { %v751_v44 = vpop.permute.xlu0 %750  ;;  %2258 = vrot.lane.b32.xlu1 %v2251_v33, %s5283_s18  ;;  %v4372_v33 = vcombine.low %v3256_v48, %v3260_v8 }
 0x7af   :  { %754 = vst.msk [vmem:[#allocation2] sm:$0xff] %vm753_vm5, %v751_v44  ;;  %v4713_v10 = vpop.f32.mrf.mxu1  ;;  %v4374_v44 = vcombine.low %v3257_v18, %v3261_v35  ;;  %v3212_v18 = vld [vmem:[#allocation12 + $0x20] sm:$0xff]  ;;  %v3209_v35 = vld [vmem:[#allocation12 + $0x8] sm:$0xff] }
 0x7b0   :  { %3595 = vmatpush1.bf16.msra.mxu1 %v4372_v33  ;;  %v4314_v10 = vld [vmem:[%s6601_s7] ss:$0 sm:$0xff] }
 0x7b1   :  { %v2254_v38 = vpop.f32.mrf.mxu1 }
 0x7b3   :  { %v4714_v13 = vpop.f32.mrf.mxu1 }
 0x7b5   :  { %v2412_v7 = vpop.f32.mrf.mxu1 }
 0x7b6   :  { %v925_v2 = vpop.permute.xlu0 %924  ;;  %2419 = vrot.lane.b32.xlu1 %v2412_v7, %s5299_s28 }
 0x7b7   :  { %928 = vst.msk [vmem:[#allocation2] sm:$0xff] %vm927_vm6, %v925_v2  ;;  %v4725_v52 = vpop.f32.mrf.mxu1 }
 0x7b9   :  { %v2415_v32 = vpop.f32.mrf.mxu1 }
 0x7bb   :  { %v4726_v60 = vpop.f32.mrf.mxu1 }
 0x7bc   :  { %v5106_v60 = vld [vmem:[#allocation3 + $0x8] sm:$0xff] }
 0x7bd   :  { %v2573_v49 = vpop.f32.mrf.mxu1 }
 0x7be   :  { %v1099_v4 = vpop.permute.xlu0 %1098  ;;  %2580 = vrot.lane.b32.xlu1 %v2573_v49, %s5289_s0 }
 0x7bf   :  { %1102 = vst.msk [vmem:[#allocation2] sm:$0xff] %vm1101_vm7, %v1099_v4  ;;  %v4737_v5 = vpop.f32.mrf.mxu1  ;;  %v3248_v4 = vld [vmem:[#allocation12 + $0x140] sm:$0xff] }
 0x7c0   :  { %v3252_v5 = vld [vmem:[#allocation12 + $0x160] sm:$0xff] }
 0x7c1   :  { %v2576_v31 = vpop.f32.mrf.mxu1  ;;  %v4365_v21 = vcombine.high %v3248_v4, %v3252_v5  ;;  %v4364_v9 = vcombine.low %v3248_v4, %v3252_v5 }
 0x7c2   :  { %v3249_v31 = vld [vmem:[#allocation12 + $0x148] sm:$0xff] }
 0x7c3   :  { %v4738_v0 = vpop.f32.mrf.mxu1  ;;  %3596 = vmatprep.subr.bf16.mxu1 %v4365_v21 }
 0x7c4   :  { %v3253_v0 = vld [vmem:[#allocation12 + $0x168] sm:$0xff]  ;;  %3597 = vmatpush1.bf16.msra.mxu1 %v4364_v9 }
 0x7c5   :  { %v2734_v59 = vpop.f32.mrf.mxu1 }
 0x7c6   :  { %v1273_v28 = vpop.permute.xlu0 %1272  ;;  %2741 = vrot.lane.b32.xlu1 %v2734_v59, %s5304_s15  ;;  %v4366_v59 = vcombine.low %v3249_v31, %v3253_v0 }
 0x7c7   :  { %1276 = vst.msk [vmem:[#allocation2] sm:$0xff] %vm1275_vm8, %v1273_v28  ;;  %v4749_v27 = vpop.f32.mrf.mxu1  ;;  %v4367_v28 = vcombine.high %v3249_v31, %v3253_v0  ;;  %v4323_v0 = vld [vmem:[%s6602_s8] ss:$0 sm:$0xff] }
 0x7c8   :  { %v3240_v27 = vld [vmem:[#allocation12 + $0x100] sm:$0xff] }
 0x7c9   :  { %v2737_v47 = vpop.f32.mrf.mxu1 }
 0x7ca   :  { %v3244_v47 = vld [vmem:[#allocation12 + $0x120] sm:$0xff] }
 0x7cb   :  { %v4750_v63 = vpop.f32.mrf.mxu1 }
 0x7cc   :  { %v4357_v63 = vcombine.high %v3240_v27, %v3244_v47 }
 0x7cd   :  { %v2895_v15 = vpop.f32.mrf.mxu1 }
 0x7ce   :  { %2902 = vrot.lane.b32.xlu1 %v2895_v15, %s5302_s13  ;;  %v4356_v15 = vcombine.low %v3240_v27, %v3244_v47  ;;  %3598 = vmatprep.subr.bf16.mxu1 %v4357_v63  ;;  %v3259_v27 = vld [vmem:[#allocation12 + $0x198] sm:$0xff] }
 0x7cf   :  { %v4761_v23 = vpop.f32.mrf.mxu1  ;;  %v3263_v47 = vld [vmem:[#allocation12 + $0x1b8] sm:$0xff] }
 0x7d0   :  { %v4358_v23 = vcombine.low %v3241_v36, %v3245_v57  ;;  %3599 = vmatpush1.bf16.msra.mxu1 %v4356_v15 }
 0x7d1   :  { %v2898_v24 = vpop.f32.mrf.mxu1 }
 0x7d2   :  { %v4359_v24 = vcombine.high %v3241_v36, %v3245_v57 }
 0x7d3   :  { %v4762_v20 = vpop.f32.mrf.mxu1 }
 0x7d4   :  { %v3232_v20 = vld [vmem:[#allocation12 + $0xc0] sm:$0xff] }
 0x7d5   :  { %v3056_v61 = vpop.f32.mrf.mxu1 }
 0x7d6   :  { %3063 = vrot.lane.b32.xlu1 %v3056_v61, %s5306_s17  ;;  %v3236_v61 = vld [vmem:[#allocation12 + $0xe0] sm:$0xff] }
 0x7d7   :  { %v4773_v16 = vpop.f32.mrf.mxu1 }
 0x7d8   :  { %v3233_v16 = vld [vmem:[#allocation12 + $0xc8] sm:$0xff] }
 0x7d9   :  { %v3059_v29 = vpop.f32.mrf.mxu1 }
 0x7da   :  { %v4349_v29 = vcombine.high %v3232_v20, %v3236_v61 }
 0x7db   :  { %v4774_v22 = vpop.f32.mrf.mxu1 }
 0x7dc   :  { %v3237_v22 = vld [vmem:[#allocation12 + $0xe8] sm:$0xff]  ;;  %3600 = vmatprep.subr.bf16.mxu1 %v4349_v29 }
 0x7dd   :  { %v1447_v56 = vpop.permute.xlu0 %1446 }
 0x7de   :  { %1450 = vst.msk [vmem:[#allocation2] sm:$0xff] %vm1449_vm9, %v1447_v56  ;;  %v3224_v56 = vld [vmem:[#allocation12 + $0x80] sm:$0xff] }
 0x7fd   :  { %v2098_v42 = vpop.permute.xlu0 %2097 }
 0x7fe   :  { %2100 = vst.msk [vmem:[#allocation2 + $0x8] sm:$0xff] %vm753_vm5, %v2098_v42  ;;  %v3228_v42 = vld [vmem:[#allocation12 + $0xa0] sm:$0xff] }
 0x7ff   :  { %v4340_v54 = vcombine.low %v3224_v56, %v3228_v42 }
 0x801   :  { %v1621_v26 = vpop.permute.xlu0 %1620 }
 0x802   :  { %1624 = vst.msk [vmem:[#allocation2] sm:$0xff] %vm1623_vm10, %v1621_v26  ;;  %v4348_v26 = vcombine.low %v3232_v20, %v3236_v61  ;;  %v3254_v20 = vld [vmem:[#allocation12 + $0x170] sm:$0xff]  ;;  %v3251_v61 = vld [vmem:[#allocation12 + $0x158] sm:$0xff] }
 0x804   :  { %3601 = vmatpush1.bf16.msra.mxu1 %v4348_v26  ;;  %v3242_v26 = vld [vmem:[#allocation12 + $0x110] sm:$0xff] }
 0x805   :  { %v1795_v37 = vpop.permute.xlu0 %1794 }
 0x806   :  { %1798 = vst.msk [vmem:[#allocation2] sm:$0xff] %vm1797_vm11, %v1795_v37  ;;  %v4351_v37 = vcombine.high %v3233_v16, %v3237_v22 }
 0x80d   :  { %v3067_v46 = vld [vmem:[#allocation2] sm:$0xff] }
 0x820   :  { %v2259_v17 = vpop.permute.xlu1 %2258 }
 0x821   :  { %2261 = vst.msk [vmem:[#allocation2 + $0x8] sm:$0xff] %vm927_vm6, %v2259_v17  ;;  %v3225_v17 = vld [vmem:[#allocation12 + $0x88] sm:$0xff] }
 0x828   :  { %v2420_v34 = vpop.permute.xlu1 %2419 }
 0x829   :  { %2422 = vst.msk [vmem:[#allocation2 + $0x8] sm:$0xff] %vm1101_vm7, %v2420_v34  ;;  %v3229_v34 = vld [vmem:[#allocation12 + $0xa8] sm:$0xff] }
 0x82a   :  { %v4342_v48 = vcombine.low %v3225_v17, %v3229_v34 }
 0x830   :  { %v2581_v25 = vpop.permute.xlu1 %2580 }
 0x831   :  { %2583 = vst.msk [vmem:[#allocation2 + $0x8] sm:$0xff] %vm1275_vm8, %v2581_v25  ;;  %v4350_v25 = vcombine.low %v3233_v16, %v3237_v22  ;;  %v3255_v16 = vld [vmem:[#allocation12 + $0x178] sm:$0xff]  ;;  %v4378_v22 = vcombine.low %v3259_v27, %v3263_v47 }
 0x838   :  { %v2742_v62 = vpop.permute.xlu1 %2741 }
 0x839   :  { %2744 = vst.msk [vmem:[#allocation2 + $0x8] sm:$0xff] %vm1449_vm9, %v2742_v62  ;;  %v4341_v62 = vcombine.high %v3224_v56, %v3228_v42  ;;  %v4371_v42 = vcombine.high %v3251_v61, %v3255_v16 }
 0x83b   :  { %3602 = vmatprep.subr.bf16.mxu1 %v4341_v62  ;;  %v4370_v62 = vcombine.low %v3251_v61, %v3255_v16  ;;  %v4950_v61 = vld [vmem:[#allocation14 + $0x20] sm:$0xff]  }
 0x83c   :  { %3603 = vmatpush1.bf16.msra.mxu1 %v4340_v54  ;;  %v4951_v16 = vld [vmem:[#allocation14 + $0xa0] sm:$0xff]  }
 0x840   :  { %v2903_v11 = vpop.permute.xlu1 %2902 }
 0x841   :  { %2905 = vst.msk [vmem:[#allocation2 + $0x8] sm:$0xff] %vm1623_vm10, %v2903_v11  ;;  %v4343_v11 = vcombine.high %v3225_v17, %v3229_v34  ;;  %v3243_v17 = vld [vmem:[#allocation12 + $0x118] sm:$0xff] }
 0x842   :  { %v3247_v34 = vld [vmem:[#allocation12 + $0x138] sm:$0xff] }
 0x843   :  { %v4362_v54 = vcombine.low %v3243_v17, %v3247_v34 }
 0x848   :  { %v3064_v43 = vpop.permute.xlu1 %3063 }
 0x849   :  { %3066 = vst.msk [vmem:[#allocation2 + $0x8] sm:$0xff] %vm1797_vm11, %v3064_v43  ;;  %v3216_v43 = vld [vmem:[#allocation12 + $0x40] sm:$0xff] }
 0x850   :  { %v3068_v30 = vld [vmem:[#allocation2 + $0x8] sm:$0xff] }
 0x851   :  { %v3069_v58 = vpack.c.bf16 %v3068_v30, %v3067_v46  ;;  %v3220_v46 = vld [vmem:[#allocation12 + $0x60] sm:$0xff]  ;;  %v3217_v30 = vld [vmem:[#allocation12 + $0x48] sm:$0xff] }
 0x852   :  { %v4333_v8 = vcombine.high %v3216_v43, %v3220_v46  ;;  %v4332_v33 = vcombine.low %v3216_v43, %v3220_v46  ;;  %v4363_v43 = vcombine.high %v3243_v17, %v3247_v34  ;;  %v3234_v46 = vld [vmem:[#allocation12 + $0xd0] sm:$0xff] }
 0x853   :  { %4792 = vmatmul.mubr.bf16.vlgmr.msra.gmra.mxu0 %v3069_v58  ;;  %v3221_v58 = vld [vmem:[#allocation12 + $0x68] sm:$0xff]  ;;  %v4958_v17 = vld [vmem:[#allocation14 + $0x10] sm:$0xff]  }
 0x854   :  { %3667 = vmatprep.mubr.bf16.mxu0 %v6620_v55  ;;  %3636 = vmatpush1.bf16.msra.mxu0 %v4382_v53  ;;  %v4386_v53 = vcombine.low %v3267_v14, %v3271_v3  ;;  %v4335_v1 = vcombine.high %v3217_v30, %v3221_v58  ;;  %v4959_v34 = vld [vmem:[#allocation14 + $0x90] sm:$0xff]  }
 0x855   :  { %3637 = vmatprep.subr.bf16.mxu0 %v4375_v41  ;;  %v3213_v41 = vld [vmem:[#allocation12 + $0x28] sm:$0xff]  ;;  %3604 = vmatprep.subr.bf16.mxu1 %v4333_v8  ;;  %v3231_v8 = vld [vmem:[#allocation12 + $0xb8] sm:$0xff] }
 0x856   :  { %3605 = vmatpush1.bf16.msra.mxu1 %v4332_v33  ;;  %v3219_v33 = vld [vmem:[#allocation12 + $0x58] sm:$0xff] }
 0x858   :  { %3638 = vmatpush1.bf16.msra.mxu0 %v4374_v44  ;;  %v4334_v44 = vcombine.low %v3217_v30, %v3221_v58  ;;  %v3238_v30 = vld [vmem:[#allocation12 + $0xf0] sm:$0xff]  ;;  %v3235_v58 = vld [vmem:[#allocation12 + $0xd8] sm:$0xff] }
 0x859   :  { %3639 = vmatprep.subr.bf16.mxu0 %v4367_v28  ;;  %v3262_v28 = vld [vmem:[#allocation12 + $0x1b0] sm:$0xff] }
 0x85c   :  { %3640 = vmatpush1.bf16.msra.mxu0 %v4366_v59  ;;  %v3258_v59 = vld [vmem:[#allocation12 + $0x190] sm:$0xff] }
 0x85d   :  { %3641 = vmatprep.subr.bf16.mxu0 %v4359_v24  ;;  %v4377_v15 = vcombine.high %v3258_v59, %v3262_v28  ;;  %v3250_v24 = vld [vmem:[#allocation12 + $0x150] sm:$0xff]  ;;  %v4376_v29 = vcombine.low %v3258_v59, %v3262_v28  ;;  %v4939_v59 = vld [vmem:[#allocation14 + $0xb8] sm:$0xff]  }
 0x85e   :  { %v4369_v56 = vcombine.high %v3250_v24, %v3254_v20  ;;  %v4940_v28 = vld [vmem:[#allocation14 + $0x70] sm:$0xff]  }
 0x860   :  { %3642 = vmatpush1.bf16.msra.mxu0 %v4358_v23  ;;  %v4379_v23 = vcombine.high %v3259_v27, %v3263_v47  ;;  %v4941_v27 = vld [vmem:[#allocation14 + $0xf0] sm:$0xff]  }
 0x861   :  { %3643 = vmatprep.subr.bf16.mxu0 %v4351_v37  ;;  %v3246_v37 = vld [vmem:[#allocation12 + $0x130] sm:$0xff] }
 0x862   :  { %v4942_v47 = vld [vmem:[#allocation14 + $0x30] sm:$0xff]  }
 0x864   :  { %3644 = vmatpush1.bf16.msra.mxu0 %v4350_v25  ;;  %v4368_v25 = vcombine.low %v3250_v24, %v3254_v20  ;;  %v4948_v24 = vld [vmem:[#allocation14 + $0x60] sm:$0xff]  }
 0x865   :  { %3645 = vmatprep.subr.bf16.mxu0 %v4343_v11  ;;  %v4361_v11 = vcombine.high %v3242_v26, %v3246_v37  ;;  %v4949_v20 = vld [vmem:[#allocation14 + $0xe0] sm:$0xff]  }
 0x868   :  { %3646 = vmatpush1.bf16.msra.mxu0 %v4342_v48  ;;  %v3227_v48 = vld [vmem:[#allocation12 + $0x98] sm:$0xff] }
 0x869   :  { %3647 = vmatprep.subr.bf16.mxu0 %v4335_v1 }
 0x86c   :  { %3648 = vmatpush1.bf16.msra.mxu0 %v4334_v44  ;;  %v3223_v44 = vld [vmem:[#allocation12 + $0x78] sm:$0xff] }
 0x913   :  { %v3175_v38 = vpop.f32.mrf.mxu0 }
 0x914   :  { %v3176_v6 = vadd.f32 %v4314_v10, %v3175_v38  ;;  %v4327_v38 = vcombine.high %v3209_v35, %v3213_v41 }
 0x915   :  { %v4793_v13 = vpop.f32.mrf.mxu0 }
 0x916   :  { %v6490_v7 = vadd.f32 %v5105_v19, %v3176_v6  ;;  %v4324_v6 = vcombine.low %v3208_v50, %v3212_v18  ;;  %v4326_v13 = vcombine.low %v3209_v35, %v3213_v41  ;;  %v4385_v19 = vcombine.high %v6498_v45, %v6500_v40  ;;  %3649 = vmatprep.subr.bf16.mxu0 %v4327_v38  ;;  %v3239_v45 = vld [vmem:[#allocation12 + $0xf8] sm:$0xff]  ;;  %v3218_v35 = vld [vmem:[#allocation12 + $0x50] sm:$0xff] }
 0x917   :  { %v3178_v2 = vpop.f32.mrf.mxu0  ;;  %v4360_v40 = vcombine.low %v3242_v26, %v3246_v37  ;;  %v4354_v1 = vcombine.low %v3235_v58, %v3239_v45  ;;  %v3222_v41 = vld [vmem:[#allocation12 + $0x70] sm:$0xff]  ;;  %v4346_v38 = vcombine.low %v3227_v48, %v3231_v8 }
 0x918   :  { %v3179_v52 = vadd.f32 %v4314_v10, %v3178_v2  ;;  %v3184_v32 = vmul.f32 %v6490_v7, %v6490_v7  ;;  %v4325_v10 = vcombine.high %v3208_v50, %v3212_v18  ;;  %v4387_v2 = vcombine.high %v3267_v14, %v3271_v3  ;;  %3650 = vmatpush1.bf16.msra.mxu0 %v4326_v13  ;;  %v3226_v14 = vld [vmem:[#allocation12 + $0x90] sm:$0xff] }
 0x919   :  { %v4794_v12 = vpop.f32.mrf.mxu0  ;;  %v3230_v3 = vld [vmem:[#allocation12 + $0xb0] sm:$0xff]  ;;  %v4347_v18 = vcombine.high %v3227_v48, %v3231_v8  ;;  %v4339_v13 = vcombine.high %v3219_v33, %v3223_v44 }
 0x91a   :  { %v6494_v51 = vadd.f32 %v5106_v60, %v3179_v52  ;;  %3186 = vadd.xlane.f32.xlu0 %v3184_v32  ;;  %3606 = vmatprep.subr.bf16.mxu1 %v4325_v10  ;;  %v4345_v50 = vcombine.high %v3226_v14, %v3230_v3  ;;  %v4344_v10 = vcombine.low %v3226_v14, %v3230_v3  ;;  %v4956_v26 = vld [vmem:[#allocation14 + $0x50] sm:$0xff]  }
 0x91b   :  { %3607 = vmatpush1.bf16.msra.mxu1 %v4324_v6  ;;  %3721 = vmatprep.subr.bf16.mxu0 %v4387_v2  ;;  %v4337_v6 = vcombine.high %v3218_v35, %v3222_v41  ;;  %v3214_v2 = vld [vmem:[#allocation12 + $0x30] sm:$0xff] }
 0x91c   :  { %v3185_v49 = vmul.f32 %v6494_v51, %v6494_v51  ;;  %3678 = vmatprep.subr.bf16.mxu1 %v4385_v19  ;;  %v3210_v19 = vld [vmem:[#allocation12 + $0x10] sm:$0xff] }
 0x91d   :  { %v4957_v37 = vld [vmem:[#allocation14 + $0xd0] sm:$0xff]  }
 0x91e   :  { %3188 = vadd.xlane.f32.xlu1 %v3185_v49 }
 0x9a3   :  { %v3187_v52 = vpop.xlane.xlu0 %3186 }
 0x9a4   :  { %v3190_v32 = vmul.f32 0.0078125, %v3187_v52  ;;  %v3211_v52 = vld [vmem:[#allocation12 + $0x18] sm:$0xff] }
 0x9a6   :  { %v3192_v12 = vadd.f32 1e-05, %v3190_v32  ;;  %v3215_v32 = vld [vmem:[#allocation12 + $0x38] sm:$0xff] }
 0x9a7   :  { %v3189_v60 = vpop.xlane.xlu1 %3188 }
 0x9a8   :  { %5036 = vrsqrt.f32 %v3192_v12  ;;  %v3191_v49 = vmul.f32 0.0078125, %v3189_v60  ;;  %v4336_v12 = vcombine.low %v3218_v35, %v3222_v41  ;;  %v4338_v60 = vcombine.low %v3219_v33, %v3223_v44 }
 0x9aa   :  { %v3193_v4 = vadd.f32 1e-05, %v3191_v49  ;;  %v4329_v49 = vcombine.high %v3210_v19, %v3214_v2 }
 0x9ac   :  { %5038 = vrsqrt.f32 %v3193_v4  ;;  %v4331_v4 = vcombine.high %v3211_v52, %v3215_v32 }
 0x9b5   :  { %v5037_v5 = vpop.eup %5036 }
 0x9b6   :  { %v3196_v31 = vmul.f32 %v5037_v5, %v6490_v7  ;;  %v4328_v5 = vcombine.low %v3210_v19, %v3214_v2 }
 0x9b8   :  { %v3205_v36 = vmul.f32 %v4323_v0, %v3196_v31  ;;  %v4330_v31 = vcombine.low %v3211_v52, %v3215_v32 }
 0x9b9   :  { %v5039_v21 = vpop.eup %5038 }
 0x9ba   :  { %v3197_v9 = vmul.f32 %v5039_v21, %v6494_v51  ;;  %v4936_v21 = vld [vmem:[#allocation14 + $0x78] sm:$0xff]  }
 0x9bc   :  { %v3206_v63 = vmul.f32 %v4323_v0, %v3197_v9  ;;  %v4937_v0 = vld [vmem:[#allocation14 + $0xf8] sm:$0xff]  }
 0x9bd   :  { %v4938_v9 = vld [vmem:[#allocation14 + $0x38] sm:$0xff]  }
 0x9be   :  { %v6511_v57 = vpack.c.bf16 %v3206_v63, %v3205_v36  ;;  %v4943_v36 = vld [vmem:[#allocation14 + $0xb0] sm:$0xff]   ;;  %v4944_v63 = vld [vmem:[#allocation14 + $0x68] sm:$0xff]  }
 0x9c0   :  { %3625 = vmatmul.mubr.bf16.vlgmr.msra.gmra.mxu1 %v6511_v57  ;;  %3668 = vmatmul.mubr.bf16.vlgmr.msra.gmra.mxu0 %v6511_v57 }
 0x9c1   :  { %3679 = vmatpush1.bf16.msra.mxu1 %v4384_v39  ;;  %3722 = vmatpush1.bf16.msra.mxu0 %v4386_v53  ;;  %v4353_v39 = vcombine.high %v3234_v46, %v3238_v30  ;;  %v4352_v53 = vcombine.low %v3234_v46, %v3238_v30  ;;  %v4964_v46 = vld [vmem:[#allocation14 + $0x40] sm:$0xff]  }
 0x9c2   :  { %3680 = vmatprep.subr.bf16.mxu1 %v4377_v15  ;;  %3723 = vmatprep.subr.bf16.mxu0 %v4379_v23  ;;  %v4945_v15 = vld [vmem:[#allocation14 + $0xe8] sm:$0xff]   ;;  %v4965_v30 = vld [vmem:[#allocation14 + $0xc0] sm:$0xff]  }
 0x9c3   :  { %3710 = vmatprep.mubr.bf16.mxu1 %v6620_v55  ;;  %3753 = vmatprep.mubr.bf16.mxu0 %v6620_v55  ;;  %v4355_v55 = vcombine.high %v3235_v58, %v3239_v45  ;;  %v4946_v23 = vld [vmem:[#allocation14 + $0x28] sm:$0xff]   ;;  %v4966_v58 = vld [vmem:[#allocation14] sm:$0xff]  }
 0x9c4   :  { %v4967_v45 = vld [vmem:[#allocation14 + $0x80] sm:$0xff]  }
 0x9c5   :  { %3681 = vmatpush1.bf16.msra.mxu1 %v4376_v29  ;;  %3724 = vmatpush1.bf16.msra.mxu0 %v4378_v22  ;;  %v4952_v29 = vld [vmem:[#allocation14 + $0x58] sm:$0xff]  }
 0x9c6   :  { %3682 = vmatprep.subr.bf16.mxu1 %v4369_v56  ;;  %3725 = vmatprep.subr.bf16.mxu0 %v4371_v42  ;;  %v4953_v22 = vld [vmem:[#allocation14 + $0xd8] sm:$0xff]  }
 0x9c7   :  { %v4954_v56 = vld [vmem:[#allocation14 + $0x18] sm:$0xff]  }
 0x9c8   :  { %v4955_v42 = vld [vmem:[#allocation14 + $0x98] sm:$0xff]  }
 0x9c9   :  { %3683 = vmatpush1.bf16.msra.mxu1 %v4368_v25  ;;  %3726 = vmatpush1.bf16.msra.mxu0 %v4370_v62  ;;  %v4960_v25 = vld [vmem:[#allocation14 + $0x48] sm:$0xff]  }
 0x9ca   :  { %3684 = vmatprep.subr.bf16.mxu1 %v4361_v11  ;;  %3727 = vmatprep.subr.bf16.mxu0 %v4363_v43  ;;  %v4961_v62 = vld [vmem:[#allocation14 + $0xc8] sm:$0xff]  }
 0x9cb   :  { %v4962_v11 = vld [vmem:[#allocation14 + $0x8] sm:$0xff]  }
 0x9cc   :  { %v4963_v43 = vld [vmem:[#allocation14 + $0x88] sm:$0xff]  }
 0x9cd   :  { %3685 = vmatpush1.bf16.msra.mxu1 %v4360_v40  ;;  %3728 = vmatpush1.bf16.msra.mxu0 %v4362_v54 }
 0x9ce   :  { %3686 = vmatprep.subr.bf16.mxu1 %v4353_v39  ;;  %3729 = vmatprep.subr.bf16.mxu0 %v4355_v55 }
 0x9d1   :  { %3687 = vmatpush1.bf16.msra.mxu1 %v4352_v53  ;;  %3730 = vmatpush1.bf16.msra.mxu0 %v4354_v1 }
 0x9d2   :  { %3688 = vmatprep.subr.bf16.mxu1 %v4345_v50  ;;  %3731 = vmatprep.subr.bf16.mxu0 %v4347_v18 }
 0x9d5   :  { %3689 = vmatpush1.bf16.msra.mxu1 %v4344_v10  ;;  %3732 = vmatpush1.bf16.msra.mxu0 %v4346_v38 }
 0x9d6   :  { %3690 = vmatprep.subr.bf16.mxu1 %v4337_v6  ;;  %3733 = vmatprep.subr.bf16.mxu0 %v4339_v13 }
 0x9d9   :  { %3691 = vmatpush1.bf16.msra.mxu1 %v4336_v12  ;;  %3734 = vmatpush1.bf16.msra.mxu0 %v4338_v60 }
 0x9da   :  { %3692 = vmatprep.subr.bf16.mxu1 %v4329_v49  ;;  %3735 = vmatprep.subr.bf16.mxu0 %v4331_v4 }
 0x9dd   :  { %3693 = vmatpush1.bf16.msra.mxu1 %v4328_v5  ;;  %3736 = vmatpush1.bf16.msra.mxu0 %v4330_v31 }
 0x9de   :  { %4519 = vmatprep.subr.bf16.mxu1 %v4936_v21  ;;  %4541 = vmatprep.subr.bf16.mxu0 %v4937_v0 }
 0x9e0   :  { %3711 = vmatmul.mubr.bf16.vlgmr.msra.gmra.mxu1 %v6511_v57  ;;  %3754 = vmatmul.mubr.bf16.vlgmr.msra.gmra.mxu0 %v6511_v57  ;;  %v4947_v57 = vld [vmem:[#allocation14 + $0xa8] sm:$0xff]  }
 0x9e1   :  { %4520 = vmatpush3.bf16.msra.mxu1 %v4938_v9  ;;  %4542 = vmatpush3.bf16.msra.mxu0 %v4939_v59 }
 0x9e2   :  { %4521 = vmatprep.subr.bf16.mxu1 %v4940_v28  ;;  %4543 = vmatprep.subr.bf16.mxu0 %v4941_v27 }
 0x9e5   :  { %4522 = vmatpush3.bf16.msra.mxu1 %v4942_v47  ;;  %4544 = vmatpush3.bf16.msra.mxu0 %v4943_v36 }
 0x9e6   :  { %4523 = vmatprep.subr.bf16.mxu1 %v4944_v63  ;;  %4545 = vmatprep.subr.bf16.mxu0 %v4945_v15 }
 0x9e9   :  { %4524 = vmatpush3.bf16.msra.mxu1 %v4946_v23  ;;  %4546 = vmatpush3.bf16.msra.mxu0 %v4947_v57 }
 0x9ea   :  { %4525 = vmatprep.subr.bf16.mxu1 %v4948_v24  ;;  %4547 = vmatprep.subr.bf16.mxu0 %v4949_v20 }
 0x9ed   :  { %4526 = vmatpush3.bf16.msra.mxu1 %v4950_v61  ;;  %4548 = vmatpush3.bf16.msra.mxu0 %v4951_v16 }
 0x9ee   :  { %4527 = vmatprep.subr.bf16.mxu1 %v4952_v29  ;;  %4549 = vmatprep.subr.bf16.mxu0 %v4953_v22 }
 0x9f1   :  { %4528 = vmatpush3.bf16.msra.mxu1 %v4954_v56  ;;  %4550 = vmatpush3.bf16.msra.mxu0 %v4955_v42 }
 0x9f2   :  { %4529 = vmatprep.subr.bf16.mxu1 %v4956_v26  ;;  %4551 = vmatprep.subr.bf16.mxu0 %v4957_v37 }
 0x9f5   :  { %4530 = vmatpush3.bf16.msra.mxu1 %v4958_v17  ;;  %4552 = vmatpush3.bf16.msra.mxu0 %v4959_v34 }
 0x9f6   :  { %4531 = vmatprep.subr.bf16.mxu1 %v4960_v25  ;;  %4553 = vmatprep.subr.bf16.mxu0 %v4961_v62 }
 0x9f9   :  { %4532 = vmatpush3.bf16.msra.mxu1 %v4962_v11  ;;  %4554 = vmatpush3.bf16.msra.mxu0 %v4963_v43 }
 0x9fa   :  { %4533 = vmatprep.subr.bf16.mxu1 %v4964_v46  ;;  %4555 = vmatprep.subr.bf16.mxu0 %v4965_v30 }
 0x9fd   :  { %4534 = vmatpush3.bf16.msra.mxu1 %v4966_v58  ;;  %4556 = vmatpush3.bf16.msra.mxu0 %v4967_v45 }
 0xa80   :  { %v6519_v40 = vpop.f32.mrf.mxu1  ;;  %v6521_v54 = vpop.f32.mrf.mxu0 }
 0xa81   :  { %v4388_v3 = vmul.f32 -1.442695, %v6519_v40  ;;  %v4390_v8 = vmul.f32 -1.442695, %v6521_v54 }
 0xa82   :  { %v6523_v39 = vpop.f32.mrf.mxu1  ;;  %v6525_v55 = vpop.f32.mrf.mxu0 }
 0xa83   :  { %v4389_v53 = vmul.f32 -1.442695, %v6523_v39  ;;  %v4391_v1 = vmul.f32 -1.442695, %v6525_v55  ;;  %5040 = vpow2.f32 %v4388_v3 }
 0xa84   :  { %v6527_v14 = vpop.f32.mrf.mxu1  ;;  %v6530_v48 = vpop.f32.mrf.mxu0  ;;  %5042 = vpow2.f32 %v4390_v8 }
 0xa85   :  { %v4392_v18 = vmul.f32 -1.442695, %v6527_v14  ;;  %v4394_v41 = vmul.f32 -1.442695, %v6530_v48  ;;  %5044 = vpow2.f32 %v4389_v53 }
 0xa86   :  { %v6535_v50 = vpop.f32.mrf.mxu1  ;;  %v6538_v35 = vpop.f32.mrf.mxu0  ;;  %5046 = vpow2.f32 %v4391_v1 }
 0xa87   :  { %v4393_v33 = vmul.f32 -1.442695, %v6535_v50  ;;  %v4395_v44 = vmul.f32 -1.442695, %v6538_v35  ;;  %5048 = vpow2.f32 %v4392_v18 }
 0xa88   :  { %5050 = vpow2.f32 %v4394_v41 }
 0xa89   :  { %5052 = vpow2.f32 %v4393_v33 }
 0xa8a   :  { %5054 = vpow2.f32 %v4395_v44 }
 0xa90   :  { %v5041_v12 = vpop.eup %5040 }
 0xa91   :  { %v5043_v4 = vpop.eup %5042  ;;  %v3788_v28 = vadd.f32 1.0, %v5041_v12 }
 0xa92   :  { %v5045_v21 = vpop.eup %5044  ;;  %v3790_v63 = vadd.f32 1.0, %v5043_v4 }
 0xa93   :  { %v5047_v59 = vpop.eup %5046  ;;  %v3789_v23 = vadd.f32 1.0, %v5045_v21 }
 0xa94   :  { %v5049_v36 = vpop.eup %5048  ;;  %v3791_v24 = vadd.f32 1.0, %v5047_v59 }
 0xa95   :  { %v5051_v15 = vpop.eup %5050  ;;  %v3792_v61 = vadd.f32 1.0, %v5049_v36 }
 0xa96   :  { %v5053_v57 = vpop.eup %5052  ;;  %v3794_v16 = vadd.f32 1.0, %v5051_v15 }
 0xa97   :  { %v5055_v20 = vpop.eup %5054  ;;  %v3793_v29 = vadd.f32 1.0, %v5053_v57 }
 0xa98   :  { %v3795_v22 = vadd.f32 1.0, %v5055_v20 }
 0xaa0   :  { %v6543_v10 = vpop.f32.mrf.mxu1  ;;  %v6545_v38 = vpop.f32.mrf.mxu0 }
 0xaa1   :  { %v4396_v6 = vmul.f32 -1.442695, %v6543_v10  ;;  %v4398_v13 = vmul.f32 -1.442695, %v6545_v38 }
 0xaa2   :  { %v6549_v19 = vpop.f32.mrf.mxu1  ;;  %v6551_v2 = vpop.f32.mrf.mxu0 }
 0xaa3   :  { %5056 = vpow2.f32 %v4396_v6  ;;  %v4397_v52 = vmul.f32 -1.442695, %v6549_v19  ;;  %v4399_v32 = vmul.f32 -1.442695, %v6551_v2 }
 0xaa4   :  { %5058 = vpow2.f32 %v4398_v13  ;;  %v6555_v60 = vpop.f32.mrf.mxu1  ;;  %v6557_v49 = vpop.f32.mrf.mxu0 }
 0xaa5   :  { %5060 = vpow2.f32 %v4397_v52  ;;  %v4400_v5 = vmul.f32 -1.442695, %v6555_v60  ;;  %v4402_v31 = vmul.f32 -1.442695, %v6557_v49 }
 0xaa6   :  { %5062 = vpow2.f32 %v4399_v32  ;;  %v6561_v0 = vpop.f32.mrf.mxu1  ;;  %v6563_v9 = vpop.f32.mrf.mxu0 }
 0xaa7   :  { %5064 = vpow2.f32 %v4400_v5  ;;  %v4401_v27 = vmul.f32 -1.442695, %v6561_v0  ;;  %v4403_v47 = vmul.f32 -1.442695, %v6563_v9 }
 0xaa8   :  { %5066 = vpow2.f32 %v4402_v31 }
 0xaa9   :  { %5068 = vpow2.f32 %v4401_v27 }
 0xaaa   :  { %5070 = vpow2.f32 %v4403_v47 }
 0xaab   :  { %5072 = vrcp.f32 %v3788_v28 }
 0xaac   :  { %5074 = vrcp.f32 %v3790_v63 }
 0xaad   :  { %5076 = vrcp.f32 %v3789_v23 }
 0xaae   :  { %5078 = vrcp.f32 %v3791_v24 }
 0xaaf   :  { %5080 = vrcp.f32 %v3792_v61 }
 0xab0   :  { %v5057_v56 = vpop.eup %5056  ;;  %5082 = vrcp.f32 %v3794_v16 }
 0xab1   :  { %v5059_v42 = vpop.eup %5058  ;;  %5084 = vrcp.f32 %v3793_v29  ;;  %v3844_v26 = vadd.f32 1.0, %v5057_v56 }
 0xab2   :  { %v5061_v37 = vpop.eup %5060  ;;  %5086 = vrcp.f32 %v3795_v22  ;;  %v3846_v17 = vadd.f32 1.0, %v5059_v42 }
 0xab3   :  { %v5063_v34 = vpop.eup %5062  ;;  %5088 = vrcp.f32 %v3844_v26  ;;  %v3845_v25 = vadd.f32 1.0, %v5061_v37 }
 0xab4   :  { %v5065_v62 = vpop.eup %5064  ;;  %5090 = vrcp.f32 %v3846_v17  ;;  %v3847_v11 = vadd.f32 1.0, %v5063_v34 }
 0xab5   :  { %v5067_v43 = vpop.eup %5066  ;;  %5092 = vrcp.f32 %v3845_v25  ;;  %v3848_v46 = vadd.f32 1.0, %v5065_v62 }
 0xab6   :  { %v5069_v30 = vpop.eup %5068  ;;  %5094 = vrcp.f32 %v3847_v11  ;;  %v3850_v58 = vadd.f32 1.0, %v5067_v43 }
 0xab7   :  { %v5071_v45 = vpop.eup %5070  ;;  %5096 = vrcp.f32 %v3848_v46  ;;  %v3849_v3 = vadd.f32 1.0, %v5069_v30 }
 0xab8   :  { %v5073_v8 = vpop.eup %5072  ;;  %5098 = vrcp.f32 %v3850_v58  ;;  %v3851_v53 = vadd.f32 1.0, %v5071_v45 }
 0xab9   :  { %v5075_v1 = vpop.eup %5074  ;;  %5100 = vrcp.f32 %v3849_v3  ;;  %v3812_v21 = vmul.f32 %v5073_v8, %v6519_v40 }
 0xaba   :  { %v5077_v18 = vpop.eup %5076  ;;  %5102 = vrcp.f32 %v3851_v53 }
 0xabb   :  { %v5079_v41 = vpop.eup %5078  ;;  %v3813_v59 = vmul.f32 %v5077_v18, %v6523_v39 }
 0xabc   :  { %v5081_v33 = vpop.eup %5080 }
 0xabd   :  { %v5083_v44 = vpop.eup %5082  ;;  %v3816_v36 = vmul.f32 %v5081_v33, %v6527_v14 }
 0xabe   :  { %v5085_v6 = vpop.eup %5084  ;;  %v3818_v24 = vmul.f32 %v5083_v44, %v6530_v48 }
 0xabf   :  { %v5087_v13 = vpop.eup %5086  ;;  %v3817_v40 = vmul.f32 %v5085_v6, %v6535_v50 }
 0xac0   :  { %v5089_v52 = vpop.eup %5088  ;;  %v3819_v20 = vmul.f32 %v5087_v13, %v6538_v35 }
 0xac1   :  { %v5091_v32 = vpop.eup %5090  ;;  %v3868_v63 = vmul.f32 %v5089_v52, %v6543_v10 }
 0xac2   :  { %v5093_v12 = vpop.eup %5092  ;;  %v3870_v39 = vmul.f32 %v5091_v32, %v6545_v38 }
 0xac3   :  { %v5095_v4 = vpop.eup %5094  ;;  %v3869_v28 = vmul.f32 %v5093_v12, %v6549_v19  ;;  %v3876_v29 = vmul.f32 %v3868_v63, %v3812_v21 }
 0xac4   :  { %v5097_v5 = vpop.eup %5096  ;;  %v3871_v15 = vmul.f32 %v5095_v4, %v6551_v2  ;;  %v3814_v2 = vmul.f32 %v5075_v1, %v6521_v54  ;;  %v4404_v54 = vld [vmem:[%s6605_s11] ss:$0 sm:$0xff]  ;;  %s5247_s11 = scalar_lea.vmem %s4243_s21, 256 }
 0xac5   :  { %v5099_v31 = vpop.eup %5098  ;;  %v3872_v27 = vmul.f32 %v5097_v5, %v6555_v60  ;;  %v3815_v60 = vmul.f32 %v5079_v41, %v6525_v55  ;;  %v3877_v61 = vmul.f32 %v3869_v28, %v3813_v59  ;;  %p5248_p7 = scmp.ne.s32.totalorder %s4243_s21, %s5247_s11  ;;  %p5253_p9 = scmp.lt.s32.totalorder %s5247_s11, %s5247_s11 }
 0xac6   :  { %v5101_v47 = vpop.eup %5100  ;;  %v3874_v23 = vmul.f32 %v5099_v31, %v6557_v49  ;;  %v3878_v50 = vmul.f32 %v3870_v39, %v3814_v2 }
 0xac7   :  { %v5103_v57 = vpop.eup %5102  ;;  %v3873_v19 = vmul.f32 %v5101_v47, %v6561_v0  ;;  %v3880_v14 = vmul.f32 %v3872_v27, %v3816_v36  ;;  %v3879_v48 = vmul.f32 %v3871_v15, %v3815_v60  ;;  %p5254_p10 = por %p5253_p9, %p5252_p8 }
 0xac8   :  { %v3875_v10 = vmul.f32 %v5103_v57, %v6563_v9  ;;  %v3882_v49 = vmul.f32 %v3874_v23, %v3818_v24 }
 0xac9   :  { %v3881_v16 = vmul.f32 %v3873_v19, %v3817_v40  ;;  %v3884_v38 = vpack.c.bf16 %v3880_v14, %v3876_v29  ;;  %p5255_p11 = pnand %p5254_p10, %p5248_p7 }
 0xaca   :  { %v3883_v22 = vmul.f32 %v3875_v10, %v3819_v20  ;;  %v3886_v0 = vpack.c.bf16 %v3882_v49, %v3878_v50 }
 0xacb   :  { %v3885_v56 = vpack.c.bf16 %v3881_v16, %v3877_v61 }
 0xacc   :  { %v3887_v42 = vpack.c.bf16 %v3883_v22, %v3879_v48 }
 0xacd   :  { %4183 = vmatprep.mubr.bf16.mxu1 %v3885_v56 }
 0xace   :  { %4224 = vmatprep.mubr.bf16.mxu0 %v3887_v42  ;;  %4184 = vmatmul.mubr.bf16.vlgmr.msra.gmra.mxu1 %v3884_v38 }
 0xacf   :  { %4225 = vmatmul.mubr.bf16.vlgmr.msra.gmra.mxu0 %v3886_v0 }
 0xb8e   :  { %v4535_v55 = vpop.f32.mrf.mxu1 }
 0xb8f   :  { %v4557_v35 = vpop.f32.mrf.mxu0 }
 0xb90   :  { %v4536_v9 = vpop.f32.mrf.mxu1 }
 0xb91   :  { %v4537_v26 = vadd.f32 %v4536_v9, %v4535_v55  ;;  %v4558_v37 = vpop.f32.mrf.mxu0 }
 0xb92   :  { %v4538_v17 = vpop.f32.mrf.mxu1  ;;  %v4559_v25 = vadd.f32 %v4558_v37, %v4557_v35 }
 0xb93   :  { %v4186_v34 = vadd.f32 %v4537_v26, %v4404_v54  ;;  %v4560_v62 = vpop.f32.mrf.mxu0 }
 0xb94   :  { %v4539_v11 = vpop.f32.mrf.mxu1 }
 0xb95   :  { %v4227_v43 = vadd.f32 %v4559_v25, %v4186_v34  ;;  %v4540_v46 = vadd.f32 %v4539_v11, %v4538_v17  ;;  %v4561_v30 = vpop.f32.mrf.mxu0 }
 0xb96   :  { %v4562_v3 = vadd.f32 %v4561_v30, %v4560_v62 }
 0xb97   :  { %v4233_v58 = vadd.f32 %v4227_v43, %v6490_v7  ;;  %v4189_v45 = vadd.f32 %v4540_v46, %v4404_v54 }
 0xb99   :  { %4235 = vst [vmem:[#allocation15] sm:$0xff] %v4233_v58  ;;  %v4230_v8 = vadd.f32 %v4562_v3, %v4189_v45 }
 0xb9b   :  { %v4234_v53 = vadd.f32 %v4230_v8, %v6494_v51 }
 0xb9d   :  { %4236 = vst [vmem:[#allocation15 + $0x8] sm:$0xff] %v4234_v53 }
 0xb9e   :  { %5258 = shalt.err (!%p5255_p11)
}
 0xb9f   :  { %4248 = dma.vmem_to_hbm [thread:$0]  %s4243_s21, 256, %s6606_s12, [#allocation5], %s5285_s4, %s5285_s4, %s5286_s24  }
 0xba0   :  { %5275 = dma.done.wait [#allocation5], 256  }
 0xba1   :  { %5276 = vsyncadd [#allocation5], 4294967040 }
 0xba2   :  { %4252 = vsyncpa [#allocation4], 1 }
 0xba3   :  { %4253 = vsyncpa [#allocation7], 1 }
 0xba4   :  { %4254 = vsyncpa [#allocation10], 1 }
 0xba5   :  { %4255 = vsyncpa [#allocation13], 1 }
 0xba6   :  { %4256 = vsyncpa [#allocation5], 1 }

</bundles_post_ra>
